<compile_context>
chip_gen: v7x
topology: tpu7x:2x2x1
jax: 0.10.0
libtpu: 0.0.40
codegen_flags: <defaults>
</compile_context>

<pallas_src>
import functools

import jax
import jax.numpy as jnp
from jax import lax
from jax.experimental import pallas as pl
from jax.experimental.pallas import tpu as pltpu


def _round_up(x, m):
    return (x + m - 1) // m * m


# ----------------------------- RoI pooling kernel -----------------------------

def _roi_pool_kernel(S, W, H, C,
                     idx_ref, hs_ref, he_ref, ws_ref, we_ref,   # scalar prefetch (SMEM)
                     x_ref,                                     # (1, W, H, C) VMEM
                     out_ref,                                   # (1, S*S, C)  VMEM
                     wred_ref):                                 # (S, H, C)    VMEM scratch
    r = pl.program_id(0)
    feat = x_ref[0]                                             # (W, H, C), C on lanes
    neg = jnp.float32(-1e30)

    # Pass 1: masked max over W (leading axis => elementwise vmax tree on the
    # VALU, no XLU), one pass per pw bin, accumulated into lane-dense scratch.
    w_iota = lax.broadcasted_iota(jnp.int32, (W, 1, 1), 0)
    for pw in range(S):
        ws_v = ws_ref[r * S + pw]
        we_v = we_ref[r * S + pw]
        wmask = (w_iota >= ws_v) & (w_iota < we_v)              # (W, 1, 1)
        wred_ref[pw] = jnp.max(jnp.where(wmask, feat, neg), axis=0)      # (H, C)

    # Pass 2: masked max over H, all pw bins of one ph at once -> (S, C) rows.
    h_iota = lax.broadcasted_iota(jnp.int32, (1, H, 1), 1)
    for ph in range(S):
        hs_v = hs_ref[r * S + ph]
        he_v = he_ref[r * S + ph]
        hmask = (h_iota >= hs_v) & (h_iota < he_v)              # (1, H, 1)
        out_ref[0, ph * S:(ph + 1) * S, :] = jnp.max(
            jnp.where(hmask, wred_ref[...], neg), axis=1)       # (S, C)


def roi_pool(x_whc, roi_indices, hs, he, ws, we, roi_size):
    """x_whc: (N, W, H, C) f32; roi_indices: (R,) i32 (sorted by batch index);
    hs/he/ws/we: (R*S,) i32 flattened bin boundaries."""
    N, W, H, C = x_whc.shape
    R = roi_indices.shape[0]
    S = roi_size

    grid_spec = pltpu.PrefetchScalarGridSpec(
        num_scalar_prefetch=5,
        grid=(R,),
        in_specs=[
            pl.BlockSpec((1, W, H, C),
                         lambda r, idx, hs, he, ws, we: (idx[r], 0, 0, 0)),
        ],
        out_specs=pl.BlockSpec((1, S * S, C),
                               lambda r, idx, hs, he, ws, we: (r, 0, 0)),
        scratch_shapes=[pltpu.VMEM((S, H, C), jnp.float32)],
    )
    # RoIs are independent -> "parallel" lets v7x shard the R loop across its
    # two TensorCores; harmless on v5e/v6e.
    # NOTE: per-grid-step overhead could be further amortized by pooling several
    # batch-uniform RoIs per step; kept 1 RoI/step for simplicity.
    return pl.pallas_call(
        functools.partial(_roi_pool_kernel, S, W, H, C),
        out_shape=jax.ShapeDtypeStruct((R, S * S, C), jnp.float32),
        grid_spec=grid_spec,
        compiler_params=pltpu.CompilerParams(dimension_semantics=("parallel",)),
    )(roi_indices, hs, he, ws, we, x_whc)


# ------------------------------- FC head kernel --------------------------------

def _head_kernel(pool_ref, w1_ref, b1_ref, wcat_ref, bcat_ref, out_ref,
                 fc7_acc, out_acc):
    n = pl.program_id(0)            # hidden (N) tile
    k = pl.program_id(1)            # d_in  (K) tile — reduction axis, innermost
    nt = pl.num_programs(0)
    kt = pl.num_programs(1)

    @pl.when(k == 0)
    def _():
        fc7_acc[...] = jnp.zeros_like(fc7_acc)

    @pl.when((n == 0) & (k == 0))
    def _():
        out_acc[...] = jnp.zeros_like(out_acc)

    # bf16 x bf16 -> f32 accumulation on the MXU.
    fc7_acc[...] += jnp.dot(pool_ref[...], w1_ref[...],
                            preferred_element_type=jnp.float32)

    @pl.when(k == kt - 1)
    def _():
        fc7 = jnp.maximum(fc7_acc[...] + b1_ref[...], 0.0)      # classifier ReLU (f32)
        out_acc[...] += jnp.dot(fc7.astype(jnp.bfloat16), wcat_ref[...],
                                preferred_element_type=jnp.float32)

    @pl.when((k == kt - 1) & (n == nt - 1))
    def _():
        out_ref[...] = out_acc[...] + bcat_ref[...]


def roi_head_fc(pool_flat, w1, b1, wcat, bcat, *, tk=512, tn=512):
    """pool_flat: (R_pad, K_pad) bf16; w1: (K_pad, hidden) bf16; b1: (1, hidden) f32;
    wcat: (hidden, out_pad) bf16 fused [cls_loc | score]; bcat: (1, out_pad) f32."""
    Rp, Kp = pool_flat.shape
    hidden = w1.shape[1]
    out_p = wcat.shape[1]
    tk = min(tk, Kp)
    tn = min(tn, hidden)
    assert Kp % tk == 0 and hidden % tn == 0
    nt, kt = hidden // tn, Kp // tk

    grid_spec = pltpu.PrefetchScalarGridSpec(
        num_scalar_prefetch=0,
        grid=(nt, kt),
        in_specs=[
            pl.BlockSpec((Rp, tk), lambda n, k: (0, k)),        # activations K-tile
            pl.BlockSpec((tk, tn), lambda n, k: (k, n)),        # w1 tile
            pl.BlockSpec((1, tn), lambda n, k: (0, n)),         # b1 tile
            pl.BlockSpec((tn, out_p), lambda n, k: (n, 0)),     # fused cls_loc|score tile
            pl.BlockSpec((1, out_p), lambda n, k: (0, 0)),      # fused bias
        ],
        out_specs=pl.BlockSpec((Rp, out_p), lambda n, k: (0, 0)),
        scratch_shapes=[pltpu.VMEM((Rp, tn), jnp.float32),      # fc7 accumulator
                        pltpu.VMEM((Rp, out_p), jnp.float32)],  # output accumulator
    )
    cost = pl.CostEstimate(
        flops=2 * Rp * Kp * hidden + 2 * Rp * hidden * out_p,
        transcendentals=0,
        bytes_accessed=(pool_flat.size * pool_flat.dtype.itemsize * nt
                        + w1.size * w1.dtype.itemsize
                        + wcat.size * wcat.dtype.itemsize
                        + Rp * out_p * 4),
    )
    return pl.pallas_call(
        _head_kernel,
        out_shape=jax.ShapeDtypeStruct((Rp, out_p), jnp.float32),
        grid_spec=grid_spec,
        compiler_params=pltpu.CompilerParams(
            dimension_semantics=("arbitrary", "arbitrary"),
            vmem_limit_bytes=48 * 1024 * 1024),                 # stays under v7x 64 MiB
        cost_estimate=cost,
    )(pool_flat, w1, b1, wcat, bcat)


# ------------------------------- glue / wrapper ---------------------------------

def compute_bins(rois, spatial_scale, roi_size, H, W):
    """torchvision RoIPool bin boundaries. rois: (R, 4) = (x1, y1, x2, y2)."""
    rs_w = jnp.round(rois[:, 0] * spatial_scale).astype(jnp.int32)
    rs_h = jnp.round(rois[:, 1] * spatial_scale).astype(jnp.int32)
    re_w = jnp.round(rois[:, 2] * spatial_scale).astype(jnp.int32)
    re_h = jnp.round(rois[:, 3] * spatial_scale).astype(jnp.int32)
    roi_w = jnp.maximum(re_w - rs_w + 1, 1).astype(jnp.float32)
    roi_h = jnp.maximum(re_h - rs_h + 1, 1).astype(jnp.float32)
    bin_h = roi_h / roi_size
    bin_w = roi_w / roi_size
    p = jnp.arange(roi_size, dtype=jnp.float32)
    hs = jnp.floor(p[None, :] * bin_h[:, None]).astype(jnp.int32) + rs_h[:, None]
    he = jnp.ceil((p[None, :] + 1.0) * bin_h[:, None]).astype(jnp.int32) + rs_h[:, None]
    ws = jnp.floor(p[None, :] * bin_w[:, None]).astype(jnp.int32) + rs_w[:, None]
    we = jnp.ceil((p[None, :] + 1.0) * bin_w[:, None]).astype(jnp.int32) + rs_w[:, None]
    hs = jnp.clip(hs, 0, H); he = jnp.clip(he, 0, H)
    ws = jnp.clip(ws, 0, W); we = jnp.clip(we, 0, W)
    return hs, he, ws, we


def prepare_params(params, C, roi_size, n_class):
    """One-time weight preprocessing (the 'init' step):
      - permute w1 rows from PyTorch's (c, ph, pw) flatten order to the kernel's
        lane-dense (ph, pw, c) order, zero-pad K to the tile size, cast bf16;
      - fuse cls_loc + score weights into one lane-padded (hidden, 128k) matmul."""
    S2 = roi_size * roi_size
    d_in = C * S2
    K_pad = _round_up(d_in, 512)
    out_dim = n_class * 4 + n_class
    out_p = _round_up(out_dim, 128)

    perm = (jnp.arange(C)[None, :] * S2 + jnp.arange(S2)[:, None]).reshape(-1)
    w1p = params["w1"][perm]                                     # rows -> (ph, pw, c)
    w1p = jnp.pad(w1p, ((0, K_pad - d_in), (0, 0))).astype(jnp.bfloat16)

    wcat = jnp.concatenate([params["wl"], params["wsc"]], axis=1)
    wcat = jnp.pad(wcat, ((0, 0), (0, out_p - out_dim))).astype(jnp.bfloat16)
    bcat = jnp.concatenate([params["bl"], params["bsc"]], axis=1)
    bcat = jnp.pad(bcat, ((0, 0), (0, out_p - out_dim)))

    return {"w1": w1p, "b1": params["b1"], "wcat": wcat, "bcat": bcat}


def roi_header_forward(prep, x, rois, roi_indices, *, n_class, roi_size, spatial_scale):
    """Equivalent of RoIHeader.forward: returns (roi_cls_locs, roi_scores)."""
    N, C, H, W = x.shape
    R = rois.shape[0]
    S = roi_size

    # Sort RoIs by batch index so the data-dependent feature-map DMA is reused
    # for consecutive RoIs of the same image; undo the permutation at the end.
    order = jnp.argsort(roi_indices)
    inv = jnp.argsort(order)
    rois_s = rois[order]
    idx_s = roi_indices[order].astype(jnp.int32)

    hs, he, ws, we = compute_bins(rois_s, spatial_scale, S, H, W)

    x_whc = jnp.transpose(x, (0, 3, 2, 1))                       # (N, W, H, C): C on lanes
    pooled = roi_pool(x_whc, idx_s,
                      hs.reshape(-1), he.reshape(-1),
                      ws.reshape(-1), we.reshape(-1), S)         # (R, S*S, C)

    # Empty-bin zeroing (torchvision semantics) — cheap elementwise glue in XLA.
    empty = (he <= hs)[:, :, None] | (we <= ws)[:, None, :]      # (R, S, S)
    pooled = jnp.where(empty.reshape(R, S * S)[:, :, None], 0.0, pooled)

    d_in = C * S * S
    K_pad = prep["w1"].shape[0]
    out_p = prep["wcat"].shape[1]
    R_pad = _round_up(R, 128)                                    # MXU M-occupancy

    pool_flat = pooled.reshape(R, d_in)                          # (ph, pw, c) order
    pool_flat = jnp.pad(pool_flat,
                        ((0, R_pad - R), (0, K_pad - d_in))).astype(jnp.bfloat16)

    out = roi_head_fc(pool_flat, prep["w1"], prep["b1"], prep["wcat"], prep["bcat"])
    roi_cls_locs = out[:R, :n_class * 4][inv]
    roi_scores = out[:R, n_class * 4:n_class * 5][inv]
    return roi_cls_locs, roi_scores


# ------------------------------ pure-JAX reference ------------------------------

def _reference(params, x, rois, roi_indices, *, n_class, roi_size, spatial_scale):
    N, C, H, W = x.shape
    R = rois.shape[0]
    hs, he, ws, we = compute_bins(rois, spatial_scale, roi_size, H, W)
    hi = jnp.arange(H); wi = jnp.arange(W)
    hmask = (hi[None, None, :] >= hs[:, :, None]) & (hi[None, None, :] < he[:, :, None])
    wmask = (wi[None, None, :] >= ws[:, :, None]) & (wi[None, None, :] < we[:, :, None])
    mask = hmask[:, :, None, :, None] & wmask[:, None, :, None, :]   # (R,S,S,H,W)
    feat = x[roi_indices]                                            # (R,C,H,W)
    masked = jnp.where(mask[:, None], feat[:, :, None, None, :, :], -1e30)
    val = masked.max(axis=(-1, -2))                                  # (R,C,S,S)
    empty = (he <= hs)[:, :, None] | (we <= ws)[:, None, :]
    val = jnp.where(empty[:, None], 0.0, val)
    pool_flat = val.reshape(R, -1)                                   # PyTorch (c,ph,pw) order
    fc7 = jnp.maximum(pool_flat @ params["w1"] + params["b1"][0], 0.0)
    return fc7 @ params["wl"] + params["bl"][0], fc7 @ params["wsc"] + params["bsc"][0]


# ------------------------------------ main ---------------------------------------

if __name__ == "__main__":
    # Small, deterministic configuration.
    N, C, H, W = 2, 8, 16, 16
    roi_size = 7
    spatial_scale = 0.25            # feature map is 1/4 of the 64x64 "image"
    n_class = 5
    R = 8
    hidden = 4096                   # cls_loc / score expect 4096-d features
    d_in = C * roi_size * roi_size

    key = jax.random.PRNGKey(0)
    k = jax.random.split(key, 8)

    x = jax.random.normal(k[0], (N, C, H, W), jnp.float32)

    # RoIs in image coordinates (x1, y1, x2, y2), image size 64.
    xy1 = jax.random.uniform(k[1], (R, 2), jnp.float32, 0.0, 40.0)
    wh = jax.random.uniform(k[2], (R, 2), jnp.float32, 8.0, 24.0)
    xy2 = jnp.minimum(xy1 + wh, 63.0)
    rois = jnp.concatenate([xy1, xy2], axis=1)
    roi_indices = jax.random.randint(k[3], (R,), 0, N, jnp.int32)

    # Deterministic synthetic parameters (weights stored as (in, out) = W^T,
    # rows in PyTorch's pool.view(R,-1) order = (c, ph, pw)).
    # classifier is an injected module; here: Linear(d_in, 4096) + ReLU, N(0, 0.01).
    # TODO(synk): original VGG16 classifier has two 4096-wide FC layers; a single
    #             FC+ReLU stands in for the injected `classifier` argument.
    params = {
        "w1":  jax.random.normal(k[4], (d_in, hidden), jnp.float32) * 0.01,
        "b1":  jnp.zeros((1, hidden), jnp.float32),
        "wl":  jax.random.normal(k[5], (hidden, n_class * 4), jnp.float32) * 0.001,  # cls_loc
        "bl":  jnp.zeros((1, n_class * 4), jnp.float32),
        "wsc": jax.random.normal(k[6], (hidden, n_class), jnp.float32) * 0.01,       # score
        "bsc": jnp.zeros((1, n_class), jnp.float32),
    }

    prep = prepare_params(params, C, roi_size, n_class)          # one-time init step

    fwd = jax.jit(functools.partial(roi_header_forward, n_class=n_class,
                                    roi_size=roi_size, spatial_scale=spatial_scale))
    roi_cls_locs, roi_scores = fwd(prep, x, rois, roi_indices)
    jax.block_until_ready((roi_cls_locs, roi_scores))

    ref_locs, ref_scores = _reference(params, x, rois, roi_indices, n_class=n_class,
                                      roi_size=roi_size, spatial_scale=spatial_scale)
    assert roi_cls_locs.shape == (R, n_class * 4)
    assert roi_scores.shape == (R, n_class)
    assert jnp.allclose(roi_cls_locs, ref_locs, rtol=1e-2, atol=1e-2)
    assert jnp.allclose(roi_scores, ref_scores, rtol=1e-2, atol=1e-2)

    print("KERNEL_OK")
</pallas_src>

<mosaic_0001>
module attributes {stable_mosaic.version = 11 : i64} {
  func.func @_roi_pool_kernel(%arg0: i32, %arg1: memref<8xi32, #tpu.memory_space<smem>>, %arg2: memref<56xi32, #tpu.memory_space<smem>>, %arg3: memref<56xi32, #tpu.memory_space<smem>>, %arg4: memref<56xi32, #tpu.memory_space<smem>>, %arg5: memref<56xi32, #tpu.memory_space<smem>>, %arg6: memref<1x16x16x8xf32, #tpu.memory_space<vmem>>, %arg7: memref<1x49x8xf32, #tpu.memory_space<vmem>>, %arg8: memref<7x16x8xf32, #tpu.memory_space<vmem>>) attributes {dimension_semantics = [#tpu.dimension_semantics<parallel>], iteration_bounds = array<i64: 8>, scalar_prefetch = 5 : i64, scratch_operands = 1 : i64, tpu.core_type = #tpu.core_type<tc>, window_params = [{transform_indices = @transform_0, window_bounds = array<i64: 1, 16, 16, 8>}, {transform_indices = @transform_1, window_bounds = array<i64: 1, 49, 8>}]} {
    %c0 = arith.constant 0 : index
    %c0_0 = arith.constant 0 : index
    %c0_1 = arith.constant 0 : index
    %c0_2 = arith.constant 0 : index
    %0 = vector.load %arg6[%c0, %c0_0, %c0_1, %c0_2] : memref<1x16x16x8xf32, #tpu.memory_space<vmem>>, vector<1x16x16x8xf32>
    %1 = vector.shape_cast %0 : vector<1x16x16x8xf32> to vector<16x16x8xf32>
    %2 = tpu.iota {dimensions = array<i32: 0>} : vector<16x1x1xi32>
    %c7_i32 = arith.constant 7 : i32
    %3 = arith.muli %arg0, %c7_i32 : i32
    %c0_i32 = arith.constant 0 : i32
    %4 = arith.addi %3, %c0_i32 : i32
    %5 = arith.index_cast %4 : i32 to index
    %6 = memref.load %arg4[%5] : memref<56xi32, #tpu.memory_space<smem>>
    %c7_i32_3 = arith.constant 7 : i32
    %7 = arith.muli %arg0, %c7_i32_3 : i32
    %c0_i32_4 = arith.constant 0 : i32
    %8 = arith.addi %7, %c0_i32_4 : i32
    %9 = arith.index_cast %8 : i32 to index
    %10 = memref.load %arg5[%9] : memref<56xi32, #tpu.memory_space<smem>>
    %11 = vector.broadcast %6 : i32 to vector<16x1x1xi32>
    %12 = arith.cmpi sge, %2, %11 : vector<16x1x1xi32>
    %13 = vector.broadcast %10 : i32 to vector<16x1x1xi32>
    %14 = arith.cmpi slt, %2, %13 : vector<16x1x1xi32>
    %15 = arith.andi %12, %14 : vector<16x1x1xi1>
    %cst = arith.constant -1.000000e+30 : f32
    %16 = vector.shape_cast %15 : vector<16x1x1xi1> to vector<16x1x1xi1>
    %17 = vector.broadcast %16 : vector<16x1x1xi1> to vector<16x16x8xi1>
    %18 = vector.broadcast %cst : f32 to vector<16x16x8xf32>
    %19 = arith.select %17, %1, %18 : vector<16x16x8xi1>, vector<16x16x8xf32>
    %cst_5 = arith.constant dense<0xFF800000> : vector<16x8xf32>
    %20 = vector.multi_reduction <maximumf>, %19, %cst_5 [0] : vector<16x16x8xf32> to vector<16x8xf32>
    %c0_6 = arith.constant 0 : index
    %c0_7 = arith.constant 0 : index
    %c0_8 = arith.constant 0 : index
    %21 = vector.load %arg8[%c0_6, %c0_7, %c0_8] : memref<7x16x8xf32, #tpu.memory_space<vmem>>, vector<1x16x8xf32>
    %22 = vector.shape_cast %21 : vector<1x16x8xf32> to vector<16x8xf32>
    %23 = vector.shape_cast %20 : vector<16x8xf32> to vector<1x16x8xf32>
    tpu.vector_store %arg8[%c0_6, %c0_7, %c0_8], %23 {strides = array<i32>} : memref<7x16x8xf32, #tpu.memory_space<vmem>>, vector<1x16x8xf32>,
    %c7_i32_9 = arith.constant 7 : i32
    %24 = arith.muli %arg0, %c7_i32_9 : i32
    %c1_i32 = arith.constant 1 : i32
    %25 = arith.addi %24, %c1_i32 : i32
    %26 = arith.index_cast %25 : i32 to index
    %27 = memref.load %arg4[%26] : memref<56xi32, #tpu.memory_space<smem>>
    %c7_i32_10 = arith.constant 7 : i32
    %28 = arith.muli %arg0, %c7_i32_10 : i32
    %c1_i32_11 = arith.constant 1 : i32
    %29 = arith.addi %28, %c1_i32_11 : i32
    %30 = arith.index_cast %29 : i32 to index
    %31 = memref.load %arg5[%30] : memref<56xi32, #tpu.memory_space<smem>>
    %32 = vector.broadcast %27 : i32 to vector<16x1x1xi32>
    %33 = arith.cmpi sge, %2, %32 : vector<16x1x1xi32>
    %34 = vector.broadcast %31 : i32 to vector<16x1x1xi32>
    %35 = arith.cmpi slt, %2, %34 : vector<16x1x1xi32>
    %36 = arith.andi %33, %35 : vector<16x1x1xi1>
    %cst_12 = arith.constant -1.000000e+30 : f32
    %37 = vector.shape_cast %36 : vector<16x1x1xi1> to vector<16x1x1xi1>
    %38 = vector.broadcast %37 : vector<16x1x1xi1> to vector<16x16x8xi1>
    %39 = vector.broadcast %cst_12 : f32 to vector<16x16x8xf32>
    %40 = arith.select %38, %1, %39 : vector<16x16x8xi1>, vector<16x16x8xf32>
    %cst_13 = arith.constant dense<0xFF800000> : vector<16x8xf32>
    %41 = vector.multi_reduction <maximumf>, %40, %cst_13 [0] : vector<16x16x8xf32> to vector<16x8xf32>
    %c1 = arith.constant 1 : index
    %c0_14 = arith.constant 0 : index
    %c0_15 = arith.constant 0 : index
    %42 = vector.load %arg8[%c1, %c0_14, %c0_15] : memref<7x16x8xf32, #tpu.memory_space<vmem>>, vector<1x16x8xf32>
    %43 = vector.shape_cast %42 : vector<1x16x8xf32> to vector<16x8xf32>
    %44 = vector.shape_cast %41 : vector<16x8xf32> to vector<1x16x8xf32>
    tpu.vector_store %arg8[%c1, %c0_14, %c0_15], %44 {strides = array<i32>} : memref<7x16x8xf32, #tpu.memory_space<vmem>>, vector<1x16x8xf32>,
    %c7_i32_16 = arith.constant 7 : i32
    %45 = arith.muli %arg0, %c7_i32_16 : i32
    %c2_i32 = arith.constant 2 : i32
    %46 = arith.addi %45, %c2_i32 : i32
    %47 = arith.index_cast %46 : i32 to index
    %48 = memref.load %arg4[%47] : memref<56xi32, #tpu.memory_space<smem>>
    %c7_i32_17 = arith.constant 7 : i32
    %49 = arith.muli %arg0, %c7_i32_17 : i32
    %c2_i32_18 = arith.constant 2 : i32
    %50 = arith.addi %49, %c2_i32_18 : i32
    %51 = arith.index_cast %50 : i32 to index
    %52 = memref.load %arg5[%51] : memref<56xi32, #tpu.memory_space<smem>>
    %53 = vector.broadcast %48 : i32 to vector<16x1x1xi32>
    %54 = arith.cmpi sge, %2, %53 : vector<16x1x1xi32>
    %55 = vector.broadcast %52 : i32 to vector<16x1x1xi32>
    %56 = arith.cmpi slt, %2, %55 : vector<16x1x1xi32>
    %57 = arith.andi %54, %56 : vector<16x1x1xi1>
    %cst_19 = arith.constant -1.000000e+30 : f32
    %58 = vector.shape_cast %57 : vector<16x1x1xi1> to vector<16x1x1xi1>
    %59 = vector.broadcast %58 : vector<16x1x1xi1> to vector<16x16x8xi1>
    %60 = vector.broadcast %cst_19 : f32 to vector<16x16x8xf32>
    %61 = arith.select %59, %1, %60 : vector<16x16x8xi1>, vector<16x16x8xf32>
    %cst_20 = arith.constant dense<0xFF800000> : vector<16x8xf32>
    %62 = vector.multi_reduction <maximumf>, %61, %cst_20 [0] : vector<16x16x8xf32> to vector<16x8xf32>
    %c2 = arith.constant 2 : index
    %c0_21 = arith.constant 0 : index
    %c0_22 = arith.constant 0 : index
    %63 = vector.load %arg8[%c2, %c0_21, %c0_22] : memref<7x16x8xf32, #tpu.memory_space<vmem>>, vector<1x16x8xf32>
    %64 = vector.shape_cast %63 : vector<1x16x8xf32> to vector<16x8xf32>
    %65 = vector.shape_cast %62 : vector<16x8xf32> to vector<1x16x8xf32>
    tpu.vector_store %arg8[%c2, %c0_21, %c0_22], %65 {strides = array<i32>} : memref<7x16x8xf32, #tpu.memory_space<vmem>>, vector<1x16x8xf32>,
    %c7_i32_23 = arith.constant 7 : i32
    %66 = arith.muli %arg0, %c7_i32_23 : i32
    %c3_i32 = arith.constant 3 : i32
    %67 = arith.addi %66, %c3_i32 : i32
    %68 = arith.index_cast %67 : i32 to index
    %69 = memref.load %arg4[%68] : memref<56xi32, #tpu.memory_space<smem>>
    %c7_i32_24 = arith.constant 7 : i32
    %70 = arith.muli %arg0, %c7_i32_24 : i32
    %c3_i32_25 = arith.constant 3 : i32
    %71 = arith.addi %70, %c3_i32_25 : i32
    %72 = arith.index_cast %71 : i32 to index
    %73 = memref.load %arg5[%72] : memref<56xi32, #tpu.memory_space<smem>>
    %74 = vector.broadcast %69 : i32 to vector<16x1x1xi32>
    %75 = arith.cmpi sge, %2, %74 : vector<16x1x1xi32>
    %76 = vector.broadcast %73 : i32 to vector<16x1x1xi32>
    %77 = arith.cmpi slt, %2, %76 : vector<16x1x1xi32>
    %78 = arith.andi %75, %77 : vector<16x1x1xi1>
    %cst_26 = arith.constant -1.000000e+30 : f32
    %79 = vector.shape_cast %78 : vector<16x1x1xi1> to vector<16x1x1xi1>
    %80 = vector.broadcast %79 : vector<16x1x1xi1> to vector<16x16x8xi1>
    %81 = vector.broadcast %cst_26 : f32 to vector<16x16x8xf32>
    %82 = arith.select %80, %1, %81 : vector<16x16x8xi1>, vector<16x16x8xf32>
    %cst_27 = arith.constant dense<0xFF800000> : vector<16x8xf32>
    %83 = vector.multi_reduction <maximumf>, %82, %cst_27 [0] : vector<16x16x8xf32> to vector<16x8xf32>
    %c3 = arith.constant 3 : index
    %c0_28 = arith.constant 0 : index
    %c0_29 = arith.constant 0 : index
    %84 = vector.load %arg8[%c3, %c0_28, %c0_29] : memref<7x16x8xf32, #tpu.memory_space<vmem>>, vector<1x16x8xf32>
    %85 = vector.shape_cast %84 : vector<1x16x8xf32> to vector<16x8xf32>
    %86 = vector.shape_cast %83 : vector<16x8xf32> to vector<1x16x8xf32>
    tpu.vector_store %arg8[%c3, %c0_28, %c0_29], %86 {strides = array<i32>} : memref<7x16x8xf32, #tpu.memory_space<vmem>>, vector<1x16x8xf32>,
    %c7_i32_30 = arith.constant 7 : i32
    %87 = arith.muli %arg0, %c7_i32_30 : i32
    %c4_i32 = arith.constant 4 : i32
    %88 = arith.addi %87, %c4_i32 : i32
    %89 = arith.index_cast %88 : i32 to index
    %90 = memref.load %arg4[%89] : memref<56xi32, #tpu.memory_space<smem>>
    %c7_i32_31 = arith.constant 7 : i32
    %91 = arith.muli %arg0, %c7_i32_31 : i32
    %c4_i32_32 = arith.constant 4 : i32
    %92 = arith.addi %91, %c4_i32_32 : i32
    %93 = arith.index_cast %92 : i32 to index
    %94 = memref.load %arg5[%93] : memref<56xi32, #tpu.memory_space<smem>>
    %95 = vector.broadcast %90 : i32 to vector<16x1x1xi32>
    %96 = arith.cmpi sge, %2, %95 : vector<16x1x1xi32>
    %97 = vector.broadcast %94 : i32 to vector<16x1x1xi32>
    %98 = arith.cmpi slt, %2, %97 : vector<16x1x1xi32>
    %99 = arith.andi %96, %98 : vector<16x1x1xi1>
    %cst_33 = arith.constant -1.000000e+30 : f32
    %100 = vector.shape_cast %99 : vector<16x1x1xi1> to vector<16x1x1xi1>
    %101 = vector.broadcast %100 : vector<16x1x1xi1> to vector<16x16x8xi1>
    %102 = vector.broadcast %cst_33 : f32 to vector<16x16x8xf32>
    %103 = arith.select %101, %1, %102 : vector<16x16x8xi1>, vector<16x16x8xf32>
    %cst_34 = arith.constant dense<0xFF800000> : vector<16x8xf32>
    %104 = vector.multi_reduction <maximumf>, %103, %cst_34 [0] : vector<16x16x8xf32> to vector<16x8xf32>
    %c4 = arith.constant 4 : index
    %c0_35 = arith.constant 0 : index
    %c0_36 = arith.constant 0 : index
    %105 = vector.load %arg8[%c4, %c0_35, %c0_36] : memref<7x16x8xf32, #tpu.memory_space<vmem>>, vector<1x16x8xf32>
    %106 = vector.shape_cast %105 : vector<1x16x8xf32> to vector<16x8xf32>
    %107 = vector.shape_cast %104 : vector<16x8xf32> to vector<1x16x8xf32>
    tpu.vector_store %arg8[%c4, %c0_35, %c0_36], %107 {strides = array<i32>} : memref<7x16x8xf32, #tpu.memory_space<vmem>>, vector<1x16x8xf32>,
    %c7_i32_37 = arith.constant 7 : i32
    %108 = arith.muli %arg0, %c7_i32_37 : i32
    %c5_i32 = arith.constant 5 : i32
    %109 = arith.addi %108, %c5_i32 : i32
    %110 = arith.index_cast %109 : i32 to index
    %111 = memref.load %arg4[%110] : memref<56xi32, #tpu.memory_space<smem>>
    %c7_i32_38 = arith.constant 7 : i32
    %112 = arith.muli %arg0, %c7_i32_38 : i32
    %c5_i32_39 = arith.constant 5 : i32
    %113 = arith.addi %112, %c5_i32_39 : i32
    %114 = arith.index_cast %113 : i32 to index
    %115 = memref.load %arg5[%114] : memref<56xi32, #tpu.memory_space<smem>>
    %116 = vector.broadcast %111 : i32 to vector<16x1x1xi32>
    %117 = arith.cmpi sge, %2, %116 : vector<16x1x1xi32>
    %118 = vector.broadcast %115 : i32 to vector<16x1x1xi32>
    %119 = arith.cmpi slt, %2, %118 : vector<16x1x1xi32>
    %120 = arith.andi %117, %119 : vector<16x1x1xi1>
    %cst_40 = arith.constant -1.000000e+30 : f32
    %121 = vector.shape_cast %120 : vector<16x1x1xi1> to vector<16x1x1xi1>
    %122 = vector.broadcast %121 : vector<16x1x1xi1> to vector<16x16x8xi1>
    %123 = vector.broadcast %cst_40 : f32 to vector<16x16x8xf32>
    %124 = arith.select %122, %1, %123 : vector<16x16x8xi1>, vector<16x16x8xf32>
    %cst_41 = arith.constant dense<0xFF800000> : vector<16x8xf32>
    %125 = vector.multi_reduction <maximumf>, %124, %cst_41 [0] : vector<16x16x8xf32> to vector<16x8xf32>
    %c5 = arith.constant 5 : index
    %c0_42 = arith.constant 0 : index
    %c0_43 = arith.constant 0 : index
    %126 = vector.load %arg8[%c5, %c0_42, %c0_43] : memref<7x16x8xf32, #tpu.memory_space<vmem>>, vector<1x16x8xf32>
    %127 = vector.shape_cast %126 : vector<1x16x8xf32> to vector<16x8xf32>
    %128 = vector.shape_cast %125 : vector<16x8xf32> to vector<1x16x8xf32>
    tpu.vector_store %arg8[%c5, %c0_42, %c0_43], %128 {strides = array<i32>} : memref<7x16x8xf32, #tpu.memory_space<vmem>>, vector<1x16x8xf32>,
    %c7_i32_44 = arith.constant 7 : i32
    %129 = arith.muli %arg0, %c7_i32_44 : i32
    %c6_i32 = arith.constant 6 : i32
    %130 = arith.addi %129, %c6_i32 : i32
    %131 = arith.index_cast %130 : i32 to index
    %132 = memref.load %arg4[%131] : memref<56xi32, #tpu.memory_space<smem>>
    %c7_i32_45 = arith.constant 7 : i32
    %133 = arith.muli %arg0, %c7_i32_45 : i32
    %c6_i32_46 = arith.constant 6 : i32
    %134 = arith.addi %133, %c6_i32_46 : i32
    %135 = arith.index_cast %134 : i32 to index
    %136 = memref.load %arg5[%135] : memref<56xi32, #tpu.memory_space<smem>>
    %137 = vector.broadcast %132 : i32 to vector<16x1x1xi32>
    %138 = arith.cmpi sge, %2, %137 : vector<16x1x1xi32>
    %139 = vector.broadcast %136 : i32 to vector<16x1x1xi32>
    %140 = arith.cmpi slt, %2, %139 : vector<16x1x1xi32>
    %141 = arith.andi %138, %140 : vector<16x1x1xi1>
    %cst_47 = arith.constant -1.000000e+30 : f32
    %142 = vector.shape_cast %141 : vector<16x1x1xi1> to vector<16x1x1xi1>
    %143 = vector.broadcast %142 : vector<16x1x1xi1> to vector<16x16x8xi1>
    %144 = vector.broadcast %cst_47 : f32 to vector<16x16x8xf32>
    %145 = arith.select %143, %1, %144 : vector<16x16x8xi1>, vector<16x16x8xf32>
    %cst_48 = arith.constant dense<0xFF800000> : vector<16x8xf32>
    %146 = vector.multi_reduction <maximumf>, %145, %cst_48 [0] : vector<16x16x8xf32> to vector<16x8xf32>
    %c6 = arith.constant 6 : index
    %c0_49 = arith.constant 0 : index
    %c0_50 = arith.constant 0 : index
    %147 = vector.load %arg8[%c6, %c0_49, %c0_50] : memref<7x16x8xf32, #tpu.memory_space<vmem>>, vector<1x16x8xf32>
    %148 = vector.shape_cast %147 : vector<1x16x8xf32> to vector<16x8xf32>
    %149 = vector.shape_cast %146 : vector<16x8xf32> to vector<1x16x8xf32>
    tpu.vector_store %arg8[%c6, %c0_49, %c0_50], %149 {strides = array<i32>} : memref<7x16x8xf32, #tpu.memory_space<vmem>>, vector<1x16x8xf32>,
    %150 = tpu.iota {dimensions = array<i32: 1>} : vector<1x16x1xi32>
    %c7_i32_51 = arith.constant 7 : i32
    %151 = arith.muli %arg0, %c7_i32_51 : i32
    %c0_i32_52 = arith.constant 0 : i32
    %152 = arith.addi %151, %c0_i32_52 : i32
    %153 = arith.index_cast %152 : i32 to index
    %154 = memref.load %arg2[%153] : memref<56xi32, #tpu.memory_space<smem>>
    %c7_i32_53 = arith.constant 7 : i32
    %155 = arith.muli %arg0, %c7_i32_53 : i32
    %c0_i32_54 = arith.constant 0 : i32
    %156 = arith.addi %155, %c0_i32_54 : i32
    %157 = arith.index_cast %156 : i32 to index
    %158 = memref.load %arg3[%157] : memref<56xi32, #tpu.memory_space<smem>>
    %159 = vector.broadcast %154 : i32 to vector<1x16x1xi32>
    %160 = arith.cmpi sge, %150, %159 : vector<1x16x1xi32>
    %161 = vector.broadcast %158 : i32 to vector<1x16x1xi32>
    %162 = arith.cmpi slt, %150, %161 : vector<1x16x1xi32>
    %163 = arith.andi %160, %162 : vector<1x16x1xi1>
    %c0_55 = arith.constant 0 : index
    %c0_56 = arith.constant 0 : index
    %c0_57 = arith.constant 0 : index
    %164 = vector.load %arg8[%c0_55, %c0_56, %c0_57] : memref<7x16x8xf32, #tpu.memory_space<vmem>>, vector<7x16x8xf32>
    %cst_58 = arith.constant -1.000000e+30 : f32
    %165 = vector.shape_cast %163 : vector<1x16x1xi1> to vector<1x16x1xi1>
    %166 = vector.broadcast %165 : vector<1x16x1xi1> to vector<7x16x8xi1>
    %167 = vector.broadcast %cst_58 : f32 to vector<7x16x8xf32>
    %168 = arith.select %166, %164, %167 : vector<7x16x8xi1>, vector<7x16x8xf32>
    %cst_59 = arith.constant dense<0xFF800000> : vector<7x8xf32>
    %169 = vector.multi_reduction <maximumf>, %168, %cst_59 [1] : vector<7x16x8xf32> to vector<7x8xf32>
    %c0_60 = arith.constant 0 : index
    %c0_61 = arith.constant 0 : index
    %c0_62 = arith.constant 0 : index
    %170 = vector.load %arg7[%c0_60, %c0_61, %c0_62] : memref<1x49x8xf32, #tpu.memory_space<vmem>>, vector<1x7x8xf32>
    %171 = vector.shape_cast %170 : vector<1x7x8xf32> to vector<7x8xf32>
    %172 = vector.shape_cast %169 : vector<7x8xf32> to vector<1x7x8xf32>
    tpu.vector_store %arg7[%c0_60, %c0_61, %c0_62], %172 {strides = array<i32>} : memref<1x49x8xf32, #tpu.memory_space<vmem>>, vector<1x7x8xf32>,
    %c7_i32_63 = arith.constant 7 : i32
    %173 = arith.muli %arg0, %c7_i32_63 : i32
    %c1_i32_64 = arith.constant 1 : i32
    %174 = arith.addi %173, %c1_i32_64 : i32
    %175 = arith.index_cast %174 : i32 to index
    %176 = memref.load %arg2[%175] : memref<56xi32, #tpu.memory_space<smem>>
    %c7_i32_65 = arith.constant 7 : i32
    %177 = arith.muli %arg0, %c7_i32_65 : i32
    %c1_i32_66 = arith.constant 1 : i32
    %178 = arith.addi %177, %c1_i32_66 : i32
    %179 = arith.index_cast %178 : i32 to index
    %180 = memref.load %arg3[%179] : memref<56xi32, #tpu.memory_space<smem>>
    %181 = vector.broadcast %176 : i32 to vector<1x16x1xi32>
    %182 = arith.cmpi sge, %150, %181 : vector<1x16x1xi32>
    %183 = vector.broadcast %180 : i32 to vector<1x16x1xi32>
    %184 = arith.cmpi slt, %150, %183 : vector<1x16x1xi32>
    %185 = arith.andi %182, %184 : vector<1x16x1xi1>
    %c0_67 = arith.constant 0 : index
    %c0_68 = arith.constant 0 : index
    %c0_69 = arith.constant 0 : index
    %186 = vector.load %arg8[%c0_67, %c0_68, %c0_69] : memref<7x16x8xf32, #tpu.memory_space<vmem>>, vector<7x16x8xf32>
    %cst_70 = arith.constant -1.000000e+30 : f32
    %187 = vector.shape_cast %185 : vector<1x16x1xi1> to vector<1x16x1xi1>
    %188 = vector.broadcast %187 : vector<1x16x1xi1> to vector<7x16x8xi1>
    %189 = vector.broadcast %cst_70 : f32 to vector<7x16x8xf32>
    %190 = arith.select %188, %186, %189 : vector<7x16x8xi1>, vector<7x16x8xf32>
    %cst_71 = arith.constant dense<0xFF800000> : vector<7x8xf32>
    %191 = vector.multi_reduction <maximumf>, %190, %cst_71 [1] : vector<7x16x8xf32> to vector<7x8xf32>
    %c0_72 = arith.constant 0 : index
    %c7 = arith.constant 7 : index
    %c0_73 = arith.constant 0 : index
    %192 = vector.load %arg7[%c0_72, %c7, %c0_73] : memref<1x49x8xf32, #tpu.memory_space<vmem>>, vector<1x7x8xf32>
    %193 = vector.shape_cast %192 : vector<1x7x8xf32> to vector<7x8xf32>
    %194 = vector.shape_cast %191 : vector<7x8xf32> to vector<1x7x8xf32>
    tpu.vector_store %arg7[%c0_72, %c7, %c0_73], %194 {strides = array<i32>} : memref<1x49x8xf32, #tpu.memory_space<vmem>>, vector<1x7x8xf32>,
    %c7_i32_74 = arith.constant 7 : i32
    %195 = arith.muli %arg0, %c7_i32_74 : i32
    %c2_i32_75 = arith.constant 2 : i32
    %196 = arith.addi %195, %c2_i32_75 : i32
    %197 = arith.index_cast %196 : i32 to index
    %198 = memref.load %arg2[%197] : memref<56xi32, #tpu.memory_space<smem>>
    %c7_i32_76 = arith.constant 7 : i32
    %199 = arith.muli %arg0, %c7_i32_76 : i32
    %c2_i32_77 = arith.constant 2 : i32
    %200 = arith.addi %199, %c2_i32_77 : i32
    %201 = arith.index_cast %200 : i32 to index
    %202 = memref.load %arg3[%201] : memref<56xi32, #tpu.memory_space<smem>>
    %203 = vector.broadcast %198 : i32 to vector<1x16x1xi32>
    %204 = arith.cmpi sge, %150, %203 : vector<1x16x1xi32>
    %205 = vector.broadcast %202 : i32 to vector<1x16x1xi32>
    %206 = arith.cmpi slt, %150, %205 : vector<1x16x1xi32>
    %207 = arith.andi %204, %206 : vector<1x16x1xi1>
    %c0_78 = arith.constant 0 : index
    %c0_79 = arith.constant 0 : index
    %c0_80 = arith.constant 0 : index
    %208 = vector.load %arg8[%c0_78, %c0_79, %c0_80] : memref<7x16x8xf32, #tpu.memory_space<vmem>>, vector<7x16x8xf32>
    %cst_81 = arith.constant -1.000000e+30 : f32
    %209 = vector.shape_cast %207 : vector<1x16x1xi1> to vector<1x16x1xi1>
    %210 = vector.broadcast %209 : vector<1x16x1xi1> to vector<7x16x8xi1>
    %211 = vector.broadcast %cst_81 : f32 to vector<7x16x8xf32>
    %212 = arith.select %210, %208, %211 : vector<7x16x8xi1>, vector<7x16x8xf32>
    %cst_82 = arith.constant dense<0xFF800000> : vector<7x8xf32>
    %213 = vector.multi_reduction <maximumf>, %212, %cst_82 [1] : vector<7x16x8xf32> to vector<7x8xf32>
    %c0_83 = arith.constant 0 : index
    %c14 = arith.constant 14 : index
    %c0_84 = arith.constant 0 : index
    %214 = vector.load %arg7[%c0_83, %c14, %c0_84] : memref<1x49x8xf32, #tpu.memory_space<vmem>>, vector<1x7x8xf32>
    %215 = vector.shape_cast %214 : vector<1x7x8xf32> to vector<7x8xf32>
    %216 = vector.shape_cast %213 : vector<7x8xf32> to vector<1x7x8xf32>
    tpu.vector_store %arg7[%c0_83, %c14, %c0_84], %216 {strides = array<i32>} : memref<1x49x8xf32, #tpu.memory_space<vmem>>, vector<1x7x8xf32>,
    %c7_i32_85 = arith.constant 7 : i32
    %217 = arith.muli %arg0, %c7_i32_85 : i32
    %c3_i32_86 = arith.constant 3 : i32
    %218 = arith.addi %217, %c3_i32_86 : i32
    %219 = arith.index_cast %218 : i32 to index
    %220 = memref.load %arg2[%219] : memref<56xi32, #tpu.memory_space<smem>>
    %c7_i32_87 = arith.constant 7 : i32
    %221 = arith.muli %arg0, %c7_i32_87 : i32
    %c3_i32_88 = arith.constant 3 : i32
    %222 = arith.addi %221, %c3_i32_88 : i32
    %223 = arith.index_cast %222 : i32 to index
    %224 = memref.load %arg3[%223] : memref<56xi32, #tpu.memory_space<smem>>
    %225 = vector.broadcast %220 : i32 to vector<1x16x1xi32>
    %226 = arith.cmpi sge, %150, %225 : vector<1x16x1xi32>
    %227 = vector.broadcast %224 : i32 to vector<1x16x1xi32>
    %228 = arith.cmpi slt, %150, %227 : vector<1x16x1xi32>
    %229 = arith.andi %226, %228 : vector<1x16x1xi1>
    %c0_89 = arith.constant 0 : index
    %c0_90 = arith.constant 0 : index
    %c0_91 = arith.constant 0 : index
    %230 = vector.load %arg8[%c0_89, %c0_90, %c0_91] : memref<7x16x8xf32, #tpu.memory_space<vmem>>, vector<7x16x8xf32>
    %cst_92 = arith.constant -1.000000e+30 : f32
    %231 = vector.shape_cast %229 : vector<1x16x1xi1> to vector<1x16x1xi1>
    %232 = vector.broadcast %231 : vector<1x16x1xi1> to vector<7x16x8xi1>
    %233 = vector.broadcast %cst_92 : f32 to vector<7x16x8xf32>
    %234 = arith.select %232, %230, %233 : vector<7x16x8xi1>, vector<7x16x8xf32>
    %cst_93 = arith.constant dense<0xFF800000> : vector<7x8xf32>
    %235 = vector.multi_reduction <maximumf>, %234, %cst_93 [1] : vector<7x16x8xf32> to vector<7x8xf32>
    %c0_94 = arith.constant 0 : index
    %c21 = arith.constant 21 : index
    %c0_95 = arith.constant 0 : index
    %236 = vector.load %arg7[%c0_94, %c21, %c0_95] : memref<1x49x8xf32, #tpu.memory_space<vmem>>, vector<1x7x8xf32>
    %237 = vector.shape_cast %236 : vector<1x7x8xf32> to vector<7x8xf32>
    %238 = vector.shape_cast %235 : vector<7x8xf32> to vector<1x7x8xf32>
    tpu.vector_store %arg7[%c0_94, %c21, %c0_95], %238 {strides = array<i32>} : memref<1x49x8xf32, #tpu.memory_space<vmem>>, vector<1x7x8xf32>,
    %c7_i32_96 = arith.constant 7 : i32
    %239 = arith.muli %arg0, %c7_i32_96 : i32
    %c4_i32_97 = arith.constant 4 : i32
    %240 = arith.addi %239, %c4_i32_97 : i32
    %241 = arith.index_cast %240 : i32 to index
    %242 = memref.load %arg2[%241] : memref<56xi32, #tpu.memory_space<smem>>
    %c7_i32_98 = arith.constant 7 : i32
    %243 = arith.muli %arg0, %c7_i32_98 : i32
    %c4_i32_99 = arith.constant 4 : i32
    %244 = arith.addi %243, %c4_i32_99 : i32
    %245 = arith.index_cast %244 : i32 to index
    %246 = memref.load %arg3[%245] : memref<56xi32, #tpu.memory_space<smem>>
    %247 = vector.broadcast %242 : i32 to vector<1x16x1xi32>
    %248 = arith.cmpi sge, %150, %247 : vector<1x16x1xi32>
    %249 = vector.broadcast %246 : i32 to vector<1x16x1xi32>
    %250 = arith.cmpi slt, %150, %249 : vector<1x16x1xi32>
    %251 = arith.andi %248, %250 : vector<1x16x1xi1>
    %c0_100 = arith.constant 0 : index
    %c0_101 = arith.constant 0 : index
    %c0_102 = arith.constant 0 : index
    %252 = vector.load %arg8[%c0_100, %c0_101, %c0_102] : memref<7x16x8xf32, #tpu.memory_space<vmem>>, vector<7x16x8xf32>
    %cst_103 = arith.constant -1.000000e+30 : f32
    %253 = vector.shape_cast %251 : vector<1x16x1xi1> to vector<1x16x1xi1>
    %254 = vector.broadcast %253 : vector<1x16x1xi1> to vector<7x16x8xi1>
    %255 = vector.broadcast %cst_103 : f32 to vector<7x16x8xf32>
    %256 = arith.select %254, %252, %255 : vector<7x16x8xi1>, vector<7x16x8xf32>
    %cst_104 = arith.constant dense<0xFF800000> : vector<7x8xf32>
    %257 = vector.multi_reduction <maximumf>, %256, %cst_104 [1] : vector<7x16x8xf32> to vector<7x8xf32>
    %c0_105 = arith.constant 0 : index
    %c28 = arith.constant 28 : index
    %c0_106 = arith.constant 0 : index
    %258 = vector.load %arg7[%c0_105, %c28, %c0_106] : memref<1x49x8xf32, #tpu.memory_space<vmem>>, vector<1x7x8xf32>
    %259 = vector.shape_cast %258 : vector<1x7x8xf32> to vector<7x8xf32>
    %260 = vector.shape_cast %257 : vector<7x8xf32> to vector<1x7x8xf32>
    tpu.vector_store %arg7[%c0_105, %c28, %c0_106], %260 {strides = array<i32>} : memref<1x49x8xf32, #tpu.memory_space<vmem>>, vector<1x7x8xf32>,
    %c7_i32_107 = arith.constant 7 : i32
    %261 = arith.muli %arg0, %c7_i32_107 : i32
    %c5_i32_108 = arith.constant 5 : i32
    %262 = arith.addi %261, %c5_i32_108 : i32
    %263 = arith.index_cast %262 : i32 to index
    %264 = memref.load %arg2[%263] : memref<56xi32, #tpu.memory_space<smem>>
    %c7_i32_109 = arith.constant 7 : i32
    %265 = arith.muli %arg0, %c7_i32_109 : i32
    %c5_i32_110 = arith.constant 5 : i32
    %266 = arith.addi %265, %c5_i32_110 : i32
    %267 = arith.index_cast %266 : i32 to index
    %268 = memref.load %arg3[%267] : memref<56xi32, #tpu.memory_space<smem>>
    %269 = vector.broadcast %264 : i32 to vector<1x16x1xi32>
    %270 = arith.cmpi sge, %150, %269 : vector<1x16x1xi32>
    %271 = vector.broadcast %268 : i32 to vector<1x16x1xi32>
    %272 = arith.cmpi slt, %150, %271 : vector<1x16x1xi32>
    %273 = arith.andi %270, %272 : vector<1x16x1xi1>
    %c0_111 = arith.constant 0 : index
    %c0_112 = arith.constant 0 : index
    %c0_113 = arith.constant 0 : index
    %274 = vector.load %arg8[%c0_111, %c0_112, %c0_113] : memref<7x16x8xf32, #tpu.memory_space<vmem>>, vector<7x16x8xf32>
    %cst_114 = arith.constant -1.000000e+30 : f32
    %275 = vector.shape_cast %273 : vector<1x16x1xi1> to vector<1x16x1xi1>
    %276 = vector.broadcast %275 : vector<1x16x1xi1> to vector<7x16x8xi1>
    %277 = vector.broadcast %cst_114 : f32 to vector<7x16x8xf32>
    %278 = arith.select %276, %274, %277 : vector<7x16x8xi1>, vector<7x16x8xf32>
    %cst_115 = arith.constant dense<0xFF800000> : vector<7x8xf32>
    %279 = vector.multi_reduction <maximumf>, %278, %cst_115 [1] : vector<7x16x8xf32> to vector<7x8xf32>
    %c0_116 = arith.constant 0 : index
    %c35 = arith.constant 35 : index
    %c0_117 = arith.constant 0 : index
    %280 = vector.load %arg7[%c0_116, %c35, %c0_117] : memref<1x49x8xf32, #tpu.memory_space<vmem>>, vector<1x7x8xf32>
    %281 = vector.shape_cast %280 : vector<1x7x8xf32> to vector<7x8xf32>
    %282 = vector.shape_cast %279 : vector<7x8xf32> to vector<1x7x8xf32>
    tpu.vector_store %arg7[%c0_116, %c35, %c0_117], %282 {strides = array<i32>} : memref<1x49x8xf32, #tpu.memory_space<vmem>>, vector<1x7x8xf32>,
    %c7_i32_118 = arith.constant 7 : i32
    %283 = arith.muli %arg0, %c7_i32_118 : i32
    %c6_i32_119 = arith.constant 6 : i32
    %284 = arith.addi %283, %c6_i32_119 : i32
    %285 = arith.index_cast %284 : i32 to index
    %286 = memref.load %arg2[%285] : memref<56xi32, #tpu.memory_space<smem>>
    %c7_i32_120 = arith.constant 7 : i32
    %287 = arith.muli %arg0, %c7_i32_120 : i32
    %c6_i32_121 = arith.constant 6 : i32
    %288 = arith.addi %287, %c6_i32_121 : i32
    %289 = arith.index_cast %288 : i32 to index
    %290 = memref.load %arg3[%289] : memref<56xi32, #tpu.memory_space<smem>>
    %291 = vector.broadcast %286 : i32 to vector<1x16x1xi32>
    %292 = arith.cmpi sge, %150, %291 : vector<1x16x1xi32>
    %293 = vector.broadcast %290 : i32 to vector<1x16x1xi32>
    %294 = arith.cmpi slt, %150, %293 : vector<1x16x1xi32>
    %295 = arith.andi %292, %294 : vector<1x16x1xi1>
    %c0_122 = arith.constant 0 : index
    %c0_123 = arith.constant 0 : index
    %c0_124 = arith.constant 0 : index
    %296 = vector.load %arg8[%c0_122, %c0_123, %c0_124] : memref<7x16x8xf32, #tpu.memory_space<vmem>>, vector<7x16x8xf32>
    %cst_125 = arith.constant -1.000000e+30 : f32
    %297 = vector.shape_cast %295 : vector<1x16x1xi1> to vector<1x16x1xi1>
    %298 = vector.broadcast %297 : vector<1x16x1xi1> to vector<7x16x8xi1>
    %299 = vector.broadcast %cst_125 : f32 to vector<7x16x8xf32>
    %300 = arith.select %298, %296, %299 : vector<7x16x8xi1>, vector<7x16x8xf32>
    %cst_126 = arith.constant dense<0xFF800000> : vector<7x8xf32>
    %301 = vector.multi_reduction <maximumf>, %300, %cst_126 [1] : vector<7x16x8xf32> to vector<7x8xf32>
    %c0_127 = arith.constant 0 : index
    %c42 = arith.constant 42 : index
    %c0_128 = arith.constant 0 : index
    %302 = vector.load %arg7[%c0_127, %c42, %c0_128] : memref<1x49x8xf32, #tpu.memory_space<vmem>>, vector<1x7x8xf32>
    %303 = vector.shape_cast %302 : vector<1x7x8xf32> to vector<7x8xf32>
    %304 = vector.shape_cast %301 : vector<7x8xf32> to vector<1x7x8xf32>
    tpu.vector_store %arg7[%c0_127, %c42, %c0_128], %304 {strides = array<i32>} : memref<1x49x8xf32, #tpu.memory_space<vmem>>, vector<1x7x8xf32>,
    return
  }
  func.func @transform_0(%arg0: i32, %arg1: memref<8xi32, #tpu.memory_space<smem>>, %arg2: memref<56xi32, #tpu.memory_space<smem>>, %arg3: memref<56xi32, #tpu.memory_space<smem>>, %arg4: memref<56xi32, #tpu.memory_space<smem>>, %arg5: memref<56xi32, #tpu.memory_space<smem>>) -> (i32, i32, i32, i32) {
    %0 = arith.index_cast %arg0 : i32 to index
    %1 = memref.load %arg1[%0] : memref<8xi32, #tpu.memory_space<smem>>
    %c0_i32 = arith.constant 0 : i32
    %c0_i32_0 = arith.constant 0 : i32
    %c0_i32_1 = arith.constant 0 : i32
    %c0_i32_2 = arith.constant 0 : i32
    return %1, %c0_i32, %c0_i32_0, %c0_i32_1 : i32, i32, i32, i32
  }
  func.func @transform_1(%arg0: i32, %arg1: memref<8xi32, #tpu.memory_space<smem>>, %arg2: memref<56xi32, #tpu.memory_space<smem>>, %arg3: memref<56xi32, #tpu.memory_space<smem>>, %arg4: memref<56xi32, #tpu.memory_space<smem>>, %arg5: memref<56xi32, #tpu.memory_space<smem>>) -> (i32, i32, i32) {
    %c0_i32 = arith.constant 0 : i32
    %c0_i32_0 = arith.constant 0 : i32
    %c0_i32_1 = arith.constant 0 : i32
    return %arg0, %c0_i32, %c0_i32_0 : i32, i32, i32
  }
}

module attributes {stable_mosaic.version = 11 : i64} {
  func.func @_head_kernel(%arg0: i32, %arg1: i32, %arg2: memref<128x512xbf16, #tpu.memory_space<vmem>>, %arg3: memref<512x512xbf16, #tpu.memory_space<vmem>>, %arg4: memref<1x512xf32, #tpu.memory_space<vmem>>, %arg5: memref<512x128xbf16, #tpu.memory_space<vmem>>, %arg6: memref<1x128xf32, #tpu.memory_space<vmem>>, %arg7: memref<128x128xf32, #tpu.memory_space<vmem>>, %arg8: memref<128x512xf32, #tpu.memory_space<vmem>>, %arg9: memref<128x128xf32, #tpu.memory_space<vmem>>) attributes {dimension_semantics = [#tpu.dimension_semantics<arbitrary>, #tpu.dimension_semantics<arbitrary>], iteration_bounds = array<i64: 8, 1>, scalar_prefetch = 0 : i64, scratch_operands = 2 : i64, tpu.core_type = #tpu.core_type<tc>, window_params = [{transform_indices = @transform_0, window_bounds = array<i64: 128, 512>}, {transform_indices = @transform_1, window_bounds = array<i64: 512, 512>}, {transform_indices = @transform_2, window_bounds = array<i64: 1, 512>}, {transform_indices = @transform_3, window_bounds = array<i64: 512, 128>}, {pipeline_mode = #tpu.pipeline_mode<synchronous>, transform_indices = @transform_4, window_bounds = array<i64: 1, 128>}, {pipeline_mode = #tpu.pipeline_mode<synchronous>, transform_indices = @transform_5, window_bounds = array<i64: 128, 128>}]} {
    %c0_i32 = arith.constant 0 : i32
    %0 = arith.cmpi eq, %arg1, %c0_i32 : i32
    %1 = arith.extui %0 : i1 to i32
    %c0_i32_0 = arith.constant 0 : i32
    %2 = arith.cmpi ne, %1, %c0_i32_0 : i32
    scf.if %2 {
      %cst_15 = arith.constant 0.000000e+00 : f32
      %22 = vector.broadcast %cst_15 : f32 to vector<128x512xf32>
      %c0_16 = arith.constant 0 : index
      %c0_17 = arith.constant 0 : index
      %23 = vector.load %arg8[%c0_16, %c0_17] : memref<128x512xf32, #tpu.memory_space<vmem>>, vector<128x512xf32>
      tpu.vector_store %arg8[%c0_16, %c0_17], %22 {strides = array<i32>} : memref<128x512xf32, #tpu.memory_space<vmem>>, vector<128x512xf32>,
    } else {
    }
    %c0_i32_1 = arith.constant 0 : i32
    %3 = arith.cmpi eq, %arg0, %c0_i32_1 : i32
    %c0_i32_2 = arith.constant 0 : i32
    %4 = arith.cmpi eq, %arg1, %c0_i32_2 : i32
    %5 = arith.andi %3, %4 : i1
    %6 = arith.extui %5 : i1 to i32
    %c0_i32_3 = arith.constant 0 : i32
    %7 = arith.cmpi ne, %6, %c0_i32_3 : i32
    scf.if %7 {
      %cst_15 = arith.constant 0.000000e+00 : f32
      %22 = vector.broadcast %cst_15 : f32 to vector<128x128xf32>
      %c0_16 = arith.constant 0 : index
      %c0_17 = arith.constant 0 : index
      %23 = vector.load %arg9[%c0_16, %c0_17] : memref<128x128xf32, #tpu.memory_space<vmem>>, vector<128x128xf32>
      tpu.vector_store %arg9[%c0_16, %c0_17], %22 {strides = array<i32>} : memref<128x128xf32, #tpu.memory_space<vmem>>, vector<128x128xf32>,
    } else {
    }
    %c0 = arith.constant 0 : index
    %c0_4 = arith.constant 0 : index
    %8 = vector.load %arg8[%c0, %c0_4] : memref<128x512xf32, #tpu.memory_space<vmem>>, vector<128x512xf32>
    %c0_5 = arith.constant 0 : index
    %c0_6 = arith.constant 0 : index
    %9 = vector.load %arg2[%c0_5, %c0_6] : memref<128x512xbf16, #tpu.memory_space<vmem>>, vector<128x512xbf16>
    %c0_7 = arith.constant 0 : index
    %c0_8 = arith.constant 0 : index
    %10 = vector.load %arg3[%c0_7, %c0_8] : memref<512x512xbf16, #tpu.memory_space<vmem>>, vector<512x512xbf16>
    %cst = arith.constant dense<0.000000e+00> : vector<128x512xf32>
    %11 = tpu.matmul %9, %10, %cst {dimension_numbers = #tpu.dot_dimension_numbers<[1], [0], [0], [1], [0, 0, 1, 1], [], []>} : vector<128x512xbf16>, vector<512x512xbf16>, vector<128x512xf32> -> vector<128x512xf32>
    %12 = arith.addf %8, %11 : vector<128x512xf32>
    %c0_9 = arith.constant 0 : index
    %c0_10 = arith.constant 0 : index
    %13 = vector.load %arg8[%c0_9, %c0_10] : memref<128x512xf32, #tpu.memory_space<vmem>>, vector<128x512xf32>
    tpu.vector_store %arg8[%c0_9, %c0_10], %12 {strides = array<i32>} : memref<128x512xf32, #tpu.memory_space<vmem>>, vector<128x512xf32>,
    %c0_i32_11 = arith.constant 0 : i32
    %14 = arith.cmpi eq, %arg1, %c0_i32_11 : i32
    %15 = arith.extui %14 : i1 to i32
    %c0_i32_12 = arith.constant 0 : i32
    %16 = arith.cmpi ne, %15, %c0_i32_12 : i32
    scf.if %16 {
      %c0_15 = arith.constant 0 : index
      %c0_16 = arith.constant 0 : index
      %22 = vector.load %arg8[%c0_15, %c0_16] : memref<128x512xf32, #tpu.memory_space<vmem>>, vector<128x512xf32>
      %c0_17 = arith.constant 0 : index
      %c0_18 = arith.constant 0 : index
      %23 = vector.load %arg4[%c0_17, %c0_18] : memref<1x512xf32, #tpu.memory_space<vmem>>, vector<1x512xf32>
      %24 = vector.broadcast %23 : vector<1x512xf32> to vector<128x512xf32>
      %25 = arith.addf %22, %24 : vector<128x512xf32>
      %cst_19 = arith.constant 0.000000e+00 : f32
      %26 = vector.broadcast %cst_19 : f32 to vector<128x512xf32>
      %27 = arith.maximumf %25, %26 : vector<128x512xf32>
      %c0_20 = arith.constant 0 : index
      %c0_21 = arith.constant 0 : index
      %28 = vector.load %arg9[%c0_20, %c0_21] : memref<128x128xf32, #tpu.memory_space<vmem>>, vector<128x128xf32>
      %29 = arith.truncf %27 : vector<128x512xf32> to vector<128x512xbf16>
      %c0_22 = arith.constant 0 : index
      %c0_23 = arith.constant 0 : index
      %30 = vector.load %arg5[%c0_22, %c0_23] : memref<512x128xbf16, #tpu.memory_space<vmem>>, vector<512x128xbf16>
      %cst_24 = arith.constant dense<0.000000e+00> : vector<128x128xf32>
      %31 = tpu.matmul %29, %30, %cst_24 {dimension_numbers = #tpu.dot_dimension_numbers<[1], [0], [0], [1], [0, 0, 1, 1], [], []>} : vector<128x512xbf16>, vector<512x128xbf16>, vector<128x128xf32> -> vector<128x128xf32>
      %32 = arith.addf %28, %31 : vector<128x128xf32>
      %c0_25 = arith.constant 0 : index
      %c0_26 = arith.constant 0 : index
      %33 = vector.load %arg9[%c0_25, %c0_26] : memref<128x128xf32, #tpu.memory_space<vmem>>, vector<128x128xf32>
      tpu.vector_store %arg9[%c0_25, %c0_26], %32 {strides = array<i32>} : memref<128x128xf32, #tpu.memory_space<vmem>>, vector<128x128xf32>,
    } else {
    }
    %c0_i32_13 = arith.constant 0 : i32
    %17 = arith.cmpi eq, %arg1, %c0_i32_13 : i32
    %c7_i32 = arith.constant 7 : i32
    %18 = arith.cmpi eq, %arg0, %c7_i32 : i32
    %19 = arith.andi %17, %18 : i1
    %20 = arith.extui %19 : i1 to i32
    %c0_i32_14 = arith.constant 0 : i32
    %21 = arith.cmpi ne, %20, %c0_i32_14 : i32
    scf.if %21 {
      %c0_15 = arith.constant 0 : index
      %c0_16 = arith.constant 0 : index
      %22 = vector.load %arg9[%c0_15, %c0_16] : memref<128x128xf32, #tpu.memory_space<vmem>>, vector<128x128xf32>
      %c0_17 = arith.constant 0 : index
      %c0_18 = arith.constant 0 : index
      %23 = vector.load %arg6[%c0_17, %c0_18] : memref<1x128xf32, #tpu.memory_space<vmem>>, vector<1x128xf32>
      %24 = vector.broadcast %23 : vector<1x128xf32> to vector<128x128xf32>
      %25 = arith.addf %22, %24 : vector<128x128xf32>
      %c0_19 = arith.constant 0 : index
      %c0_20 = arith.constant 0 : index
      %26 = vector.load %arg7[%c0_19, %c0_20] : memref<128x128xf32, #tpu.memory_space<vmem>>, vector<128x128xf32>
      tpu.vector_store %arg7[%c0_19, %c0_20], %25 {strides = array<i32>} : memref<128x128xf32, #tpu.memory_space<vmem>>, vector<128x128xf32>,
    } else {
    }
    return
  }
  func.func @transform_0(%arg0: i32, %arg1: i32) -> (i32, i32) {
    %c0_i32 = arith.constant 0 : i32
    %c0_i32_0 = arith.constant 0 : i32
    return %c0_i32, %arg1 : i32, i32
  }
  func.func @transform_1(%arg0: i32, %arg1: i32) -> (i32, i32) {
    %c0_i32 = arith.constant 0 : i32
    return %arg1, %arg0 : i32, i32
  }
  func.func @transform_2(%arg0: i32, %arg1: i32) -> (i32, i32) {
    %c0_i32 = arith.constant 0 : i32
    %c0_i32_0 = arith.constant 0 : i32
    return %c0_i32, %arg0 : i32, i32
  }
  func.func @transform_3(%arg0: i32, %arg1: i32) -> (i32, i32) {
    %c0_i32 = arith.constant 0 : i32
    %c0_i32_0 = arith.constant 0 : i32
    return %arg0, %c0_i32 : i32, i32
  }
  func.func @transform_4(%arg0: i32, %arg1: i32) -> (i32, i32) {
    %c0_i32 = arith.constant 0 : i32
    %c0_i32_0 = arith.constant 0 : i32
    %c0_i32_1 = arith.constant 0 : i32
    return %c0_i32, %c0_i32_0 : i32, i32
  }
  func.func @transform_5(%arg0: i32, %arg1: i32) -> (i32, i32) {
    %c0_i32 = arith.constant 0 : i32
    %c0_i32_0 = arith.constant 0 : i32
    %c0_i32_1 = arith.constant 0 : i32
    return %c0_i32, %c0_i32_0 : i32, i32
  }
}

</mosaic_0001>

<bundles_post_ra>
// kernel: roi_header_forward.2
= control target key start
LH: loop header
LB: loop body
LE: loop exit
PB: predicated region body
PF: predicated region fallthrough
CT: control target
= control target key end

     0   :  { %s5723_s0 = inlined_call_operand.vmem [shape: s32[8], index: 0, kind: input, shape index: {}]   ;;  %s5724_s5 = inlined_call_operand.vmem [shape: f32[2,16,16,8], index: 5, kind: input, shape index: {}]   ;;  %s5725_s6 = inlined_call_operand.vmem [shape: f32[8,49,8], index: 6, kind: output, shape index: {}]   ;;  %s5726_s1 = inlined_call_operand.vmem [shape: s32[56], index: 1, kind: input, shape index: {}]   ;;  %s5727_s2 = inlined_call_operand.vmem [shape: s32[56], index: 2, kind: input, shape index: {}]   ;;  %s5728_s3 = inlined_call_operand.vmem [shape: s32[56], index: 3, kind: input, shape index: {}]   ;;  %s5729_s4 = inlined_call_operand.vmem [shape: s32[56], index: 4, kind: input, shape index: {}]  }
   0x1   :  { %s11_s23 = sshll.u32 %s5723_s0, 4  ;;  %s15_s26 = sshll.u32 %s5726_s1, 4  ;;  %s12_s23 = int_to_ptr.vmem [resolvable:$true] %s11_s23  ;;  %s16_s26 = int_to_ptr.vmem [resolvable:$true] %s15_s26 }
   0x2   :  { %s2419_s27 = scalar_lea.vmem %s12_s23, 16  ;;  %p2424_p1 = scmp.lt.s32.totalorder %s12_s23, %s12_s23 }
   0x3   :  { %p2420_p0 = scmp.ne.s32.totalorder %s12_s23, %s2419_s27  ;;  %p2425_p2 = scmp.lt.s32.totalorder %s2419_s27, %s2419_s27 }
   0x5   :  { %p2426_p3 = por %p2425_p2, %p2424_p1 }
   0x7   :  { %p2427_p4 = pnand %p2426_p3, %p2420_p0 }
   0x9   :  { %2430 = shalt.err (!%p2427_p4)  }
   0xa   :  { %s2489_s28 = smov [#allocation4]   ;;  %s2431_s29 = scalar_lea.vmem %s16_s26, 16 }
   0xb   :  { %14 = dma.vmem_to_smem %s12_s23, 16, %s2489_s28, [#allocation3] }
   0xc   :  { %p2432_p5 = scmp.ne.s32.totalorder %s16_s26, %s2431_s29  ;;  %p2436_p6 = scmp.lt.s32.totalorder %s16_s26, %s16_s26 }
   0xd   :  { %p2437_p7 = scmp.lt.s32.totalorder %s2431_s29, %s2431_s29 }
   0xf   :  { %p2438_p8 = por %p2437_p7, %p2436_p6 }
  0x11   :  { %p2439_p9 = pnand %p2438_p8, %p2432_p5 }
  0x13   :  { %2442 = shalt.err (!%p2439_p9)  }
  0x14   :  { %s2490_s0 = smov [#allocation5]   ;;  %s19_s7 = sshll.u32 %s5727_s2, 4  ;;  %s20_s7 = int_to_ptr.vmem [resolvable:$true] %s19_s7 }
  0x15   :  { %18 = dma.vmem_to_smem %s16_s26, 16, %s2490_s0, [#allocation3] }
  0x16   :  { %s23_s10 = sshll.u32 %s5728_s3, 4  ;;  %s2443_s11 = scalar_lea.vmem %s20_s7, 16  ;;  %s24_s10 = int_to_ptr.vmem [resolvable:$true] %s23_s10 }
  0x17   :  { %p2444_p10 = scmp.ne.s32.totalorder %s20_s7, %s2443_s11  ;;  %p2448_p11 = scmp.lt.s32.totalorder %s20_s7, %s20_s7 }
  0x18   :  { %p2449_p12 = scmp.lt.s32.totalorder %s2443_s11, %s2443_s11 }
  0x1a   :  { %p2450_p13 = por %p2449_p12, %p2448_p11 }
  0x1c   :  { %p2451_p0 = pnand %p2450_p13, %p2444_p10 }
  0x1e   :  { %2454 = shalt.err (!%p2451_p0)  }
  0x1f   :  { %s2491_s12 = smov [#allocation6]   ;;  %s2455_s13 = scalar_lea.vmem %s24_s10, 16 }
  0x20   :  { %22 = dma.vmem_to_smem %s20_s7, 16, %s2491_s12, [#allocation3] }
  0x21   :  { %p2456_p1 = scmp.ne.s32.totalorder %s24_s10, %s2455_s13  ;;  %p2460_p2 = scmp.lt.s32.totalorder %s24_s10, %s24_s10 }
  0x22   :  { %p2461_p3 = scmp.lt.s32.totalorder %s2455_s13, %s2455_s13 }
  0x24   :  { %p2462_p4 = por %p2461_p3, %p2460_p2 }
  0x26   :  { %p2463_p5 = pnand %p2462_p4, %p2456_p1 }
  0x28   :  { %2466 = shalt.err (!%p2463_p5)  }
  0x29   :  { %s2492_s2 = smov [#allocation7]   ;;  %s27_s15 = sshll.u32 %s5729_s4, 4  ;;  %s28_s15 = int_to_ptr.vmem [resolvable:$true] %s27_s15 }
  0x2a   :  { %26 = dma.vmem_to_smem %s24_s10, 16, %s2492_s2, [#allocation3] }
  0x2b   :  { %s2467_s16 = scalar_lea.vmem %s28_s15, 16  ;;  %p2472_p7 = scmp.lt.s32.totalorder %s28_s15, %s28_s15 }
  0x2c   :  { %p2468_p6 = scmp.ne.s32.totalorder %s28_s15, %s2467_s16  ;;  %p2473_p8 = scmp.lt.s32.totalorder %s2467_s16, %s2467_s16 }
  0x2e   :  { %p2474_p9 = por %p2473_p8, %p2472_p7 }
  0x30   :  { %p2475_p10 = pnand %p2474_p9, %p2468_p6 }
  0x32   :  { %2478 = shalt.err (!%p2475_p10)  }
  0x33   :  { %s2493_s17 = smov [#allocation8]  }
  0x34   :  { %30 = dma.vmem_to_smem %s28_s15, 16, %s2493_s17, [#allocation3] }
  0x35   :  { %2483 = dma.done.wait [#allocation3], 80 }
  0x36   :  { %2484 = vsyncadd [#allocation3], 4294967216 }
  0x37   :  { %32 = sfence }
  0x38   :  { %s2544_s18 = smov 0  }
  0x39 LB: > { %s2550_s4 = sadd.s32 4294967295, %s2487_s18   ;;  %p2366_p11 = scmp.ge.s32.totalorder %s2487_s18, 1  ;;  %s2487_s18 = sphi %s2544_s18, %s38_s18  }
  0x3a   : > { %p118_p12 = scmp.lt.s32.totalorder %s2487_s18, 9 }
  0x3c   : > { %p119_p13 = pnand %p2366_p11, %p118_p12 }
  0x3e   : > { %122 = sbr.rel (%p119_p13) target bundleno = 561 (0x231), region = 24 }
  0x45   : > { %s139_s19 = sld [smem:[#allocation4 + %s2550_s4]]  ;;  %s2556_s20 = smul.u32 7, %s2550_s4  ;;  %vm5730_vm2 = vcmask 64512  }
  0x46   : > { %p146_p1 = scmp.lt.s32.totalorder %s2550_s4, 7 }
  0x47   : > { %s184_s21 = sld [smem:[#allocation7 + %s2556_s20]]  ;;  %s2561_s23 = sadd.s32 1, %s2556_s20 }
  0x48   : > { %s185_s22 = sld [smem:[#allocation8 + %s2556_s20]]  ;;  %s3221_s0 = sadd.s32 2, %s2556_s20 }
  0x49   : > { %s366_s24 = sld [smem:[#allocation7 + %s2561_s23]]  ;;  %s3530_s7 = sadd.s32 3, %s2556_s20 }
  0x4a   : > { %s367_s25 = sld [smem:[#allocation8 + %s2561_s23]]  ;;  %s3831_s10 = sadd.s32 4, %s2556_s20 }
  0x4b   : > { %p140_p0 = scmp.lt.s32.totalorder %s139_s19, 1  ;;  %s3238_s1 = sld [smem:[#allocation7 + %s3221_s0]] }
  0x4c   : > { %s3255_s30 = sld [smem:[#allocation8 + %s3221_s0]]  ;;  %s4213_s13 = sadd.s32 5, %s2556_s20 }
  0x4d   : > { %s6520_s19 = smov (!%p140_p0, %s139_s19), 1  ;;  %v2565_v0 = vstv %s184_s21  ;;  %s3547_s8 = sld [smem:[#allocation7 + %s3530_s7]] }
  0x4e   : > { %s2372_s26 = sshll.u32 %s6520_s19, 8  ;;  %v2572_v1 = vstv %s185_s22  ;;  %vm187_vm0 = vcmp.le.s32.totalorder %v2565_v0, 0  ;;  %vm188_vm1 = vcmp.le.s32.totalorder %v2565_v0, 1  ;;  %vm189_vm3 = vcmp.le.s32.totalorder %v2565_v0, 2  ;;  %s3560_s9 = sld [smem:[#allocation8 + %s3530_s7]] }
  0x4f   : > { %s2570_s29 = scalar_lea.vmem %s5724_s5, %s2372_s26  ;;  %vm190_vm4 = vcmp.le.s32.totalorder %v2565_v0, 3  ;;  %vm204_vm10 = vcmp.gt.s32.totalorder %v2572_v1, 0  ;;  %vm205_vm12 = vcmp.gt.s32.totalorder %v2572_v1, 1  ;;  %v2595_v5 = vstv %s366_s24  ;;  %s3848_s11 = sld [smem:[#allocation7 + %s3831_s10]] }
  0x50   : > { %v2581_v2 = vld [vmem:[%s2570_s29] sm:$0xff]  ;;  %v2588_v3 = vld [vmem:[%s2570_s29 + $0x8] sm:$0xff]  ;;  %v2591_v4 = vld [vmem:[%s2570_s29 + $0x10] sm:$0xff]  ;;  %v2597_v6 = vstv %s367_s25  ;;  %vm206_vm14 = vcmp.gt.s32.totalorder %v2572_v1, 2  ;;  %vm207_vm15 = vcmp.gt.s32.totalorder %v2572_v1, 3  ;;  %vm211_vm7 = vcmp.gt.s32.totalorder %v2572_v1, 7 }
  0x51   : > { %v2600_v7 = vld [vmem:[%s2570_s29 + $0x18] sm:$0xff]  ;;  %v2603_v8 = vld [vmem:[%s2570_s29 + $0x20] sm:$0xff]  ;;  %v2611_v9 = vld [vmem:[%s2570_s29 + $0x28] sm:$0xff]  ;;  %vm213_vm5 = vcmp.gt.s32.totalorder %v2572_v1, 9  ;;  %vm199_vm9 = vcmp.le.s32.totalorder %v2565_v0, 12  ;;  %vm214_vm8 = vcmp.gt.s32.totalorder %v2572_v1, 10 }
  0x52   : > { %v2614_v10 = vld [vmem:[%s2570_s29 + $0x30] sm:$0xff]  ;;  %v2617_v11 = vld [vmem:[%s2570_s29 + $0x40] sm:$0xff]  ;;  %vm2628_vm11 = vmand %vm187_vm0, %vm204_vm10  ;;  %vm215_vm13 = vcmp.gt.s32.totalorder %v2572_v1, 11  ;;  %vm217_vm10 = vcmp.gt.s32.totalorder %v2572_v1, 13  ;;  %vm218_vm0 = vcmp.gt.s32.totalorder %v2572_v1, 14  ;;  %s3861_s12 = sld [smem:[#allocation8 + %s3831_s10]] }
  0x53   : > { %vm2639_vm6 = vmand %vm188_vm1, %vm205_vm12  ;;  %v268_v14 = vsel %vm2628_vm11, %v2581_v2, -1e+30  ;;  %v269_v15 = vsel %vm2628_vm11, %v2588_v3, -1e+30  ;;  %v2650_v16 = vld [vmem:[%s2570_s29 + $0x38] sm:$0xff]  ;;  %v2653_v17 = vld [vmem:[%s2570_s29 + $0x50] sm:$0xff] }
  0x54   : > { %vm216_vm1 = vcmp.gt.s32.totalorder %v2572_v1, 12  ;;  %vm2662_vm12 = vmand %vm189_vm3, %vm206_vm14  ;;  %v270_v19 = vsel %vm2639_vm6, %v2591_v4, -1e+30  ;;  %v301_v20 = vsel %vm5730_vm2, %v268_v14, -inf  ;;  %v271_v22 = vsel %vm2639_vm6, %v2600_v7, -1e+30 }
  0x55   : > { %vm2676_vm3 = vmand %vm190_vm4, %vm207_vm15  ;;  %v272_v23 = vsel %vm2662_vm12, %v2603_v8, -1e+30  ;;  %v302_v24 = vsel %vm5730_vm2, %v270_v19, -inf  ;;  %v2688_v25 = vld [vmem:[%s2570_s29 + $0x48] sm:$0xff]  ;;  %v2691_v26 = vld [vmem:[%s2570_s29 + $0x60] sm:$0xff]  ;;  %vm5775_vm15 = vcmp.gt.s32.totalorder %v2572_v1, 4 }
  0x56   : > { %vm5776_vm6 = vcmp.le.s32.totalorder %v2565_v0, 4  ;;  %v274_v28 = vsel %vm2676_vm3, %v2614_v10, -1e+30  ;;  %v303_v29 = vsel %vm5730_vm2, %v272_v23, -inf  ;;  %v2708_v30 = vsel %vm5730_vm2, %v269_v15, -inf  ;;  %v2711_v31 = vld [vmem:[%s2570_s29 + $0x58] sm:$0xff] }
  0x57   : > { %vm2699_vm11 = vmand %vm5776_vm6, %vm5775_vm15  ;;  %v2714_v32 = vld [vmem:[%s2570_s29 + $0x70] sm:$0xff]  ;;  %vm5779_vm15 = vcmp.gt.s32.totalorder %v2572_v1, 5  ;;  %vm5780_vm6 = vcmp.le.s32.totalorder %v2565_v0, 5  ;;  %v273_v34 = vsel %vm2662_vm12, %v2611_v9, -1e+30  ;;  %v304_v36 = vmax.f32 %v301_v20, %v303_v29  ;;  %v2732_v38 = vld [vmem:[%s2570_s29 + $0x68] sm:$0xff] }
  0x58   : > { %vm2720_vm4 = vmand %vm5780_vm6, %vm5779_vm15  ;;  %v276_v35 = vsel %vm2699_vm11, %v2617_v11, -1e+30  ;;  %v305_v37 = vsel %vm5730_vm2, %v274_v28, -inf  ;;  %v2735_v39 = vld [vmem:[%s2570_s29 + $0x80] sm:$0xff]  ;;  %vm5783_vm15 = vcmp.gt.s32.totalorder %v2572_v1, 6  ;;  %vm5784_vm6 = vcmp.le.s32.totalorder %v2565_v0, 6 }
  0x59   : > { %vm2741_vm14 = vmand %vm5784_vm6, %vm5783_vm15  ;;  %v278_v41 = vsel %vm2720_vm4, %v2653_v17, -1e+30  ;;  %v306_v42 = vmax.f32 %v302_v24, %v305_v37  ;;  %v307_v43 = vsel %vm5730_vm2, %v276_v35, -inf  ;;  %v2750_v44 = vsel %vm5730_vm2, %v271_v22, -inf  ;;  %v2753_v45 = vld [vmem:[%s2570_s29 + $0x78] sm:$0xff]  ;;  %v2756_v46 = vld [vmem:[%s2570_s29 + $0x90] sm:$0xff] }
  0x5a   : > { %vm5787_vm12 = vcmp.le.s32.totalorder %v2565_v0, 7  ;;  %v275_v48 = vsel %vm2676_vm3, %v2650_v16, -1e+30  ;;  %v280_v49 = vsel %vm2741_vm14, %v2691_v26, -1e+30  ;;  %v308_v50 = vmax.f32 %v304_v36, %v307_v43  ;;  %v2774_v52 = vld [vmem:[%s2570_s29 + $0x88] sm:$0xff] }
  0x5b   : > { %vm2762_vm15 = vmand %vm5787_vm12, %vm211_vm7  ;;  %v309_v51 = vsel %vm5730_vm2, %v278_v41, -inf  ;;  %v2777_v53 = vld [vmem:[%s2570_s29 + $0xa0] sm:$0xff]  ;;  %vm5791_vm7 = vcmp.gt.s32.totalorder %v2572_v1, 8  ;;  %vm5792_vm6 = vcmp.le.s32.totalorder %v2565_v0, 8  ;;  %v311_v57 = vsel %vm5730_vm2, %v280_v49, -inf  ;;  %v2795_v59 = vld [vmem:[%s2570_s29 + $0x98] sm:$0xff] }
  0x5c   : > { %5790 = vst [vmem:[#allocation10_spill] sm:$0xff] %v2777_v53  ;;  %vm2783_vm12 = vmand %vm5792_vm6, %vm5791_vm7  ;;  %v282_v55 = vsel %vm2762_vm15, %v2714_v32, -1e+30  ;;  %v310_v56 = vmax.f32 %v306_v42, %v309_v51  ;;  %v2792_v58 = vsel %vm5730_vm2, %v273_v34, -inf  ;;  %v2798_v60 = vld [vmem:[%s2570_s29 + $0xb0] sm:$0xff]  ;;  %vm5796_vm7 = vcmp.le.s32.totalorder %v2565_v0, 9 }
  0x5d   : > { %5795 = vst [vmem:[#allocation11_spill] sm:$0xff] %v2798_v60  ;;  %vm2804_vm6 = vmand %vm5796_vm7, %vm213_vm5  ;;  %v277_v62 = vsel %vm2699_vm11, %v2688_v25, -1e+30  ;;  %v284_v63 = vsel %vm2783_vm12, %v2735_v39, -1e+30  ;;  %v312_v12 = vmax.f32 %v308_v50, %v311_v57  ;;  %v313_v13 = vsel %vm5730_vm2, %v282_v55, -inf }
  0x5e   : > { %v2816_v14 = vld [vmem:[%s2570_s29 + $0xa8] sm:$0xff]  ;;  %v2819_v15 = vld [vmem:[%s2570_s29 + $0xc0] sm:$0xff]  ;;  %vm5800_vm5 = vcmp.le.s32.totalorder %v2565_v0, 10  ;;  %v279_v19 = vsel %vm2720_vm4, %v2711_v31, -1e+30  ;;  %v314_v22 = vmax.f32 %v310_v56, %v313_v13  ;;  %v315_v23 = vsel %vm5730_vm2, %v284_v63, -inf }
  0x5f   : > { %5799 = vst [vmem:[#allocation12_spill] sm:$0xff] %v2819_v15  ;;  %vm2825_vm7 = vmand %vm5800_vm5, %vm214_vm8  ;;  %v286_v20 = vsel %vm2804_vm6, %v2756_v46, -1e+30  ;;  %v2837_v24 = vld [vmem:[%s2570_s29 + $0xb8] sm:$0xff]  ;;  %v2840_v27 = vld [vmem:[%s2570_s29 + $0xd0] sm:$0xff]  ;;  %vm5805_vm8 = vcmp.le.s32.totalorder %v2565_v0, 11  ;;  %v316_v34 = vmax.f32 %v312_v12, %v315_v23  ;;  %v335_v28 = vmax.f32 %v2708_v30, %v2792_v58 }
  0x60   : > { %5803 = vst [vmem:[#allocation13_spill] sm:$0xff] %v2837_v24  ;;  %5804 = vst [vmem:[#allocation14_spill] sm:$0xff] %v2840_v27  ;;  %v281_v29 = vsel %vm2741_vm14, %v2732_v38, -1e+30  ;;  %v288_v33 = vsel %vm2825_vm7, %v2777_v53, -1e+30 }
  0x61   : > { %vm2846_vm11 = vmand %vm5805_vm8, %vm215_vm13  ;;  %v317_v35 = vsel %vm5730_vm2, %v286_v20, -inf  ;;  %v2858_v36 = vld [vmem:[%s2570_s29 + $0xe0] sm:$0xff]  ;;  %v283_v40 = vsel %vm2762_vm15, %v2753_v45, -1e+30  ;;  %v319_v43 = vsel %vm5730_vm2, %v288_v33, -inf  ;;  %v2876_v49 = vld [vmem:[%s2570_s29 + $0xf0] sm:$0xff] }
  0x62   : > { %5808 = vst [vmem:[#allocation15_spill] sm:$0xff] %v2858_v36  ;;  %vm2864_vm13 = vmand %vm199_vm9, %vm216_vm1  ;;  %v290_v41 = vsel %vm2846_vm11, %v2798_v60, -1e+30  ;;  %v318_v42 = vmax.f32 %v314_v22, %v317_v35  ;;  %vm5812_vm9 = vcmp.le.s32.totalorder %v2565_v0, 13  ;;  %v285_v47 = vsel %vm2783_vm12, %v2774_v52, -1e+30 }
  0x63   : > { %5811 = vst [vmem:[#allocation16_spill] sm:$0xff] %v2876_v49  ;;  %vm2882_vm1 = vmand %vm5812_vm9, %vm217_vm10  ;;  %v292_v51 = vsel %vm2864_vm13, %v2819_v15, -1e+30  ;;  %v320_v55 = vmax.f32 %v316_v34, %v319_v43  ;;  %v321_v56 = vsel %vm5730_vm2, %v290_v41, -inf  ;;  %vm5815_vm4 = vcmp.le.s32.totalorder %v2565_v0, 14  ;;  %v2937_v41 = vld [vmem:[%s2570_s29 + $0xd8] sm:$0xff] }
  0x64   : > { %vm2897_vm10 = vmand %vm5815_vm4, %vm218_vm0  ;;  %v287_v54 = vsel %vm2804_vm6, %v2795_v59, -1e+30  ;;  %v294_v63 = vsel %vm2882_vm1, %v2840_v27, -1e+30  ;;  %v322_v12 = vmax.f32 %v318_v42, %v321_v56  ;;  %v323_v13 = vsel %vm5730_vm2, %v292_v51, -inf  ;;  %v2956_v30 = vld [vmem:[%s2570_s29 + $0xf8] sm:$0xff] }
  0x65   : > { %vm369_vm14 = vcmp.le.s32.totalorder %v2595_v5, 0  ;;  %vm5818_vm15 = vcmp.gt.s32.totalorder %v2572_v1, 15  ;;  %vm5819_vm0 = vcmp.le.s32.totalorder %v2565_v0, 15  ;;  %v289_v61 = vsel %vm2825_vm7, %v2816_v14, -1e+30  ;;  %v2926_v1 = vld [vmem:[%s2570_s29 + $0xc8] sm:$0xff] }
  0x66   : > { %vm2913_vm12 = vmand %vm5819_vm0, %vm5818_vm15  ;;  %v296_v22 = vsel %vm2897_vm10, %v2858_v36, -1e+30  ;;  %v324_v23 = vmax.f32 %v320_v55, %v323_v13  ;;  %v325_v33 = vsel %vm5730_vm2, %v294_v63, -inf  ;;  %vm370_vm6 = vcmp.le.s32.totalorder %v2595_v5, 1  ;;  %5822 = vst [vmem:[#allocation17_spill] sm:$0xff] %v2926_v1  ;;  %v2953_v13 = vld [vmem:[%s2570_s29 + $0xe8] sm:$0xff] }
  0x67   : > { %v291_v0 = vsel %vm2846_vm11, %v2837_v24, -1e+30  ;;  %v298_v18 = vsel %vm2913_vm12, %v2876_v49, -1e+30  ;;  %v326_v34 = vmax.f32 %v322_v12, %v325_v33  ;;  %v327_v35 = vsel %vm5730_vm2, %v296_v22, -inf  ;;  %s4236_s2 = sld [smem:[#allocation7 + %s4213_s13]] }
  0x68   : > { %vm371_vm5 = vcmp.le.s32.totalorder %v2595_v5, 2  ;;  %v328_v42 = vmax.f32 %v324_v23, %v327_v35  ;;  %v329_v43 = vsel %vm5730_vm2, %v298_v18, -inf  ;;  %v336_v51 = vsel %vm5730_vm2, %v275_v48, -inf  ;;  %s4261_s3 = sld [smem:[#allocation8 + %s4213_s13]]  ;;  %s4334_s14 = sadd.s32 6, %s2556_s20 }
  0x69   : > { %vm372_vm7 = vcmp.le.s32.totalorder %v2595_v5, 3  ;;  %v330_v55 = vmax.f32 %v326_v34, %v329_v43  ;;  %v337_v56 = vmax.f32 %v2750_v44, %v336_v51  ;;  %v338_v63 = vsel %vm5730_vm2, %v277_v62, -inf  ;;  %s4351_s15 = sld [smem:[#allocation7 + %s4334_s14]]  ;;  %s6522_s4 = smov (!%p146_p1, %s2550_s4), 7 }
  0x6a   : > { %v340_v12 = vsel %vm5730_vm2, %v279_v19, -inf  ;;  %vm373_vm8 = vcmp.le.s32.totalorder %v2595_v5, 4  ;;  %v293_v21 = vsel %vm2864_vm13, %v2926_v1, -1e+30  ;;  %v339_v48 = vmax.f32 %v335_v28, %v338_v63  ;;  %s4364_s16 = sld [smem:[#allocation8 + %s4334_s14]] }
  0x6b   : > { %v342_v58 = vsel %vm5730_vm2, %v281_v29, -inf  ;;  %v344_v22 = vsel %vm5730_vm2, %v283_v40, -inf  ;;  %v295_v44 = vsel %vm2882_vm1, %v2937_v41, -1e+30  ;;  %v331_v62 = vmax.f32 %v328_v42, %v330_v55  ;;  %s4598_s17 = sld [smem:[#allocation5 + %s2556_s20]] }
  0x6c   : > { %v341_v19 = vmax.f32 %v337_v56, %v340_v12  ;;  %v346_v23 = vsel %vm5730_vm2, %v285_v47, -inf  ;;  %v343_v33 = vmax.f32 %v339_v48, %v342_v58  ;;  %v348_v18 = vsel %vm5730_vm2, %v287_v54, -inf  ;;  %s4603_s19 = sld [smem:[#allocation6 + %s2556_s20]] }
  0x6d   : > { %v297_v29 = vsel %vm2897_vm10, %v2953_v13, -1e+30  ;;  %v299_v37 = vsel %vm2913_vm12, %v2956_v30, -1e+30  ;;  %v350_v50 = vsel %vm5730_vm2, %v289_v61, -inf  ;;  %363 = vst.msk [vmem:[#allocation2] sm:$0xff] %vm5730_vm2, %v331_v62 }
  0x6e   : > { %v345_v40 = vmax.f32 %v341_v19, %v344_v22  ;;  %v347_v47 = vmax.f32 %v343_v33, %v346_v23  ;;  %v352_v54 = vsel %vm5730_vm2, %v291_v0, -inf  ;;  %v354_v34 = vsel %vm5730_vm2, %v293_v21, -inf  ;;  %s4622_s20 = sld [smem:[#allocation5 + %s2561_s23]] }
  0x6f   : > { %v356_v35 = vsel %vm5730_vm2, %v295_v44, -inf  ;;  %vm386_vm10 = vcmp.gt.s32.totalorder %v2597_v6, 0  ;;  %vm387_vm15 = vcmp.gt.s32.totalorder %v2597_v6, 1  ;;  %vm388_vm0 = vcmp.gt.s32.totalorder %v2597_v6, 2  ;;  %s4661_s21 = sld [smem:[#allocation6 + %s2561_s23]] }
  0x70   : > { %v349_v57 = vmax.f32 %v345_v40, %v348_v18  ;;  %v351_v20 = vmax.f32 %v347_v47, %v350_v50  ;;  %v358_v61 = vsel %vm5730_vm2, %v297_v29, -inf  ;;  %v360_v0 = vsel %vm5730_vm2, %v299_v37, -inf  ;;  %vm2994_vm1 = vmand %vm369_vm14, %vm386_vm10  ;;  %s4668_s22 = sld [smem:[#allocation5 + %s3221_s0]] }
  0x71   : > { %vm389_vm9 = vcmp.gt.s32.totalorder %v2597_v6, 3  ;;  %vm390_vm13 = vcmp.gt.s32.totalorder %v2597_v6, 4  ;;  %vm391_vm11 = vcmp.gt.s32.totalorder %v2597_v6, 5  ;;  %vm3003_vm2 = vmand %vm370_vm6, %vm387_vm15  ;;  %vm393_vm10 = vcmp.gt.s32.totalorder %v2597_v6, 7  ;;  %s4679_s23 = sld [smem:[#allocation6 + %s3221_s0]] }
  0x72   : > { %v353_v43 = vmax.f32 %v349_v57, %v352_v54  ;;  %v355_v51 = vmax.f32 %v351_v20, %v354_v34  ;;  %vm3015_vm4 = vmand %vm371_vm5, %vm388_vm0  ;;  %vm396_vm12 = vcmp.gt.s32.totalorder %v2597_v6, 10  ;;  %vm398_vm0 = vcmp.gt.s32.totalorder %v2597_v6, 12  ;;  %s4692_s24 = sld [smem:[#allocation5 + %s3530_s7]] }
  0x73   : > { %vm3027_vm3 = vmand %vm372_vm7, %vm389_vm9  ;;  %vm399_vm6 = vcmp.gt.s32.totalorder %v2597_v6, 13  ;;  %vm400_vm15 = vcmp.gt.s32.totalorder %v2597_v6, 14  ;;  %vm5833_vm9 = vcmp.le.s32.totalorder %v2595_v5, 5  ;;  %v450_v22 = vsel %vm2994_vm1, %v2581_v2, -1e+30  ;;  %s4704_s25 = sld [smem:[#allocation6 + %s3530_s7]] }
  0x74   : > { %v357_v56 = vmax.f32 %v353_v43, %v356_v35  ;;  %v359_v12 = vmax.f32 %v355_v51, %v358_v61  ;;  %vm3039_vm14 = vmand %vm373_vm8, %vm390_vm13  ;;  %vm5836_vm8 = vcmp.gt.s32.totalorder %v2597_v6, 6  ;;  %vm5837_vm13 = vcmp.le.s32.totalorder %v2595_v5, 6  ;;  %s4939_s26 = sld [smem:[#allocation5 + %s3831_s10]] }
  0x75   : > { %vm3048_vm5 = vmand %vm5833_vm9, %vm391_vm11  ;;  %v452_v19 = vsel %vm3003_vm2, %v2591_v4, -1e+30  ;;  %v454_v33 = vsel %vm3015_vm4, %v2603_v8, -1e+30  ;;  %vm5840_vm11 = vcmp.le.s32.totalorder %v2595_v5, 7  ;;  %s4942_s27 = sld [smem:[#allocation6 + %s3831_s10]] }
  0x76   : > { %v361_v48 = vmax.f32 %v357_v56, %v360_v0  ;;  %vm3062_vm7 = vmand %vm5837_vm13, %vm5836_vm8  ;;  %v455_v37 = vsel %vm3015_vm4, %v2611_v9, -1e+30  ;;  %v456_v40 = vsel %vm3027_vm3, %v2614_v10, -1e+30  ;;  %v457_v50 = vsel %vm3027_vm3, %v2650_v16, -1e+30 }
  0x77   : > { %vm3079_vm9 = vmand %vm5840_vm11, %vm393_vm10  ;;  %vm5843_vm8 = vcmp.gt.s32.totalorder %v2597_v6, 8  ;;  %vm5844_vm13 = vcmp.le.s32.totalorder %v2595_v5, 8  ;;  %v458_v54 = vsel %vm3039_vm14, %v2617_v11, -1e+30  ;;  %v460_v35 = vsel %vm3048_vm5, %v2653_v17, -1e+30 }
  0x78   : > { %v362_v18 = vmax.f32 %v359_v12, %v361_v48  ;;  %vm3096_vm10 = vmand %vm5844_vm13, %vm5843_vm8  ;;  %vm5847_vm3 = vcmask 64512   ;;  %vm5848_vm4 = vcmp.gt.s32.totalorder %v2597_v6, 9  ;;  %vm5849_vm11 = vcmp.le.s32.totalorder %v2595_v5, 9  ;;  %s4953_s28 = sld [smem:[#allocation5 + %s4213_s13]] }
  0x79   : > { %vm3114_vm8 = vmand %vm5849_vm11, %vm5848_vm4  ;;  %v461_v20 = vsel %vm3048_vm5, %v2711_v31, -1e+30  ;;  %v462_v61 = vsel %vm3062_vm7, %v2691_v26, -1e+30  ;;  %v463_v0 = vsel %vm3062_vm7, %v2732_v38, -1e+30 }
  0x7a   : > { %364 = vst.msk [vmem:[#allocation2 + $0x8] sm:$0xff] %vm5847_vm3, %v362_v18  ;;  %vm5852_vm13 = vcmp.le.s32.totalorder %v2595_v5, 10  ;;  %v464_v51 = vsel %vm3079_vm9, %v2714_v32, -1e+30  ;;  %v465_v55 = vsel %vm3079_vm9, %v2753_v45, -1e+30 }
  0x7b   : > { %vm3131_vm3 = vmand %vm5852_vm13, %vm396_vm12  ;;  %v466_v56 = vsel %vm3096_vm10, %v2735_v39, -1e+30  ;;  %vm5855_vm5 = vcmp.gt.s32.totalorder %v2597_v6, 11  ;;  %vm5856_vm7 = vcmp.le.s32.totalorder %v2595_v5, 11  ;;  %v467_v12 = vsel %vm3096_vm10, %v2774_v52, -1e+30 }
  0x7c   : > { %vm3148_vm12 = vmand %vm5856_vm7, %vm5855_vm5  ;;  %v468_v48 = vsel %vm3114_vm8, %v2756_v46, -1e+30  ;;  %vm5859_vm9 = vcmask 64512   ;;  %vm5861_vm11 = vcmp.le.s32.totalorder %v2595_v5, 12  ;;  %v469_v29 = vsel %vm3114_vm8, %v2795_v59, -1e+30 }
  0x7d   : > { %v482_v58 = vsel %vm5859_vm9, %v450_v22, -inf  ;;  %vm5860_vm4 = vmmov %vm5859_vm9  ;;  %v470_v47 = vsel %vm3131_vm3, %v2777_v53, -1e+30  ;;  %vm5866_vm7 = vcmp.le.s32.totalorder %v2595_v5, 13  ;;  %v471_v57 = vsel %vm3131_vm3, %v2816_v14, -1e+30 }
  0x7e   : > { %v483_v62 = vsel %vm5860_vm4, %v452_v19, -inf  ;;  %vm3164_vm13 = vmand %vm5861_vm11, %vm398_vm0  ;;  %v472_v23 = vsel %vm3148_vm12, %v2798_v60, -1e+30  ;;  %vm5869_vm8 = vcmp.le.s32.totalorder %v2595_v5, 14  ;;  %v473_v53 = vsel %vm3148_vm12, %v2837_v24, -1e+30 }
  0x7f   : > { %vm5864_vm10 = vmmov %vm5860_vm4  ;;  %v474_v43 = vsel %vm3164_vm13, %v2819_v15, -1e+30  ;;  %vm5875_vm11 = vcmp.le.s32.totalorder %v2595_v5, 15  ;;  %v475_v63 = vsel %vm3164_vm13, %v2926_v1, -1e+30  ;;  %s5531_s7 = sld [smem:[#allocation5 + %s4334_s14]] }
  0x80   : > { %v484_v22 = vsel %vm5864_vm10, %v454_v33, -inf  ;;  %vm5865_vm5 = vmmov %vm5860_vm4 }
  0x81   : > { %v486_v19 = vsel %vm5865_vm5, %v456_v40, -inf  ;;  %vm3180_vm0 = vmand %vm5866_vm7, %vm399_vm6  ;;  %v485_v33 = vmax.f32 %v482_v58, %v484_v22 }
  0x82   : > { %v487_v44 = vmax.f32 %v483_v62, %v486_v19  ;;  %vm3194_vm9 = vmand %vm5869_vm8, %vm400_vm15  ;;  %v476_v22 = vsel %vm3180_vm0, %v2840_v27, -1e+30 }
  0x83   : > { %vm5872_vm6 = vmmov %vm5860_vm4  ;;  %v478_v5 = vsel %vm3194_vm9, %v2858_v36, -1e+30  ;;  %v479_v21 = vsel %vm3194_vm9, %v2953_v13, -1e+30 }
  0x84   : > { %v488_v60 = vsel %vm5872_vm6, %v458_v54, -inf  ;;  %vm5873_vm3 = vmmov %vm5860_vm4  ;;  %vm5874_vm4 = vcmp.gt.s32.totalorder %v2597_v6, 15 }
  0x85   : > { %v490_v58 = vsel %vm5873_vm3, %v460_v35, -inf  ;;  %vm3210_vm15 = vmand %vm5875_vm11, %vm5874_vm4  ;;  %v489_v19 = vmax.f32 %v485_v33, %v488_v60  ;;  %v506_v27 = vsel %vm5873_vm3, %v476_v22, -inf }
  0x86   : > { %v491_v54 = vmax.f32 %v487_v44, %v490_v58  ;;  %v480_v6 = vsel %vm3210_vm15, %v2876_v49, -1e+30  ;;  %vm5878_vm12 = vmmov %vm5873_vm3 }
  0x87   : > { %v492_v35 = vsel %vm5878_vm12, %v462_v61, -inf  ;;  %vm5879_vm13 = vmmov %vm5873_vm3 }
  0x88   : > { %v494_v18 = vsel %vm5879_vm13, %v464_v51, -inf  ;;  %v493_v1 = vmax.f32 %v489_v19, %v492_v35  ;;  %vm5880_vm10 = vmmov %vm5873_vm3 }
  0x89   : > { %v495_v15 = vmax.f32 %v491_v54, %v494_v18  ;;  %v496_v60 = vsel %vm5880_vm10, %v466_v56, -inf  ;;  %vm5881_vm5 = vmmov %vm5873_vm3  ;;  %v5887_v56 = vsel %vm2994_vm1, %v2588_v3, -1e+30 }
  0x8a   : > { %v498_v44 = vsel %vm5881_vm5, %v468_v48, -inf  ;;  %vm5882_vm7 = vmmov %vm5873_vm3  ;;  %v497_v61 = vmax.f32 %v493_v1, %v496_v60 }
  0x8b   : > { %v500_v33 = vsel %vm5882_vm7, %v470_v47, -inf  ;;  %vm5883_vm8 = vmmov %vm5873_vm3  ;;  %v499_v49 = vmax.f32 %v495_v15, %v498_v44 }
  0x8c   : > { %v502_v58 = vsel %vm5883_vm8, %v472_v23, -inf  ;;  %vm5884_vm6 = vmmov %vm5873_vm3  ;;  %v5889_v23 = vsel %vm3003_vm2, %v2600_v7, -1e+30  ;;  %v501_v1 = vmax.f32 %v497_v61, %v500_v33 }
  0x8d   : > { %v504_v36 = vsel %vm5884_vm6, %v474_v43, -inf  ;;  %vm5885_vm4 = vmmov %vm5873_vm3  ;;  %v503_v22 = vmax.f32 %v499_v49, %v502_v58  ;;  %v477_v49 = vsel %vm3180_vm0, %v2937_v41, -1e+30 }
  0x8e   : > { %v508_v51 = vsel %vm5885_vm4, %v478_v5, -inf  ;;  %vm5886_vm11 = vmmov %vm5873_vm3  ;;  %v5893_v5 = vsel %vm3039_vm14, %v2688_v25, -1e+30 }
  0x8f   : > { %v510_v19 = vsel %vm5886_vm11, %v480_v6, -inf  ;;  %vm5888_vm12 = vmmov %vm5873_vm3  ;;  %v507_v18 = vmax.f32 %v503_v22, %v506_v27  ;;  %v481_v27 = vsel %vm3210_vm15, %v2956_v30, -1e+30 }
  0x90   : > { %v513_v48 = vsel %vm5888_vm12, %v5887_v56, -inf  ;;  %vm5890_vm13 = vmmov %vm5873_vm3  ;;  %v3279_v56 = vstv %s3238_s1 }
  0x91   : > { %v514_v47 = vsel %vm5890_vm13, %v5889_v23, -inf  ;;  %vm5891_vm10 = vmmov %vm5873_vm3  ;;  %vm551_vm13 = vcmp.le.s32.totalorder %v3279_v56, 0 }
  0x92   : > { %v515_v43 = vsel %vm5891_vm10, %v455_v37, -inf  ;;  %vm5892_vm5 = vmmov %vm5873_vm3  ;;  %vm552_vm10 = vcmp.le.s32.totalorder %v3279_v56, 1 }
  0x93   : > { %v517_v15 = vsel %vm5892_vm5, %v457_v50, -inf  ;;  %v516_v54 = vmax.f32 %v513_v48, %v515_v43  ;;  %vm5894_vm1 = vmmov %vm5873_vm3  ;;  %v505_v50 = vmax.f32 %v501_v1, %v504_v36  ;;  %vm553_vm5 = vcmp.le.s32.totalorder %v3279_v56, 2 }
  0x94   : > { %v518_v42 = vmax.f32 %v514_v47, %v517_v15  ;;  %v519_v28 = vsel %vm5894_vm1, %v5893_v5, -inf  ;;  %vm5895_vm7 = vmmov %vm5894_vm1 }
  0x95   : > { %v521_v6 = vsel %vm5895_vm7, %v461_v20, -inf  ;;  %vm5896_vm2 = vmmov %vm5894_vm1  ;;  %v520_v60 = vmax.f32 %v516_v54, %v519_v28  ;;  %vm555_vm7 = vcmp.le.s32.totalorder %v3279_v56, 4 }
  0x96   : > { %v523_v35 = vsel %vm5896_vm2, %v463_v0, -inf  ;;  %vm5897_vm8 = vmmov %vm5894_vm1  ;;  %v522_v44 = vmax.f32 %v518_v42, %v521_v6  ;;  %v509_v0 = vmax.f32 %v505_v50, %v508_v51  ;;  %v5954_v6 = vld [vmem:[#allocation11_spill] sm:$0xff] }
  0x97   : > { %v525_v37 = vsel %vm5897_vm8, %v465_v55, -inf  ;;  %vm5898_vm14 = vmmov %vm5894_vm1  ;;  %v511_v55 = vmax.f32 %v507_v18, %v510_v19  ;;  %v524_v58 = vmax.f32 %v520_v60, %v523_v35  ;;  %v3285_v19 = vstv %s3255_s30  ;;  %s5429_s30 = sld [smem:[#allocation6 + %s4213_s13]] }
  0x98   : > { %v527_v33 = vsel %vm5898_vm14, %v467_v12, -inf  ;;  %vm5899_vm6 = vmmov %vm5894_vm1  ;;  %v526_v36 = vmax.f32 %v522_v44, %v525_v37  ;;  %vm573_vm8 = vcmp.gt.s32.totalorder %v3285_v19, 5 }
  0x99   : > { %v529_v20 = vsel %vm5899_vm6, %v469_v29, -inf  ;;  %vm5900_vm3 = vmmov %vm5894_vm1  ;;  %v512_v40 = vmax.f32 %v509_v0, %v511_v55  ;;  %v528_v48 = vmax.f32 %v524_v58, %v527_v33  ;;  %vm572_vm6 = vcmp.gt.s32.totalorder %v3285_v19, 4 }
  0x9a   : > { %v531_v34 = vsel %vm5900_vm3, %v471_v57, -inf  ;;  %vm5901_vm0 = vmmov %vm5894_vm1  ;;  %v530_v12 = vmax.f32 %v526_v36, %v529_v20  ;;  %vm554_vm1 = vcmp.le.s32.totalorder %v3279_v56, 3  ;;  %vm571_vm3 = vcmp.gt.s32.totalorder %v3285_v19, 3 }
  0x9b   : > { %v533_v61 = vsel %vm5901_vm0, %v473_v53, -inf  ;;  %vm5902_vm9 = vmmov %vm5901_vm0  ;;  %v532_v47 = vmax.f32 %v528_v48, %v531_v34 }
  0x9c   : > { %v535_v23 = vsel %vm5902_vm9, %v475_v63, -inf  ;;  %vm5903_vm4 = vmmov %vm5901_vm0  ;;  %v534_v62 = vmax.f32 %v530_v12, %v533_v61  ;;  %vm569_vm9 = vcmp.gt.s32.totalorder %v3285_v19, 1 }
  0x9d   : > { %v537_v29 = vsel %vm5903_vm4, %v477_v49, -inf  ;;  %vm5904_vm11 = vmmov %vm5901_vm0  ;;  %v536_v53 = vmax.f32 %v532_v47, %v535_v23  ;;  %vm570_vm4 = vcmp.gt.s32.totalorder %v3285_v19, 2 }
  0x9e   : > { %v539_v51 = vsel %vm5904_vm11, %v479_v21, -inf  ;;  %vm5905_vm15 = vmmov %vm5901_vm0  ;;  %v538_v57 = vmax.f32 %v534_v62, %v537_v29 }
  0x9f   : > { %v541_v43 = vsel %vm5905_vm15, %v481_v27, -inf  ;;  %vm5906_vm12 = vmmov %vm5901_vm0  ;;  %vm568_vm0 = vcmp.gt.s32.totalorder %v3285_v19, 0  ;;  %v540_v63 = vmax.f32 %v536_v53, %v539_v51  ;;  %vm578_vm15 = vcmp.gt.s32.totalorder %v3285_v19, 10 }
  0xa0   : > { %545 = vst.msk [vmem:[#allocation2 + $0x10] sm:$0xff] %vm5906_vm12, %v512_v40  ;;  %v542_v15 = vmax.f32 %v538_v57, %v541_v43  ;;  %vm3304_vm11 = vmand %vm551_vm13, %vm568_vm0  ;;  %vm577_vm13 = vcmp.gt.s32.totalorder %v3285_v19, 9 }
  0xa1   : > { %vm3314_vm14 = vmand %vm552_vm10, %vm569_vm9  ;;  %vm580_vm9 = vcmp.gt.s32.totalorder %v3285_v19, 12  ;;  %v632_v35 = vsel %vm3304_vm11, %v2581_v2, -1e+30 }
  0xa2   : > { %v543_v54 = vmax.f32 %v540_v63, %v542_v15  ;;  %vm3323_vm12 = vmand %vm553_vm5, %vm570_vm4  ;;  %vm5918_vm4 = vcmp.le.s32.totalorder %v3279_v56, 5  ;;  %v634_v18 = vsel %vm3314_vm14, %v2591_v4, -1e+30  ;;  %v635_v60 = vsel %vm3314_vm14, %v2600_v7, -1e+30  ;;  %v5948_v15 = vld [vmem:[#allocation10_spill] sm:$0xff] }
  0xa3   : > { %vm3334_vm0 = vmand %vm554_vm1, %vm571_vm3  ;;  %vm582_vm3 = vcmp.gt.s32.totalorder %v3285_v19, 14  ;;  %v636_v44 = vsel %vm3323_vm12, %v2603_v8, -1e+30  ;;  %v637_v21 = vsel %vm3323_vm12, %v2611_v9, -1e+30  ;;  %vm5929_vm14 = vcmp.gt.s32.totalorder %v3285_v19, 8 }
  0xa4   : > { %vm5915_vm5 = vmmov %vm5896_vm2  ;;  %vm581_vm2 = vcmp.gt.s32.totalorder %v3285_v19, 13  ;;  %v638_v33 = vsel %vm3334_vm0, %v2614_v10, -1e+30  ;;  %v639_v20 = vsel %vm3334_vm0, %v2650_v16, -1e+30  ;;  %vm5933_vm12 = vcmp.le.s32.totalorder %v3279_v56, 9 }
  0xa5   : > { %546 = vst.msk [vmem:[#allocation2 + $0x18] sm:$0xff] %vm5915_vm5, %v543_v54  ;;  %vm3348_vm1 = vmand %vm555_vm7, %vm572_vm6  ;;  %vm5921_vm7 = vcmp.gt.s32.totalorder %v3285_v19, 6  ;;  %vm5922_vm6 = vcmp.le.s32.totalorder %v3279_v56, 6 }
  0xa6   : > { %vm3358_vm10 = vmand %vm5918_vm4, %vm573_vm8  ;;  %vm5925_vm8 = vcmp.gt.s32.totalorder %v3285_v19, 7  ;;  %vm5926_vm4 = vcmp.le.s32.totalorder %v3279_v56, 7  ;;  %v640_v55 = vsel %vm3348_vm1, %v2617_v11, -1e+30  ;;  %v641_v58 = vsel %vm3348_vm1, %v2688_v25, -1e+30 }
  0xa7   : > { %vm3372_vm5 = vmand %vm5922_vm6, %vm5921_vm7  ;;  %vm5930_vm6 = vcmp.le.s32.totalorder %v3279_v56, 8  ;;  %v642_v36 = vsel %vm3358_vm10, %v2653_v17, -1e+30  ;;  %v643_v34 = vsel %vm3358_vm10, %v2711_v31, -1e+30  ;;  %vm5936_vm1 = vcmp.le.s32.totalorder %v3279_v56, 10 }
  0xa8   : > { %vm3389_vm7 = vmand %vm5926_vm4, %vm5925_vm8  ;;  %v644_v61 = vsel %vm3372_vm5, %v2691_v26, -1e+30  ;;  %v645_v40 = vsel %vm3372_vm5, %v2732_v38, -1e+30  ;;  %vm5939_vm10 = vcmp.gt.s32.totalorder %v3285_v19, 11  ;;  %vm5940_vm5 = vcmp.le.s32.totalorder %v3279_v56, 11 }
  0xa9   : > { %vm3406_vm8 = vmand %vm5930_vm6, %vm5929_vm14  ;;  %v646_v12 = vsel %vm3389_vm7, %v2714_v32, -1e+30  ;;  %v647_v23 = vsel %vm3389_vm7, %v2753_v45, -1e+30  ;;  %vm5943_vm4 = vcmask 64512   ;;  %vm5945_vm14 = vcmp.le.s32.totalorder %v3279_v56, 12 }
  0xaa   : > { %vm3423_vm0 = vmand %vm5933_vm12, %vm577_vm13  ;;  %v648_v29 = vsel %vm3406_vm8, %v2735_v39, -1e+30  ;;  %v649_v47 = vsel %vm3406_vm8, %v2774_v52, -1e+30  ;;  %v664_v43 = vsel %vm5943_vm4, %v632_v35, -inf }
  0xab   : > { %vm3440_vm13 = vmand %vm5936_vm1, %vm578_vm15  ;;  %v650_v62 = vsel %vm3423_vm0, %v2756_v46, -1e+30  ;;  %v651_v63 = vsel %vm3423_vm0, %v2795_v59, -1e+30  ;;  %vm5951_vm1 = vcmp.le.s32.totalorder %v3279_v56, 13  ;;  %vm5955_vm0 = vcmp.le.s32.totalorder %v3279_v56, 14 }
  0xac   : > { %vm3457_vm15 = vmand %vm5940_vm5, %vm5939_vm10  ;;  %v652_v22 = vsel %vm3440_vm13, %v5948_v15, -1e+30  ;;  %v653_v28 = vsel %vm3440_vm13, %v2816_v14, -1e+30  ;;  %vm5961_vm5 = vcmp.gt.s32.totalorder %v3285_v19, 15  ;;  %v5968_v19 = vld [vmem:[#allocation16_spill] sm:$0xff] }
  0xad   : > { %vm5944_vm7 = vmmov %vm5943_vm4  ;;  %v654_v35 = vsel %vm3457_vm15, %v5954_v6, -1e+30  ;;  %v655_v49 = vsel %vm3457_vm15, %v2837_v24, -1e+30 }
  0xae   : > { %v665_v53 = vsel %vm5944_vm7, %v634_v18, -inf  ;;  %vm3473_vm6 = vmand %vm5945_vm14, %vm580_vm9 }
  0xaf   : > { %vm5949_vm8 = vmmov %vm5943_vm4 }
  0xb0   : > { %v666_v54 = vsel %vm5949_vm8, %v636_v44, -inf  ;;  %vm5950_vm12 = vmmov %vm5943_vm4 }
  0xb1   : > { %v668_v42 = vsel %vm5950_vm12, %v638_v33, -inf  ;;  %vm3489_vm9 = vmand %vm5951_vm1, %vm581_vm2  ;;  %v667_v50 = vmax.f32 %v664_v43, %v666_v54  ;;  %v5958_v33 = vld [vmem:[#allocation12_spill] sm:$0xff]  ;;  %v5966_v54 = vld [vmem:[#allocation14_spill] sm:$0xff] }
  0xb2   : > { %v669_v18 = vmax.f32 %v665_v53, %v668_v42  ;;  %vm3503_vm10 = vmand %vm5955_vm0, %vm582_vm3  ;;  %v656_v0 = vsel %vm3473_vm6, %v5958_v33, -1e+30  ;;  %v5965_v53 = vld [vmem:[#allocation17_spill] sm:$0xff]  ;;  %v658_v42 = vsel %vm3489_vm9, %v5966_v54, -1e+30 }
  0xb3   : > { %vm5959_vm2 = vmmov %vm5943_vm4  ;;  %vm5962_vm4 = vcmp.le.s32.totalorder %v3279_v56, 15  ;;  %v657_v51 = vsel %vm3473_vm6, %v5965_v53, -1e+30 }
  0xb4   : > { %v670_v27 = vsel %vm5959_vm2, %v640_v55, -inf  ;;  %vm5960_vm13 = vmmov %vm5959_vm2 }
  0xb5   : > { %v672_v48 = vsel %vm5960_vm13, %v642_v36, -inf  ;;  %vm3519_vm3 = vmand %vm5962_vm4, %vm5961_vm5  ;;  %v671_v37 = vmax.f32 %v667_v50, %v670_v27  ;;  %v5967_v36 = vld [vmem:[#allocation15_spill] sm:$0xff] }
  0xb6   : > { %v673_v55 = vmax.f32 %v669_v18, %v672_v48  ;;  %v660_v56 = vsel %vm3503_vm10, %v5967_v36, -1e+30  ;;  %v662_v33 = vsel %vm3519_vm3, %v5968_v19, -1e+30  ;;  %vm5969_vm15 = vmmov %vm5959_vm2 }
  0xb7   : > { %v674_v57 = vsel %vm5969_vm15, %v644_v61, -inf  ;;  %vm5970_vm7 = vmmov %vm5959_vm2 }
  0xb8   : > { %v676_v53 = vsel %vm5970_vm7, %v646_v12, -inf  ;;  %v675_v24 = vmax.f32 %v671_v37, %v674_v57  ;;  %vm5971_vm14 = vmmov %vm5959_vm2 }
  0xb9   : > { %v677_v6 = vmax.f32 %v673_v55, %v676_v53  ;;  %v678_v50 = vsel %vm5971_vm14, %v648_v29, -inf  ;;  %vm5972_vm6 = vmmov %vm5959_vm2  ;;  %v5979_v29 = vsel %vm3304_vm11, %v2588_v3, -1e+30 }
  0xba   : > { %v680_v18 = vsel %vm5972_vm6, %v650_v62, -inf  ;;  %vm5973_vm8 = vmmov %vm5959_vm2  ;;  %v679_v61 = vmax.f32 %v675_v24, %v678_v50 }
  0xbb   : > { %v682_v27 = vsel %vm5973_vm8, %v652_v22, -inf  ;;  %vm5974_vm12 = vmmov %vm5959_vm2  ;;  %v681_v19 = vmax.f32 %v677_v6, %v680_v18 }
  0xbc   : > { %v684_v48 = vsel %vm5974_vm12, %v654_v35, -inf  ;;  %vm5975_vm1 = vmmov %vm5959_vm2  ;;  %v683_v24 = vmax.f32 %v679_v61, %v682_v27 }
  0xbd   : > { %v686_v36 = vsel %vm5975_vm1, %v656_v0, -inf  ;;  %vm5976_vm0 = vmmov %vm5975_vm1  ;;  %v685_v6 = vmax.f32 %v681_v19, %v684_v48  ;;  %v661_v19 = vsel %vm3503_vm10, %v2953_v13, -1e+30  ;;  %v3580_v48 = vstv %s3547_s8  ;;  %s5617_s8 = sld [smem:[#allocation6 + %s4334_s14]] }
  0xbe   : > { %v688_v54 = vsel %vm5976_vm0, %v658_v42, -inf  ;;  %vm5977_vm2 = vmmov %vm5976_vm0  ;;  %v713_v5 = vsel %vm5976_vm0, %v653_v28, -inf }
  0xbf   : > { %v690_v37 = vsel %vm5977_vm2, %v660_v56, -inf  ;;  %vm5978_vm13 = vmmov %vm5976_vm0  ;;  %v689_v57 = vmax.f32 %v685_v6, %v688_v54  ;;  %v663_v54 = vsel %vm3519_vm3, %v2956_v30, -1e+30 }
  0xc0   : > { %v692_v12 = vsel %vm5978_vm13, %v662_v33, -inf  ;;  %vm5980_vm5 = vmmov %vm5976_vm0 }
  0xc1   : > { %v695_v62 = vsel %vm5980_vm5, %v5979_v29, -inf  ;;  %vm5981_vm4 = vmmov %vm5976_vm0 }
  0xc2   : > { %v696_v22 = vsel %vm5981_vm4, %v635_v60, -inf  ;;  %vm5982_vm15 = vmmov %vm5976_vm0  ;;  %v687_v60 = vmax.f32 %v683_v24, %v686_v36  ;;  %vm733_vm4 = vcmp.le.s32.totalorder %v3580_v48, 0 }
  0xc3   : > { %v697_v35 = vsel %vm5982_vm15, %v637_v21, -inf  ;;  %vm5983_vm7 = vmmov %vm5976_vm0  ;;  %vm734_vm15 = vcmp.le.s32.totalorder %v3580_v48, 1 }
  0xc4   : > { %v699_v0 = vsel %vm5983_vm7, %v639_v20, -inf  ;;  %v698_v53 = vmax.f32 %v695_v62, %v697_v35  ;;  %vm5984_vm14 = vmmov %vm5976_vm0  ;;  %v659_v20 = vsel %vm3489_vm9, %v2937_v41, -1e+30  ;;  %vm735_vm7 = vcmp.le.s32.totalorder %v3580_v48, 2 }
  0xc5   : > { %v700_v42 = vmax.f32 %v696_v22, %v699_v0  ;;  %v701_v33 = vsel %vm5984_vm14, %v641_v58, -inf  ;;  %vm5985_vm6 = vmmov %vm5976_vm0  ;;  %vm736_vm14 = vcmp.le.s32.totalorder %v3580_v48, 3 }
  0xc6   : > { %v703_v1 = vsel %vm5985_vm6, %v643_v34, -inf  ;;  %vm5986_vm8 = vmmov %vm5976_vm0  ;;  %v702_v21 = vmax.f32 %v698_v53, %v701_v33  ;;  %vm737_vm6 = vcmp.le.s32.totalorder %v3580_v48, 4 }
  0xc7   : > { %v705_v55 = vsel %vm5986_vm8, %v645_v40, -inf  ;;  %vm5987_vm11 = vmmov %vm5976_vm0  ;;  %v704_v50 = vmax.f32 %v700_v42, %v703_v1  ;;  %v691_v40 = vmax.f32 %v687_v60, %v690_v37 }
  0xc8   : > { %v707_v56 = vsel %vm5987_vm11, %v647_v23, -inf  ;;  %vm5988_vm12 = vmmov %vm5976_vm0  ;;  %v693_v23 = vmax.f32 %v689_v57, %v692_v12  ;;  %v706_v18 = vmax.f32 %v702_v21, %v705_v55  ;;  %v3586_v12 = vstv %s3560_s9 }
  0xc9   : > { %v709_v58 = vsel %vm5988_vm12, %v649_v47, -inf  ;;  %vm5989_vm1 = vmmov %vm5976_vm0  ;;  %v708_v36 = vmax.f32 %v704_v50, %v707_v56  ;;  %vm755_vm11 = vcmp.gt.s32.totalorder %v3586_v12, 5  ;;  %vm763_vm8 = vcmp.gt.s32.totalorder %v3586_v12, 13 }
  0xca   : > { %v711_v34 = vsel %vm5989_vm1, %v651_v63, -inf  ;;  %vm5990_vm9 = vmmov %vm5976_vm0  ;;  %v694_v44 = vmax.f32 %v691_v40, %v693_v23  ;;  %v710_v61 = vmax.f32 %v706_v18, %v709_v58  ;;  %vm754_vm1 = vcmp.gt.s32.totalorder %v3586_v12, 4 }
  0xcb   : > { %v715_v27 = vsel %vm5990_vm9, %v655_v49, -inf  ;;  %v712_v47 = vmax.f32 %v708_v36, %v711_v34  ;;  %vm5991_vm10 = vmmov %vm5976_vm0  ;;  %vm750_vm9 = vcmp.gt.s32.totalorder %v3586_v12, 0 }
  0xcc   : > { %v717_v29 = vsel %vm5991_vm10, %v657_v51, -inf  ;;  %vm5992_vm2 = vmmov %vm5976_vm0  ;;  %v714_v62 = vmax.f32 %v710_v61, %v713_v5  ;;  %vm751_vm10 = vcmp.gt.s32.totalorder %v3586_v12, 1  ;;  %v6042_v5 = vld [vmem:[#allocation11_spill] sm:$0xff] }
  0xcd   : > { %v719_v63 = vsel %vm5992_vm2, %v659_v20, -inf  ;;  %vm5993_vm13 = vmmov %vm5976_vm0  ;;  %v716_v43 = vmax.f32 %v712_v47, %v715_v27  ;;  %vm752_vm2 = vcmp.gt.s32.totalorder %v3586_v12, 2  ;;  %v6046_v47 = vld [vmem:[#allocation13_spill] sm:$0xff] }
  0xce   : > { %v721_v37 = vsel %vm5993_vm13, %v661_v19, -inf  ;;  %vm5994_vm3 = vmmov %vm5976_vm0  ;;  %v718_v28 = vmax.f32 %v714_v62, %v717_v29 }
  0xcf   : > { %v723_v22 = vsel %vm5994_vm3, %v663_v54, -inf  ;;  %vm5995_vm5 = vmmov %vm5976_vm0  ;;  %v720_v49 = vmax.f32 %v716_v43, %v719_v63  ;;  %vm753_vm0 = vcmp.gt.s32.totalorder %v3586_v12, 3  ;;  %v6047_v63 = vld [vmem:[#allocation12_spill] sm:$0xff] }
  0xd0   : > { %727 = vst.msk [vmem:[#allocation2 + $0x20] sm:$0xff] %vm5995_vm5, %v694_v44  ;;  %v722_v51 = vmax.f32 %v718_v28, %v721_v37  ;;  %vm3605_vm13 = vmand %vm733_vm4, %vm750_vm9  ;;  %vm759_vm4 = vcmp.gt.s32.totalorder %v3586_v12, 9 }
  0xd1   : > { %v724_v35 = vmax.f32 %v720_v49, %v723_v22  ;;  %vm3615_vm12 = vmand %vm734_vm15, %vm751_vm10  ;;  %vm762_vm10 = vcmp.gt.s32.totalorder %v3586_v12, 12  ;;  %v814_v55 = vsel %vm3605_vm13, %v2581_v2, -1e+30  ;;  %v815_v56 = vsel %vm3605_vm13, %v2588_v3, -1e+30  ;;  %v6054_v22 = vld [vmem:[#allocation17_spill] sm:$0xff] }
  0xd2   : > { %vm3624_vm5 = vmand %vm735_vm7, %vm752_vm2  ;;  %vm6007_vm2 = vcmp.le.s32.totalorder %v3580_v48, 5  ;;  %v816_v57 = vsel %vm3615_vm12, %v2591_v4, -1e+30  ;;  %v817_v2 = vsel %vm3615_vm12, %v2600_v7, -1e+30  ;;  %vm6018_vm12 = vcmp.gt.s32.totalorder %v3586_v12, 8 }
  0xd3   : > { %v725_v6 = vmax.f32 %v722_v51, %v724_v35  ;;  %vm3635_vm9 = vmand %vm736_vm14, %vm753_vm0  ;;  %vm764_vm0 = vcmp.gt.s32.totalorder %v3586_v12, 14  ;;  %v818_v21 = vsel %vm3624_vm5, %v2603_v8, -1e+30  ;;  %v819_v4 = vsel %vm3624_vm5, %v2611_v9, -1e+30  ;;  %v6055_v49 = vld [vmem:[#allocation14_spill] sm:$0xff] }
  0xd4   : > { %vm6004_vm7 = vmmov %vm5994_vm3  ;;  %vm760_vm3 = vcmp.gt.s32.totalorder %v3586_v12, 10  ;;  %v820_v7 = vsel %vm3635_vm9, %v2614_v10, -1e+30  ;;  %v821_v8 = vsel %vm3635_vm9, %v2650_v16, -1e+30  ;;  %vm6022_vm5 = vcmp.le.s32.totalorder %v3580_v48, 9 }
  0xd5   : > { %728 = vst.msk [vmem:[#allocation2 + $0x28] sm:$0xff] %vm6004_vm7, %v725_v6  ;;  %vm3649_vm14 = vmand %vm737_vm6, %vm754_vm1  ;;  %vm6010_vm6 = vcmp.gt.s32.totalorder %v3586_v12, 6  ;;  %vm6011_vm1 = vcmp.le.s32.totalorder %v3580_v48, 6  ;;  %v6056_v6 = vld [vmem:[#allocation15_spill] sm:$0xff] }
  0xd6   : > { %vm3659_vm15 = vmand %vm6007_vm2, %vm755_vm11  ;;  %vm6014_vm11 = vcmp.gt.s32.totalorder %v3586_v12, 7  ;;  %vm6015_vm2 = vcmp.le.s32.totalorder %v3580_v48, 7  ;;  %v822_v9 = vsel %vm3649_vm14, %v2617_v11, -1e+30  ;;  %v823_v10 = vsel %vm3649_vm14, %v2688_v25, -1e+30 }
  0xd7   : > { %vm3673_vm7 = vmand %vm6011_vm1, %vm6010_vm6  ;;  %vm6019_vm1 = vcmp.le.s32.totalorder %v3580_v48, 8  ;;  %v824_v16 = vsel %vm3659_vm15, %v2653_v17, -1e+30  ;;  %v825_v11 = vsel %vm3659_vm15, %v2711_v31, -1e+30  ;;  %vm6025_vm14 = vcmp.le.s32.totalorder %v3580_v48, 10 }
  0xd8   : > { %vm3690_vm6 = vmand %vm6015_vm2, %vm6014_vm11  ;;  %v826_v25 = vsel %vm3673_vm7, %v2691_v26, -1e+30  ;;  %v827_v17 = vsel %vm3673_vm7, %v2732_v38, -1e+30  ;;  %vm6028_vm15 = vcmp.gt.s32.totalorder %v3586_v12, 11  ;;  %vm6029_vm7 = vcmp.le.s32.totalorder %v3580_v48, 11 }
  0xd9   : > { %vm3707_vm11 = vmand %vm6019_vm1, %vm6018_vm12  ;;  %v828_v31 = vsel %vm3690_vm6, %v2714_v32, -1e+30  ;;  %v829_v26 = vsel %vm3690_vm6, %v2753_v45, -1e+30  ;;  %vm6032_vm2 = vcmask 64512   ;;  %vm6034_vm12 = vcmp.le.s32.totalorder %v3580_v48, 12 }
  0xda   : > { %vm3724_vm9 = vmand %vm6022_vm5, %vm759_vm4  ;;  %v830_v38 = vsel %vm3707_vm11, %v2735_v39, -1e+30  ;;  %v831_v32 = vsel %vm3707_vm11, %v2774_v52, -1e+30  ;;  %v846_v40 = vsel %vm6032_vm2, %v814_v55, -inf }
  0xdb   : > { %vm3741_vm4 = vmand %vm6025_vm14, %vm760_vm3  ;;  %v832_v45 = vsel %vm3724_vm9, %v2756_v46, -1e+30  ;;  %v833_v52 = vsel %vm3724_vm9, %v2795_v59, -1e+30  ;;  %vm6039_vm14 = vcmp.le.s32.totalorder %v3580_v48, 13  ;;  %vm6043_vm9 = vcmp.le.s32.totalorder %v3580_v48, 14 }
  0xdc   : > { %vm3758_vm3 = vmand %vm6029_vm7, %vm6028_vm15  ;;  %v834_v46 = vsel %vm3741_vm4, %v5948_v15, -1e+30  ;;  %v835_v59 = vsel %vm3741_vm4, %v2816_v14, -1e+30  ;;  %vm6050_vm7 = vcmp.gt.s32.totalorder %v3586_v12, 15  ;;  %v6057_v12 = vld [vmem:[#allocation16_spill] sm:$0xff] }
  0xdd   : > { %vm6033_vm6 = vmmov %vm6032_vm2  ;;  %v836_v15 = vsel %vm3758_vm3, %v6042_v5, -1e+30  ;;  %v837_v29 = vsel %vm3758_vm3, %v6046_v47, -1e+30  ;;  %v3881_v47 = vstv %s3848_s11 }
  0xde   : > { %v847_v39 = vsel %vm6033_vm6, %v816_v57, -inf  ;;  %vm3774_vm1 = vmand %vm6034_vm12, %vm762_vm10 }
  0xdf   : > { %vm6037_vm11 = vmmov %vm6032_vm2  ;;  %v838_v14 = vsel %vm3774_vm1, %v6047_v63, -1e+30  ;;  %v839_v28 = vsel %vm3774_vm1, %v6054_v22, -1e+30 }
  0xe0   : > { %v848_v18 = vsel %vm6037_vm11, %v818_v21, -inf  ;;  %vm6038_vm5 = vmmov %vm6032_vm2 }
  0xe1   : > { %v850_v36 = vsel %vm6038_vm5, %v820_v7, -inf  ;;  %vm3790_vm10 = vmand %vm6039_vm14, %vm763_vm8  ;;  %v849_v27 = vmax.f32 %v846_v40, %v848_v18 }
  0xe2   : > { %v851_v44 = vmax.f32 %v847_v39, %v850_v36  ;;  %vm3804_vm15 = vmand %vm6043_vm9, %vm764_vm0  ;;  %v840_v51 = vsel %vm3790_vm10, %v6055_v49, -1e+30 }
  0xe3   : > { %vm6048_vm8 = vmmov %vm6032_vm2  ;;  %v843_v5 = vsel %vm3804_vm15, %v2953_v13, -1e+30 }
  0xe4   : > { %v852_v37 = vsel %vm6048_vm8, %v822_v9, -inf  ;;  %vm6049_vm4 = vmmov %vm6032_vm2  ;;  %vm6051_vm2 = vcmp.le.s32.totalorder %v3580_v48, 15  ;;  %v842_v48 = vsel %vm3804_vm15, %v6056_v6, -1e+30 }
  0xe5   : > { %v854_v62 = vsel %vm6049_vm4, %v824_v16, -inf  ;;  %vm3820_vm0 = vmand %vm6051_vm2, %vm6050_vm7  ;;  %v853_v35 = vmax.f32 %v849_v27, %v852_v37  ;;  %v3887_v37 = vstv %s3861_s12 }
  0xe6   : > { %v855_v24 = vmax.f32 %v851_v44, %v854_v62  ;;  %v844_v53 = vsel %vm3820_vm0, %v6057_v12, -1e+30  ;;  %vm6058_vm3 = vmmov %vm6049_vm4  ;;  %v845_v44 = vsel %vm3820_vm0, %v2956_v30, -1e+30 }
  0xe7   : > { %v856_v42 = vsel %vm6058_vm3, %v826_v25, -inf  ;;  %vm6059_vm6 = vmmov %vm6058_vm3 }
  0xe8   : > { %v858_v33 = vsel %vm6059_vm6, %v828_v31, -inf  ;;  %v857_v1 = vmax.f32 %v853_v35, %v856_v42  ;;  %vm6060_vm12 = vmmov %vm6058_vm3 }
  0xe9   : > { %v859_v55 = vmax.f32 %v855_v24, %v858_v33  ;;  %v860_v60 = vsel %vm6060_vm12, %v830_v38, -inf  ;;  %vm6061_vm1 = vmmov %vm6058_vm3  ;;  %v3971_v33 = vld [vmem:[%s2570_s29 + $0x8] sm:$0xff] }
  0xea   : > { %v862_v57 = vsel %vm6061_vm1, %v832_v45, -inf  ;;  %vm6062_vm11 = vmmov %vm6061_vm1  ;;  %v861_v9 = vmax.f32 %v857_v1, %v860_v60  ;;  %v885_v0 = vsel %vm6061_vm1, %v825_v11, -inf  ;;  %v3985_v60 = vld [vmem:[%s2570_s29 + $0x10] sm:$0xff] }
  0xeb   : > { %v864_v21 = vsel %vm6062_vm11, %v834_v46, -inf  ;;  %vm6063_vm5 = vmmov %vm6061_vm1  ;;  %v863_v16 = vmax.f32 %v859_v55, %v862_v57 }
  0xec   : > { %v866_v50 = vsel %vm6063_vm5, %v836_v15, -inf  ;;  %vm6064_vm14 = vmmov %vm6061_vm1  ;;  %v865_v45 = vmax.f32 %v861_v9, %v864_v21  ;;  %v3991_v21 = vld [vmem:[%s2570_s29 + $0x18] sm:$0xff]  ;;  %v6103_v9 = vmov 0 }
  0xed   : > { %v868_v7 = vsel %vm6064_vm14, %v838_v14, -inf  ;;  %vm6065_vm9 = vmmov %vm6061_vm1  ;;  %v867_v40 = vmax.f32 %v863_v16, %v866_v50  ;;  %v4011_v16 = vld [vmem:[%s2570_s29 + $0x28] sm:$0xff] }
  0xee   : > { %v870_v20 = vsel %vm6065_vm9, %v840_v51, -inf  ;;  %vm6066_vm8 = vmmov %vm6061_vm1 }
  0xef   : > { %v872_v19 = vsel %vm6066_vm8, %v842_v48, -inf  ;;  %vm6067_vm4 = vmmov %vm6061_vm1  ;;  %v871_v18 = vmax.f32 %v867_v40, %v870_v20 }
  0xf0   : > { %v874_v25 = vsel %vm6067_vm4, %v844_v53, -inf  ;;  %vm6068_vm7 = vmmov %vm6061_vm1  ;;  %v3965_v53 = vld [vmem:[%s2570_s29] sm:$0xff] }
  0xf1   : > { %v877_v58 = vsel %vm6068_vm7, %v815_v56, -inf  ;;  %vm6069_vm2 = vmmov %vm6061_vm1 }
  0xf2   : > { %v878_v31 = vsel %vm6069_vm2, %v817_v2, -inf  ;;  %vm6070_vm3 = vmmov %vm6061_vm1  ;;  %v869_v2 = vmax.f32 %v865_v45, %v868_v7  ;;  %vm915_vm2 = vcmp.le.s32.totalorder %v3881_v47, 0  ;;  %v3997_v7 = vld [vmem:[%s2570_s29 + $0x20] sm:$0xff] }
  0xf3   : > { %v879_v38 = vsel %vm6070_vm3, %v819_v4, -inf  ;;  %vm6071_vm6 = vmmov %vm6061_vm1  ;;  %vm916_vm3 = vcmp.le.s32.totalorder %v3881_v47, 1  ;;  %v4037_v45 = vld [vmem:[%s2570_s29 + $0x40] sm:$0xff] }
  0xf4   : > { %v881_v34 = vsel %vm6071_vm6, %v821_v8, -inf  ;;  %v880_v39 = vmax.f32 %v877_v58, %v879_v38  ;;  %vm6072_vm12 = vmmov %vm6061_vm1  ;;  %v841_v8 = vsel %vm3790_vm10, %v2937_v41, -1e+30  ;;  %vm917_vm6 = vcmp.le.s32.totalorder %v3881_v47, 2  ;;  %v4222_v38 = vld [vmem:[%s2570_s29 + $0xf0] sm:$0xff] }
  0xf5   : > { %v882_v23 = vmax.f32 %v878_v31, %v881_v34  ;;  %v883_v46 = vsel %vm6072_vm12, %v823_v10, -inf  ;;  %vm6073_vm11 = vmmov %vm6061_vm1  ;;  %vm918_vm12 = vcmp.le.s32.totalorder %v3881_v47, 3  ;;  %v4023_v31 = vld [vmem:[%s2570_s29 + $0x38] sm:$0xff]  ;;  %v6107_v34 = vmov 0  ;;  %6149 = vst [vmem:[#allocation19_spill] sm:$0xff] %v4222_v38 }
  0xf6   : > { %v887_v3 = vsel %vm6073_vm11, %v827_v17, -inf  ;;  %vm6074_vm13 = vmmov %vm6061_vm1  ;;  %v884_v4 = vmax.f32 %v880_v39, %v883_v46  ;;  %v873_v17 = vmax.f32 %v869_v2, %v872_v19  ;;  %v4043_v39 = vld [vmem:[%s2570_s29 + $0x48] sm:$0xff]  ;;  %v4049_v46 = vld [vmem:[%s2570_s29 + $0x50] sm:$0xff] }
  0xf7   : > { %v889_v56 = vsel %vm6074_vm13, %v829_v26, -inf  ;;  %v886_v36 = vmax.f32 %v882_v23, %v885_v0  ;;  %vm6075_vm5 = vmmov %vm6061_vm1  ;;  %v875_v26 = vmax.f32 %v871_v18, %v874_v25  ;;  %vm937_vm13 = vcmp.gt.s32.totalorder %v3887_v37, 5  ;;  %v4017_v25 = vld [vmem:[%s2570_s29 + $0x30] sm:$0xff]  ;;  %v4069_v18 = vld [vmem:[%s2570_s29 + $0x60] sm:$0xff] }
  0xf8   : > { %v891_v10 = vsel %vm6075_vm5, %v831_v32, -inf  ;;  %vm6076_vm14 = vmmov %vm6061_vm1  ;;  %v888_v15 = vmax.f32 %v884_v4, %v887_v3  ;;  %v6111_v3 = vmov 0  ;;  %v4207_v2 = vld [vmem:[%s2570_s29 + $0xd0] sm:$0xff] }
  0xf9   : > { %v893_v11 = vsel %vm6076_vm14, %v833_v52, -inf  ;;  %v890_v27 = vmax.f32 %v886_v36, %v889_v56  ;;  %vm6077_vm9 = vmmov %vm6061_vm1  ;;  %v876_v13 = vmax.f32 %v873_v17, %v875_v26  ;;  %vm936_vm14 = vcmp.gt.s32.totalorder %v3887_v37, 4  ;;  %v4063_v56 = vld [vmem:[%s2570_s29 + $0x58] sm:$0xff]  ;;  %v4075_v36 = vld [vmem:[%s2570_s29 + $0x68] sm:$0xff]  ;;  %6147 = vst [vmem:[#allocation16_spill] sm:$0xff] %v4207_v2 }
  0xfa   : > { %v895_v54 = vsel %vm6077_vm9, %v835_v59, -inf  ;;  %vm6078_vm10 = vmmov %vm6061_vm1  ;;  %v892_v61 = vmax.f32 %v888_v15, %v891_v10  ;;  %vm935_vm9 = vcmp.gt.s32.totalorder %v3887_v37, 3  ;;  %v4089_v10 = vld [vmem:[%s2570_s29 + $0x70] sm:$0xff]  ;;  %v4095_v17 = vld [vmem:[%s2570_s29 + $0x78] sm:$0xff] }
  0xfb   : > { %v897_v41 = vsel %vm6078_vm10, %v837_v29, -inf  ;;  %v894_v32 = vmax.f32 %v890_v27, %v893_v11  ;;  %vm6079_vm15 = vmmov %vm6061_vm1  ;;  %vm932_vm10 = vcmp.gt.s32.totalorder %v3887_v37, 0  ;;  %v4101_v15 = vld [vmem:[%s2570_s29 + $0x80] sm:$0xff] }
  0xfc   : > { %v899_v63 = vsel %vm6079_vm15, %v839_v28, -inf  ;;  %vm6080_vm8 = vmmov %vm6061_vm1  ;;  %v896_v62 = vmax.f32 %v892_v61, %v895_v54  ;;  %vm933_vm15 = vcmp.gt.s32.totalorder %v3887_v37, 1  ;;  %v4115_v54 = vld [vmem:[%s2570_s29 + $0x88] sm:$0xff]  ;;  %v4185_v26 = vld [vmem:[%s2570_s29 + $0xc0] sm:$0xff] }
  0xfd   : > { %v901_v52 = vsel %vm6080_vm8, %v841_v8, -inf  ;;  %vm6081_vm4 = vmmov %vm6061_vm1  ;;  %v898_v43 = vmax.f32 %v894_v32, %v897_v41  ;;  %vm934_vm8 = vcmp.gt.s32.totalorder %v3887_v37, 2  ;;  %v4179_v41 = vld [vmem:[%s2570_s29 + $0xb8] sm:$0xff]  ;;  %6139 = vst [vmem:[#allocation14_spill] sm:$0xff] %v4185_v26 }
  0xfe   : > { %v903_v14 = vsel %vm6081_vm4, %v843_v5, -inf  ;;  %vm6082_vm0 = vmmov %vm6061_vm1  ;;  %vm919_vm1 = vcmp.le.s32.totalorder %v3881_v47, 4  ;;  %v900_v59 = vmax.f32 %v896_v62, %v899_v63  ;;  %v6114_v5 = vmov 0  ;;  %6138 = vst [vmem:[#allocation17_spill] sm:$0xff] %v4179_v41 }
  0xff   : > { %v905_v30 = vsel %vm6082_vm0, %v845_v44, -inf  ;;  %vm6083_vm7 = vmmov %vm6082_vm0  ;;  %v902_v29 = vmax.f32 %v898_v43, %v901_v52  ;;  %v4143_v43 = vld [vmem:[%s2570_s29 + $0xa0] sm:$0xff]  ;;  %v6136_v62 = vmov 0  ;;  %v4201_v44 = vld [vmem:[%s2570_s29 + $0xc8] sm:$0xff] }
 0x100   : > { %909 = vst.msk [vmem:[#allocation2 + $0x30] sm:$0xff] %vm6083_vm7, %v876_v13  ;;  %v904_v22 = vmax.f32 %v900_v59, %v903_v14  ;;  %vm3906_vm4 = vmand %vm915_vm2, %vm932_vm10  ;;  %v4121_v13 = vld [vmem:[%s2570_s29 + $0x90] sm:$0xff]  ;;  %v4137_v14 = vld [vmem:[%s2570_s29 + $0x98] sm:$0xff] }
 0x101   : > { %v906_v28 = vmax.f32 %v902_v29, %v905_v30  ;;  %vm3916_vm5 = vmand %vm916_vm3, %vm933_vm15  ;;  %vm938_vm3 = vcmp.gt.s32.totalorder %v3887_v37, 6  ;;  %vm943_vm15 = vcmp.gt.s32.totalorder %v3887_v37, 11  ;;  %v996_v42 = vsel %vm3906_vm4, %v3965_v53, -1e+30  ;;  %6125 = vst [vmem:[#allocation10_spill] sm:$0xff] %v4137_v14 }
 0x102   : > { %vm3925_vm7 = vmand %vm917_vm6, %vm934_vm8  ;;  %vm6095_vm8 = vcmp.le.s32.totalorder %v3881_v47, 5  ;;  %v998_v57 = vsel %vm3916_vm5, %v3985_v60, -1e+30  ;;  %6126 = vst [vmem:[#allocation11_spill] sm:$0xff] %v4143_v43 }
 0x103   : > { %v907_v35 = vmax.f32 %v904_v22, %v906_v28  ;;  %vm3936_vm11 = vmand %vm918_vm12, %vm935_vm9  ;;  %v1000_v20 = vsel %vm3925_vm7, %v3997_v7, -1e+30  ;;  %vm6119_vm9 = vcmask 64512   ;;  %v6130_v22 = vmov 0  ;;  %v4159_v28 = vld [vmem:[%s2570_s29 + $0xa8] sm:$0xff]  ;;  %6146 = vst [vmem:[#allocation15_spill] sm:$0xff] %v4201_v44 }
 0x104   : > { %vm6092_vm6 = vmmov %vm6082_vm0  ;;  %vm942_vm0 = vcmp.gt.s32.totalorder %v3887_v37, 10  ;;  %v1002_v58 = vsel %vm3936_vm11, %v4017_v25, -1e+30  ;;  %v1028_v32 = vsel %vm6119_vm9, %v996_v42, -inf  ;;  %6132 = vst [vmem:[#allocation13_spill] sm:$0xff] %v4159_v28  ;;  %v4165_v42 = vld [vmem:[%s2570_s29 + $0xb0] sm:$0xff] }
 0x105   : > { %910 = vst.msk [vmem:[#allocation2 + $0x38] sm:$0xff] %vm6092_vm6, %v907_v35  ;;  %vm3950_vm12 = vmand %vm919_vm1, %vm936_vm14  ;;  %vm6098_vm1 = vcmp.le.s32.totalorder %v3881_v47, 6  ;;  %vm6101_vm14 = vcmp.gt.s32.totalorder %v3887_v37, 7  ;;  %v1032_v29 = vsel %vm6119_vm9, %v1002_v58, -inf  ;;  %v6165_v49 = vsel %vm3936_vm11, %v4023_v31, -1e+30 }
 0x106   : > { %vm3960_vm2 = vmand %vm6095_vm8, %vm937_vm13  ;;  %v1004_v40 = vsel %vm3950_vm12, %v4037_v45, -1e+30  ;;  %6133 = vst [vmem:[#allocation12_spill] sm:$0xff] %v4165_v42  ;;  %v6167_v24 = vsel %vm3950_vm12, %v4043_v39, -1e+30 }
 0x107   : > { %vm3980_vm13 = vmand %vm6098_vm1, %vm938_vm3  ;;  %vm6102_vm3 = vcmp.le.s32.totalorder %v3881_v47, 7  ;;  %vm6105_vm1 = vcmp.gt.s32.totalorder %v3887_v37, 8  ;;  %v1006_v0 = vsel %vm3960_vm2, %v4049_v46, -1e+30  ;;  %v6169_v6 = vsel %vm3960_vm2, %v4063_v56, -1e+30 }
 0x108   : > { %vm4006_vm8 = vmand %vm6102_vm3, %vm6101_vm14  ;;  %vm6106_vm14 = vcmp.le.s32.totalorder %v3881_v47, 8  ;;  %v1008_v4 = vsel %vm3980_vm13, %v4069_v18, -1e+30 }
 0x109   : > { %v6104_v9 = vsel %vm4006_vm8, 4294967295, %v6103_v9  ;;  %vm4032_vm3 = vmand %vm6106_vm14, %vm6105_vm1  ;;  %vm6109_vm1 = vcmp.gt.s32.totalorder %v3887_v37, 9  ;;  %vm6110_vm14 = vcmp.le.s32.totalorder %v3881_v47, 9  ;;  %v1010_v11 = vsel %vm4006_vm8, %v4089_v10, -1e+30 }
 0x10a   : > { %v6108_v34 = vsel %vm4032_vm3, 4294967295, %v6107_v34  ;;  %vm4058_vm6 = vmand %vm6110_vm14, %vm6109_vm1  ;;  %vm6113_vm1 = vcmp.le.s32.totalorder %v3881_v47, 10  ;;  %v1012_v27 = vsel %vm4032_vm3, %v4101_v15, -1e+30 }
 0x10b   : > { %v6112_v3 = vsel %vm4058_vm6, 4294967295, %v6111_v3  ;;  %vm4084_vm14 = vmand %vm6113_vm1, %vm942_vm0  ;;  %vm6116_vm0 = vcmp.le.s32.totalorder %v3881_v47, 11  ;;  %v1014_v61 = vsel %vm4058_vm6, %v4121_v13, -1e+30 }
 0x10c   : > { %v6115_v5 = vsel %vm4084_vm14, 4294967295, %v6114_v5  ;;  %vm4110_vm1 = vmand %vm6116_vm0, %vm943_vm15  ;;  %vm6121_vm15 = vcmp.gt.s32.totalorder %v3887_v37, 12  ;;  %vm6122_vm0 = vcmp.le.s32.totalorder %v3881_v47, 12  ;;  %v1016_v30 = vsel %vm4084_vm14, %v4143_v43, -1e+30 }
 0x10d   : > { %vm6120_vm10 = vmmov %vm6119_vm9  ;;  %v1019_v35 = vsel %vm4110_vm1, %v4179_v41, -1e+30 }
 0x10e   : > { %v1029_v63 = vsel %vm6120_vm10, %v998_v57, -inf  ;;  %vm4132_vm8 = vmand %vm6122_vm0, %vm6121_vm15  ;;  %vm6128_vm15 = vcmp.gt.s32.totalorder %v3887_v37, 13  ;;  %vm6129_vm0 = vcmp.le.s32.totalorder %v3881_v47, 13  ;;  %v1018_v57 = vsel %vm4110_vm1, %v4165_v42, -1e+30 }
 0x10f   : > { %vm6127_vm10 = vmmov %vm6119_vm9  ;;  %v1033_v58 = vmax.f32 %v1029_v63, %v1032_v29  ;;  %vm6135_vm9 = vcmp.le.s32.totalorder %v3881_v47, 14  ;;  %v1021_v8 = vsel %vm4132_vm8, %v4201_v44, -1e+30 }
 0x110   : > { %v1030_v59 = vsel %vm6127_vm10, %v1000_v20, -inf  ;;  %vm4154_vm3 = vmand %vm6129_vm0, %vm6128_vm15  ;;  %vm6134_vm10 = vcmp.gt.s32.totalorder %v3887_v37, 14  ;;  %vm6140_vm0 = vcmask 64512  }
 0x111   : > { %v6131_v22 = vsel %vm4154_vm3, 4294967295, %v6130_v22  ;;  %v1031_v20 = vmax.f32 %v1028_v32, %v1030_v59  ;;  %vm4174_vm15 = vmand %vm6135_vm9, %vm6134_vm10  ;;  %v1020_v32 = vsel %vm4132_vm8, %v4185_v26, -1e+30  ;;  %v1034_v63 = vsel %vm6140_vm0, %v1004_v40, -inf }
 0x112   : > { %v6137_v62 = vsel %vm4174_vm15, 4294967295, %v6136_v62  ;;  %vm6141_vm14 = vmmov %vm6140_vm0  ;;  %vm6142_vm10 = vcmp.gt.s32.totalorder %v3887_v37, 15  ;;  %vm6143_vm9 = vcmp.le.s32.totalorder %v3881_v47, 15  ;;  %v1022_v40 = vsel %vm4154_vm3, %v4207_v2, -1e+30  ;;  %v4216_v47 = vld [vmem:[%s2570_s29 + $0xe0] sm:$0xff] }
 0x113   : > { %v1036_v59 = vsel %vm6141_vm14, %v1006_v0, -inf  ;;  %vm4196_vm6 = vmand %vm6143_vm9, %vm6142_vm10  ;;  %v1035_v0 = vmax.f32 %v1031_v20, %v1034_v63  ;;  %6148 = vst [vmem:[#allocation18_spill] sm:$0xff] %v4216_v47  ;;  %v1024_v23 = vsel %vm4174_vm15, %v4216_v47, -1e+30  ;;  %v1044_v50 = vsel %vm6140_vm0, %v1014_v61, -inf }
 0x114   : > { %v1037_v37 = vmax.f32 %v1033_v58, %v1036_v59  ;;  %v1026_v52 = vsel %vm4196_vm6, %v4222_v38, -1e+30  ;;  %vm6150_vm8 = vmmov %vm6140_vm0  ;;  %vm6176_vm2 = vnez %v6131_v22  ;;  %vm6177_vm12 = vnez %v6137_v62 }
 0x115   : > { %v1038_v19 = vsel %vm6150_vm8, %v1008_v4, -inf  ;;  %vm6151_vm14 = vmmov %vm6140_vm0 }
 0x116   : > { %v1040_v20 = vsel %vm6151_vm14, %v1010_v11, -inf  ;;  %v1039_v58 = vmax.f32 %v1035_v0, %v1038_v19  ;;  %vm6152_vm1 = vmmov %vm6140_vm0 }
 0x117   : > { %v1041_v63 = vmax.f32 %v1037_v37, %v1040_v20  ;;  %v1042_v59 = vsel %vm6152_vm1, %v1012_v27, -inf  ;;  %vm6153_vm10 = vmmov %vm6140_vm0  ;;  %v6159_v27 = vsel %vm3906_vm4, %v3971_v33, -1e+30 }
 0x118   : > { %v1046_v1 = vsel %vm6153_vm10, %v1016_v30, -inf  ;;  %vm6154_vm9 = vmmov %vm6140_vm0  ;;  %v1043_v4 = vmax.f32 %v1039_v58, %v1042_v59  ;;  %v6161_v30 = vsel %vm3916_vm5, %v3991_v21, -1e+30  ;;  %v6171_v58 = vsel %vm3980_vm13, %v4075_v36, -1e+30 }
 0x119   : > { %v1048_v47 = vsel %vm6154_vm9, %v1018_v57, -inf  ;;  %vm6155_vm15 = vmmov %vm6140_vm0  ;;  %v1045_v38 = vmax.f32 %v1041_v63, %v1044_v50  ;;  %v6163_v50 = vsel %vm3925_vm7, %v4011_v16, -1e+30  ;;  %vm6178_vm13 = vnez %v6108_v34 }
 0x11a   : > { %v1050_v2 = vsel %vm6155_vm15, %v1020_v32, -inf  ;;  %vm6156_vm3 = vmmov %vm6140_vm0  ;;  %v1047_v51 = vmax.f32 %v1043_v4, %v1046_v1  ;;  %v4284_v4 = vld [vmem:[%s2570_s29 + $0xd8] sm:$0xff] }
 0x11b   : > { %v1052_v44 = vsel %vm6156_vm3, %v1022_v40, -inf  ;;  %vm6157_vm8 = vmmov %vm6140_vm0  ;;  %v1049_v40 = vmax.f32 %v1045_v38, %v1048_v47  ;;  %v1023_v55 = vsel %vm6176_vm2, %v4284_v4, -1e+30 }
 0x11c   : > { %v1054_v19 = vsel %vm6157_vm8, %v1024_v23, -inf  ;;  %vm6158_vm14 = vmmov %vm6140_vm0  ;;  %v1051_v47 = vmax.f32 %v1047_v51, %v1050_v2  ;;  %v6179_v2 = vsel %vm6178_vm13, %v4115_v54, -1e+30  ;;  %vm6181_vm8 = vnez %v6112_v3 }
 0x11d   : > { %v1056_v11 = vsel %vm6158_vm14, %v1026_v52, -inf  ;;  %vm6160_vm1 = vmmov %vm6140_vm0  ;;  %v1053_v63 = vmax.f32 %v1049_v40, %v1052_v44  ;;  %v4318_v51 = vstv %s4236_s2 }
 0x11e   : > { %v1059_v61 = vsel %vm6160_vm1, %v6159_v27, -inf  ;;  %vm6162_vm15 = vmmov %vm6140_vm0  ;;  %v4290_v27 = vld [vmem:[%s2570_s29 + $0xe8] sm:$0xff]  ;;  %v1055_v22 = vmax.f32 %v1051_v47, %v1054_v19  ;;  %vm1099_vm2 = vcmp.le.s32.totalorder %v4318_v51, 2  ;;  %vm1101_vm13 = vcmp.le.s32.totalorder %v4318_v51, 4 }
 0x11f   : > { %v1060_v57 = vsel %vm6162_vm15, %v6161_v30, -inf  ;;  %vm6164_vm3 = vmmov %vm6140_vm0 }
 0x120   : > { %v1061_v23 = vsel %vm6164_vm3, %v6163_v50, -inf  ;;  %vm6166_vm4 = vmmov %vm6140_vm0 }
 0x121   : > { %v1063_v32 = vsel %vm6166_vm4, %v6165_v49, -inf  ;;  %v1062_v0 = vmax.f32 %v1059_v61, %v1061_v23  ;;  %vm6168_vm5 = vmmov %vm6140_vm0  ;;  %v6182_v61 = vsel %vm6181_vm8, %v4137_v14, -1e+30  ;;  %v4306_v49 = vld [vmem:[%s2570_s29 + $0xf8] sm:$0xff]  ;;  %s2373_s29 = smul.u32 56, %s6522_s4 }
 0x122   : > { %v1064_v37 = vmax.f32 %v1060_v57, %v1063_v32  ;;  %v1065_v52 = vsel %vm6168_vm5, %v6167_v24, -inf  ;;  %vm6170_vm11 = vmmov %vm6140_vm0  ;;  %v1057_v57 = vmax.f32 %v1053_v63, %v1056_v11  ;;  %v1027_v34 = vsel %vm4196_vm6, %v4306_v49, -1e+30 }
 0x123   : > { %v1067_v20 = vsel %vm6170_vm11, %v6169_v6, -inf  ;;  %vm6172_vm7 = vmmov %vm6140_vm0  ;;  %vm6173_vm0 = vnez %v6104_v9  ;;  %v1066_v12 = vmax.f32 %v1062_v0, %v1065_v52  ;;  %v1025_v9 = vsel %vm6177_vm12, %v4290_v27, -1e+30  ;;  %s5190_s1 = scalar_lea.vmem %s5725_s6, %s2373_s29 }
 0x124   : > { %v1069_v1 = vsel %vm6172_vm7, %v6171_v58, -inf  ;;  %v6174_v48 = vsel %vm6173_vm0, %v4095_v17, -1e+30  ;;  %vm6175_vm10 = vmmov %vm6160_vm1  ;;  %v1068_v59 = vmax.f32 %v1064_v37, %v1067_v20  ;;  %v1079_v32 = vsel %vm6164_vm3, %v1019_v35, -inf }
 0x125   : > { %v1071_v38 = vsel %vm6175_vm10, %v6174_v48, -inf  ;;  %vm6180_vm9 = vmmov %vm6160_vm1  ;;  %v1070_v50 = vmax.f32 %v1066_v12, %v1069_v1  ;;  %v1058_v19 = vmax.f32 %v1055_v22, %v1057_v57  ;;  %v4324_v24 = vstv %s4261_s3 }
 0x126   : > { %v1073_v44 = vsel %vm6180_vm9, %v6179_v2, -inf  ;;  %vm6183_vm14 = vmmov %vm6160_vm1  ;;  %v1072_v23 = vmax.f32 %v1068_v59, %v1071_v38  ;;  %vm6184_vm1 = vnez %v6115_v5  ;;  %vm1097_vm0 = vcmp.le.s32.totalorder %v4318_v51, 0 }
 0x127   : > { %v1075_v30 = vsel %vm6183_vm14, %v6182_v61, -inf  ;;  %v6185_v62 = vsel %vm6184_vm1, %v4159_v28, -1e+30  ;;  %vm6186_vm15 = vmmov %vm6164_vm3  ;;  %v1074_v11 = vmax.f32 %v1070_v50, %v1073_v44  ;;  %vm1098_vm10 = vcmp.le.s32.totalorder %v4318_v51, 1 }
 0x128   : > { %v1077_v3 = vsel %vm6186_vm15, %v6185_v62, -inf  ;;  %v1076_v40 = vmax.f32 %v1072_v23, %v1075_v30  ;;  %vm6187_vm4 = vmmov %vm6164_vm3  ;;  %vm1100_vm12 = vcmp.le.s32.totalorder %v4318_v51, 3  ;;  %vm1117_vm15 = vcmp.gt.s32.totalorder %v4324_v24, 3 }
 0x129   : > { %v1081_v0 = vsel %vm6187_vm4, %v1021_v8, -inf  ;;  %vm6188_vm5 = vmmov %vm6164_vm3  ;;  %v1078_v5 = vmax.f32 %v1074_v11, %v1077_v3  ;;  %vm1115_vm4 = vcmp.gt.s32.totalorder %v4324_v24, 1  ;;  %vm1118_vm1 = vcmp.gt.s32.totalorder %v4324_v24, 4 }
 0x12a   : > { %v1083_v37 = vsel %vm6188_vm5, %v1023_v55, -inf  ;;  %vm6189_vm11 = vmmov %vm6164_vm3  ;;  %v1080_v52 = vmax.f32 %v1076_v40, %v1079_v32  ;;  %vm1116_vm5 = vcmp.gt.s32.totalorder %v4324_v24, 2 }
 0x12b   : > { %v1085_v29 = vsel %vm6189_vm11, %v1025_v9, -inf  ;;  %vm6190_vm6 = vmmov %vm6164_vm3  ;;  %v1082_v8 = vmax.f32 %v1078_v5, %v1081_v0 }
 0x12c   : > { %v1087_v6 = vsel %vm6190_vm6, %v1027_v34, -inf  ;;  %vm6191_vm7 = vmmov %vm6164_vm3  ;;  %v1084_v35 = vmax.f32 %v1080_v52, %v1083_v37  ;;  %vm1114_vm3 = vcmp.gt.s32.totalorder %v4324_v24, 0  ;;  %vm1119_vm6 = vcmp.gt.s32.totalorder %v4324_v24, 5 }
 0x12d   : > { %1091 = vst.msk [vmem:[#allocation2 + $0x40] sm:$0xff] %vm6191_vm7, %v1058_v19  ;;  %v1086_v20 = vmax.f32 %v1082_v8, %v1085_v29  ;;  %vm4346_vm11 = vmand %vm1097_vm0, %vm1114_vm3  ;;  %vm1123_vm0 = vcmp.gt.s32.totalorder %v4324_v24, 9  ;;  %v4468_v19 = vstv %s4351_s15  ;;  %v4488_v29 = vstv %s4364_s16 }
 0x12e   : > { %v1088_v58 = vmax.f32 %v1084_v35, %v1087_v6  ;;  %vm4359_vm14 = vmand %vm1098_vm10, %vm1115_vm4  ;;  %vm1124_vm10 = vcmp.gt.s32.totalorder %v4324_v24, 10  ;;  %vm1125_vm4 = vcmp.gt.s32.totalorder %v4324_v24, 11  ;;  %v1178_v55 = vsel %vm4346_vm11, %v3965_v53, -1e+30 }
 0x12f   : > { %vm4371_vm7 = vmand %vm1099_vm2, %vm1116_vm5  ;;  %vm6203_vm5 = vcmp.le.s32.totalorder %v4318_v51, 5  ;;  %v1180_v44 = vsel %vm4359_vm14, %v3985_v60, -1e+30 }
 0x130   : > { %v1089_v38 = vmax.f32 %v1086_v20, %v1088_v58  ;;  %vm4382_vm3 = vmand %vm1100_vm12, %vm1117_vm15  ;;  %v1182_v30 = vsel %vm4371_vm7, %v3997_v7, -1e+30  ;;  %vm6215_vm15 = vcmp.le.s32.totalorder %v4318_v51, 8 }
 0x131   : > { %vm6200_vm2 = vmmov %vm6180_vm9  ;;  %vm1127_vm9 = vcmp.gt.s32.totalorder %v4324_v24, 13  ;;  %v1184_v50 = vsel %vm4382_vm3, %v4017_v25, -1e+30  ;;  %v1185_v23 = vsel %vm4382_vm3, %v4023_v31, -1e+30  ;;  %vm6218_vm3 = vcmp.le.s32.totalorder %v4318_v51, 9 }
 0x132   : > { %1092 = vst.msk [vmem:[#allocation2 + $0x48] sm:$0xff] %vm6200_vm2, %v1089_v38  ;;  %vm4396_vm12 = vmand %vm1101_vm13, %vm1118_vm1  ;;  %vm6206_vm13 = vcmp.gt.s32.totalorder %v4324_v24, 6  ;;  %vm6207_vm1 = vcmp.le.s32.totalorder %v4318_v51, 6 }
 0x133   : > { %vm4406_vm8 = vmand %vm6203_vm5, %vm1119_vm6  ;;  %vm6210_vm6 = vcmp.gt.s32.totalorder %v4324_v24, 7  ;;  %vm6211_vm5 = vcmp.le.s32.totalorder %v4318_v51, 7  ;;  %v1186_v62 = vsel %vm4396_vm12, %v4037_v45, -1e+30  ;;  %v6269_v48 = vsel %vm4396_vm12, %v4043_v39, -1e+30 }
 0x134   : > { %vm4420_vm2 = vmand %vm6207_vm1, %vm6206_vm13  ;;  %vm6214_vm1 = vcmp.gt.s32.totalorder %v4324_v24, 8  ;;  %v1188_v32 = vsel %vm4406_vm8, %v4049_v46, -1e+30  ;;  %v1189_v40 = vsel %vm4406_vm8, %v4063_v56, -1e+30  ;;  %vm6224_vm8 = vcmp.le.s32.totalorder %v4318_v51, 11 }
 0x135   : > { %vm4437_vm13 = vmand %vm6211_vm5, %vm6210_vm6  ;;  %v1190_v0 = vsel %vm4420_vm2, %v4069_v18, -1e+30  ;;  %v1191_v37 = vsel %vm4420_vm2, %v4075_v36, -1e+30  ;;  %vm6227_vm2 = vcmask 64512  }
 0x136   : > { %vm4454_vm6 = vmand %vm6215_vm15, %vm6214_vm1  ;;  %v1192_v52 = vsel %vm4437_vm13, %v4089_v10, -1e+30  ;;  %v1193_v6 = vsel %vm4437_vm13, %v4095_v17, -1e+30  ;;  %v1210_v63 = vsel %vm6227_vm2, %v1178_v55, -inf  ;;  %vm6229_vm1 = vcmp.gt.s32.totalorder %v4324_v24, 12 }
 0x137   : > { %vm4474_vm15 = vmand %vm6218_vm3, %vm1123_vm0  ;;  %vm6221_vm0 = vcmp.le.s32.totalorder %v4318_v51, 10  ;;  %v1194_v8 = vsel %vm4454_vm6, %v4101_v15, -1e+30  ;;  %v1195_v58 = vsel %vm4454_vm6, %v4115_v54, -1e+30  ;;  %vm6230_vm3 = vcmp.le.s32.totalorder %v4318_v51, 12 }
 0x138   : > { %vm4494_vm5 = vmand %vm6221_vm0, %vm1124_vm10  ;;  %v1196_v38 = vsel %vm4474_vm15, %v4121_v13, -1e+30  ;;  %v1197_v22 = vsel %vm4474_vm15, %v4137_v14, -1e+30  ;;  %vm6238_vm15 = vcmp.gt.s32.totalorder %v4324_v24, 14 }
 0x139   : > { %vm4511_vm10 = vmand %vm6224_vm8, %vm1125_vm4  ;;  %v1198_v34 = vsel %vm4494_vm5, %v4143_v43, -1e+30  ;;  %vm6235_vm8 = vcmp.le.s32.totalorder %v4318_v51, 13  ;;  %v1199_v11 = vsel %vm4494_vm5, %v4159_v28, -1e+30 }
 0x13a   : > { %vm6228_vm13 = vmmov %vm6227_vm2  ;;  %v1200_v3 = vsel %vm4511_vm10, %v4165_v42, -1e+30  ;;  %v1201_v61 = vsel %vm4511_vm10, %v4179_v41, -1e+30 }
 0x13b   : > { %v1211_v59 = vsel %vm6228_vm13, %v1180_v44, -inf  ;;  %vm4527_vm4 = vmand %vm6230_vm3, %vm6229_vm1  ;;  %vm6239_vm13 = vcmp.le.s32.totalorder %v4318_v51, 14  ;;  %vm6244_vm3 = vcmp.gt.s32.totalorder %v4324_v24, 15 }
 0x13c   : > { %vm6233_vm6 = vmmov %vm6227_vm2  ;;  %v1202_v5 = vsel %vm4527_vm4, %v4185_v26, -1e+30 }
 0x13d   : > { %v1212_v55 = vsel %vm6233_vm6, %v1182_v30, -inf  ;;  %vm6234_vm0 = vmmov %vm6227_vm2  ;;  %vm6245_vm6 = vcmp.le.s32.totalorder %v4318_v51, 15  ;;  %v6251_v51 = vld [vmem:[#allocation19_spill] sm:$0xff] }
 0x13e   : > { %v1214_v44 = vsel %vm6234_vm0, %v1184_v50, -inf  ;;  %vm4543_vm2 = vmand %vm6235_vm8, %vm1127_vm9  ;;  %v1213_v57 = vmax.f32 %v1210_v63, %v1212_v55  ;;  %v6248_v55 = vld [vmem:[#allocation15_spill] sm:$0xff] }
 0x13f   : > { %v1215_v30 = vmax.f32 %v1211_v59, %v1214_v44  ;;  %vm4557_vm1 = vmand %vm6239_vm13, %vm6238_vm15  ;;  %v1203_v20 = vsel %vm4527_vm4, %v6248_v55, -1e+30  ;;  %v6249_v44 = vld [vmem:[#allocation16_spill] sm:$0xff]  ;;  %v1205_v12 = vsel %vm4543_vm2, %v4284_v4, -1e+30 }
 0x140   : > { %vm6242_vm9 = vmmov %vm6234_vm0  ;;  %v1204_v26 = vsel %vm4543_vm2, %v6249_v44, -1e+30 }
 0x141   : > { %v1216_v9 = vsel %vm6242_vm9, %v1186_v62, -inf  ;;  %vm6243_vm5 = vmmov %vm6234_vm0 }
 0x142   : > { %v1218_v63 = vsel %vm6243_vm5, %v1188_v32, -inf  ;;  %vm4573_vm0 = vmand %vm6245_vm6, %vm6244_vm3  ;;  %v1217_v62 = vmax.f32 %v1213_v57, %v1216_v9  ;;  %v6250_v32 = vld [vmem:[#allocation18_spill] sm:$0xff] }
 0x143   : > { %v1219_v41 = vmax.f32 %v1215_v30, %v1218_v63  ;;  %v1206_v24 = vsel %vm4557_vm1, %v6250_v32, -1e+30  ;;  %v1208_v42 = vsel %vm4573_vm0, %v6251_v51, -1e+30  ;;  %vm6252_vm10 = vmmov %vm6243_vm5 }
 0x144   : > { %v1220_v28 = vsel %vm6252_vm10, %v1190_v0, -inf  ;;  %vm6253_vm8 = vmmov %vm6243_vm5 }
 0x145   : > { %v1222_v2 = vsel %vm6253_vm8, %v1192_v52, -inf  ;;  %v1221_v55 = vmax.f32 %v1217_v62, %v1220_v28  ;;  %vm6254_vm4 = vmmov %vm6243_vm5  ;;  %v6262_v52 = vsel %vm4346_vm11, %v3971_v33, -1e+30 }
 0x146   : > { %v1223_v43 = vmax.f32 %v1219_v41, %v1222_v2  ;;  %v1224_v14 = vsel %vm6254_vm4, %v1194_v8, -inf  ;;  %vm6255_vm15 = vmmov %vm6254_vm4 }
 0x147   : > { %v1226_v9 = vsel %vm6255_vm15, %v1196_v38, -inf  ;;  %vm6256_vm13 = vmmov %vm6254_vm4  ;;  %v1225_v0 = vmax.f32 %v1221_v55, %v1224_v14  ;;  %v6266_v14 = vsel %vm4371_vm7, %v4011_v16, -1e+30 }
 0x148   : > { %v1228_v57 = vsel %vm6256_vm13, %v1198_v34, -inf  ;;  %vm6257_vm9 = vmmov %vm6254_vm4  ;;  %v1227_v32 = vmax.f32 %v1223_v43, %v1226_v9 }
 0x149   : > { %v1230_v30 = vsel %vm6257_vm9, %v1200_v3, -inf  ;;  %vm6258_vm5 = vmmov %vm6254_vm4  ;;  %v1229_v1 = vmax.f32 %v1225_v0, %v1228_v57  ;;  %v1209_v0 = vsel %vm4573_vm0, %v4306_v49, -1e+30 }
 0x14a   : > { %v1232_v63 = vsel %vm6258_vm5, %v1202_v5, -inf  ;;  %vm6259_vm3 = vmmov %vm6254_vm4  ;;  %v1231_v38 = vmax.f32 %v1227_v32, %v1230_v30  ;;  %v1207_v32 = vsel %vm4557_vm1, %v4290_v27, -1e+30 }
 0x14b   : > { %v1234_v51 = vsel %vm6259_vm3, %v1204_v26, -inf  ;;  %vm6260_vm6 = vmmov %vm6259_vm3  ;;  %v6264_v26 = vsel %vm4359_vm14, %v3991_v21, -1e+30  ;;  %v1259_v35 = vsel %vm6259_vm3, %v1199_v11, -inf }
 0x14c   : > { %v1236_v28 = vsel %vm6260_vm6, %v1206_v24, -inf  ;;  %vm6261_vm10 = vmmov %vm6259_vm3  ;;  %v1235_v2 = vmax.f32 %v1231_v38, %v1234_v51 }
 0x14d   : > { %v1238_v41 = vsel %vm6261_vm10, %v1208_v42, -inf  ;;  %vm6263_vm8 = vmmov %vm6259_vm3 }
 0x14e   : > { %v1241_v3 = vsel %vm6263_vm8, %v6262_v52, -inf  ;;  %vm6265_vm4 = vmmov %vm6259_vm3  ;;  %v1239_v30 = vmax.f32 %v1235_v2, %v1238_v41 }
 0x14f   : > { %v1242_v8 = vsel %vm6265_vm4, %v6264_v26, -inf  ;;  %vm6267_vm15 = vmmov %vm6259_vm3  ;;  %vm1279_vm4 = vcmp.le.s32.totalorder %v4468_v19, 0 }
 0x150   : > { %v1243_v43 = vsel %vm6267_vm15, %v6266_v14, -inf  ;;  %vm6268_vm13 = vmmov %vm6259_vm3  ;;  %v1589_v14 = vstv %s4622_s20  ;;  %vm1280_vm15 = vcmp.le.s32.totalorder %v4468_v19, 1 }
 0x151   : > { %v1245_v42 = vsel %vm6268_vm13, %v1185_v23, -inf  ;;  %v1244_v34 = vmax.f32 %v1241_v3, %v1243_v43  ;;  %vm6270_vm14 = vmmov %vm6259_vm3  ;;  %v1233_v23 = vmax.f32 %v1229_v1, %v1232_v63  ;;  %v1462_v3 = vstv %s4598_s17 }
 0x152   : > { %v1246_v5 = vmax.f32 %v1242_v8, %v1245_v42  ;;  %v1247_v55 = vsel %vm6270_vm14, %v6269_v48, -inf  ;;  %vm6271_vm11 = vmmov %vm6259_vm3  ;;  %vm1281_vm13 = vcmp.le.s32.totalorder %v4468_v19, 2  ;;  %vm1282_vm14 = vcmp.le.s32.totalorder %v4468_v19, 3 }
 0x153   : > { %v1249_v47 = vsel %vm6271_vm11, %v1189_v40, -inf  ;;  %vm6272_vm9 = vmmov %vm6259_vm3  ;;  %v1248_v9 = vmax.f32 %v1244_v34, %v1247_v55  ;;  %vm1283_vm11 = vcmp.le.s32.totalorder %v4468_v19, 4  ;;  %v6336_v55 = vld [vmem:[#allocation17_spill] sm:$0xff] }
 0x154   : > { %v1251_v62 = vsel %vm6272_vm9, %v1191_v37, -inf  ;;  %vm6273_vm7 = vmmov %vm6259_vm3  ;;  %v1250_v57 = vmax.f32 %v1246_v5, %v1249_v47  ;;  %vm1305_vm9 = vcmp.gt.s32.totalorder %v4488_v29, 9 }
 0x155   : > { %v1253_v24 = vsel %vm6273_vm7, %v1193_v6, -inf  ;;  %vm6274_vm12 = vmmov %vm6259_vm3  ;;  %v1237_v6 = vmax.f32 %v1233_v23, %v1236_v28  ;;  %v1252_v63 = vmax.f32 %v1248_v9, %v1251_v62 }
 0x156   : > { %v1255_v40 = vsel %vm6274_vm12, %v1195_v58, -inf  ;;  %vm6275_vm5 = vmmov %vm6259_vm3  ;;  %v1254_v51 = vmax.f32 %v1250_v57, %v1253_v24  ;;  %v1465_v58 = vstv %s4603_s19  ;;  %v1592_v57 = vstv %s4661_s21 }
 0x157   : > { %v1257_v37 = vsel %vm6275_vm5, %v1197_v22, -inf  ;;  %vm6276_vm2 = vmmov %vm6259_vm3  ;;  %v1240_v50 = vmax.f32 %v1237_v6, %v1239_v30  ;;  %v1256_v26 = vmax.f32 %v1252_v63, %v1255_v40  ;;  %vm1299_vm3 = vcmp.gt.s32.totalorder %v4488_v29, 3  ;;  %v6343_v63 = vld [vmem:[#allocation18_spill] sm:$0xff] }
 0x158   : > { %v1261_v52 = vsel %vm6276_vm2, %v1201_v61, -inf  ;;  %v1258_v8 = vmax.f32 %v1254_v51, %v1257_v37  ;;  %vm6277_vm1 = vmmov %vm6276_vm2  ;;  %vm1296_vm2 = vcmp.gt.s32.totalorder %v4488_v29, 0  ;;  %vm1300_vm5 = vcmp.gt.s32.totalorder %v4488_v29, 4 }
 0x159   : > { %v1263_v22 = vsel %vm6277_vm1, %v1203_v20, -inf  ;;  %vm6278_vm6 = vmmov %vm6277_vm1  ;;  %v1260_v43 = vmax.f32 %v1256_v26, %v1259_v35  ;;  %v1709_v37 = vstv %s4668_s22  ;;  %v1712_v30 = vstv %s4679_s23 }
 0x15a   : > { %v1265_v28 = vsel %vm6278_vm6, %v1205_v12, -inf  ;;  %vm6279_vm10 = vmmov %vm6277_vm1  ;;  %v1262_v59 = vmax.f32 %v1258_v8, %v1261_v52  ;;  %vm1298_vm6 = vcmp.gt.s32.totalorder %v4488_v29, 2  ;;  %v1832_v52 = vstv %s4704_s25  ;;  %v6342_v12 = vld [vmem:[#allocation14_spill] sm:$0xff] }
 0x15b   : > { %v1267_v41 = vsel %vm6279_vm10, %v1207_v32, -inf  ;;  %vm6280_vm0 = vmmov %vm6277_vm1  ;;  %v1264_v61 = vmax.f32 %v1260_v43, %v1263_v22  ;;  %vm1297_vm1 = vcmp.gt.s32.totalorder %v4488_v29, 1  ;;  %v6323_v22 = vld [vmem:[#allocation10_spill] sm:$0xff] }
 0x15c   : > { %v1269_v42 = vsel %vm6280_vm0, %v1209_v0, -inf  ;;  %vm6281_vm8 = vmmov %vm6280_vm0  ;;  %v1266_v11 = vmax.f32 %v1262_v59, %v1265_v28  ;;  %vm1301_vm0 = vcmp.gt.s32.totalorder %v4488_v29, 5  ;;  %v1829_v0 = vstv %s4692_s24  ;;  %v6329_v59 = vld [vmem:[#allocation11_spill] sm:$0xff] }
 0x15d   : > { %1273 = vst.msk [vmem:[#allocation2 + $0x50] sm:$0xff] %vm6281_vm8, %v1240_v50  ;;  %v1268_v20 = vmax.f32 %v1264_v61, %v1267_v41  ;;  %vm4674_vm10 = vmand %vm1279_vm4, %vm1296_vm2  ;;  %vm1304_vm4 = vcmp.gt.s32.totalorder %v4488_v29, 8 }
 0x15e   : > { %v1270_v1 = vmax.f32 %v1266_v11, %v1269_v42  ;;  %vm4687_vm12 = vmand %vm1280_vm15, %vm1297_vm1  ;;  %vm1306_vm15 = vcmp.gt.s32.totalorder %v4488_v29, 10  ;;  %vm6293_vm1 = vcmp.le.s32.totalorder %v4468_v19, 5  ;;  %v1360_v24 = vsel %vm4674_vm10, %v3965_v53, -1e+30  ;;  %v6330_v42 = vld [vmem:[#allocation13_spill] sm:$0xff] }
 0x15f   : > { %vm4699_vm8 = vmand %vm1281_vm13, %vm1298_vm6  ;;  %vm1311_vm6 = vcmp.gt.s32.totalorder %v4488_v29, 15  ;;  %v1361_v2 = vsel %vm4674_vm10, %v3971_v33, -1e+30  ;;  %v1362_v9 = vsel %vm4687_vm12, %v3985_v60, -1e+30 }
 0x160   : > { %v1271_v5 = vmax.f32 %v1268_v20, %v1270_v1  ;;  %vm4712_vm2 = vmand %vm1282_vm14, %vm1299_vm3  ;;  %vm1309_vm3 = vcmp.gt.s32.totalorder %v4488_v29, 13  ;;  %v1363_v53 = vsel %vm4687_vm12, %v3991_v21, -1e+30  ;;  %v1364_v32 = vsel %vm4699_vm8, %v3997_v7, -1e+30 }
 0x161   : > { %vm6290_vm13 = vmmov %vm6273_vm7  ;;  %v1365_v60 = vsel %vm4699_vm8, %v4011_v16, -1e+30  ;;  %v1366_v40 = vsel %vm4712_vm2, %v4017_v25, -1e+30  ;;  %v1367_v7 = vsel %vm4712_vm2, %v4023_v31, -1e+30 }
 0x162   : > { %1274 = vst.msk [vmem:[#allocation2 + $0x58] sm:$0xff] %vm6290_vm13, %v1271_v5  ;;  %vm4726_vm14 = vmand %vm1283_vm11, %vm1300_vm5  ;;  %vm6296_vm11 = vcmp.gt.s32.totalorder %v4488_v29, 6  ;;  %vm6297_vm5 = vcmp.le.s32.totalorder %v4468_v19, 6  ;;  %vm6307_vm8 = vcmp.le.s32.totalorder %v4468_v19, 9  ;;  %v6335_v5 = vld [vmem:[#allocation12_spill] sm:$0xff] }
 0x163   : > { %vm4737_vm7 = vmand %vm6293_vm1, %vm1301_vm0  ;;  %vm6300_vm0 = vcmp.gt.s32.totalorder %v4488_v29, 7  ;;  %vm6301_vm1 = vcmp.le.s32.totalorder %v4468_v19, 7  ;;  %v1368_v16 = vsel %vm4726_vm14, %v4037_v45, -1e+30  ;;  %v1369_v25 = vsel %vm4726_vm14, %v4043_v39, -1e+30 }
 0x164   : > { %vm4748_vm13 = vmand %vm6297_vm5, %vm6296_vm11  ;;  %vm6304_vm5 = vcmp.le.s32.totalorder %v4468_v19, 8  ;;  %v1370_v31 = vsel %vm4737_vm7, %v4049_v46, -1e+30  ;;  %v1371_v45 = vsel %vm4737_vm7, %v4063_v56, -1e+30  ;;  %vm6313_vm7 = vcmp.gt.s32.totalorder %v4488_v29, 11 }
 0x165   : > { %vm4766_vm11 = vmand %vm6301_vm1, %vm6300_vm0  ;;  %v1372_v51 = vsel %vm4748_vm13, %v4069_v18, -1e+30  ;;  %v1373_v46 = vsel %vm4748_vm13, %v4075_v36, -1e+30  ;;  %vm6317_vm13 = vcmask 64512  }
 0x166   : > { %vm4784_vm0 = vmand %vm6304_vm5, %vm1304_vm4  ;;  %v1374_v56 = vsel %vm4766_vm11, %v4089_v10, -1e+30  ;;  %v1375_v18 = vsel %vm4766_vm11, %v4095_v17, -1e+30  ;;  %v1392_v26 = vsel %vm6317_vm13, %v1360_v24, -inf  ;;  %vm6319_vm5 = vcmp.gt.s32.totalorder %v4488_v29, 12 }
 0x167   : > { %vm4802_vm4 = vmand %vm6307_vm8, %vm1305_vm9  ;;  %vm6310_vm9 = vcmp.le.s32.totalorder %v4468_v19, 10  ;;  %v1376_v36 = vsel %vm4784_vm0, %v4101_v15, -1e+30  ;;  %v1377_v10 = vsel %vm4784_vm0, %v4115_v54, -1e+30  ;;  %vm6320_vm8 = vcmp.le.s32.totalorder %v4468_v19, 12 }
 0x168   : > { %vm4820_vm2 = vmand %vm6310_vm9, %vm1306_vm15  ;;  %vm6314_vm15 = vcmp.le.s32.totalorder %v4468_v19, 11  ;;  %v1378_v15 = vsel %vm4802_vm4, %v4121_v13, -1e+30  ;;  %v1379_v54 = vsel %vm4802_vm4, %v6323_v22, -1e+30  ;;  %vm6331_vm4 = vcmp.gt.s32.totalorder %v4488_v29, 14 }
 0x169   : > { %vm4838_vm1 = vmand %vm6314_vm15, %vm6313_vm7  ;;  %vm6326_vm15 = vcmp.le.s32.totalorder %v4468_v19, 13  ;;  %v1380_v13 = vsel %vm4820_vm2, %v6329_v59, -1e+30  ;;  %v1381_v61 = vsel %vm4820_vm2, %v6330_v42, -1e+30 }
 0x16a   : > { %vm6318_vm11 = vmmov %vm6317_vm13  ;;  %v1382_v48 = vsel %vm4838_vm1, %v6335_v5, -1e+30  ;;  %v1383_v62 = vsel %vm4838_vm1, %v6336_v55, -1e+30 }
 0x16b   : > { %v1393_v17 = vsel %vm6318_vm11, %v1362_v9, -inf  ;;  %vm4854_vm9 = vmand %vm6320_vm8, %vm6319_vm5  ;;  %vm6339_vm8 = vcmp.le.s32.totalorder %v4468_v19, 15  ;;  %v4978_v9 = vld [vmem:[#allocation2 + $0x8] sm:$0xff] }
 0x16c   : > { %vm6324_vm0 = vmmov %vm6318_vm11  ;;  %vm6332_vm11 = vcmp.le.s32.totalorder %v4468_v19, 14 }
 0x16d   : > { %v1394_v28 = vsel %vm6324_vm0, %v1364_v32, -inf  ;;  %vm6325_vm7 = vmmov %vm6324_vm0  ;;  %v1384_v32 = vsel %vm4854_vm9, %v6342_v12, -1e+30  ;;  %v6362_v12 = vld [vmem:[#allocation15_spill] sm:$0xff] }
 0x16e   : > { %v1396_v41 = vsel %vm6325_vm7, %v1366_v40, -inf  ;;  %vm4870_vm13 = vmand %vm6326_vm15, %vm1309_vm3  ;;  %v1395_v11 = vmax.f32 %v1392_v26, %v1394_v28  ;;  %v1385_v47 = vsel %vm4854_vm9, %v6362_v12, -1e+30 }
 0x16f   : > { %v1397_v20 = vmax.f32 %v1393_v17, %v1396_v41  ;;  %vm4884_vm5 = vmand %vm6332_vm11, %vm6331_vm4  ;;  %v1386_v40 = vsel %vm4870_vm13, %v6249_v44, -1e+30  ;;  %v1387_v39 = vsel %vm4870_vm13, %v4284_v4, -1e+30 }
 0x170   : > { %vm6337_vm3 = vmmov %vm6324_vm0  ;;  %v1388_v29 = vsel %vm4884_vm5, %v6343_v63, -1e+30  ;;  %v6367_v63 = vlaneseq }
 0x171   : > { %v1398_v24 = vsel %vm6337_vm3, %v1368_v16, -inf  ;;  %vm6338_vm2 = vmmov %vm6324_vm0 }
 0x172   : > { %v1400_v23 = vsel %vm6338_vm2, %v1370_v31, -inf  ;;  %vm4900_vm0 = vmand %vm6339_vm8, %vm1311_vm6  ;;  %v1399_v6 = vmax.f32 %v1395_v11, %v1398_v24  ;;  %v6344_v31 = vld [vmem:[#allocation19_spill] sm:$0xff] }
 0x173   : > { %v1401_v16 = vmax.f32 %v1397_v20, %v1400_v23  ;;  %v1390_v19 = vsel %vm4900_vm0, %v6344_v31, -1e+30  ;;  %vm6345_vm6 = vmmov %vm6338_vm2  ;;  %v1391_v8 = vsel %vm4900_vm0, %v4306_v49, -1e+30  ;;  %v4980_v49 = vld [vmem:[#allocation2 + $0x10] sm:$0xff] }
 0x174   : > { %v1402_v35 = vsel %vm6345_vm6, %v1372_v51, -inf  ;;  %vm6346_vm1 = vmmov %vm6338_vm2 }
 0x175   : > { %v1404_v50 = vsel %vm6346_vm1, %v1374_v56, -inf  ;;  %v1403_v26 = vmax.f32 %v1399_v6, %v1402_v35  ;;  %vm6347_vm7 = vmmov %vm6346_vm1  ;;  %v1389_v6 = vsel %vm4884_vm5, %v4290_v27, -1e+30  ;;  %v4976_v27 = vld [vmem:[#allocation2] sm:$0xff] }
 0x176   : > { %v1405_v17 = vmax.f32 %v1401_v16, %v1404_v50  ;;  %v1406_v44 = vsel %vm6347_vm7, %v1376_v36, -inf  ;;  %vm6348_vm15 = vmmov %vm6346_vm1  ;;  %v1423_v36 = vsel %vm6346_vm1, %v1361_v2, -inf }
 0x177   : > { %v1408_v22 = vsel %vm6348_vm15, %v1378_v15, -inf  ;;  %vm6349_vm4 = vmmov %vm6346_vm1  ;;  %v1407_v11 = vmax.f32 %v1403_v26, %v1406_v44  ;;  %v4997_v44 = vld [vmem:[#allocation2 + $0x20] sm:$0xff] }
 0x178   : > { %v1410_v28 = vsel %vm6349_vm4, %v1380_v13, -inf  ;;  %vm6350_vm11 = vmmov %vm6346_vm1  ;;  %v1409_v51 = vmax.f32 %v1405_v17, %v1408_v22  ;;  %v4995_v17 = vld [vmem:[#allocation2 + $0x18] sm:$0xff]  ;;  %v4999_v22 = vld [vmem:[#allocation2 + $0x28] sm:$0xff] }
 0x179   : > { %v1412_v41 = vsel %vm6350_vm11, %v1382_v48, -inf  ;;  %vm6351_vm3 = vmmov %vm6346_vm1  ;;  %v1411_v48 = vmax.f32 %v1407_v11, %v1410_v28  ;;  %v1449_v28 = vsel %vm6346_vm1, %v1389_v6, -inf  ;;  %v5010_v11 = vld [vmem:[#allocation2 + $0x40] sm:$0xff] }
 0x17a   : > { %v1414_v59 = vsel %vm6351_vm3, %v1384_v32, -inf  ;;  %vm6352_vm2 = vmmov %vm6346_vm1  ;;  %v1413_v38 = vmax.f32 %v1409_v51, %v1412_v41  ;;  %v2069_v51 = vstv %s4953_s28 }
 0x17b   : > { %v1416_v42 = vsel %vm6352_vm2, %v1386_v40, -inf  ;;  %vm6353_vm8 = vmmov %vm6346_vm1 }
 0x17c   : > { %v1418_v56 = vsel %vm6353_vm8, %v1388_v29, -inf  ;;  %vm6354_vm6 = vmmov %vm6346_vm1  ;;  %v4972_v29 = vshrl.u32 %v6367_v63, 7 }
 0x17d   : > { %v1420_v20 = vsel %vm6354_vm6, %v1390_v19, -inf  ;;  %vm6355_vm7 = vmmov %vm6346_vm1 }
 0x17e   : > { %v1424_v15 = vsel %vm6355_vm7, %v1363_v53, -inf  ;;  %vm6356_vm15 = vmmov %vm6346_vm1  ;;  %v4986_v50 = vadd.s32 8, %v4972_v29  ;;  %vm4991_vm0 = vcmp.ge.s32.totalorder %v4972_v29, %v1462_v3 }
 0x17f   : > { %v1425_v13 = vsel %vm6356_vm15, %v1365_v60, -inf  ;;  %vm6357_vm4 = vmmov %vm6346_vm1  ;;  %v1415_v60 = vmax.f32 %v1411_v48, %v1414_v59  ;;  %vm1466_vm15 = vcmp.lt.s32.totalorder %v4972_v29, %v1465_v58  ;;  %v5006_v59 = vld [vmem:[#allocation2 + $0x30] sm:$0xff] }
 0x180   : > { %v1427_v5 = vsel %vm6357_vm4, %v1367_v7, -inf  ;;  %v1426_v55 = vmax.f32 %v1423_v36, %v1425_v13  ;;  %vm6358_vm10 = vmmov %vm6346_vm1  ;;  %v1417_v7 = vmax.f32 %v1413_v38, %v1416_v42  ;;  %v5008_v42 = vld [vmem:[#allocation2 + $0x38] sm:$0xff]  ;;  %vm1464_vm4 = vcmp.ge.s32.totalorder %v4986_v50, %v1462_v3  ;;  %v5027_v13 = vld [vmem:[#allocation2 + $0x50] sm:$0xff] }
 0x181   : > { %v1428_v33 = vmax.f32 %v1424_v15, %v1427_v5  ;;  %v1429_v21 = vsel %vm6358_vm10, %v1369_v25, -inf  ;;  %vm6359_vm12 = vmmov %vm6346_vm1  ;;  %vm1467_vm10 = vcmp.lt.s32.totalorder %v4986_v50, %v1465_v58  ;;  %v5025_v15 = vld [vmem:[#allocation2 + $0x48] sm:$0xff] }
 0x182   : > { %v1431_v34 = vsel %vm6359_vm12, %v1371_v45, -inf  ;;  %vm6360_vm11 = vmmov %vm6346_vm1  ;;  %v1430_v24 = vmax.f32 %v1426_v55, %v1429_v21  ;;  %v5049_v21 = vld [vmem:[#allocation2 + $0x58] sm:$0xff] }
 0x183   : > { %v1433_v2 = vsel %vm6360_vm11, %v1373_v46, -inf  ;;  %vm6361_vm3 = vmmov %vm6346_vm1  ;;  %v1432_v23 = vmax.f32 %v1428_v33, %v1431_v34  ;;  %v1419_v46 = vmax.f32 %v1415_v60, %v1418_v56 }
 0x184   : > { %v1435_v53 = vsel %vm6361_vm3, %v1375_v18, -inf  ;;  %vm6363_vm14 = vmmov %vm6346_vm1  ;;  %v1421_v18 = vmax.f32 %v1417_v7, %v1420_v20  ;;  %v1434_v32 = vmax.f32 %v1430_v24, %v1433_v2  ;;  %vm5045_vm3 = vcmp.ge.s32.totalorder %v4972_v29, %v1589_v14 }
 0x185   : > { %v1437_v25 = vsel %vm6363_vm14, %v1377_v10, -inf  ;;  %vm6364_vm2 = vmmov %vm6346_vm1  ;;  %v1436_v40 = vmax.f32 %v1432_v23, %v1435_v53  ;;  %vm5069_vm14 = vcmp.ge.s32.totalorder %v4986_v50, %v1589_v14 }
 0x186   : > { %v1439_v45 = vsel %vm6364_vm2, %v1379_v54, -inf  ;;  %vm6365_vm9 = vmmov %vm6346_vm1  ;;  %v1422_v54 = vmax.f32 %v1419_v46, %v1421_v18  ;;  %v1438_v43 = vmax.f32 %v1434_v32, %v1437_v25 }
 0x187   : > { %v1441_v4 = vsel %vm6365_vm9, %v1381_v61, -inf  ;;  %vm6366_vm13 = vmmov %vm6346_vm1  ;;  %v1440_v16 = vmax.f32 %v1436_v40, %v1439_v45  ;;  %v1949_v61 = vstv %s4939_s26 }
 0x188   : > { %v1443_v10 = vsel %vm6366_vm13, %v1383_v62, -inf  ;;  %vm6368_vm8 = vmmov %vm6346_vm1  ;;  %v1952_v62 = vstv %s4942_s27  ;;  %v1442_v19 = vmax.f32 %v1438_v43, %v1441_v4 }
 0x189   : > { %v1445_v31 = vsel %vm6368_vm8, %v1385_v47, -inf  ;;  %vm6369_vm6 = vmmov %vm6346_vm1  ;;  %v1444_v35 = vmax.f32 %v1440_v16, %v1443_v10 }
 0x18a   : > { %v1447_v1 = vsel %vm6369_vm6, %v1387_v39, -inf  ;;  %vm6370_vm5 = vmmov %vm6346_vm1  ;;  %v1446_v56 = vmax.f32 %v1442_v19, %v1445_v31 }
 0x18b   : > { %1455 = vst.msk [vmem:[#allocation2 + $0x60] sm:$0xff] %vm6370_vm5, %v1422_v54  ;;  %vm6373_vm7 = vmmov %vm6346_vm1  ;;  %v1448_v20 = vmax.f32 %v1444_v35, %v1447_v1 }
 0x18c   : > { %v1451_v41 = vsel %vm6373_vm7, %v1391_v8, -inf  ;;  %vm5021_vm12 = vmand %vm4991_vm0, %vm1466_vm15  ;;  %v1450_v55 = vmax.f32 %v1446_v56, %v1449_v28 }
 0x18d   : > { %vm5029_vm11 = vmand %vm1464_vm4, %vm1467_vm10  ;;  %v1488_v3 = vsel %vm5021_vm12, %v4976_v27, -1e+30  ;;  %v1490_v58 = vsel %vm5021_vm12, %v4980_v49, -1e+30  ;;  %v1492_v48 = vsel %vm5021_vm12, %v4997_v44, -1e+30  ;;  %v1452_v33 = vmax.f32 %v1448_v20, %v1451_v41 }
 0x18e   : > { %v1489_v34 = vsel %vm5029_vm11, %v4978_v9, -1e+30  ;;  %v1491_v2 = vsel %vm5029_vm11, %v4995_v17, -1e+30  ;;  %v1493_v53 = vsel %vm5029_vm11, %v4999_v22, -1e+30  ;;  %vm6382_vm2 = vmmov %vm6346_vm1 }
 0x18f   : > { %v1494_v60 = vsel %vm5021_vm12, %v5006_v59, -1e+30  ;;  %v1495_v7 = vsel %vm5029_vm11, %v5008_v42, -1e+30  ;;  %v1453_v23 = vmax.f32 %v1450_v55, %v1452_v33  ;;  %v1496_v12 = vsel %vm5021_vm12, %v5010_v11, -1e+30  ;;  %vm6383_vm9 = vmmov %vm6346_vm1 }
 0x190   : > { %v1497_v47 = vsel %vm5029_vm11, %v5025_v15, -1e+30  ;;  %v1498_v39 = vsel %vm5021_vm12, %v5027_v13, -1e+30  ;;  %v1499_v14 = vsel %vm5029_vm11, %v5049_v21, -1e+30  ;;  %vm6384_vm13 = vmmov %vm6346_vm1 }
 0x191   : > { %v1502_v45 = vsel %vm6382_vm2, %v1488_v3, -inf  ;;  %v1503_v46 = vsel %vm6383_vm9, %v1489_v34, -inf  ;;  %v1511_v18 = vsel %vm6384_vm13, %v1490_v58, -inf  ;;  %vm6385_vm8 = vmmov %vm6346_vm1  ;;  %vm1572_vm2 = vcmask 1041409  }
 0x192   : > { %v5082_v25 = vld [vmem:[#allocation2 + $0x60] sm:$0xff]  ;;  %1456 = vst.msk [vmem:[#allocation2 + $0x68] sm:$0xff] %vm6385_vm8, %v1453_v23  ;;  %v1504_v40 = vmax.f32 %v1502_v45, %v1503_v46  ;;  %vm6386_vm6 = vmmov %vm6346_vm1  ;;  %vm1574_vm13 = vcmask 1042434   ;;  %vm1593_vm8 = vcmp.lt.s32.totalorder %v4972_v29, %v1592_v57 }
 0x193   : > { %v1500_v32 = vsel %vm5021_vm12, %v5082_v25, -1e+30  ;;  %v1512_v6 = vsel %vm6386_vm6, %v1491_v2, -inf  ;;  %vm6387_vm5 = vmmov %vm6346_vm1  ;;  %vm1576_vm6 = vcmask 1043459  }
 0x194   : > { %v1520_v8 = vsel %vm6387_vm5, %v1492_v48, -inf  ;;  %v1513_v4 = vmax.f32 %v1511_v18, %v1512_v6  ;;  %vm6388_vm0 = vmmov %vm6346_vm1  ;;  %v1505_v16 = vrot.slane %v1504_v40, 4 }
 0x195   : > { %v1521_v10 = vsel %vm6388_vm0, %v1493_v53, -inf  ;;  %vm6389_vm1 = vmmov %vm6388_vm0 }
 0x196   : > { %v1529_v54 = vsel %vm6389_vm1, %v1494_v60, -inf  ;;  %vm6390_vm7 = vmmov %vm6388_vm0  ;;  %v1522_v63 = vmax.f32 %v1520_v8, %v1521_v10  ;;  %v1514_v19 = vrot.slane %v1513_v4, 4  ;;  %v1506_v41 = vmax.f32 %v1504_v40, %v1505_v16 }
 0x197   : > { %v1530_v43 = vsel %vm6390_vm7, %v1495_v7, -inf  ;;  %vm6391_vm15 = vmmov %vm6388_vm0 }
 0x198   : > { %v1531_v31 = vmax.f32 %v1529_v54, %v1530_v43  ;;  %v1538_v1 = vsel %vm6391_vm15, %v1496_v12, -inf  ;;  %vm6392_vm4 = vmmov %vm6388_vm0  ;;  %v1523_v56 = vrot.slane %v1522_v63, 4  ;;  %v1515_v3 = vmax.f32 %v1513_v4, %v1514_v19 }
 0x199   : > { %v1539_v35 = vsel %vm6392_vm4, %v1497_v47, -inf  ;;  %vm6393_vm10 = vmmov %vm6388_vm0  ;;  %v1507_v55 = vrot.slane %v1506_v41, 2  ;;  %v5113_v60 = vld [vmem:[#allocation2 + $0x68] sm:$0xff]  ;;  %vm1580_vm15 = vcmask 1045509  }
 0x19a   : > { %v1547_v26 = vsel %vm6393_vm10, %v1498_v39, -inf  ;;  %vm6394_vm12 = vmmov %vm6388_vm0  ;;  %v1532_v20 = vrot.slane %v1531_v31, 4  ;;  %v1540_v36 = vmax.f32 %v1538_v1, %v1539_v35  ;;  %v1524_v33 = vmax.f32 %v1522_v63, %v1523_v56 }
 0x19b   : > { %v1548_v28 = vsel %vm6394_vm12, %v1499_v14, -inf  ;;  %vm6395_vm9 = vmmov %vm6388_vm0  ;;  %v1516_v7 = vrot.slane %v1515_v3, 2  ;;  %vm1594_vm0 = vcmp.lt.s32.totalorder %v4986_v50, %v1592_v57  ;;  %v1501_v47 = vsel %vm5029_vm11, %v5113_v60, -1e+30 }
 0x19c   : > { %v1549_v58 = vmax.f32 %v1547_v26, %v1548_v28  ;;  %v1556_v48 = vsel %vm6395_vm9, %v1500_v32, -inf  ;;  %v1533_v34 = vmax.f32 %v1531_v31, %v1532_v20  ;;  %v1541_v2 = vrot.slane %v1540_v36, 4  ;;  %vm5109_vm5 = vmand %vm5045_vm3, %vm1593_vm8 }
 0x19d   : > { %v1615_v12 = vsel %vm5109_vm5, %v4976_v27, -1e+30  ;;  %v1508_v38 = vmax.f32 %v1506_v41, %v1507_v55  ;;  %v1525_v39 = vrot.slane %v1524_v33, 2  ;;  %vm1578_vm3 = vcmask 1044484   ;;  %vm5126_vm1 = vmand %vm5069_vm14, %vm1594_vm0 }
 0x19e   : > { %v1550_v23 = vrot.slane %v1549_v58, 4  ;;  %v1534_v14 = vrot.slane %v1533_v34, 2  ;;  %v1517_v57 = vmax.f32 %v1515_v3, %v1516_v7  ;;  %v1542_v46 = vmax.f32 %v1540_v36, %v1541_v2  ;;  %vm6400_vm7 = vmmov %vm6392_vm4 }
 0x19f   : > { %v1557_v32 = vsel %vm6400_vm7, %v1501_v47, -inf  ;;  %v1509_v5 = vrot.slane %v1508_v38, 1  ;;  %v1526_v40 = vmax.f32 %v1524_v33, %v1525_v39  ;;  %v1616_v54 = vsel %vm5126_vm1, %v4978_v9, -1e+30  ;;  %vm6401_vm10 = vmmov %vm6392_vm4 }
 0x1a0   : > { %v1551_v18 = vmax.f32 %v1549_v58, %v1550_v23  ;;  %v1535_v6 = vmax.f32 %v1533_v34, %v1534_v14  ;;  %v1558_v8 = vmax.f32 %v1556_v48, %v1557_v32  ;;  %v1518_v4 = vrot.slane %v1517_v57, 1  ;;  %vm6402_vm12 = vmmov %vm6392_vm4 }
 0x1a1   : > { %v1543_v10 = vrot.slane %v1542_v46, 2  ;;  %v1510_v43 = vmax.f32 %v1508_v38, %v1509_v5  ;;  %v1527_v16 = vrot.slane %v1526_v40, 1  ;;  %vm1582_vm11 = vcmask 1046534   ;;  %vm6403_vm9 = vmmov %vm6392_vm4 }
 0x1a2   : > { %v1552_v24 = vrot.slane %v1551_v18, 2  ;;  %v1536_v63 = vrot.slane %v1535_v6, 1  ;;  %v1559_v31 = vrot.slane %v1558_v8, 4  ;;  %v1519_v1 = vmax.f32 %v1517_v57, %v1518_v4  ;;  %vm6404_vm8 = vmmov %vm6392_vm4 }
 0x1a3   : > { %v1544_v19 = vmax.f32 %v1542_v46, %v1543_v10  ;;  %v1617_v26 = vsel %vm5109_vm5, %v4980_v49, -1e+30  ;;  %v1528_v28 = vmax.f32 %v1526_v40, %v1527_v16  ;;  %vm5766_vm14 = vcmask 63488   ;;  %vm6406_vm0 = vmmov %vm6392_vm4 }
 0x1a4   : > { %v1553_v35 = vmax.f32 %v1551_v18, %v1552_v24  ;;  %v1537_v41 = vmax.f32 %v1535_v6, %v1536_v63  ;;  %v1560_v56 = vmax.f32 %v1558_v8, %v1559_v31  ;;  %v1618_v20 = vsel %vm5126_vm1, %v4995_v17, -1e+30  ;;  %vm6408_vm7 = vmmov %vm6406_vm0 }
 0x1a5   : > { %v1545_v36 = vrot.slane %v1544_v19, 1  ;;  %v1573_v58 = vsel %vm1572_vm2, %v1519_v1, %v1510_v43  ;;  %v1619_v48 = vsel %vm5109_vm5, %v4997_v44, -1e+30  ;;  %v1620_v34 = vsel %vm5126_vm1, %v4999_v22, -1e+30 }
 0x1a6   : > { %v1554_v3 = vrot.slane %v1553_v35, 1  ;;  %v1561_v55 = vrot.slane %v1560_v56, 2  ;;  %v1575_v33 = vsel %vm1574_vm13, %v1528_v28, %v1573_v58  ;;  %v1621_v2 = vsel %vm5109_vm5, %v5006_v59, -1e+30 }
 0x1a7   : > { %v1546_v7 = vmax.f32 %v1544_v19, %v1545_v36  ;;  %v1577_v47 = vsel %vm1576_vm6, %v1537_v41, %v1575_v33  ;;  %v1622_v38 = vsel %vm5126_vm1, %v5008_v42, -1e+30  ;;  %v1623_v14 = vsel %vm5109_vm5, %v5010_v11, -1e+30 }
 0x1a8   : > { %v1555_v23 = vmax.f32 %v1553_v35, %v1554_v3  ;;  %v1562_v39 = vmax.f32 %v1560_v56, %v1561_v55  ;;  %v1624_v57 = vsel %vm5126_vm1, %v5025_v15, -1e+30  ;;  %v1625_v46 = vsel %vm5109_vm5, %v5027_v13, -1e+30 }
 0x1a9   : > { %v1579_v18 = vsel %vm1578_vm3, %v1546_v7, %v1577_v47  ;;  %v1626_v32 = vsel %vm5126_vm1, %v5049_v21, -1e+30  ;;  %v1627_v5 = vsel %vm5109_vm5, %v5082_v25, -1e+30  ;;  %v1628_v40 = vsel %vm5126_vm1, %v5113_v60, -1e+30  ;;  %vm6405_vm5 = vmmov %vm6392_vm4 }
 0x1aa   : > { %v1563_v6 = vrot.slane %v1562_v39, 1  ;;  %v1581_v8 = vsel %vm1580_vm15, %v1555_v23, %v1579_v18  ;;  %v1629_v4 = vsel %vm6392_vm4, %v1615_v12, -inf  ;;  %v1630_v10 = vsel %vm6401_vm10, %v1616_v54, -inf  ;;  %vm6407_vm1 = vmmov %vm6406_vm0 }
 0x1ab   : > { %v1631_v24 = vmax.f32 %v1629_v4, %v1630_v10  ;;  %v1638_v43 = vsel %vm6402_vm12, %v1617_v26, -inf  ;;  %v1639_v16 = vsel %vm6403_vm9, %v1618_v20, -inf  ;;  %v1647_v63 = vsel %vm6404_vm8, %v1619_v48, -inf  ;;  %vm6409_vm4 = vmmov %vm6406_vm0 }
 0x1ac   : > { %v1564_v53 = vmax.f32 %v1562_v39, %v1563_v6  ;;  %v1640_v45 = vmax.f32 %v1638_v43, %v1639_v16  ;;  %v1648_v31 = vsel %vm6405_vm5, %v1620_v34, -inf  ;;  %v1656_v12 = vsel %vm6406_vm0, %v1621_v2, -inf  ;;  %vm6410_vm10 = vmmov %vm6406_vm0 }
 0x1ad   : > { %v1632_v54 = vrot.slane %v1631_v24, 4  ;;  %v1649_v1 = vmax.f32 %v1647_v63, %v1648_v31  ;;  %v1657_v19 = vsel %vm6407_vm1, %v1622_v38, -inf  ;;  %v1665_v35 = vsel %vm6408_vm7, %v1623_v14, -inf  ;;  %vm6411_vm12 = vmmov %vm6406_vm0 }
 0x1ae   : > { %v1583_v26 = vsel %vm1582_vm11, %v1564_v53, %v1581_v8  ;;  %v1641_v28 = vrot.slane %v1640_v45, 4  ;;  %v1658_v41 = vmax.f32 %v1656_v12, %v1657_v19  ;;  %v1666_v56 = vsel %vm6409_vm4, %v1624_v57, -inf  ;;  %vm6412_vm9 = vmmov %vm6406_vm0 }
 0x1af   : > { %1586 = vst.msk [vmem:[%s5190_s1] sm:$0x7f] %vm5766_vm14, %v1583_v26  ;;  %v1633_v20 = vmax.f32 %v1631_v24, %v1632_v54  ;;  %v1650_v36 = vrot.slane %v1649_v1, 4  ;;  %v1667_v3 = vmax.f32 %v1665_v35, %v1666_v56  ;;  %v1674_v58 = vsel %vm6410_vm10, %v1625_v46, -inf  ;;  %vm6413_vm8 = vmmov %vm6406_vm0 }
 0x1b0   : > { %v1642_v48 = vmax.f32 %v1640_v45, %v1641_v28  ;;  %v1659_v55 = vrot.slane %v1658_v41, 4  ;;  %v1675_v33 = vsel %vm6411_vm12, %v1626_v32, -inf  ;;  %v1683_v34 = vsel %vm6412_vm9, %v1627_v5, -inf  ;;  %vm6422_vm12 = vmmov %vm6413_vm8 }
 0x1b1   : > { %v1634_v2 = vrot.slane %v1633_v20, 2  ;;  %v1651_v7 = vmax.f32 %v1649_v1, %v1650_v36  ;;  %v1668_v23 = vrot.slane %v1667_v3, 4  ;;  %v1676_v47 = vmax.f32 %v1674_v58, %v1675_v33  ;;  %vm6423_vm9 = vmmov %vm6413_vm8 }
 0x1b2   : > { %v1643_v38 = vrot.slane %v1642_v48, 2  ;;  %v1660_v39 = vmax.f32 %v1658_v41, %v1659_v55  ;;  %v1684_v14 = vsel %vm6413_vm8, %v1628_v40, -inf  ;;  %vm5207_vm5 = vcmp.ge.s32.totalorder %v4972_v29, %v1709_v37 }
 0x1b3   : > { %v1635_v46 = vmax.f32 %v1633_v20, %v1634_v2  ;;  %v1652_v18 = vrot.slane %v1651_v7, 2  ;;  %v1669_v32 = vmax.f32 %v1667_v3, %v1668_v23  ;;  %v1677_v5 = vrot.slane %v1676_v47, 4 }
 0x1b4   : > { %v1644_v6 = vmax.f32 %v1642_v48, %v1643_v38  ;;  %v1661_v8 = vrot.slane %v1660_v39, 2  ;;  %v1685_v4 = vmax.f32 %v1683_v34, %v1684_v14  ;;  %vm5214_vm0 = vcmp.ge.s32.totalorder %v4986_v50, %v1709_v37 }
 0x1b5   : > { %v1636_v40 = vrot.slane %v1635_v46, 1  ;;  %v1653_v24 = vmax.f32 %v1651_v7, %v1652_v18  ;;  %v1670_v43 = vrot.slane %v1669_v32, 2  ;;  %v1678_v16 = vmax.f32 %v1676_v47, %v1677_v5 }
 0x1b6   : > { %v1645_v63 = vrot.slane %v1644_v6, 1  ;;  %v1662_v53 = vmax.f32 %v1660_v39, %v1661_v8  ;;  %v1686_v45 = vrot.slane %v1685_v4, 4  ;;  %vm1713_vm1 = vcmp.lt.s32.totalorder %v4972_v29, %v1712_v30 }
 0x1b7   : > { %v1637_v31 = vmax.f32 %v1635_v46, %v1636_v40  ;;  %v1654_v12 = vrot.slane %v1653_v24, 1  ;;  %v1671_v54 = vmax.f32 %v1669_v32, %v1670_v43  ;;  %v1679_v1 = vrot.slane %v1678_v16, 2  ;;  %vm5223_vm7 = vmand %vm5207_vm5, %vm1713_vm1 }
 0x1b8   : > { %v1646_v19 = vmax.f32 %v1644_v6, %v1645_v63  ;;  %v1663_v35 = vrot.slane %v1662_v53, 1  ;;  %v1687_v26 = vmax.f32 %v1685_v4, %v1686_v45  ;;  %vm1714_vm4 = vcmp.lt.s32.totalorder %v4986_v50, %v1712_v30  ;;  %vm6424_vm5 = vmmov %vm6413_vm8 }
 0x1b9   : > { %v1655_v28 = vmax.f32 %v1653_v24, %v1654_v12  ;;  %v1672_v41 = vrot.slane %v1671_v54, 1  ;;  %v1680_v56 = vmax.f32 %v1678_v16, %v1679_v1  ;;  %vm5232_vm10 = vmand %vm5214_vm0, %vm1714_vm4  ;;  %v1735_v36 = vsel %vm5223_vm7, %v4976_v27, -1e+30 }
 0x1ba   : > { %v1664_v3 = vmax.f32 %v1662_v53, %v1663_v35  ;;  %v1688_v58 = vrot.slane %v1687_v26, 2  ;;  %v1699_v48 = vsel %vm1572_vm2, %v1646_v19, %v1637_v31  ;;  %v1736_v30 = vsel %vm5232_vm10, %v4978_v9, -1e+30  ;;  %vm6425_vm0 = vmmov %vm6424_vm5 }
 0x1bb   : > { %v1673_v55 = vmax.f32 %v1671_v54, %v1672_v41  ;;  %v1681_v33 = vrot.slane %v1680_v56, 1  ;;  %v1700_v34 = vsel %vm1574_vm13, %v1655_v28, %v1699_v48  ;;  %v1737_v2 = vsel %vm5223_vm7, %v4980_v49, -1e+30  ;;  %vm6426_vm1 = vmmov %vm6425_vm0 }
 0x1bc   : > { %v1689_v7 = vmax.f32 %v1687_v26, %v1688_v58  ;;  %v1701_v23 = vsel %vm1576_vm6, %v1664_v3, %v1700_v34  ;;  %v1738_v47 = vsel %vm5232_vm10, %v4995_v17, -1e+30  ;;  %v1739_v38 = vsel %vm5223_vm7, %v4997_v44, -1e+30  ;;  %vm6427_vm4 = vmmov %vm6425_vm0 }
 0x1bd   : > { %v1682_v39 = vmax.f32 %v1680_v56, %v1681_v33  ;;  %v1702_v14 = vsel %vm1578_vm3, %v1673_v55, %v1701_v23  ;;  %v1740_v57 = vsel %vm5232_vm10, %v4999_v22, -1e+30  ;;  %v1741_v46 = vsel %vm5223_vm7, %v5006_v59, -1e+30 }
 0x1be   : > { %v1690_v18 = vrot.slane %v1689_v7, 1  ;;  %v1742_v32 = vsel %vm5232_vm10, %v5008_v42, -1e+30  ;;  %v1743_v5 = vsel %vm5223_vm7, %v5010_v11, -1e+30  ;;  %v1749_v6 = vsel %vm6422_vm12, %v1735_v36, -inf  ;;  %vm6430_vm12 = vmmov %vm6425_vm0 }
 0x1bf   : > { %v1703_v8 = vsel %vm1580_vm15, %v1682_v39, %v1702_v14  ;;  %v1744_v4 = vsel %vm5232_vm10, %v5025_v15, -1e+30  ;;  %v1745_v10 = vsel %vm5223_vm7, %v5027_v13, -1e+30  ;;  %v1746_v40 = vsel %vm5232_vm10, %v5049_v21, -1e+30 }
 0x1c0   : > { %v1691_v24 = vmax.f32 %v1689_v7, %v1690_v18  ;;  %v1747_v43 = vsel %vm5223_vm7, %v5082_v25, -1e+30  ;;  %v1748_v16 = vsel %vm5232_vm10, %v5113_v60, -1e+30  ;;  %v1750_v63 = vsel %vm6423_vm9, %v1736_v30, -inf  ;;  %vm6428_vm7 = vmmov %vm6425_vm0 }
 0x1c1   : > { %v1751_v53 = vmax.f32 %v1749_v6, %v1750_v63  ;;  %v1758_v45 = vsel %vm6413_vm8, %v1737_v2, -inf  ;;  %v1759_v31 = vsel %vm6424_vm5, %v1738_v47, -inf  ;;  %v1767_v12 = vsel %vm6425_vm0, %v1739_v38, -inf  ;;  %vm6429_vm10 = vmmov %vm6425_vm0 }
 0x1c2   : > { %v1704_v54 = vsel %vm1582_vm11, %v1691_v24, %v1703_v8  ;;  %v1760_v1 = vmax.f32 %v1758_v45, %v1759_v31  ;;  %v1768_v19 = vsel %vm6426_vm1, %v1740_v57, -inf  ;;  %v1776_v37 = vsel %vm6427_vm4, %v1741_v46, -inf  ;;  %vm6431_vm9 = vmmov %vm6425_vm0 }
 0x1c3   : > { %1706 = vst.msk [vmem:[%s5190_s1 + $0x7] sm:$0x7f] %vm5766_vm14, %v1704_v54  ;;  %v1752_v35 = vrot.slane %v1751_v53, 4  ;;  %v1769_v26 = vmax.f32 %v1767_v12, %v1768_v19  ;;  %v1777_v28 = vsel %vm6428_vm7, %v1742_v32, -inf  ;;  %v1785_v41 = vsel %vm6429_vm10, %v1743_v5, -inf  ;;  %vm6432_vm8 = vmmov %vm6425_vm0 }
 0x1c4   : > { %v1761_v56 = vrot.slane %v1760_v1, 4  ;;  %v1778_v20 = vmax.f32 %v1776_v37, %v1777_v28  ;;  %v1786_v36 = vsel %vm6430_vm12, %v1744_v4, -inf  ;;  %v1794_v3 = vsel %vm6431_vm9, %v1745_v10, -inf  ;;  %vm6433_vm5 = vmmov %vm6425_vm0 }
 0x1c5   : > { %v1753_v58 = vmax.f32 %v1751_v53, %v1752_v35  ;;  %v1770_v48 = vrot.slane %v1769_v26, 4  ;;  %v1787_v30 = vmax.f32 %v1785_v41, %v1786_v36  ;;  %v1795_v55 = vsel %vm6432_vm8, %v1746_v40, -inf }
 0x1c6   : > { %v1762_v33 = vmax.f32 %v1760_v1, %v1761_v56  ;;  %v1779_v34 = vrot.slane %v1778_v20, 4  ;;  %v1796_v2 = vmax.f32 %v1794_v3, %v1795_v55  ;;  %v1803_v7 = vsel %vm6433_vm5, %v1747_v43, -inf  ;;  %vm6444_vm5 = vmmov %vm6425_vm0 }
 0x1c7   : > { %v1754_v23 = vrot.slane %v1753_v58, 2  ;;  %v1771_v47 = vmax.f32 %v1769_v26, %v1770_v48  ;;  %v1788_v38 = vrot.slane %v1787_v30, 4  ;;  %v1804_v39 = vsel %vm6425_vm0, %v1748_v16, -inf }
 0x1c8   : > { %v1763_v14 = vrot.slane %v1762_v33, 2  ;;  %v1780_v57 = vmax.f32 %v1778_v20, %v1779_v34  ;;  %v1797_v46 = vrot.slane %v1796_v2, 4  ;;  %v1805_v18 = vmax.f32 %v1803_v7, %v1804_v39 }
 0x1c9   : > { %v1755_v32 = vmax.f32 %v1753_v58, %v1754_v23  ;;  %v1772_v5 = vrot.slane %v1771_v47, 2  ;;  %v1789_v6 = vmax.f32 %v1787_v30, %v1788_v38  ;;  %vm5303_vm1 = vcmp.ge.s32.totalorder %v4972_v29, %v1829_v0 }
 0x1ca   : > { %v1764_v4 = vmax.f32 %v1762_v33, %v1763_v14  ;;  %v1781_v10 = vrot.slane %v1780_v57, 2  ;;  %v1798_v40 = vmax.f32 %v1796_v2, %v1797_v46  ;;  %v1806_v24 = vrot.slane %v1805_v18, 4 }
 0x1cb   : > { %v1756_v43 = vrot.slane %v1755_v32, 1  ;;  %v1773_v16 = vmax.f32 %v1771_v47, %v1772_v5  ;;  %v1790_v63 = vrot.slane %v1789_v6, 2  ;;  %vm5310_vm4 = vcmp.ge.s32.totalorder %v4986_v50, %v1829_v0 }
 0x1cc   : > { %v1765_v45 = vrot.slane %v1764_v4, 1  ;;  %v1782_v31 = vmax.f32 %v1780_v57, %v1781_v10  ;;  %v1799_v12 = vrot.slane %v1798_v40, 2  ;;  %v1807_v54 = vmax.f32 %v1805_v18, %v1806_v24 }
 0x1cd   : > { %v1757_v1 = vmax.f32 %v1755_v32, %v1756_v43  ;;  %v1774_v19 = vrot.slane %v1773_v16, 1  ;;  %v1791_v37 = vmax.f32 %v1789_v6, %v1790_v63  ;;  %vm1833_vm7 = vcmp.lt.s32.totalorder %v4972_v29, %v1832_v52 }
 0x1ce   : > { %v1766_v35 = vmax.f32 %v1764_v4, %v1765_v45  ;;  %v1783_v26 = vrot.slane %v1782_v31, 1  ;;  %v1800_v28 = vmax.f32 %v1798_v40, %v1799_v12  ;;  %v1808_v41 = vrot.slane %v1807_v54, 2  ;;  %vm5319_vm10 = vmand %vm5303_vm1, %vm1833_vm7 }
 0x1cf   : > { %v1775_v56 = vmax.f32 %v1773_v16, %v1774_v19  ;;  %v1792_v20 = vrot.slane %v1791_v37, 1  ;;  %vm1834_vm12 = vcmp.lt.s32.totalorder %v4986_v50, %v1832_v52  ;;  %v1855_v36 = vsel %vm5319_vm10, %v4976_v27, -1e+30  ;;  %vm6445_vm1 = vmmov %vm6425_vm0 }
 0x1d0   : > { %v1784_v3 = vmax.f32 %v1782_v31, %v1783_v26  ;;  %v1801_v58 = vrot.slane %v1800_v28, 1  ;;  %v1809_v48 = vmax.f32 %v1807_v54, %v1808_v41  ;;  %v1819_v30 = vsel %vm1572_vm2, %v1766_v35, %v1757_v1  ;;  %vm5332_vm9 = vmand %vm5310_vm4, %vm1834_vm12 }
 0x1d1   : > { %v1793_v33 = vmax.f32 %v1791_v37, %v1792_v20  ;;  %v1820_v34 = vsel %vm1574_vm13, %v1775_v56, %v1819_v30  ;;  %v1856_v52 = vsel %vm5332_vm9, %v4978_v9, -1e+30  ;;  %v1857_v2 = vsel %vm5319_vm10, %v4980_v49, -1e+30  ;;  %vm6446_vm4 = vmmov %vm6425_vm0 }
 0x1d2   : > { %v1802_v7 = vmax.f32 %v1800_v28, %v1801_v58  ;;  %v1810_v23 = vrot.slane %v1809_v48, 1  ;;  %v1821_v47 = vsel %vm1576_vm6, %v1784_v3, %v1820_v34  ;;  %v1858_v38 = vsel %vm5332_vm9, %v4995_v17, -1e+30  ;;  %vm6447_vm7 = vmmov %vm6425_vm0 }
 0x1d3   : > { %v1822_v39 = vsel %vm1578_vm3, %v1793_v33, %v1821_v47  ;;  %v1859_v14 = vsel %vm5319_vm10, %v4997_v44, -1e+30  ;;  %v1860_v57 = vsel %vm5332_vm9, %v4999_v22, -1e+30  ;;  %v1861_v46 = vsel %vm5319_vm10, %v5006_v59, -1e+30  ;;  %vm6448_vm12 = vmmov %vm6425_vm0 }
 0x1d4   : > { %v1811_v18 = vmax.f32 %v1809_v48, %v1810_v23  ;;  %v1823_v32 = vsel %vm1580_vm15, %v1802_v7, %v1822_v39  ;;  %v1862_v5 = vsel %vm5332_vm9, %v5008_v42, -1e+30  ;;  %v1863_v6 = vsel %vm5319_vm10, %v5010_v11, -1e+30 }
 0x1d5   : > { %v1864_v8 = vsel %vm5332_vm9, %v5025_v15, -1e+30  ;;  %v1865_v4 = vsel %vm5319_vm10, %v5027_v13, -1e+30  ;;  %v1866_v10 = vsel %vm5332_vm9, %v5049_v21, -1e+30  ;;  %vm5376_vm8 = vcmp.ge.s32.totalorder %v4972_v29, %v1949_v61 }
 0x1d6   : > { %v1824_v24 = vsel %vm1582_vm11, %v1811_v18, %v1823_v32  ;;  %v1867_v43 = vsel %vm5319_vm10, %v5082_v25, -1e+30  ;;  %v1868_v16 = vsel %vm5332_vm9, %v5113_v60, -1e+30  ;;  %v1869_v63 = vsel %vm6444_vm5, %v1855_v36, -inf  ;;  %vm6449_vm10 = vmmov %vm6425_vm0 }
 0x1d7   : > { %1826 = vst.msk [vmem:[%s5190_s1 + $0xe] sm:$0x7f] %vm5766_vm14, %v1824_v24  ;;  %v1870_v53 = vsel %vm6425_vm0, %v1856_v52, -inf  ;;  %v1878_v45 = vsel %vm6445_vm1, %v1857_v2, -inf  ;;  %v1879_v31 = vsel %vm6446_vm4, %v1858_v38, -inf  ;;  %v1887_v12 = vsel %vm6447_vm7, %v1859_v14, -inf  ;;  %vm6450_vm9 = vmmov %vm6425_vm0 }
 0x1d8   : > { %v1871_v54 = vmax.f32 %v1869_v63, %v1870_v53  ;;  %v1880_v1 = vmax.f32 %v1878_v45, %v1879_v31  ;;  %v1888_v19 = vsel %vm6448_vm12, %v1860_v57, -inf  ;;  %v1896_v37 = vsel %vm6449_vm10, %v1861_v46, -inf  ;;  %vm6451_vm5 = vmmov %vm6425_vm0 }
 0x1d9   : > { %v1889_v35 = vmax.f32 %v1887_v12, %v1888_v19  ;;  %v1897_v26 = vsel %vm6450_vm9, %v1862_v5, -inf  ;;  %v1905_v28 = vsel %vm6451_vm5, %v1863_v6, -inf  ;;  %vm6452_vm14 = vmmov %vm6425_vm0  ;;  %v1914_v58 = vsel %vm6425_vm0, %v1865_v4, -inf }
 0x1da   : > { %v1906_v41 = vsel %vm6452_vm14, %v1864_v8, -inf  ;;  %v1872_v0 = vrot.slane %v1871_v54, 4  ;;  %v1881_v56 = vrot.slane %v1880_v1, 4  ;;  %v1898_v20 = vmax.f32 %v1896_v37, %v1897_v26  ;;  %vm6453_vm1 = vmmov %vm6425_vm0 }
 0x1db   : > { %v1907_v36 = vmax.f32 %v1905_v28, %v1906_v41  ;;  %v1890_v3 = vrot.slane %v1889_v35, 4  ;;  %v1915_v48 = vsel %vm6453_vm1, %v1866_v10, -inf  ;;  %vm6454_vm4 = vmmov %vm6425_vm0  ;;  %vm5406_vm7 = vcmp.ge.s32.totalorder %v4986_v50, %v1949_v61 }
 0x1dc   : > { %v1923_v30 = vsel %vm6454_vm4, %v1867_v43, -inf  ;;  %v1873_v55 = vmax.f32 %v1871_v54, %v1872_v0  ;;  %v1882_v33 = vmax.f32 %v1880_v1, %v1881_v56  ;;  %v1899_v34 = vrot.slane %v1898_v20, 4  ;;  %vm6455_vm14 = vmmov %vm6425_vm0 }
 0x1dd   : > { %v1908_v52 = vrot.slane %v1907_v36, 4  ;;  %v1891_v2 = vmax.f32 %v1889_v35, %v1890_v3  ;;  %v1916_v7 = vmax.f32 %v1914_v58, %v1915_v48  ;;  %v1924_v23 = vsel %vm6455_vm14, %v1868_v16, -inf  ;;  %vm6463_vm1 = vmmov %vm6425_vm0 }
 0x1de   : > { %v1874_v38 = vrot.slane %v1873_v55, 2  ;;  %v1883_v39 = vrot.slane %v1882_v33, 2  ;;  %v1900_v14 = vmax.f32 %v1898_v20, %v1899_v34  ;;  %v1925_v32 = vmax.f32 %v1923_v30, %v1924_v23  ;;  %vm6466_vm14 = vmmov %vm6425_vm0 }
 0x1df   : > { %v1909_v57 = vmax.f32 %v1907_v36, %v1908_v52  ;;  %v1892_v46 = vrot.slane %v1891_v2, 2  ;;  %v1917_v18 = vrot.slane %v1916_v7, 4  ;;  %vm1953_vm12 = vcmp.lt.s32.totalorder %v4972_v29, %v1952_v62 }
 0x1e0   : > { %v1875_v5 = vmax.f32 %v1873_v55, %v1874_v38  ;;  %v1884_v6 = vmax.f32 %v1882_v33, %v1883_v39  ;;  %v1901_v8 = vrot.slane %v1900_v14, 2  ;;  %vm5415_vm10 = vmand %vm5376_vm8, %vm1953_vm12  ;;  %v1926_v43 = vrot.slane %v1925_v32, 4 }
 0x1e1   : > { %v1910_v4 = vrot.slane %v1909_v57, 2  ;;  %v1893_v10 = vmax.f32 %v1891_v2, %v1892_v46  ;;  %v1918_v24 = vmax.f32 %v1916_v7, %v1917_v18  ;;  %vm1954_vm9 = vcmp.lt.s32.totalorder %v4986_v50, %v1952_v62  ;;  %vm6462_vm8 = vmmov %vm6425_vm0 }
 0x1e2   : > { %v1876_v16 = vrot.slane %v1875_v5, 1  ;;  %v1885_v63 = vrot.slane %v1884_v6, 1  ;;  %v1902_v53 = vmax.f32 %v1900_v14, %v1901_v8  ;;  %vm5424_vm5 = vmand %vm5406_vm7, %vm1954_vm9  ;;  %v1927_v54 = vmax.f32 %v1925_v32, %v1926_v43 }
 0x1e3   : > { %v1911_v45 = vmax.f32 %v1909_v57, %v1910_v4  ;;  %v1894_v40 = vrot.slane %v1893_v10, 1  ;;  %v1919_v12 = vrot.slane %v1918_v24, 2  ;;  %v1975_v1 = vsel %vm5415_vm10, %v4976_v27, -1e+30  ;;  %vm6467_vm7 = vmmov %vm6425_vm0 }
 0x1e4   : > { %v1877_v62 = vmax.f32 %v1875_v5, %v1876_v16  ;;  %v1886_v19 = vmax.f32 %v1884_v6, %v1885_v63  ;;  %v1903_v37 = vrot.slane %v1902_v53, 1  ;;  %v1928_v41 = vrot.slane %v1927_v54, 2  ;;  %vm6470_vm9 = vmmov %vm6425_vm0 }
 0x1e5   : > { %v1912_v35 = vrot.slane %v1911_v45, 1  ;;  %v1895_v26 = vmax.f32 %v1893_v10, %v1894_v40  ;;  %v1920_v28 = vmax.f32 %v1918_v24, %v1919_v12  ;;  %v1976_v0 = vsel %vm5424_vm5, %v4978_v9, -1e+30 }
 0x1e6   : > { %v1904_v56 = vmax.f32 %v1902_v53, %v1903_v37  ;;  %v1939_v36 = vsel %vm1572_vm2, %v1886_v19, %v1877_v62  ;;  %v1977_v3 = vsel %vm5415_vm10, %v4980_v49, -1e+30  ;;  %v1929_v58 = vmax.f32 %v1927_v54, %v1928_v41 }
 0x1e7   : > { %v1913_v20 = vmax.f32 %v1911_v45, %v1912_v35  ;;  %v1921_v27 = vrot.slane %v1920_v28, 1  ;;  %v1940_v48 = vsel %vm1574_vm13, %v1895_v26, %v1939_v36  ;;  %v1978_v30 = vsel %vm5424_vm5, %v4995_v17, -1e+30 }
 0x1e8   : > { %v1941_v55 = vsel %vm1576_vm6, %v1904_v56, %v1940_v48  ;;  %v1979_v9 = vsel %vm5415_vm10, %v4997_v44, -1e+30  ;;  %v1980_v33 = vsel %vm5424_vm5, %v4999_v22, -1e+30  ;;  %v1981_v49 = vsel %vm5415_vm10, %v5006_v59, -1e+30 }
 0x1e9   : > { %v1922_v34 = vmax.f32 %v1920_v28, %v1921_v27  ;;  %v1930_v52 = vrot.slane %v1929_v58, 1  ;;  %v1942_v2 = vsel %vm1578_vm3, %v1913_v20, %v1941_v55  ;;  %v1982_v17 = vsel %vm5424_vm5, %v5008_v42, -1e+30 }
 0x1ea   : > { %v1983_v44 = vsel %vm5415_vm10, %v5010_v11, -1e+30  ;;  %v1984_v22 = vsel %vm5424_vm5, %v5025_v15, -1e+30  ;;  %v1985_v59 = vsel %vm5415_vm10, %v5027_v13, -1e+30  ;;  %v2072_v7 = vstv %s5429_s30 }
 0x1eb   : > { %v1931_v23 = vmax.f32 %v1929_v58, %v1930_v52  ;;  %v1943_v47 = vsel %vm1580_vm15, %v1922_v34, %v1942_v2  ;;  %v1986_v42 = vsel %vm5424_vm5, %v5049_v21, -1e+30  ;;  %v1987_v11 = vsel %vm5415_vm10, %v5082_v25, -1e+30  ;;  %vm6469_vm10 = vmmov %vm6425_vm0 }
 0x1ec   : > { %v1988_v15 = vsel %vm5424_vm5, %v5113_v60, -1e+30  ;;  %v1989_v38 = vsel %vm6462_vm8, %v1975_v1, -inf  ;;  %v1990_v13 = vsel %vm6425_vm0, %v1976_v0, -inf  ;;  %v1998_v39 = vsel %vm6463_vm1, %v1977_v3, -inf  ;;  %vm6471_vm5 = vmmov %vm6425_vm0 }
 0x1ed   : > { %vm5485_vm4 = vcmp.ge.s32.totalorder %v4972_v29, %v2069_v51  ;;  %v1944_v21 = vsel %vm1582_vm11, %v1931_v23, %v1943_v47  ;;  %v1991_v57 = vmax.f32 %v1989_v38, %v1990_v13  ;;  %v1999_v25 = vsel %vm6466_vm14, %v1978_v30, -inf  ;;  %vm6472_vm8 = vmmov %vm6425_vm0  ;;  %v5535_v13 = vld [vmem:[#allocation2 + $0x20] sm:$0xff] }
 0x1ee   : > { %v2007_v46 = vsel %vm6467_vm7, %v1979_v9, -inf  ;;  %vm6468_vm12 = vcmask 63488   ;;  %v2000_v60 = vmax.f32 %v1998_v39, %v1999_v25  ;;  %v2008_v18 = vsel %vm6469_vm10, %v1980_v33, -inf  ;;  %vm6473_vm1 = vmmov %vm6425_vm0  ;;  %v5540_v25 = vld [vmem:[#allocation2 + $0x28] sm:$0xff] }
 0x1ef   : > { %1946 = vst.msk [vmem:[%s5190_s1 + $0x15] sm:$0x7f] %vm6468_vm12, %v1944_v21  ;;  %v2016_v32 = vsel %vm6470_vm9, %v1981_v49, -inf  ;;  %v2017_v5 = vsel %vm6471_vm5, %v1982_v17, -inf  ;;  %v1992_v6 = vrot.slane %v1991_v57, 4  ;;  %v2009_v8 = vmax.f32 %v2007_v46, %v2008_v18  ;;  %vm6474_vm14 = vmmov %vm6425_vm0  ;;  %v5517_v49 = vld [vmem:[#allocation2] sm:$0xff] }
 0x1f0   : > { %v2018_v4 = vmax.f32 %v2016_v32, %v2017_v5  ;;  %v2025_v61 = vsel %vm6472_vm8, %v1983_v44, -inf  ;;  %v2001_v10 = vrot.slane %v2000_v60, 4  ;;  %v2026_v24 = vsel %vm6425_vm0, %v1984_v22, -inf  ;;  %vm6475_vm7 = vmmov %vm6425_vm0  ;;  %v5520_v17 = vld [vmem:[#allocation2 + $0x8] sm:$0xff]  ;;  %v5546_v5 = vld [vmem:[#allocation2 + $0x30] sm:$0xff] }
 0x1f1   : > { %v2034_v43 = vsel %vm6473_vm1, %v1985_v59, -inf  ;;  %v2035_v16 = vsel %vm6474_vm14, %v1986_v42, -inf  ;;  %v1993_v63 = vmax.f32 %v1991_v57, %v1992_v6  ;;  %v2010_v53 = vrot.slane %v2009_v8, 4  ;;  %vm6476_vm12 = vmmov %vm6425_vm0  ;;  %v5528_v42 = vld [vmem:[#allocation2 + $0x10] sm:$0xff]  ;;  %v5548_v6 = vld [vmem:[#allocation2 + $0x38] sm:$0xff] }
 0x1f2   : > { %v2019_v45 = vrot.slane %v2018_v4, 4  ;;  %v2027_v31 = vmax.f32 %v2025_v61, %v2026_v24  ;;  %v2002_v40 = vmax.f32 %v2000_v60, %v2001_v10  ;;  %v2036_v12 = vmax.f32 %v2034_v43, %v2035_v16  ;;  %v5556_v24 = vld [vmem:[#allocation2 + $0x48] sm:$0xff]  ;;  %v5558_v43 = vld [vmem:[#allocation2 + $0x50] sm:$0xff]  ;;  %vm6484_vm14 = vmmov %vm6473_vm1 }
 0x1f3   : > { %v2043_v54 = vsel %vm6475_vm7, %v1987_v11, -inf  ;;  %v2044_v1 = vsel %vm6476_vm12, %v1988_v15, -inf  ;;  %v1994_v62 = vrot.slane %v1993_v63, 2  ;;  %v2011_v19 = vmax.f32 %v2009_v8, %v2010_v53  ;;  %v5550_v8 = vld [vmem:[#allocation2 + $0x40] sm:$0xff]  ;;  %vm6486_vm12 = vmmov %vm6473_vm1 }
 0x1f4   : > { %v2020_v37 = vmax.f32 %v2018_v4, %v2019_v45  ;;  %v2028_v35 = vrot.slane %v2027_v31, 4  ;;  %v2003_v26 = vrot.slane %v2002_v40, 2  ;;  %v2037_v28 = vrot.slane %v2036_v12, 4 }
 0x1f5   : > { %v2045_v41 = vmax.f32 %v2043_v54, %v2044_v1  ;;  %vm5506_vm10 = vcmp.ge.s32.totalorder %v4986_v50, %v2069_v51  ;;  %v1995_v56 = vmax.f32 %v1993_v63, %v1994_v62  ;;  %v2012_v20 = vrot.slane %v2011_v19, 2  ;;  %v5571_v54 = vld [vmem:[#allocation2 + $0x68] sm:$0xff] }
 0x1f6   : > { %v2021_v36 = vrot.slane %v2020_v37, 2  ;;  %v2029_v3 = vmax.f32 %v2027_v31, %v2028_v35  ;;  %v2004_v27 = vmax.f32 %v2002_v40, %v2003_v26  ;;  %v2038_v58 = vmax.f32 %v2036_v12, %v2037_v28  ;;  %v5567_v40 = vld [vmem:[#allocation2 + $0x58] sm:$0xff]  ;;  %v5569_v12 = vld [vmem:[#allocation2 + $0x60] sm:$0xff] }
 0x1f7   : > { %v2046_v48 = vrot.slane %v2045_v41, 4  ;;  %vm2073_vm9 = vcmp.lt.s32.totalorder %v4972_v29, %v2072_v7  ;;  %v1996_v30 = vrot.slane %v1995_v56, 1  ;;  %v2013_v55 = vmax.f32 %v2011_v19, %v2012_v20 }
 0x1f8   : > { %v2022_v9 = vmax.f32 %v2020_v37, %v2021_v36  ;;  %v2030_v33 = vrot.slane %v2029_v3, 2  ;;  %vm5513_vm5 = vmand %vm5485_vm4, %vm2073_vm9  ;;  %v2005_v34 = vrot.slane %v2004_v27, 1  ;;  %v2039_v52 = vrot.slane %v2038_v58, 2 }
 0x1f9   : > { %v2047_v2 = vmax.f32 %v2045_v41, %v2046_v48  ;;  %vm2074_vm8 = vcmp.lt.s32.totalorder %v4986_v50, %v2072_v7  ;;  %v1997_v44 = vmax.f32 %v1995_v56, %v1996_v30  ;;  %v2014_v22 = vrot.slane %v2013_v55, 1  ;;  %v5533_v7 = vld [vmem:[#allocation2 + $0x18] sm:$0xff]  ;;  %vm6483_vm4 = vmmov %vm6473_vm1 }
 0x1fa   : > { %v2023_v59 = vrot.slane %v2022_v9, 1  ;;  %v2031_v23 = vmax.f32 %v2029_v3, %v2030_v33  ;;  %vm5524_vm0 = vmand %vm5506_vm10, %vm2074_vm8  ;;  %v2006_v11 = vmax.f32 %v2004_v27, %v2005_v34  ;;  %v2040_v15 = vmax.f32 %v2038_v58, %v2039_v52 }
 0x1fb   : > { %v2048_v38 = vrot.slane %v2047_v2, 2  ;;  %v2095_v39 = vsel %vm5513_vm5, %v5517_v49, -1e+30  ;;  %v2015_v14 = vmax.f32 %v2013_v55, %v2014_v22  ;;  %v2096_v46 = vsel %vm5524_vm0, %v5520_v17, -1e+30  ;;  %vm6487_vm10 = vmmov %vm6473_vm1 }
 0x1fc   : > { %v2024_v21 = vmax.f32 %v2022_v9, %v2023_v59  ;;  %v2032_v57 = vrot.slane %v2031_v23, 1  ;;  %v2041_v60 = vrot.slane %v2040_v15, 1  ;;  %v2059_v32 = vsel %vm1572_vm2, %v2006_v11, %v1997_v44  ;;  %vm6488_vm9 = vmmov %vm6473_vm1 }
 0x1fd   : > { %v2049_v18 = vmax.f32 %v2047_v2, %v2048_v38  ;;  %v2097_v4 = vsel %vm5513_vm5, %v5528_v42, -1e+30  ;;  %v2060_v10 = vsel %vm1574_vm13, %v2015_v14, %v2059_v32  ;;  %v2098_v16 = vsel %vm5524_vm0, %v5533_v7, -1e+30  ;;  %vm6490_vm8 = vmmov %vm6473_vm1 }
 0x1fe   : > { %v2033_v61 = vmax.f32 %v2031_v23, %v2032_v57  ;;  %v2099_v63 = vsel %vm5513_vm5, %v5535_v13, -1e+30  ;;  %v2042_v53 = vmax.f32 %v2040_v15, %v2041_v60  ;;  %v2061_v31 = vsel %vm1576_vm6, %v2024_v21, %v2060_v10 }
 0x1ff   : > { %v2050_v45 = vrot.slane %v2049_v18, 1  ;;  %v2100_v1 = vsel %vm5524_vm0, %v5540_v25, -1e+30  ;;  %v2101_v19 = vsel %vm5513_vm5, %v5546_v5, -1e+30  ;;  %v2189_v3 = vstv %s5531_s7 }
 0x200   : > { %v2062_v62 = vsel %vm1578_vm3, %v2033_v61, %v2061_v31  ;;  %v2102_v37 = vsel %vm5524_vm0, %v5548_v6, -1e+30  ;;  %v2103_v35 = vsel %vm5513_vm5, %v5550_v8, -1e+30  ;;  %v2104_v41 = vsel %vm5524_vm0, %v5556_v24, -1e+30 }
 0x201   : > { %v2051_v26 = vmax.f32 %v2049_v18, %v2050_v45  ;;  %v2063_v28 = vsel %vm1580_vm15, %v2042_v53, %v2062_v62  ;;  %v2105_v0 = vsel %vm5513_vm5, %v5558_v43, -1e+30  ;;  %v2106_v56 = vsel %vm5524_vm0, %v5567_v40, -1e+30 }
 0x202   : > { %v2107_v20 = vsel %vm5513_vm5, %v5569_v12, -1e+30  ;;  %v2108_v36 = vsel %vm5524_vm0, %v5571_v54, -1e+30  ;;  %v2109_v58 = vsel %vm6483_vm4, %v2095_v39, -inf  ;;  %v2110_v48 = vsel %vm6473_vm1, %v2096_v46, -inf  ;;  %vm6489_vm5 = vmmov %vm6473_vm1 }
 0x203   : > { %v2064_v27 = vsel %vm1582_vm11, %v2051_v26, %v2063_v28  ;;  %v2118_v30 = vsel %vm6484_vm14, %v2097_v4, -inf  ;;  %vm6485_vm7 = vcmask 63488   ;;  %v2111_v55 = vmax.f32 %v2109_v58, %v2110_v48  ;;  %vm6491_vm0 = vmmov %vm6473_vm1 }
 0x204   : > { %2066 = vst.msk [vmem:[%s5190_s1 + $0x1c] sm:$0x7f] %vm6485_vm7, %v2064_v27  ;;  %v2119_v9 = vsel %vm6486_vm12, %v2098_v16, -inf  ;;  %v2127_v33 = vsel %vm6487_vm10, %v2099_v63, -inf  ;;  %v2128_v51 = vsel %vm6488_vm9, %v2100_v1, -inf  ;;  %v2136_v2 = vsel %vm6489_vm5, %v2101_v19, -inf  ;;  %vm6492_vm4 = vmmov %vm6491_vm0 }
 0x205   : > { %v2120_v34 = vmax.f32 %v2118_v30, %v2119_v9  ;;  %v2129_v52 = vmax.f32 %v2127_v33, %v2128_v51  ;;  %v2137_v44 = vsel %vm6490_vm8, %v2102_v37, -inf  ;;  %v2112_v22 = vrot.slane %v2111_v55, 4  ;;  %vm6493_vm1 = vmmov %vm6491_vm0 }
 0x206   : > { %v2138_v59 = vmax.f32 %v2136_v2, %v2137_v44  ;;  %v2145_v23 = vsel %vm6491_vm0, %v2103_v35, -inf  ;;  %v2146_v47 = vsel %vm6492_vm4, %v2104_v41, -inf  ;;  %v2154_v39 = vsel %vm6493_vm1, %v2105_v0, -inf  ;;  %vm6494_vm14 = vmmov %vm6491_vm0 }
 0x207   : > { %v2121_v11 = vrot.slane %v2120_v34, 4  ;;  %v2130_v15 = vrot.slane %v2129_v52, 4  ;;  %v2147_v38 = vmax.f32 %v2145_v23, %v2146_v47  ;;  %v2113_v14 = vmax.f32 %v2111_v55, %v2112_v22  ;;  %vm6495_vm7 = vmmov %vm6491_vm0 }
 0x208   : > { %v2139_v21 = vrot.slane %v2138_v59, 4  ;;  %v2155_v57 = vsel %vm6494_vm14, %v2106_v56, -inf  ;;  %v2163_v46 = vsel %vm6495_vm7, %v2107_v20, -inf  ;;  %vm6496_vm12 = vmmov %vm6491_vm0  ;;  %vm5624_vm10 = vcmp.ge.s32.totalorder %v4972_v29, %v2189_v3 }
 0x209   : > { %v2122_v60 = vmax.f32 %v2120_v34, %v2121_v11  ;;  %v2131_v18 = vmax.f32 %v2129_v52, %v2130_v15  ;;  %v2148_v32 = vrot.slane %v2147_v38, 4  ;;  %v2156_v4 = vmax.f32 %v2154_v39, %v2155_v57  ;;  %vm6505_vm14 = vmmov %vm6493_vm1 }
 0x20a   : > { %v2114_v61 = vrot.slane %v2113_v14, 2  ;;  %v2140_v10 = vmax.f32 %v2138_v59, %v2139_v21  ;;  %v2164_v16 = vsel %vm6496_vm12, %v2108_v36, -inf  ;;  %vm5629_vm9 = vcmp.ge.s32.totalorder %v4986_v50, %v2189_v3  ;;  %vm6506_vm7 = vmmov %vm6493_vm1 }
 0x20b   : > { %v2123_v53 = vrot.slane %v2122_v60, 2  ;;  %v2132_v45 = vrot.slane %v2131_v18, 2  ;;  %v2149_v31 = vmax.f32 %v2147_v38, %v2148_v32  ;;  %v2157_v1 = vrot.slane %v2156_v4, 4  ;;  %vm6507_vm12 = vmmov %vm6493_vm1 }
 0x20c   : > { %v2115_v62 = vmax.f32 %v2113_v14, %v2114_v61  ;;  %v2141_v19 = vrot.slane %v2140_v10, 2  ;;  %v2165_v37 = vmax.f32 %v2163_v46, %v2164_v16  ;;  %v2192_v27 = vstv %s5617_s8 }
 0x20d   : > { %v2124_v26 = vmax.f32 %v2122_v60, %v2123_v53  ;;  %v2133_v28 = vmax.f32 %v2131_v18, %v2132_v45  ;;  %v2150_v41 = vrot.slane %v2149_v31, 2  ;;  %v2158_v0 = vmax.f32 %v2156_v4, %v2157_v1 }
 0x20e   : > { %v2116_v56 = vrot.slane %v2115_v62, 1  ;;  %v2142_v20 = vmax.f32 %v2140_v10, %v2141_v19  ;;  %v2166_v36 = vrot.slane %v2165_v37, 4  ;;  %vm2193_vm5 = vcmp.lt.s32.totalorder %v4972_v29, %v2192_v27 }
 0x20f   : > { %v2125_v58 = vrot.slane %v2124_v26, 1  ;;  %v2134_v48 = vrot.slane %v2133_v28, 1  ;;  %v2151_v30 = vmax.f32 %v2149_v31, %v2150_v41  ;;  %v2159_v55 = vrot.slane %v2158_v0, 2  ;;  %vm5637_vm8 = vmand %vm5624_vm10, %vm2193_vm5 }
 0x210   : > { %v2117_v9 = vmax.f32 %v2115_v62, %v2116_v56  ;;  %v2143_v33 = vrot.slane %v2142_v20, 1  ;;  %v2167_v51 = vmax.f32 %v2165_v37, %v2166_v36  ;;  %vm2194_vm0 = vcmp.lt.s32.totalorder %v4986_v50, %v2192_v27  ;;  %vm6508_vm10 = vmmov %vm6493_vm1 }
 0x211   : > { %v2126_v3 = vmax.f32 %v2124_v26, %v2125_v58  ;;  %v2135_v34 = vmax.f32 %v2133_v28, %v2134_v48  ;;  %v2152_v52 = vrot.slane %v2151_v30, 1  ;;  %v2160_v2 = vmax.f32 %v2158_v0, %v2159_v55  ;;  %vm5648_vm4 = vmand %vm5629_vm9, %vm2194_vm0 }
 0x212   : > { %v2144_v22 = vmax.f32 %v2142_v20, %v2143_v33  ;;  %v2168_v59 = vrot.slane %v2167_v51, 2  ;;  %v2215_v23 = vsel %vm5637_vm8, %v5517_v49, -1e+30  ;;  %v2217_v38 = vsel %vm5637_vm8, %v5528_v42, -1e+30  ;;  %vm6510_vm5 = vmmov %vm6493_vm1 }
 0x213   : > { %v2153_v47 = vmax.f32 %v2151_v30, %v2152_v52  ;;  %v2161_v29 = vrot.slane %v2160_v2, 1  ;;  %v2179_v11 = vsel %vm1572_vm2, %v2126_v3, %v2117_v9  ;;  %v2216_v49 = vsel %vm5648_vm4, %v5520_v17, -1e+30  ;;  %vm6512_vm0 = vmmov %vm6493_vm1 }
 0x214   : > { %v2169_v39 = vmax.f32 %v2167_v51, %v2168_v59  ;;  %v2180_v50 = vsel %vm1574_vm13, %v2135_v34, %v2179_v11  ;;  %v2218_v14 = vsel %vm5648_vm4, %v5533_v7, -1e+30  ;;  %v2219_v46 = vsel %vm5637_vm8, %v5535_v13, -1e+30 }
 0x215   : > { %v2162_v21 = vmax.f32 %v2160_v2, %v2161_v29  ;;  %v2181_v57 = vsel %vm1576_vm6, %v2144_v22, %v2180_v50  ;;  %v2220_v42 = vsel %vm5648_vm4, %v5540_v25, -1e+30  ;;  %v2221_v17 = vsel %vm5637_vm8, %v5546_v5, -1e+30 }
 0x216   : > { %v2170_v60 = vrot.slane %v2169_v39, 1  ;;  %v2182_v18 = vsel %vm1578_vm3, %v2153_v47, %v2181_v57  ;;  %v2222_v7 = vsel %vm5648_vm4, %v5548_v6, -1e+30  ;;  %v2223_v13 = vsel %vm5637_vm8, %v5550_v8, -1e+30 }
 0x217   : > { %v2183_v32 = vsel %vm1580_vm15, %v2162_v21, %v2182_v18  ;;  %v2224_v25 = vsel %vm5648_vm4, %v5556_v24, -1e+30  ;;  %v2225_v4 = vsel %vm5637_vm8, %v5558_v43, -1e+30  ;;  %v2226_v6 = vsel %vm5648_vm4, %v5567_v40, -1e+30 }
 0x218   : > { %v2171_v5 = vmax.f32 %v2169_v39, %v2170_v60  ;;  %v2227_v61 = vsel %vm5637_vm8, %v5569_v12, -1e+30  ;;  %v2228_v8 = vsel %vm5648_vm4, %v5571_v54, -1e+30  ;;  %v2229_v10 = vsel %vm6493_vm1, %v2215_v23, -inf  ;;  %vm6511_vm8 = vmmov %vm6493_vm1 }
 0x219   : > { %v2230_v24 = vsel %vm6505_vm14, %v2216_v49, -inf  ;;  %v2238_v16 = vsel %vm6506_vm7, %v2217_v38, -inf  ;;  %v2239_v43 = vsel %vm6507_vm12, %v2218_v14, -inf  ;;  %v2247_v45 = vsel %vm6508_vm10, %v2219_v46, -inf  ;;  %vm6513_vm4 = vmmov %vm6512_vm0 }
 0x21a   : > { %v2184_v63 = vsel %vm1582_vm11, %v2171_v5, %v2183_v32  ;;  %v2231_v53 = vmax.f32 %v2229_v10, %v2230_v24  ;;  %v2240_v40 = vmax.f32 %v2238_v16, %v2239_v43  ;;  %vm6509_vm9 = vcmask 63488   ;;  %vm6514_vm1 = vmmov %vm6512_vm0 }
 0x21b   : > { %2186 = vst.msk [vmem:[%s5190_s1 + $0x23] sm:$0x7f] %vm6509_vm9, %v2184_v63  ;;  %v2248_v12 = vsel %vm6510_vm5, %v2220_v42, -inf  ;;  %v2256_v54 = vsel %vm6511_vm8, %v2221_v17, -inf  ;;  %v2257_v31 = vsel %vm6512_vm0, %v2222_v7, -inf  ;;  %v2265_v1 = vsel %vm6513_vm4, %v2223_v13, -inf  ;;  %vm6515_vm14 = vmmov %vm6512_vm0 }
 0x21c   : > { %v2232_v62 = vrot.slane %v2231_v53, 4  ;;  %v2241_v19 = vrot.slane %v2240_v40, 4  ;;  %v2249_v37 = vmax.f32 %v2247_v45, %v2248_v12  ;;  %v2258_v35 = vmax.f32 %v2256_v54, %v2257_v31  ;;  %vm6516_vm7 = vmmov %vm6512_vm0 }
 0x21d   : > { %v2266_v26 = vsel %vm6514_vm1, %v2224_v25, -inf  ;;  %v2274_v28 = vsel %vm6515_vm14, %v2225_v4, -inf  ;;  %v2275_v41 = vsel %vm6516_vm7, %v2226_v6, -inf  ;;  %vm6517_vm12 = vmmov %vm6512_vm0 }
 0x21e   : > { %v2283_v0 = vsel %vm6517_vm12, %v2227_v61, -inf  ;;  %v2233_v56 = vmax.f32 %v2231_v53, %v2232_v62  ;;  %v2242_v20 = vmax.f32 %v2240_v40, %v2241_v19  ;;  %v2250_v36 = vrot.slane %v2249_v37, 4  ;;  %vm6518_vm10 = vmmov %vm6512_vm0 }
 0x21f   : > { %v2259_v27 = vrot.slane %v2258_v35, 4  ;;  %v2267_v58 = vmax.f32 %v2265_v1, %v2266_v26  ;;  %v2276_v48 = vmax.f32 %v2274_v28, %v2275_v41  ;;  %v2284_v30 = vsel %vm6518_vm10, %v2228_v8, -inf }
 0x220   : > { %v2234_v55 = vrot.slane %v2233_v56, 2  ;;  %v2243_v9 = vrot.slane %v2242_v20, 2  ;;  %v2251_v33 = vmax.f32 %v2249_v37, %v2250_v36  ;;  %v2285_v52 = vmax.f32 %v2283_v0, %v2284_v30 }
 0x221   : > { %v2260_v51 = vmax.f32 %v2258_v35, %v2259_v27  ;;  %v2268_v3 = vrot.slane %v2267_v58, 4  ;;  %v2277_v34 = vrot.slane %v2276_v48, 4 }
 0x222   : > { %v2235_v2 = vmax.f32 %v2233_v56, %v2234_v55  ;;  %v2244_v44 = vmax.f32 %v2242_v20, %v2243_v9  ;;  %v2252_v22 = vrot.slane %v2251_v33, 2  ;;  %v2286_v29 = vrot.slane %v2285_v52, 4 }
 0x223   : > { %v2261_v59 = vrot.slane %v2260_v51, 2  ;;  %v2269_v23 = vmax.f32 %v2267_v58, %v2268_v3  ;;  %v2278_v47 = vmax.f32 %v2276_v48, %v2277_v34 }
 0x224   : > { %v2236_v11 = vrot.slane %v2235_v2, 1  ;;  %v2245_v15 = vrot.slane %v2244_v44, 1  ;;  %v2253_v38 = vmax.f32 %v2251_v33, %v2252_v22  ;;  %v2287_v14 = vmax.f32 %v2285_v52, %v2286_v29 }
 0x225   : > { %v2262_v39 = vmax.f32 %v2260_v51, %v2261_v59  ;;  %v2270_v50 = vrot.slane %v2269_v23, 2  ;;  %v2279_v49 = vrot.slane %v2278_v47, 2 }
 0x226   : > { %v2237_v21 = vmax.f32 %v2235_v2, %v2236_v11  ;;  %v2246_v57 = vmax.f32 %v2244_v44, %v2245_v15  ;;  %v2254_v46 = vrot.slane %v2253_v38, 1  ;;  %v2288_v17 = vrot.slane %v2287_v14, 2 }
 0x227   : > { %v2263_v42 = vrot.slane %v2262_v39, 1  ;;  %v2271_v60 = vmax.f32 %v2269_v23, %v2270_v50  ;;  %v2280_v18 = vmax.f32 %v2278_v47, %v2279_v49 }
 0x228   : > { %v2255_v7 = vmax.f32 %v2253_v38, %v2254_v46  ;;  %v2299_v32 = vsel %vm1572_vm2, %v2246_v57, %v2237_v21  ;;  %v2289_v5 = vmax.f32 %v2287_v14, %v2288_v17 }
 0x229   : > { %v2264_v13 = vmax.f32 %v2262_v39, %v2263_v42  ;;  %v2272_v25 = vrot.slane %v2271_v60, 1  ;;  %v2281_v4 = vrot.slane %v2280_v18, 1 }
 0x22a   : > { %v2300_v6 = vsel %vm1574_vm13, %v2255_v7, %v2299_v32  ;;  %v2290_v8 = vrot.slane %v2289_v5, 1 }
 0x22b   : > { %v2273_v61 = vmax.f32 %v2271_v60, %v2272_v25  ;;  %v2301_v10 = vsel %vm1576_vm6, %v2264_v13, %v2300_v6  ;;  %v2282_v24 = vmax.f32 %v2280_v18, %v2281_v4 }
 0x22c   : > { %v2291_v16 = vmax.f32 %v2289_v5, %v2290_v8 }
 0x22d   : > { %v2302_v43 = vsel %vm1578_vm3, %v2273_v61, %v2301_v10 }
 0x22e   : > { %v2303_v63 = vsel %vm1580_vm15, %v2282_v24, %v2302_v43 }
 0x22f   : > { %v2304_v53 = vsel %vm1582_vm11, %v2291_v16, %v2303_v63 }
 0x230   : > { %2306 = vst.msk [vmem:[%s5190_s1 + $0x2a] sm:$0x7f] %vm6509_vm9, %v2304_v53 }
 0x231 PF: > { %s38_s18 = sadd.s32 1, %s2487_s18  }
 0x232   : > { %p35_p2 = scmp.ge.s32.totalorder %s38_s18, 10  }
 0x234   :  { %37 = sbr.rel (!%p35_p2) target bundleno = 57 (0x39), region = 60 }

// kernel: roi_header_forward.3
= control target key start
LH: loop header
LB: loop body
LE: loop exit
PB: predicated region body
PF: predicated region fallthrough
CT: control target
= control target key end

     0   :  { %s4659_s0 = inlined_call_operand.vmem [shape: bf16[128,512], index: 0, kind: input, shape index: {}]   ;;  %s4660_s1 = inlined_call_operand.hbm [shape: bf16[512,4096], index: 1, kind: input, shape index: {}]   ;;  %s4661_s2 = inlined_call_operand.hbm [shape: f32[1,4096], index: 2, kind: input, shape index: {}]   ;;  %s4662_s3 = inlined_call_operand.hbm [shape: bf16[4096,128], index: 3, kind: input, shape index: {}]   ;;  %s4663_s4 = inlined_call_operand.hbm [shape: f32[1,128], index: 4, kind: input, shape index: {}]   ;;  %s4664_s5 = inlined_call_operand.vmem [shape: f32[128,128], index: 5, kind: output, shape index: {}]  }
   0x1   :  { %4675 = sst [smem:[#allocation16_spill]] %s4661_s2 }
   0x2   :  { %10 = vsyncpa [#allocation5], 0 }
   0x3   :  { %12 = vsyncpa [#allocation5 + $0x1], 0 }
   0x4   :  { %13 = vsyncpa [#allocation7], 0 }
   0x5   :  { %15 = vsyncpa [#allocation7 + $0x1], 0 }
   0x6   :  { %16 = vsyncpa [#allocation10], 0  ;;  %s3968_s18 = smov 0   ;;  %s3970_s19 = smov 0  }
   0x7   :  { %s3972_s20 = smov 0   ;;  %s3974_s21 = smov 0  }
   0x8   :  { %s3976_s22 = smov 0   ;;  %s3978_s23 = smov 0  }
   0x9 LB: > { %s34_s24 = sadd.s32 1, %s3921_s22  ;;  %s69_s25 = sadd.s32 1, %s3913_s20  ;;  %s3925_s23 = sphi %s3978_s23, %s22_s23   ;;  %s3921_s22 = sphi %s3976_s22, %s4698_s22   ;;  %s3917_s21 = sphi %s3974_s21, %s4697_s21   ;;  %s3913_s20 = sphi %s3972_s20, %s4696_s20   ;;  %s3909_s19 = sphi %s3970_s19, %s4695_s19   ;;  %s3905_s18 = sphi %s3968_s18, %s4694_s18  }
   0xa   : > { %p36_p0 = scmp.ge.s32.totalorder %s34_s24, 8  ;;  %p76_p1 = scmp.ne.s32.totalorder %s3913_s20, %s3909_s19 }
   0xb   : > { %p77_p2 = scmp.eq.s32.totalorder %s3925_s23, 0  ;;  %p3419_p4 = scmp.lt.s32.totalorder %s3925_s23, 8 }
   0xc   : > { %s4700_s24 = smov (%p36_p0, %s34_s24), 0  ;;  %s4009_s27 = sand.u32 1, %s3913_s20  }
   0xd   : > { %4676 = sst [smem:[#allocation14_spill]] %s4700_s24  ;;  %p78_p3 = por %p77_p2, %p76_p1 }
   0xe   : > { %s65_s26 = ssub.s32 %s3921_s22, %s4700_s24  ;;  %s2986_s28 = sshll.u32 %s4009_s27, 10 }
   0xf   : > { %p67_p5 = scmp.eq.s32.totalorder %s65_s26, 0  ;;  %p4012_p6 = pnand %p3419_p4, %p78_p3 }
  0x10   : > { %s244_s30 = sand.u32 1, %s3925_s23   ;;  %s2989_s7 = sshll.u32 %s4009_s27, 2 }
  0x11   : > { %s4677_s29 = scalar_select %p4012_p6, 1, 0 }
  0x12   : > { %s4018_s6 = scalar_select %p67_p5, %s3913_s20, %s69_s25  }
  0x13   : > { %s3198_s8 = sshll.u32 %s3921_s22, 6  ;;  %s4679_s2 = sld [smem:[#allocation16_spill]] }
  0x14   : > { %4678 = sst [smem:[#allocation15_spill]] %s4018_s6  ;;  %s248_s12 = scalar_lea.vmem [#allocation6], %s2989_s7 }
  0x15   : > { %s256_s13 = sshll.u32 %s248_s12, 4  ;;  %s4030_s15 = scalar_lea.sflag [#allocation7], %s244_s30  ;;  %s4028_s13 = int_to_ptr.vmem [resolvable:$true] %s256_s13 }
  0x16   : > { %p4036_p8 = pneg %p4012_p6 }
  0x18   : > { %s4680_s17 = scalar_select %p4036_p8, 1, 0 }
  0x19   : > { %s4025_s11 = scalar_lea.hbm %s4679_s2, %s3198_s8  ;;  %s3754_s7 = scalar_lea.hbm %s4679_s2, 512 }
  0x1a   : > { %s3749_s16 = scalar_lea.hbm %s4025_s11, 64  ;;  %p3755_p11 = scmp.lt.u32.totalorder %s4025_s11, %s4679_s2 }
  0x1b   : > { %p3750_p7 = scmp.ne.s32.totalorder %s4025_s11, %s3749_s16  ;;  %p3756_p12 = scmp.lt.u32.totalorder %s3754_s7, %s3749_s16 }
  0x1c   : > { %p3758_p0 = scmp.lt.u32.totalorder %s3749_s16, %s4025_s11 }
  0x1d   : > { %p3752_p9 = pnand %p4036_p8, %p3750_p7  ;;  %p3757_p13 = por %p3756_p12, %p3755_p11 }
  0x1f   : > { %p3753_p10 = pneg %p3752_p9  ;;  %p3759_p1 = por %p3758_p0, %p3757_p13 }
  0x21   : > { %p3760_p2 = pnand %p3759_p1, %p3753_p10 }
  0x23   : > { %3763 = shalt.err (!%p3760_p2)
}
  0x24   : > { %s3764_s30 = scalar_lea.vmem %s4028_s13, 64  ;;  %s3927_s10 = smov [#allocation6]  }
  0x25   : > { %p3765_p3 = scmp.ne.s32.totalorder %s4028_s13, %s3764_s30  ;;  %s3769_s12 = sshll.u32 %s3927_s10, 4  ;;  %s3770_s12 = int_to_ptr.vmem [resolvable:$false] %s3769_s12 }
  0x26   : > { %s3771_s25 = scalar_lea.vmem %s3770_s12, 128  ;;  %p3772_p7 = scmp.lt.s32.totalorder %s4028_s13, %s3770_s12 }
  0x27   : > { %p3767_p4 = pnand %p3765_p3, %p4036_p8  ;;  %p3773_p9 = scmp.lt.s32.totalorder %s3771_s25, %s3764_s30 }
  0x29   : > { %p3768_p5 = pneg %p3767_p4  ;;  %p3774_p11 = por %p3773_p9, %p3772_p7 }
  0x2b   : > { %p3775_p12 = pnand %p3774_p11, %p3768_p5 }
  0x2d   : > { %3778 = shalt.err (!%p3775_p12)
}
  0x2e   : > { %3414 = dma.hbm_to_vmem [thread:$0]  (!%p4012_p6), %s4025_s11, 64, %s4028_s13, %s4030_s15  }
  0x2f   : > { %s4665_s16 = sadd.s32 4294967295, %s3925_s23   ;;  %p82_p10 = scmp.ne.s32.totalorder %s3909_s19, %s3905_s18 }
  0x30   : > { %p4065_p13 = scmp.eq.s32.totalorder %s4665_s16, 0  ;;  %p2982_p0 = scmp.ge.s32.totalorder %s3925_s23, 1 }
  0x31   : > { %p187_p1 = scmp.lt.s32.totalorder %s3925_s23, 9  ;;  %s3928_s18 = smov [#allocation9]  }
  0x32   : > { %s4681_s26 = scalar_select %p4065_p13, 1, 0 }
  0x33   : > { %p4073_p2 = por %p4065_p13, %p82_p10  ;;  %p4077_p3 = pnand %p2982_p0, %p187_p1 }
  0x34   : > { %s209_s11 = sshll.u32 %s3928_s18, 4  ;;  %s3197_s13 = sshll.u32 %s3921_s22, 8  ;;  %s210_s11 = int_to_ptr.vmem [resolvable:$true] %s209_s11 }
  0x35   : > { %s4682_s7 = scalar_select %p4073_p2, 1, 0 }
  0x36   : > { %s4683_s8 = scalar_select %p4077_p3, 1, 0 }
  0x37   : > { %p3404_p4 = pneg %p4077_p3  ;;  %s4093_s12 = scalar_lea.hbm %s4660_s1, %s3197_s13 }
  0x38   : > { %s224_s25 = scalar_lea.vmem [#allocation4], %s2986_s28  ;;  %s3779_s2 = scalar_lea.hbm %s4663_s4, 16 }
  0x39   : > { %p4086_p5 = pnand %p3404_p4, %p4065_p13  ;;  %s234_s16 = sshll.u32 %s224_s25, 4  ;;  %s4097_s16 = int_to_ptr.vmem [resolvable:$true] %s234_s16 }
  0x3a   : > { %p3780_p7 = scmp.ne.s32.totalorder %s4663_s4, %s3779_s2  ;;  %p3786_p10 = scmp.lt.u32.totalorder %s3779_s2, %s4663_s4 }
  0x3b   : > { %p3781_p9 = pneg %p4086_p5 }
  0x3d   : > { %p3782_p11 = pnand %p3781_p9, %p3780_p7 }
  0x3f   : > { %p3783_p12 = pneg %p3782_p11 }
  0x41   : > { %p3788_p0 = pnand %p3786_p10, %p3783_p12 }
  0x43   : > { %3791 = shalt.err (!%p3788_p0)
}
  0x44   : > { %s3792_s28 = scalar_lea.vmem %s210_s11, 16  ;;  %s3799_s14 = scalar_lea.vmem %s210_s11, 32 }
  0x45   : > { %p3793_p1 = scmp.ne.s32.totalorder %s210_s11, %s3792_s28  ;;  %p3800_p2 = scmp.lt.s32.totalorder %s210_s11, %s210_s11 }
  0x46   : > { %p3801_p3 = scmp.lt.s32.totalorder %s3799_s14, %s3792_s28 }
  0x47   : > { %p3795_p4 = pnand %p3793_p1, %p3781_p9 }
  0x48   : > { %p3802_p6 = por %p3801_p3, %p3800_p2 }
  0x49   : > { %p3796_p13 = pneg %p3795_p4 }
  0x4b   : > { %p3803_p8 = pnand %p3802_p6, %p3796_p13 }
  0x4d   : > { %3806 = shalt.err (!%p3803_p8)
}
  0x4e   : > { %3407 = dma.hbm_to_vmem [thread:$0]  (!%p4086_p5), %s4663_s4, 16, %s210_s11, [#allocation10]  }
  0x4f   : > { %s221_s2 = scalar_lea.sflag [#allocation5], %s4009_s27  ;;  %s3807_s10 = scalar_lea.hbm %s4093_s12, 16384 }
  0x50   : > { %p3808_p7 = scmp.ne.s32.totalorder %s4093_s12, %s3807_s10  ;;  %p4685_p9 = scmp.ne.s32.totalorder %s4680_s17, 0 }
  0x51   : > { %s3812_s9 = scalar_lea.hbm %s4660_s1, 131072  ;;  %p3813_p6 = scmp.lt.u32.totalorder %s4093_s12, %s4660_s1 }
  0x52   : > { %p3810_p11 = pnand %p3808_p7, %p4685_p9  ;;  %p3814_p8 = scmp.lt.u32.totalorder %s3812_s9, %s3807_s10 }
  0x53   : > { %p3816_p3 = scmp.lt.u32.totalorder %s3807_s10, %s4093_s12 }
  0x54   : > { %p3811_p2 = pneg %p3810_p11  ;;  %p3815_p13 = por %p3814_p8, %p3813_p6 }
  0x56   : > { %p3817_p12 = por %p3816_p3, %p3815_p13 }
  0x58   : > { %p3818_p10 = pnand %p3817_p12, %p3811_p2 }
  0x5a   : > { %3821 = shalt.err (!%p3818_p10)
}
  0x5b   : > { %s3822_s11 = scalar_lea.vmem %s4097_s16, 16384  ;;  %s3929_s28 = smov [#allocation4]  }
  0x5c   : > { %p3823_p5 = scmp.ne.s32.totalorder %s4097_s16, %s3822_s11  ;;  %s3827_s14 = sshll.u32 %s3929_s28, 4  ;;  %s3828_s14 = int_to_ptr.vmem [resolvable:$false] %s3827_s14 }
  0x5d   : > { %s3829_s24 = scalar_lea.vmem %s3828_s14, 32768  ;;  %p3830_p4 = scmp.lt.s32.totalorder %s4097_s16, %s3828_s14 }
  0x5e   : > { %p3825_p0 = pnand %p3823_p5, %p4685_p9  ;;  %p3831_p7 = scmp.lt.s32.totalorder %s3829_s24, %s3822_s11 }
  0x60   : > { %p3826_p1 = pneg %p3825_p0  ;;  %p3832_p11 = por %p3831_p7, %p3830_p4 }
  0x62   : > { %p3833_p6 = pnand %p3832_p11, %p3826_p1 }
  0x64   : > { %3836 = shalt.err (!%p3833_p6)
}
  0x65   : > { %s3930_s6 = smov 2048   ;;  %s3931_s10 = smov 256  }
  0x66   : > { %s3932_s25 = smov 16   ;;  %p4686_p2 = scmp.ne.s32.totalorder %s4677_s29, 0 }
  0x67   : > { %s3199_s18 = sshll.u32 %s3921_s22, 12  ;;  %s4687_s11 = sshll.u32 %s4009_s27, 8 }
  0x68   : > { %3411 = dma.hbm_to_vmem [thread:$0]  (!%p4686_p2), %s4093_s12, 16384, %s4097_s16, %s221_s2, %s3930_s6, %s3931_s10, %s3932_s25  }
  0x69   : > { %s4143_s13 = scalar_lea.hbm %s4662_s3, %s3199_s18  ;;  %s267_s28 = scalar_lea.vmem [#allocation8], %s4687_s11 }
  0x6a   : > { %s274_s14 = sshll.u32 %s267_s28, 4  ;;  %s3837_s24 = scalar_lea.hbm %s4143_s13, 4096  ;;  %s4147_s14 = int_to_ptr.vmem [resolvable:$true] %s274_s14 }
  0x6b   : > { %p3838_p8 = scmp.ne.s32.totalorder %s4143_s13, %s3837_s24  ;;  %s3842_s2 = scalar_lea.hbm %s4662_s3, 32768 }
  0x6c   : > { %p3843_p12 = scmp.lt.u32.totalorder %s4143_s13, %s4662_s3  ;;  %p3844_p10 = scmp.lt.u32.totalorder %s3842_s2, %s3837_s24 }
  0x6d   : > { %p3840_p13 = pnand %p3838_p8, %p4685_p9  ;;  %p3846_p0 = scmp.lt.u32.totalorder %s3837_s24, %s4143_s13 }
  0x6e   : > { %p3845_p5 = por %p3844_p10, %p3843_p12 }
  0x6f   : > { %p3841_p3 = pneg %p3840_p13 }
  0x70   : > { %p3847_p1 = por %p3846_p0, %p3845_p5 }
  0x72   : > { %p3848_p4 = pnand %p3847_p1, %p3841_p3 }
  0x74   : > { %3851 = shalt.err (!%p3848_p4)
}
  0x75   : > { %s3852_s27 = scalar_lea.vmem %s4147_s14, 4096  ;;  %s3933_s25 = smov [#allocation8]  }
  0x76   : > { %p3853_p7 = scmp.ne.s32.totalorder %s4147_s14, %s3852_s27  ;;  %s3857_s18 = sshll.u32 %s3933_s25, 4  ;;  %s3858_s18 = int_to_ptr.vmem [resolvable:$false] %s3857_s18 }
  0x77   : > { %s3859_s9 = scalar_lea.vmem %s3858_s18, 8192  ;;  %p3860_p8 = scmp.lt.s32.totalorder %s4147_s14, %s3858_s18 }
  0x78   : > { %p3855_p11 = pnand %p3853_p7, %p4685_p9  ;;  %p3861_p13 = scmp.lt.s32.totalorder %s3859_s9, %s3852_s27 }
  0x7a   : > { %p3856_p6 = pneg %p3855_p11  ;;  %p3862_p12 = por %p3861_p13, %p3860_p8 }
  0x7c   : > { %p3863_p10 = pnand %p3862_p12, %p3856_p6 }
  0x7e   : > { %3866 = shalt.err (!%p3863_p10)
}
  0x7f   : > { %s3934_s30 = smov 64   ;;  %s3935_s11 = smov 4  }
  0x80   : > { %3417 = dma.hbm_to_vmem [thread:$0]  (!%p4686_p2), %s4143_s13, 4096, %s4147_s14, %s4030_s15, %s3934_s30, %s3934_s30, %s3935_s11  }
  0x81   : > { %p4688_p9 = scmp.ne.s32.totalorder %s4683_s8, 0 }
  0x82   : > { %s288_s17 = sand.u32 (!%p4688_p9), 1, %s3909_s19   ;;  %p4689_p3 = scmp.ne.s32.totalorder (!%p4688_p9), %s4682_s7, 0 }
  0x83   : > { %286 = sbr.rel (%p4688_p9) target bundleno = 830 (0x33e), region = 40  ;;  %s2996_s28 = sshll.u32 (!%p4688_p9), %s288_s17, 10 }
  0x84   : > { %s289_s24 = scalar_lea.sflag (!%p4688_p9), [#allocation5], %s288_s17  ;;  %s4174_s16 = scalar_lea.vmem (!%p4688_p9), [#allocation4], %s2996_s28 }
  0x8a   : > { %3892 = dma.done.wait (%p4689_p3), %s289_s24, 16384  }
  0x8b   : > { %3894 = vsyncadd (%p4689_p3), %s289_s24, 4294950912  ;;  %s4690_s12 = sadd.s32 4294967295, %s3925_s23   ;;  %s2997_s15 = sshll.u32 %s288_s17, 2 }
  0x8c   : > { %s297_s29 = sand.u32 1, %s4690_s12   ;;  %s4182_s8 = scalar_lea.vmem [#allocation6], %s2997_s15 }
  0x8d   : > { %s298_s13 = scalar_lea.sflag [#allocation7], %s297_s29 }
  0x8e   : > { %3896 = dma.done.wait (%p4689_p3), %s298_s13, 4160  }
  0x8f   : > { %3898 = vsyncadd (%p4689_p3), %s298_s13, 4294963136  ;;  %s2998_s14 = sshll.u32 %s288_s17, 8  ;;  %p4691_p2 = scmp.ne.s32.totalorder %s4681_s26, 0 }
  0x90   : > { %s4188_s2 = scalar_lea.vmem [#allocation8], %s2998_s14 }
  0x91   : > { %3900 = dma.done.wait (%p4691_p2), [#allocation10], 16  }
  0x92   : > { %3902 = vsyncadd (%p4691_p2), [#allocation10], 4294967280  ;;  %p430_p5 = scmp.eq.s32.totalorder %s3917_s21, 0  ;;  %v3936_v0 = vmov 0.0  }
  0x93   : > { %366 = vst [vmem:[#allocation2] sm:$0xff] %v3936_v0  ;;  %367 = vst [vmem:[#allocation2 + $0x8] sm:$0xff] %v3936_v0  ;;  %v3937_v1 = vmov (%p430_p5), 0.0  }
  0x94   : > { %368 = vst [vmem:[#allocation2 + $0x10] sm:$0xff] %v3936_v0  ;;  %369 = vst [vmem:[#allocation2 + $0x18] sm:$0xff] %v3936_v0 }
  0x95   : > { %370 = vst [vmem:[#allocation2 + $0x20] sm:$0xff] %v3936_v0  ;;  %371 = vst [vmem:[#allocation2 + $0x28] sm:$0xff] %v3936_v0 }
  0x96   : > { %372 = vst [vmem:[#allocation2 + $0x30] sm:$0xff] %v3936_v0  ;;  %373 = vst [vmem:[#allocation2 + $0x38] sm:$0xff] %v3936_v0 }
  0x97   : > { %374 = vst [vmem:[#allocation2 + $0x40] sm:$0xff] %v3936_v0  ;;  %375 = vst [vmem:[#allocation2 + $0x48] sm:$0xff] %v3936_v0 }
  0x98   : > { %376 = vst [vmem:[#allocation2 + $0x50] sm:$0xff] %v3936_v0  ;;  %377 = vst [vmem:[#allocation2 + $0x58] sm:$0xff] %v3936_v0 }
  0x99   : > { %378 = vst [vmem:[#allocation2 + $0x60] sm:$0xff] %v3936_v0  ;;  %379 = vst [vmem:[#allocation2 + $0x68] sm:$0xff] %v3936_v0 }
  0x9a   : > { %380 = vst [vmem:[#allocation2 + $0x70] sm:$0xff] %v3936_v0  ;;  %381 = vst [vmem:[#allocation2 + $0x78] sm:$0xff] %v3936_v0 }
  0x9b   : > { %382 = vst [vmem:[#allocation2 + $0x80] sm:$0xff] %v3936_v0  ;;  %383 = vst [vmem:[#allocation2 + $0x88] sm:$0xff] %v3936_v0 }
  0x9c   : > { %384 = vst [vmem:[#allocation2 + $0x90] sm:$0xff] %v3936_v0  ;;  %385 = vst [vmem:[#allocation2 + $0x98] sm:$0xff] %v3936_v0 }
  0x9d   : > { %386 = vst [vmem:[#allocation2 + $0xa0] sm:$0xff] %v3936_v0  ;;  %387 = vst [vmem:[#allocation2 + $0xa8] sm:$0xff] %v3936_v0 }
  0x9e   : > { %388 = vst [vmem:[#allocation2 + $0xb0] sm:$0xff] %v3936_v0  ;;  %389 = vst [vmem:[#allocation2 + $0xb8] sm:$0xff] %v3936_v0 }
  0x9f   : > { %390 = vst [vmem:[#allocation2 + $0xc0] sm:$0xff] %v3936_v0  ;;  %391 = vst [vmem:[#allocation2 + $0xc8] sm:$0xff] %v3936_v0 }
  0xa0   : > { %392 = vst [vmem:[#allocation2 + $0xd0] sm:$0xff] %v3936_v0  ;;  %393 = vst [vmem:[#allocation2 + $0xd8] sm:$0xff] %v3936_v0 }
  0xa1   : > { %394 = vst [vmem:[#allocation2 + $0xe0] sm:$0xff] %v3936_v0  ;;  %395 = vst [vmem:[#allocation2 + $0xe8] sm:$0xff] %v3936_v0 }
  0xa2   : > { %396 = vst [vmem:[#allocation2 + $0xf0] sm:$0xff] %v3936_v0  ;;  %397 = vst [vmem:[#allocation2 + $0xf8] sm:$0xff] %v3936_v0 }
  0xa3   : > { %398 = vst [vmem:[#allocation2 + $0x100] sm:$0xff] %v3936_v0  ;;  %399 = vst [vmem:[#allocation2 + $0x108] sm:$0xff] %v3936_v0 }
  0xa4   : > { %400 = vst [vmem:[#allocation2 + $0x110] sm:$0xff] %v3936_v0  ;;  %401 = vst [vmem:[#allocation2 + $0x118] sm:$0xff] %v3936_v0 }
  0xa5   : > { %402 = vst [vmem:[#allocation2 + $0x120] sm:$0xff] %v3936_v0  ;;  %403 = vst [vmem:[#allocation2 + $0x128] sm:$0xff] %v3936_v0 }
  0xa6   : > { %404 = vst [vmem:[#allocation2 + $0x130] sm:$0xff] %v3936_v0  ;;  %405 = vst [vmem:[#allocation2 + $0x138] sm:$0xff] %v3936_v0 }
  0xa7   : > { %406 = vst [vmem:[#allocation2 + $0x140] sm:$0xff] %v3936_v0  ;;  %407 = vst [vmem:[#allocation2 + $0x148] sm:$0xff] %v3936_v0 }
  0xa8   : > { %408 = vst [vmem:[#allocation2 + $0x150] sm:$0xff] %v3936_v0  ;;  %409 = vst [vmem:[#allocation2 + $0x158] sm:$0xff] %v3936_v0 }
  0xa9   : > { %410 = vst [vmem:[#allocation2 + $0x160] sm:$0xff] %v3936_v0  ;;  %411 = vst [vmem:[#allocation2 + $0x168] sm:$0xff] %v3936_v0 }
  0xaa   : > { %412 = vst [vmem:[#allocation2 + $0x170] sm:$0xff] %v3936_v0  ;;  %413 = vst [vmem:[#allocation2 + $0x178] sm:$0xff] %v3936_v0 }
  0xab   : > { %414 = vst [vmem:[#allocation2 + $0x180] sm:$0xff] %v3936_v0  ;;  %415 = vst [vmem:[#allocation2 + $0x188] sm:$0xff] %v3936_v0 }
  0xac   : > { %416 = vst [vmem:[#allocation2 + $0x190] sm:$0xff] %v3936_v0  ;;  %417 = vst [vmem:[#allocation2 + $0x198] sm:$0xff] %v3936_v0  ;;  %434 = sbr.rel (!%p430_p5) target bundleno = 187 (0xbb), region = 64 }
  0xad   : > { %418 = vst [vmem:[#allocation2 + $0x1a0] sm:$0xff] %v3936_v0  ;;  %419 = vst [vmem:[#allocation2 + $0x1a8] sm:$0xff] %v3936_v0 }
  0xae   : > { %420 = vst [vmem:[#allocation2 + $0x1b0] sm:$0xff] %v3936_v0  ;;  %421 = vst [vmem:[#allocation2 + $0x1b8] sm:$0xff] %v3936_v0 }
  0xaf   : > { %422 = vst [vmem:[#allocation2 + $0x1c0] sm:$0xff] %v3936_v0  ;;  %423 = vst [vmem:[#allocation2 + $0x1c8] sm:$0xff] %v3936_v0 }
  0xb0   : > { %424 = vst [vmem:[#allocation2 + $0x1d0] sm:$0xff] %v3936_v0  ;;  %425 = vst [vmem:[#allocation2 + $0x1d8] sm:$0xff] %v3936_v0 }
  0xb1   : > { %426 = vst [vmem:[#allocation2 + $0x1e0] sm:$0xff] %v3936_v0  ;;  %427 = vst [vmem:[#allocation2 + $0x1e8] sm:$0xff] %v3936_v0 }
  0xb2   : > { %428 = vst [vmem:[#allocation2 + $0x1f0] sm:$0xff] %v3936_v0  ;;  %429 = vst [vmem:[#allocation2 + $0x1f8] sm:$0xff] %v3936_v0 }
  0xb3   : > { %435 = vst [vmem:[#allocation3] sm:$0xff] %v3937_v1  ;;  %436 = vst [vmem:[#allocation3 + $0x8] sm:$0xff] %v3937_v1 }
  0xb4   : > { %437 = vst [vmem:[#allocation3 + $0x10] sm:$0xff] %v3937_v1  ;;  %438 = vst [vmem:[#allocation3 + $0x18] sm:$0xff] %v3937_v1 }
  0xb5   : > { %439 = vst [vmem:[#allocation3 + $0x20] sm:$0xff] %v3937_v1  ;;  %440 = vst [vmem:[#allocation3 + $0x28] sm:$0xff] %v3937_v1 }
  0xb6   : > { %441 = vst [vmem:[#allocation3 + $0x30] sm:$0xff] %v3937_v1  ;;  %442 = vst [vmem:[#allocation3 + $0x38] sm:$0xff] %v3937_v1 }
  0xb7   : > { %443 = vst [vmem:[#allocation3 + $0x40] sm:$0xff] %v3937_v1  ;;  %444 = vst [vmem:[#allocation3 + $0x48] sm:$0xff] %v3937_v1 }
  0xb8   : > { %445 = vst [vmem:[#allocation3 + $0x50] sm:$0xff] %v3937_v1  ;;  %446 = vst [vmem:[#allocation3 + $0x58] sm:$0xff] %v3937_v1 }
  0xb9   : > { %447 = vst [vmem:[#allocation3 + $0x60] sm:$0xff] %v3937_v1  ;;  %448 = vst [vmem:[#allocation3 + $0x68] sm:$0xff] %v3937_v1 }
  0xba   : > { %449 = vst [vmem:[#allocation3 + $0x70] sm:$0xff] %v3937_v1  ;;  %450 = vst [vmem:[#allocation3 + $0x78] sm:$0xff] %v3937_v1 }
  0xbb PF: > { %v3477_v2 = vld [vmem:[%s4174_s16 + $0x4] ss:$16 sps:$4 sm:$0xff]   ;;  %v3479_v3 = vld [vmem:[%s4174_s16 + $0xc] ss:$16 sps:$4 sm:$0xff]   ;;  %v3481_v4 = vld [vmem:[%s4174_s16] ss:$16 sps:$4 sm:$0xff]  }
  0xbc   : > { %1475 = vmatprep.subr.bf16.mxu0 %v3477_v2  ;;  %v3482_v5 = vld [vmem:[%s4174_s16 + $0x8] ss:$16 sps:$4 sm:$0xff]   ;;  %1701 = vmatprep.subr.bf16.mxu1 %v3479_v3  ;;  %v3483_v6 = vld [vmem:[%s4174_s16 + $0x24] ss:$16 sps:$4 sm:$0xff]   ;;  %v3485_v7 = vld [vmem:[%s4174_s16 + $0x2c] ss:$16 sps:$4 sm:$0xff]  }
  0xbd   : > { %1476 = vmatpush1.bf16.msra.mxu0 %v3481_v4  ;;  %1702 = vmatpush1.bf16.msra.mxu1 %v3482_v5  ;;  %v3487_v8 = vld [vmem:[%s4174_s16 + $0x20] ss:$16 sps:$4 sm:$0xff]   ;;  %v3488_v9 = vld [vmem:[%s4174_s16 + $0x28] ss:$16 sps:$4 sm:$0xff]   ;;  %v3489_v10 = vld [vmem:[%s4174_s16 + $0x44] ss:$16 sps:$4 sm:$0xff]  }
  0xbe   : > { %1477 = vmatprep.subr.bf16.mxu0 %v3483_v6  ;;  %1703 = vmatprep.subr.bf16.mxu1 %v3485_v7  ;;  %v3491_v11 = vld [vmem:[%s4174_s16 + $0x4c] ss:$16 sps:$4 sm:$0xff]   ;;  %v3493_v12 = vld [vmem:[%s4174_s16 + $0x40] ss:$16 sps:$4 sm:$0xff]   ;;  %v3494_v13 = vld [vmem:[%s4174_s16 + $0x48] ss:$16 sps:$4 sm:$0xff]  }
  0xbf   : > { %v3495_v14 = vld [vmem:[%s4174_s16 + $0x64] ss:$16 sps:$4 sm:$0xff]   ;;  %v3497_v15 = vld [vmem:[%s4174_s16 + $0x6c] ss:$16 sps:$4 sm:$0xff]   ;;  %v3499_v16 = vld [vmem:[%s4174_s16 + $0x60] ss:$16 sps:$4 sm:$0xff]  }
  0xc0   : > { %v3500_v17 = vld [vmem:[%s4174_s16 + $0x68] ss:$16 sps:$4 sm:$0xff]   ;;  %v3501_v18 = vld [vmem:[%s4174_s16 + $0x84] ss:$16 sps:$4 sm:$0xff]   ;;  %v3503_v19 = vld [vmem:[%s4174_s16 + $0x8c] ss:$16 sps:$4 sm:$0xff]  }
  0xc1   : > { %1478 = vmatpush1.bf16.msra.mxu0 %v3487_v8  ;;  %1704 = vmatpush1.bf16.msra.mxu1 %v3488_v9  ;;  %v3505_v20 = vld [vmem:[%s4174_s16 + $0x80] ss:$16 sps:$4 sm:$0xff]   ;;  %v3506_v21 = vld [vmem:[%s4174_s16 + $0x88] ss:$16 sps:$4 sm:$0xff]   ;;  %v3507_v22 = vld [vmem:[%s4174_s16 + $0xa4] ss:$16 sps:$4 sm:$0xff]  }
  0xc2   : > { %1479 = vmatprep.subr.bf16.mxu0 %v3489_v10  ;;  %1705 = vmatprep.subr.bf16.mxu1 %v3491_v11  ;;  %v3509_v23 = vld [vmem:[%s4174_s16 + $0xac] ss:$16 sps:$4 sm:$0xff]   ;;  %v3511_v24 = vld [vmem:[%s4174_s16 + $0xa0] ss:$16 sps:$4 sm:$0xff]   ;;  %v3512_v25 = vld [vmem:[%s4174_s16 + $0xa8] ss:$16 sps:$4 sm:$0xff]  }
  0xc3   : > { %v3513_v26 = vld [vmem:[%s4174_s16 + $0xc4] ss:$16 sps:$4 sm:$0xff]   ;;  %v3515_v27 = vld [vmem:[%s4174_s16 + $0xcc] ss:$16 sps:$4 sm:$0xff]   ;;  %v3517_v28 = vld [vmem:[%s4174_s16 + $0xc0] ss:$16 sps:$4 sm:$0xff]  }
  0xc4   : > { %v3518_v29 = vld [vmem:[%s4174_s16 + $0xc8] ss:$16 sps:$4 sm:$0xff]   ;;  %v3519_v30 = vld [vmem:[%s4174_s16 + $0xe4] ss:$16 sps:$4 sm:$0xff]   ;;  %v3521_v31 = vld [vmem:[%s4174_s16 + $0xec] ss:$16 sps:$4 sm:$0xff]  }
  0xc5   : > { %1480 = vmatpush1.bf16.msra.mxu0 %v3493_v12  ;;  %1706 = vmatpush1.bf16.msra.mxu1 %v3494_v13  ;;  %v3523_v32 = vld [vmem:[%s4174_s16 + $0xe0] ss:$16 sps:$4 sm:$0xff]   ;;  %v3524_v33 = vld [vmem:[%s4174_s16 + $0xe8] ss:$16 sps:$4 sm:$0xff]   ;;  %v3525_v34 = vld [vmem:[%s4174_s16 + $0x104] ss:$16 sps:$4 sm:$0xff]  }
  0xc6   : > { %1481 = vmatprep.subr.bf16.mxu0 %v3495_v14  ;;  %1707 = vmatprep.subr.bf16.mxu1 %v3497_v15  ;;  %v3527_v35 = vld [vmem:[%s4174_s16 + $0x10c] ss:$16 sps:$4 sm:$0xff]   ;;  %v3529_v36 = vld [vmem:[%s4174_s16 + $0x100] ss:$16 sps:$4 sm:$0xff]   ;;  %v3530_v37 = vld [vmem:[%s4174_s16 + $0x108] ss:$16 sps:$4 sm:$0xff]  }
  0xc7   : > { %v3531_v38 = vld [vmem:[%s4174_s16 + $0x124] ss:$16 sps:$4 sm:$0xff]   ;;  %v3533_v39 = vld [vmem:[%s4174_s16 + $0x12c] ss:$16 sps:$4 sm:$0xff]   ;;  %v3535_v40 = vld [vmem:[%s4174_s16 + $0x120] ss:$16 sps:$4 sm:$0xff]  }
  0xc8   : > { %v3536_v41 = vld [vmem:[%s4174_s16 + $0x128] ss:$16 sps:$4 sm:$0xff]   ;;  %v3537_v42 = vld [vmem:[%s4174_s16 + $0x144] ss:$16 sps:$4 sm:$0xff]   ;;  %v3539_v43 = vld [vmem:[%s4174_s16 + $0x14c] ss:$16 sps:$4 sm:$0xff]  }
  0xc9   : > { %1482 = vmatpush1.bf16.msra.mxu0 %v3499_v16  ;;  %1708 = vmatpush1.bf16.msra.mxu1 %v3500_v17  ;;  %v3541_v44 = vld [vmem:[%s4174_s16 + $0x140] ss:$16 sps:$4 sm:$0xff]   ;;  %v3542_v45 = vld [vmem:[%s4174_s16 + $0x148] ss:$16 sps:$4 sm:$0xff]   ;;  %v3543_v46 = vld [vmem:[%s4174_s16 + $0x164] ss:$16 sps:$4 sm:$0xff]  }
  0xca   : > { %1483 = vmatprep.subr.bf16.mxu0 %v3501_v18  ;;  %1709 = vmatprep.subr.bf16.mxu1 %v3503_v19  ;;  %v3545_v47 = vld [vmem:[%s4174_s16 + $0x16c] ss:$16 sps:$4 sm:$0xff]   ;;  %v3547_v48 = vld [vmem:[%s4174_s16 + $0x160] ss:$16 sps:$4 sm:$0xff]   ;;  %v3548_v49 = vld [vmem:[%s4174_s16 + $0x168] ss:$16 sps:$4 sm:$0xff]  }
  0xcb   : > { %v3575_v50 = vld [vmem:[%s4659_s0 + $0x4] ss:$16 sps:$4 sm:$0xff]   ;;  %v3551_v52 = vld [vmem:[%s4174_s16 + $0x18c] ss:$16 sps:$4 sm:$0xff]   ;;  %v3553_v53 = vld [vmem:[%s4174_s16 + $0x180] ss:$16 sps:$4 sm:$0xff]  }
  0xcc   : > { %v3549_v51 = vld [vmem:[%s4174_s16 + $0x184] ss:$16 sps:$4 sm:$0xff]   ;;  %1507 = vmatprep.mubr.bf16.mxu0 %v3575_v50  ;;  %1733 = vmatprep.mubr.bf16.mxu1 %v3575_v50  ;;  %v3554_v54 = vld [vmem:[%s4174_s16 + $0x188] ss:$16 sps:$4 sm:$0xff]   ;;  %v3557_v56 = vld [vmem:[%s4174_s16 + $0x1ac] ss:$16 sps:$4 sm:$0xff]  }
  0xcd   : > { %1484 = vmatpush1.bf16.msra.mxu0 %v3505_v20  ;;  %1710 = vmatpush1.bf16.msra.mxu1 %v3506_v21  ;;  %v3555_v55 = vld [vmem:[%s4174_s16 + $0x1a4] ss:$16 sps:$4 sm:$0xff]   ;;  %v3559_v57 = vld [vmem:[%s4174_s16 + $0x1a0] ss:$16 sps:$4 sm:$0xff]   ;;  %v3560_v58 = vld [vmem:[%s4174_s16 + $0x1a8] ss:$16 sps:$4 sm:$0xff]  }
  0xce   : > { %1485 = vmatprep.subr.bf16.mxu0 %v3507_v22  ;;  %1711 = vmatprep.subr.bf16.mxu1 %v3509_v23  ;;  %v3561_v59 = vld [vmem:[%s4174_s16 + $0x1c4] ss:$16 sps:$4 sm:$0xff]   ;;  %v3563_v60 = vld [vmem:[%s4174_s16 + $0x1cc] ss:$16 sps:$4 sm:$0xff]   ;;  %v3565_v61 = vld [vmem:[%s4174_s16 + $0x1c0] ss:$16 sps:$4 sm:$0xff]  }
  0xcf   : > { %v3566_v62 = vld [vmem:[%s4174_s16 + $0x1c8] ss:$16 sps:$4 sm:$0xff]   ;;  %v3567_v63 = vld [vmem:[%s4174_s16 + $0x1e4] ss:$16 sps:$4 sm:$0xff]   ;;  %v3569_v0 = vld [vmem:[%s4174_s16 + $0x1ec] ss:$16 sps:$4 sm:$0xff]  }
  0xd0   : > { %v3571_v1 = vld [vmem:[%s4174_s16 + $0x1e0] ss:$16 sps:$4 sm:$0xff]   ;;  %v3572_v2 = vld [vmem:[%s4174_s16 + $0x1e8] ss:$16 sps:$4 sm:$0xff]   ;;  %v3578_v3 = vld [vmem:[%s4174_s16 + $0x204] ss:$16 sps:$4 sm:$0xff]  }
  0xd1   : > { %1486 = vmatpush1.bf16.msra.mxu0 %v3511_v24  ;;  %1712 = vmatpush1.bf16.msra.mxu1 %v3512_v25  ;;  %v3581_v4 = vld [vmem:[%s4174_s16 + $0x20c] ss:$16 sps:$4 sm:$0xff]   ;;  %v3573_v5 = vld [vmem:[%s4659_s0] ss:$16 sps:$4 sm:$0xff]   ;;  %v3579_v7 = vld [vmem:[%s4174_s16 + $0x208] ss:$16 sps:$4 sm:$0xff]  }
  0xd2   : > { %1487 = vmatprep.subr.bf16.mxu0 %v3513_v26  ;;  %1713 = vmatprep.subr.bf16.mxu1 %v3515_v27  ;;  %v3576_v6 = vld [vmem:[%s4174_s16 + $0x200] ss:$16 sps:$4 sm:$0xff]   ;;  %v3584_v8 = vld [vmem:[%s4174_s16 + $0x224] ss:$16 sps:$4 sm:$0xff]   ;;  %v3587_v9 = vld [vmem:[%s4174_s16 + $0x22c] ss:$16 sps:$4 sm:$0xff]  }
  0xd3   : > { %v3588_v10 = vld [vmem:[%s4659_s0 + $0x24] ss:$16 sps:$4 sm:$0xff]   ;;  %v3582_v11 = vld [vmem:[%s4174_s16 + $0x220] ss:$16 sps:$4 sm:$0xff]   ;;  %v3585_v12 = vld [vmem:[%s4174_s16 + $0x228] ss:$16 sps:$4 sm:$0xff]  }
  0xd4   : > { %v3593_v13 = vld [vmem:[%s4174_s16 + $0x244] ss:$16 sps:$4 sm:$0xff]   ;;  %v3596_v14 = vld [vmem:[%s4174_s16 + $0x24c] ss:$16 sps:$4 sm:$0xff]   ;;  %v3590_v15 = vld [vmem:[%s4659_s0 + $0x20] ss:$16 sps:$4 sm:$0xff]  }
  0xd5   : > { %1488 = vmatpush1.bf16.msra.mxu0 %v3517_v28  ;;  %1714 = vmatpush1.bf16.msra.mxu1 %v3518_v29  ;;  %v3591_v16 = vld [vmem:[%s4174_s16 + $0x240] ss:$16 sps:$4 sm:$0xff]   ;;  %v3594_v17 = vld [vmem:[%s4174_s16 + $0x248] ss:$16 sps:$4 sm:$0xff]   ;;  %v3599_v18 = vld [vmem:[%s4174_s16 + $0x264] ss:$16 sps:$4 sm:$0xff]  }
  0xd6   : > { %1489 = vmatprep.subr.bf16.mxu0 %v3519_v30  ;;  %1715 = vmatprep.subr.bf16.mxu1 %v3521_v31  ;;  %v3602_v19 = vld [vmem:[%s4174_s16 + $0x26c] ss:$16 sps:$4 sm:$0xff]   ;;  %v3603_v20 = vld [vmem:[%s4659_s0 + $0x44] ss:$16 sps:$4 sm:$0xff]   ;;  %v3597_v21 = vld [vmem:[%s4174_s16 + $0x260] ss:$16 sps:$4 sm:$0xff]  }
  0xd7   : > { %v3600_v22 = vld [vmem:[%s4174_s16 + $0x268] ss:$16 sps:$4 sm:$0xff]   ;;  %v3608_v23 = vld [vmem:[%s4174_s16 + $0x284] ss:$16 sps:$4 sm:$0xff]   ;;  %v3611_v24 = vld [vmem:[%s4174_s16 + $0x28c] ss:$16 sps:$4 sm:$0xff]  }
  0xd8   : > { %v3605_v25 = vld [vmem:[%s4659_s0 + $0x40] ss:$16 sps:$4 sm:$0xff]   ;;  %v3609_v27 = vld [vmem:[%s4174_s16 + $0x288] ss:$16 sps:$4 sm:$0xff]   ;;  %v3614_v28 = vld [vmem:[%s4174_s16 + $0x2a4] ss:$16 sps:$4 sm:$0xff]  }
  0xd9   : > { %1490 = vmatpush1.bf16.msra.mxu0 %v3523_v32  ;;  %1716 = vmatpush1.bf16.msra.mxu1 %v3524_v33  ;;  %v3606_v26 = vld [vmem:[%s4174_s16 + $0x280] ss:$16 sps:$4 sm:$0xff]   ;;  %v3617_v29 = vld [vmem:[%s4174_s16 + $0x2ac] ss:$16 sps:$4 sm:$0xff]   ;;  %v3618_v30 = vld [vmem:[%s4659_s0 + $0x64] ss:$16 sps:$4 sm:$0xff]  }
  0xda   : > { %1491 = vmatprep.subr.bf16.mxu0 %v3525_v34  ;;  %1717 = vmatprep.subr.bf16.mxu1 %v3527_v35  ;;  %v3612_v31 = vld [vmem:[%s4174_s16 + $0x2a0] ss:$16 sps:$4 sm:$0xff]   ;;  %v3615_v32 = vld [vmem:[%s4174_s16 + $0x2a8] ss:$16 sps:$4 sm:$0xff]   ;;  %v3623_v33 = vld [vmem:[%s4174_s16 + $0x2c4] ss:$16 sps:$4 sm:$0xff]  }
  0xdb   : > { %v3626_v34 = vld [vmem:[%s4174_s16 + $0x2cc] ss:$16 sps:$4 sm:$0xff]   ;;  %v3620_v35 = vld [vmem:[%s4659_s0 + $0x60] ss:$16 sps:$4 sm:$0xff]   ;;  %v3648_v50 = vld [vmem:[%s4659_s0 + $0xa4] ss:$16 sps:$4 sm:$0xff]  }
  0xdc   : > { %p2802_p0 = scmp.eq.s32.totalorder %s3917_s21, 7 }
  0xdd   : > { %1492 = vmatpush1.bf16.msra.mxu0 %v3529_v36  ;;  %1718 = vmatpush1.bf16.msra.mxu1 %v3530_v37  ;;  %v3621_v36 = vld [vmem:[%s4174_s16 + $0x2c0] ss:$16 sps:$4 sm:$0xff]   ;;  %v3624_v37 = vld [vmem:[%s4174_s16 + $0x2c8] ss:$16 sps:$4 sm:$0xff]  }
  0xde   : > { %1493 = vmatprep.subr.bf16.mxu0 %v3531_v38  ;;  %1719 = vmatprep.subr.bf16.mxu1 %v3533_v39  ;;  %v3629_v38 = vld [vmem:[%s4174_s16 + $0x2e4] ss:$16 sps:$4 sm:$0xff]   ;;  %v3632_v39 = vld [vmem:[%s4174_s16 + $0x2ec] ss:$16 sps:$4 sm:$0xff]  }
  0xe1   : > { %1494 = vmatpush1.bf16.msra.mxu0 %v3535_v40  ;;  %1720 = vmatpush1.bf16.msra.mxu1 %v3536_v41  ;;  %v3633_v40 = vld [vmem:[%s4659_s0 + $0x84] ss:$16 sps:$4 sm:$0xff]   ;;  %v3627_v41 = vld [vmem:[%s4174_s16 + $0x2e0] ss:$16 sps:$4 sm:$0xff]  }
  0xe2   : > { %1495 = vmatprep.subr.bf16.mxu0 %v3537_v42  ;;  %1721 = vmatprep.subr.bf16.mxu1 %v3539_v43  ;;  %v3630_v42 = vld [vmem:[%s4174_s16 + $0x2e8] ss:$16 sps:$4 sm:$0xff]   ;;  %v3638_v43 = vld [vmem:[%s4174_s16 + $0x304] ss:$16 sps:$4 sm:$0xff]  }
  0xe5   : > { %1496 = vmatpush1.bf16.msra.mxu0 %v3541_v44  ;;  %1722 = vmatpush1.bf16.msra.mxu1 %v3542_v45  ;;  %v3641_v44 = vld [vmem:[%s4174_s16 + $0x30c] ss:$16 sps:$4 sm:$0xff]   ;;  %v3635_v45 = vld [vmem:[%s4659_s0 + $0x80] ss:$16 sps:$4 sm:$0xff]  }
  0xe6   : > { %1497 = vmatprep.subr.bf16.mxu0 %v3543_v46  ;;  %1723 = vmatprep.subr.bf16.mxu1 %v3545_v47  ;;  %v3636_v46 = vld [vmem:[%s4174_s16 + $0x300] ss:$16 sps:$4 sm:$0xff]   ;;  %v3639_v47 = vld [vmem:[%s4174_s16 + $0x308] ss:$16 sps:$4 sm:$0xff]  }
  0xe9   : > { %1498 = vmatpush1.bf16.msra.mxu0 %v3547_v48  ;;  %1724 = vmatpush1.bf16.msra.mxu1 %v3548_v49  ;;  %v3644_v48 = vld [vmem:[%s4174_s16 + $0x324] ss:$16 sps:$4 sm:$0xff]   ;;  %v3647_v49 = vld [vmem:[%s4174_s16 + $0x32c] ss:$16 sps:$4 sm:$0xff]  }
  0xea   : > { %1499 = vmatprep.subr.bf16.mxu0 %v3549_v51  ;;  %1725 = vmatprep.subr.bf16.mxu1 %v3551_v52  ;;  %v3642_v51 = vld [vmem:[%s4174_s16 + $0x320] ss:$16 sps:$4 sm:$0xff]   ;;  %v3645_v52 = vld [vmem:[%s4174_s16 + $0x328] ss:$16 sps:$4 sm:$0xff]  }
  0xed   : > { %1500 = vmatpush1.bf16.msra.mxu0 %v3553_v53  ;;  %1726 = vmatpush1.bf16.msra.mxu1 %v3554_v54  ;;  %v3653_v53 = vld [vmem:[%s4174_s16 + $0x344] ss:$16 sps:$4 sm:$0xff]   ;;  %v3656_v54 = vld [vmem:[%s4174_s16 + $0x34c] ss:$16 sps:$4 sm:$0xff]  }
  0xee   : > { %1501 = vmatprep.subr.bf16.mxu0 %v3555_v55  ;;  %1727 = vmatprep.subr.bf16.mxu1 %v3557_v56  ;;  %v3650_v55 = vld [vmem:[%s4659_s0 + $0xa0] ss:$16 sps:$4 sm:$0xff]  }
  0xef   : > { %v3651_v56 = vld [vmem:[%s4174_s16 + $0x340] ss:$16 sps:$4 sm:$0xff]  }
  0xf1   : > { %1502 = vmatpush1.bf16.msra.mxu0 %v3559_v57  ;;  %1728 = vmatpush1.bf16.msra.mxu1 %v3560_v58  ;;  %v3654_v57 = vld [vmem:[%s4174_s16 + $0x348] ss:$16 sps:$4 sm:$0xff]   ;;  %v3659_v58 = vld [vmem:[%s4174_s16 + $0x364] ss:$16 sps:$4 sm:$0xff]  }
  0xf2   : > { %1503 = vmatprep.subr.bf16.mxu0 %v3561_v59  ;;  %1729 = vmatprep.subr.bf16.mxu1 %v3563_v60  ;;  %v3662_v59 = vld [vmem:[%s4174_s16 + $0x36c] ss:$16 sps:$4 sm:$0xff]   ;;  %v3657_v60 = vld [vmem:[%s4174_s16 + $0x360] ss:$16 sps:$4 sm:$0xff]  }
  0xf5   : > { %1504 = vmatpush1.bf16.msra.mxu0 %v3565_v61  ;;  %1730 = vmatpush1.bf16.msra.mxu1 %v3566_v62  ;;  %v3663_v61 = vld [vmem:[%s4659_s0 + $0xc4] ss:$16 sps:$4 sm:$0xff]   ;;  %v3660_v62 = vld [vmem:[%s4174_s16 + $0x368] ss:$16 sps:$4 sm:$0xff]  }
  0xf6   : > { %1505 = vmatprep.subr.bf16.mxu0 %v3567_v63  ;;  %1731 = vmatprep.subr.bf16.mxu1 %v3569_v0  ;;  %v3668_v63 = vld [vmem:[%s4174_s16 + $0x384] ss:$16 sps:$4 sm:$0xff]   ;;  %v3665_v0 = vld [vmem:[%s4659_s0 + $0xc0] ss:$16 sps:$4 sm:$0xff]  }
  0xf9   : > { %1506 = vmatpush1.bf16.msra.mxu0 %v3571_v1  ;;  %1732 = vmatpush1.bf16.msra.mxu1 %v3572_v2  ;;  %v3671_v1 = vld [vmem:[%s4174_s16 + $0x38c] ss:$16 sps:$4 sm:$0xff]   ;;  %v3666_v2 = vld [vmem:[%s4174_s16 + $0x380] ss:$16 sps:$4 sm:$0xff]  }
  0xfa   : > { %1588 = vmatprep.subr.bf16.mxu0 %v3578_v3  ;;  %1814 = vmatprep.subr.bf16.mxu1 %v3581_v4  ;;  %v3669_v3 = vld [vmem:[%s4174_s16 + $0x388] ss:$16 sps:$4 sm:$0xff]   ;;  %v3674_v4 = vld [vmem:[%s4174_s16 + $0x3a4] ss:$16 sps:$4 sm:$0xff]  }
  0xfc   : > { %1508 = vmatmul.mubr.bf16.vlgmr.msra.gmra.mrb[0].mxu0 %v3573_v5  ;;  %1734 = vmatmul.mubr.bf16.vlgmr.msra.gmra.mrb[0].mxu1 %v3573_v5  ;;  %v3677_v5 = vld [vmem:[%s4174_s16 + $0x3ac] ss:$16 sps:$4 sm:$0xff]  }
  0xfd   : > { %1589 = vmatpush1.bf16.msra.mxu0 %v3576_v6  ;;  %1815 = vmatpush1.bf16.msra.mxu1 %v3579_v7  ;;  %v3672_v6 = vld [vmem:[%s4174_s16 + $0x3a0] ss:$16 sps:$4 sm:$0xff]   ;;  %v3678_v7 = vld [vmem:[%s4659_s0 + $0xe4] ss:$16 sps:$4 sm:$0xff]  }
  0xfe   : > { %1590 = vmatprep.subr.bf16.mxu0 %v3584_v8  ;;  %1816 = vmatprep.subr.bf16.mxu1 %v3587_v9  ;;  %v3675_v8 = vld [vmem:[%s4174_s16 + $0x3a8] ss:$16 sps:$4 sm:$0xff]   ;;  %v3683_v9 = vld [vmem:[%s4174_s16 + $0x3c4] ss:$16 sps:$4 sm:$0xff]  }
  0xff   : > { %1517 = vmatprep.mubr.bf16.mxu0 %v3588_v10  ;;  %1743 = vmatprep.mubr.bf16.mxu1 %v3588_v10  ;;  %v3680_v10 = vld [vmem:[%s4659_s0 + $0xe0] ss:$16 sps:$4 sm:$0xff]  }
 0x101   : > { %1591 = vmatpush1.bf16.msra.mxu0 %v3582_v11  ;;  %1817 = vmatpush1.bf16.msra.mxu1 %v3585_v12  ;;  %v3686_v11 = vld [vmem:[%s4174_s16 + $0x3cc] ss:$16 sps:$4 sm:$0xff]   ;;  %v3681_v12 = vld [vmem:[%s4174_s16 + $0x3c0] ss:$16 sps:$4 sm:$0xff]  }
 0x102   : > { %1592 = vmatprep.subr.bf16.mxu0 %v3593_v13  ;;  %1818 = vmatprep.subr.bf16.mxu1 %v3596_v14  ;;  %v3684_v13 = vld [vmem:[%s4174_s16 + $0x3c8] ss:$16 sps:$4 sm:$0xff]   ;;  %v3689_v14 = vld [vmem:[%s4174_s16 + $0x3e4] ss:$16 sps:$4 sm:$0xff]  }
 0x104   : > { %1518 = vmatmul.mubr.bf16.gmra.mrb[4].mxu0 %v3590_v15  ;;  %1744 = vmatmul.mubr.bf16.gmra.mrb[4].mxu1 %v3590_v15  ;;  %v3692_v15 = vld [vmem:[%s4174_s16 + $0x3ec] ss:$16 sps:$4 sm:$0xff]  }
 0x105   : > { %1593 = vmatpush1.bf16.msra.mxu0 %v3591_v16  ;;  %1819 = vmatpush1.bf16.msra.mxu1 %v3594_v17  ;;  %v3687_v16 = vld [vmem:[%s4174_s16 + $0x3e0] ss:$16 sps:$4 sm:$0xff]   ;;  %v3695_v17 = vld [vmem:[%s4659_s0 + $0xc] ss:$16 sps:$4 sm:$0xff]  }
 0x106   : > { %1594 = vmatprep.subr.bf16.mxu0 %v3599_v18  ;;  %1820 = vmatprep.subr.bf16.mxu1 %v3602_v19  ;;  %v3690_v18 = vld [vmem:[%s4174_s16 + $0x3e8] ss:$16 sps:$4 sm:$0xff]  }
 0x107   : > { %1527 = vmatprep.mubr.bf16.mxu0 %v3603_v20  ;;  %1753 = vmatprep.mubr.bf16.mxu1 %v3603_v20  ;;  %v3717_v19 = vld [vmem:[%s4188_s2 + $0x40] sm:$0xff]  }
 0x108   : > { %v3718_v20 = vld [vmem:[%s4188_s2 + $0xc0] sm:$0xff]  }
 0x109   : > { %1595 = vmatpush1.bf16.msra.mxu0 %v3597_v21  ;;  %1821 = vmatpush1.bf16.msra.mxu1 %v3600_v22  ;;  %v3693_v21 = vld [vmem:[%s4659_s0 + $0x8] ss:$16 sps:$4 sm:$0xff]   ;;  %v3696_v22 = vld [vmem:[%s4659_s0 + $0x2c] ss:$16 sps:$4 sm:$0xff]  }
 0x10a   : > { %1596 = vmatprep.subr.bf16.mxu0 %v3608_v23  ;;  %1822 = vmatprep.subr.bf16.mxu1 %v3611_v24  ;;  %v3719_v23 = vld [vmem:[%s4188_s2] sm:$0xff]  }
 0x10b   : > { %v3720_v24 = vld [vmem:[%s4188_s2 + $0x80] sm:$0xff]  }
 0x10c   : > { %1528 = vmatmul.mubr.bf16.gmra.mrb[8].mxu0 %v3605_v25  ;;  %1754 = vmatmul.mubr.bf16.gmra.mrb[8].mxu1 %v3605_v25  ;;  %v3721_v25 = vld [vmem:[%s4188_s2 + $0x48] sm:$0xff]  }
 0x10d   : > { %1597 = vmatpush1.bf16.msra.mxu0 %v3606_v26  ;;  %1823 = vmatpush1.bf16.msra.mxu1 %v3609_v27  ;;  %v3722_v26 = vld [vmem:[%s4188_s2 + $0xc8] sm:$0xff]  }
 0x10e   : > { %1598 = vmatprep.subr.bf16.mxu0 %v3614_v28  ;;  %1824 = vmatprep.subr.bf16.mxu1 %v3617_v29  ;;  %v3723_v27 = vld [vmem:[%s4188_s2 + $0x8] sm:$0xff]   ;;  %v3725_v29 = vld [vmem:[%s4188_s2 + $0x50] sm:$0xff]  }
 0x10f   : > { %1537 = vmatprep.mubr.bf16.mxu0 %v3618_v30  ;;  %1763 = vmatprep.mubr.bf16.mxu1 %v3618_v30  ;;  %v3724_v28 = vld [vmem:[%s4188_s2 + $0x88] sm:$0xff]   ;;  %v3726_v30 = vld [vmem:[%s4188_s2 + $0xd0] sm:$0xff]  }
 0x111   : > { %1599 = vmatpush1.bf16.msra.mxu0 %v3612_v31  ;;  %1825 = vmatpush1.bf16.msra.mxu1 %v3615_v32  ;;  %v3698_v31 = vld [vmem:[%s4659_s0 + $0x28] ss:$16 sps:$4 sm:$0xff]   ;;  %v3699_v32 = vld [vmem:[%s4659_s0 + $0x4c] ss:$16 sps:$4 sm:$0xff]  }
 0x112   : > { %1600 = vmatprep.subr.bf16.mxu0 %v3623_v33  ;;  %1826 = vmatprep.subr.bf16.mxu1 %v3626_v34  ;;  %v3727_v33 = vld [vmem:[%s4188_s2 + $0x10] sm:$0xff]  }
 0x113   : > { %v3728_v34 = vld [vmem:[%s4188_s2 + $0x90] sm:$0xff]  }
 0x114   : > { %1538 = vmatmul.mubr.bf16.gmra.mrb[12].mxu0 %v3620_v35  ;;  %1764 = vmatmul.mubr.bf16.gmra.mrb[12].mxu1 %v3620_v35  ;;  %v3729_v35 = vld [vmem:[%s4188_s2 + $0x58] sm:$0xff]  }
 0x115   : > { %1601 = vmatpush1.bf16.msra.mxu0 %v3621_v36  ;;  %1827 = vmatpush1.bf16.msra.mxu1 %v3624_v37  ;;  %v3730_v36 = vld [vmem:[%s4188_s2 + $0xd8] sm:$0xff]  }
 0x116   : > { %1602 = vmatprep.subr.bf16.mxu0 %v3629_v38  ;;  %1828 = vmatprep.subr.bf16.mxu1 %v3632_v39  ;;  %v3731_v37 = vld [vmem:[%s4188_s2 + $0x18] sm:$0xff]   ;;  %v3733_v39 = vld [vmem:[%s4188_s2 + $0x60] sm:$0xff]  }
 0x117   : > { %1547 = vmatprep.mubr.bf16.mxu0 %v3633_v40  ;;  %1773 = vmatprep.mubr.bf16.mxu1 %v3633_v40  ;;  %v3732_v38 = vld [vmem:[%s4188_s2 + $0x98] sm:$0xff]   ;;  %v3734_v40 = vld [vmem:[%s4188_s2 + $0xe0] sm:$0xff]  }
 0x119   : > { %1603 = vmatpush1.bf16.msra.mxu0 %v3627_v41  ;;  %1829 = vmatpush1.bf16.msra.mxu1 %v3630_v42  ;;  %v3701_v41 = vld [vmem:[%s4659_s0 + $0x48] ss:$16 sps:$4 sm:$0xff]   ;;  %v3702_v42 = vld [vmem:[%s4659_s0 + $0x6c] ss:$16 sps:$4 sm:$0xff]  }
 0x11a   : > { %1604 = vmatprep.subr.bf16.mxu0 %v3638_v43  ;;  %1830 = vmatprep.subr.bf16.mxu1 %v3641_v44  ;;  %v3735_v43 = vld [vmem:[%s4188_s2 + $0x20] sm:$0xff]  }
 0x11b   : > { %v3736_v44 = vld [vmem:[%s4188_s2 + $0xa0] sm:$0xff]  }
 0x11c   : > { %1548 = vmatmul.mubr.bf16.gmra.mrb[16].mxu0 %v3635_v45  ;;  %1774 = vmatmul.mubr.bf16.gmra.mrb[16].mxu1 %v3635_v45  ;;  %v3737_v45 = vld [vmem:[%s4188_s2 + $0x68] sm:$0xff]  }
 0x11d   : > { %1605 = vmatpush1.bf16.msra.mxu0 %v3636_v46  ;;  %1831 = vmatpush1.bf16.msra.mxu1 %v3639_v47  ;;  %v3738_v46 = vld [vmem:[%s4188_s2 + $0xe8] sm:$0xff]  }
 0x11e   : > { %1606 = vmatprep.subr.bf16.mxu0 %v3644_v48  ;;  %1832 = vmatprep.subr.bf16.mxu1 %v3647_v49  ;;  %v3739_v47 = vld [vmem:[%s4188_s2 + $0x28] sm:$0xff]   ;;  %v3704_v49 = vld [vmem:[%s4659_s0 + $0x68] ss:$16 sps:$4 sm:$0xff]  }
 0x11f   : > { %1557 = vmatprep.mubr.bf16.mxu0 %v3648_v50  ;;  %1783 = vmatprep.mubr.bf16.mxu1 %v3648_v50  ;;  %v3740_v48 = vld [vmem:[%s4188_s2 + $0xa8] sm:$0xff]   ;;  %v3705_v50 = vld [vmem:[%s4659_s0 + $0x8c] ss:$16 sps:$4 sm:$0xff]  }
 0x121   : > { %1607 = vmatpush1.bf16.msra.mxu0 %v3642_v51  ;;  %1833 = vmatpush1.bf16.msra.mxu1 %v3645_v52  ;;  %v3707_v51 = vld [vmem:[%s4659_s0 + $0x88] ss:$16 sps:$4 sm:$0xff]   ;;  %v3708_v52 = vld [vmem:[%s4659_s0 + $0xac] ss:$16 sps:$4 sm:$0xff]  }
 0x122   : > { %1608 = vmatprep.subr.bf16.mxu0 %v3653_v53  ;;  %1834 = vmatprep.subr.bf16.mxu1 %v3656_v54  ;;  %v3710_v53 = vld [vmem:[%s4659_s0 + $0xa8] ss:$16 sps:$4 sm:$0xff]   ;;  %v3711_v54 = vld [vmem:[%s4659_s0 + $0xcc] ss:$16 sps:$4 sm:$0xff]  }
 0x124   : > { %1558 = vmatmul.mubr.bf16.gmra.mrb[20].mxu0 %v3650_v55  ;;  %1784 = vmatmul.mubr.bf16.gmra.mrb[20].mxu1 %v3650_v55  ;;  %v3713_v55 = vld [vmem:[%s4659_s0 + $0xc8] ss:$16 sps:$4 sm:$0xff]  }
 0x125   : > { %1609 = vmatpush1.bf16.msra.mxu0 %v3651_v56  ;;  %1835 = vmatpush1.bf16.msra.mxu1 %v3654_v57  ;;  %v3714_v56 = vld [vmem:[%s4659_s0 + $0xec] ss:$16 sps:$4 sm:$0xff]   ;;  %v3716_v57 = vld [vmem:[%s4659_s0 + $0xe8] ss:$16 sps:$4 sm:$0xff]  }
 0x126   : > { %1610 = vmatprep.subr.bf16.mxu0 %v3659_v58  ;;  %1836 = vmatprep.subr.bf16.mxu1 %v3662_v59  ;;  %v3741_v58 = vld [vmem:[%s4188_s2 + $0x70] sm:$0xff]  }
 0x127   : > { %1567 = vmatprep.mubr.bf16.mxu0 %v3663_v61  ;;  %1793 = vmatprep.mubr.bf16.mxu1 %v3663_v61  ;;  %v3742_v59 = vld [vmem:[%s4188_s2 + $0xf0] sm:$0xff]  }
 0x128   : > { %v3744_v61 = vld [vmem:[%s4188_s2 + $0xb0] sm:$0xff]  }
 0x129   : > { %1611 = vmatpush1.bf16.msra.mxu0 %v3657_v60  ;;  %1837 = vmatpush1.bf16.msra.mxu1 %v3660_v62  ;;  %v3743_v60 = vld [vmem:[%s4188_s2 + $0x30] sm:$0xff]   ;;  %v3745_v62 = vld [vmem:[%s4188_s2 + $0x78] sm:$0xff]  }
 0x12a   : > { %1612 = vmatprep.subr.bf16.mxu0 %v3668_v63  ;;  %1838 = vmatprep.subr.bf16.mxu1 %v3671_v1  ;;  %v3746_v63 = vld [vmem:[%s4188_s2 + $0xf8] sm:$0xff]  }
 0x12b   : > { %v3748_v1 = vld [vmem:[%s4188_s2 + $0xb8] sm:$0xff]  }
 0x12c   : > { %1568 = vmatmul.mubr.bf16.gmra.mrb[24].mxu0 %v3665_v0  ;;  %1794 = vmatmul.mubr.bf16.gmra.mrb[24].mxu1 %v3665_v0  ;;  %v3747_v0 = vld [vmem:[%s4188_s2 + $0x38] sm:$0xff]  }
 0x12d   : > { %1613 = vmatpush1.bf16.msra.mxu0 %v3666_v2  ;;  %1839 = vmatpush1.bf16.msra.mxu1 %v3669_v3  ;;  %v2124_v2 = vlaneseq }
 0x12e   : > { %1614 = vmatprep.subr.bf16.mxu0 %v3674_v4  ;;  %1840 = vmatprep.subr.bf16.mxu1 %v3677_v5 }
 0x12f   : > { %1577 = vmatprep.mubr.bf16.mxu0 %v3678_v7  ;;  %1803 = vmatprep.mubr.bf16.mxu1 %v3678_v7  ;;  %v2125_v3 = vshrl.u32 %v2124_v2, 7  ;;  %v466_v2 = vld [vmem:[#allocation2 + $0x78] sm:$0xff] }
 0x131   : > { %1615 = vmatpush1.bf16.msra.mxu0 %v3672_v6  ;;  %1841 = vmatpush1.bf16.msra.mxu1 %v3675_v8  ;;  %v2126_v4 = vsub.s32 0, %v2125_v3  ;;  %v2134_v5 = vsub.s32 2, %v2125_v3  ;;  %v2122_v6 = vld [vmem:[%s4182_s8] sm:$0xf]  ;;  %v2130_v7 = vsub.s32 1, %v2125_v3  ;;  %v2138_v8 = vsub.s32 3, %v2125_v3 }
 0x132   : > { %1616 = vmatprep.subr.bf16.mxu0 %v3683_v9  ;;  %1842 = vmatprep.subr.bf16.mxu1 %v3686_v11  ;;  %v451_v9 = vld [vmem:[#allocation2] sm:$0xff]  ;;  %v452_v11 = vld [vmem:[#allocation2 + $0x8] sm:$0xff] }
 0x134   : > { %1578 = vmatmul.mubr.bf16.gmra.mrb[28].mxu0 %v3680_v10  ;;  %1804 = vmatmul.mubr.bf16.gmra.mrb[28].mxu1 %v3680_v10  ;;  %v453_v10 = vld [vmem:[#allocation2 + $0x10] sm:$0xff] }
 0x135   : > { %1617 = vmatpush1.bf16.msra.mxu0 %v3681_v12  ;;  %1843 = vmatpush1.bf16.msra.mxu1 %v3684_v13  ;;  %v454_v12 = vld [vmem:[#allocation2 + $0x18] sm:$0xff]  ;;  %v4518_v13 = vrot.slane %v2122_v6, %v2126_v4 }
 0x136   : > { %1618 = vmatprep.subr.bf16.mxu0 %v3689_v14  ;;  %1844 = vmatprep.subr.bf16.mxu1 %v3692_v15  ;;  %v4520_v14 = vrot.slane %v2122_v6, %v2134_v5 }
 0x137   : > { %1620 = vmatprep.mubr.bf16.mxu0 %v3695_v17  ;;  %1846 = vmatprep.mubr.bf16.mxu1 %v3695_v17  ;;  %v455_v17 = vld [vmem:[#allocation2 + $0x20] sm:$0xff] }
 0x139   : > { %1619 = vmatpush1.bf16.msra.mxu0 %v3687_v16  ;;  %1845 = vmatpush1.bf16.msra.mxu1 %v3690_v18  ;;  %v457_v18 = vld [vmem:[#allocation2 + $0x30] sm:$0xff] }
 0x13a   : > { %3202 = vmatprep.subr.bf16.mxu0 %v3717_v19  ;;  %3266 = vmatprep.subr.bf16.mxu1 %v3718_v20  ;;  %v4522_v19 = vrot.slane %v2122_v6, %v2130_v7  ;;  %v4524_v20 = vrot.slane %v2122_v6, %v2138_v8 }
 0x13c   : > { %1621 = vmatmul.mubr.bf16.vlgmr.msra.gmra.mrb[0].mxu0 %v3693_v21  ;;  %1847 = vmatmul.mubr.bf16.vlgmr.msra.gmra.mrb[0].mxu1 %v3693_v21 }
 0x13d   : > { %1630 = vmatprep.mubr.bf16.mxu0 %v3696_v22  ;;  %1856 = vmatprep.mubr.bf16.mxu1 %v3696_v22 }
 0x13e   : > { %3203 = vmatpush3.bf16.msra.mxu0 %v3719_v23  ;;  %3267 = vmatpush3.bf16.msra.mxu1 %v3720_v24 }
 0x13f   : > { %3204 = vmatprep.subr.bf16.mxu0 %v3721_v25  ;;  %3268 = vmatprep.subr.bf16.mxu1 %v3722_v26  ;;  %v456_v25 = vld [vmem:[#allocation2 + $0x28] sm:$0xff]  ;;  %v458_v26 = vld [vmem:[#allocation2 + $0x38] sm:$0xff] }
 0x142   : > { %3205 = vmatpush3.bf16.msra.mxu0 %v3723_v27  ;;  %3269 = vmatpush3.bf16.msra.mxu1 %v3724_v28 }
 0x143   : > { %3206 = vmatprep.subr.bf16.mxu0 %v3725_v29  ;;  %3270 = vmatprep.subr.bf16.mxu1 %v3726_v30 }
 0x144   : > { %1631 = vmatmul.mubr.bf16.gmra.mrb[4].mxu0 %v3698_v31  ;;  %1857 = vmatmul.mubr.bf16.gmra.mrb[4].mxu1 %v3698_v31 }
 0x145   : > { %1640 = vmatprep.mubr.bf16.mxu0 %v3699_v32  ;;  %1866 = vmatprep.mubr.bf16.mxu1 %v3699_v32 }
 0x146   : > { %3207 = vmatpush3.bf16.msra.mxu0 %v3727_v33  ;;  %3271 = vmatpush3.bf16.msra.mxu1 %v3728_v34 }
 0x147   : > { %3208 = vmatprep.subr.bf16.mxu0 %v3729_v35  ;;  %3272 = vmatprep.subr.bf16.mxu1 %v3730_v36 }
 0x14a   : > { %3209 = vmatpush3.bf16.msra.mxu0 %v3731_v37  ;;  %3273 = vmatpush3.bf16.msra.mxu1 %v3732_v38 }
 0x14b   : > { %3210 = vmatprep.subr.bf16.mxu0 %v3733_v39  ;;  %3274 = vmatprep.subr.bf16.mxu1 %v3734_v40 }
 0x14c   : > { %1641 = vmatmul.mubr.bf16.gmra.mrb[8].mxu0 %v3701_v41  ;;  %1867 = vmatmul.mubr.bf16.gmra.mrb[8].mxu1 %v3701_v41  ;;  %v459_v41 = vld [vmem:[#allocation2 + $0x40] sm:$0xff] }
 0x14d   : > { %1650 = vmatprep.mubr.bf16.mxu0 %v3702_v42  ;;  %1876 = vmatprep.mubr.bf16.mxu1 %v3702_v42 }
 0x14e   : > { %3211 = vmatpush3.bf16.msra.mxu0 %v3735_v43  ;;  %3275 = vmatpush3.bf16.msra.mxu1 %v3736_v44  ;;  %v461_v44 = vld [vmem:[#allocation2 + $0x50] sm:$0xff] }
 0x14f   : > { %3212 = vmatprep.subr.bf16.mxu0 %v3737_v45  ;;  %3276 = vmatprep.subr.bf16.mxu1 %v3738_v46  ;;  %v460_v45 = vld [vmem:[#allocation2 + $0x48] sm:$0xff]  ;;  %v462_v46 = vld [vmem:[#allocation2 + $0x58] sm:$0xff] }
 0x152   : > { %3213 = vmatpush3.bf16.msra.mxu0 %v3739_v47  ;;  %3277 = vmatpush3.bf16.msra.mxu1 %v3740_v48 }
 0x153   : > { %3214 = vmatprep.subr.bf16.mxu0 %v3741_v58  ;;  %3278 = vmatprep.subr.bf16.mxu1 %v3742_v59 }
 0x154   : > { %1651 = vmatmul.mubr.bf16.gmra.mrb[12].mxu0 %v3704_v49  ;;  %1877 = vmatmul.mubr.bf16.gmra.mrb[12].mxu1 %v3704_v49  ;;  %v463_v49 = vld [vmem:[#allocation2 + $0x60] sm:$0xff] }
 0x155   : > { %1660 = vmatprep.mubr.bf16.mxu0 %v3705_v50  ;;  %1886 = vmatprep.mubr.bf16.mxu1 %v3705_v50  ;;  %v465_v50 = vld [vmem:[#allocation2 + $0x70] sm:$0xff] }
 0x156   : > { %3215 = vmatpush3.bf16.msra.mxu0 %v3743_v60  ;;  %3279 = vmatpush3.bf16.msra.mxu1 %v3744_v61 }
 0x157   : > { %3216 = vmatprep.subr.bf16.mxu0 %v3745_v62  ;;  %3280 = vmatprep.subr.bf16.mxu1 %v3746_v63 }
 0x15a   : > { %3217 = vmatpush3.bf16.msra.mxu0 %v3747_v0  ;;  %3281 = vmatpush3.bf16.msra.mxu1 %v3748_v1  ;;  %v464_v1 = vld [vmem:[#allocation2 + $0x68] sm:$0xff] }
 0x15c   : > { %1661 = vmatmul.mubr.bf16.gmra.mrb[16].mxu0 %v3707_v51  ;;  %1887 = vmatmul.mubr.bf16.gmra.mrb[16].mxu1 %v3707_v51 }
 0x15d   : > { %1670 = vmatprep.mubr.bf16.mxu0 %v3708_v52  ;;  %1896 = vmatprep.mubr.bf16.mxu1 %v3708_v52 }
 0x164   : > { %1671 = vmatmul.mubr.bf16.gmra.mrb[20].mxu0 %v3710_v53  ;;  %1897 = vmatmul.mubr.bf16.gmra.mrb[20].mxu1 %v3710_v53 }
 0x165   : > { %1680 = vmatprep.mubr.bf16.mxu0 %v3711_v54  ;;  %1906 = vmatprep.mubr.bf16.mxu1 %v3711_v54 }
 0x16c   : > { %1681 = vmatmul.mubr.bf16.gmra.mrb[24].mxu0 %v3713_v55  ;;  %1907 = vmatmul.mubr.bf16.gmra.mrb[24].mxu1 %v3713_v55 }
 0x16d   : > { %1690 = vmatprep.mubr.bf16.mxu0 %v3714_v56  ;;  %1916 = vmatprep.mubr.bf16.mxu1 %v3714_v56 }
 0x174   : > { %1691 = vmatmul.mubr.bf16.gmra.mrb[28].mxu0 %v3716_v57  ;;  %1917 = vmatmul.mubr.bf16.gmra.mrb[28].mxu1 %v3716_v57 }
 0x20f   : > { %v1622_v15 = vpop.f32.mrb[0].mxu0  ;;  %v1848_v16 = vpop.f32.mrb[0].mxu1 }
 0x210   : > { %v1927_v21 = vadd.f32 %v1622_v15, %v451_v9  ;;  %v1929_v22 = vadd.f32 %v1848_v16, %v453_v10  ;;  %v1624_v23 = vpop.f32.mrb[1].mxu0  ;;  %v1850_v24 = vpop.f32.mrb[1].mxu1 }
 0x211   : > { %v1928_v27 = vadd.f32 %v1624_v23, %v452_v11  ;;  %v1930_v28 = vadd.f32 %v1850_v24, %v454_v12  ;;  %v1626_v29 = vpop.f32.mrb[2].mxu0  ;;  %v1852_v30 = vpop.f32.mrb[2].mxu1  ;;  %v467_v24 = vld [vmem:[#allocation2 + $0x80] sm:$0xff] }
 0x212   : > { %1991 = vst [vmem:[#allocation2] sm:$0xff] %v1927_v21  ;;  %1993 = vst [vmem:[#allocation2 + $0x10] sm:$0xff] %v1929_v22  ;;  %v1931_v31 = vadd.f32 %v1626_v29, %v455_v17  ;;  %v1933_v32 = vadd.f32 %v1852_v30, %v457_v18  ;;  %v1628_v33 = vpop.f32.mrb[3].mxu0  ;;  %v1854_v34 = vpop.f32.mrb[3].mxu1  ;;  %v2144_v35 = vadd.f32 %v4518_v13, %v1927_v21  ;;  %v468_v29 = vld [vmem:[#allocation2 + $0x88] sm:$0xff]  ;;  %v470_v30 = vld [vmem:[#allocation2 + $0x98] sm:$0xff] }
 0x213   : > { %v2146_v36 = vadd.f32 %v4520_v14, %v1929_v22  ;;  %1992 = vst [vmem:[#allocation2 + $0x8] sm:$0xff] %v1928_v27  ;;  %1994 = vst [vmem:[#allocation2 + $0x18] sm:$0xff] %v1930_v28  ;;  %v1932_v37 = vadd.f32 %v1628_v33, %v456_v25  ;;  %v1934_v38 = vadd.f32 %v1854_v34, %v458_v26  ;;  %v471_v33 = vld [vmem:[#allocation2 + $0xa0] sm:$0xff]  ;;  %v473_v34 = vld [vmem:[#allocation2 + $0xb0] sm:$0xff] }
 0x214   : > { %v2145_v39 = vadd.f32 %v4522_v19, %v1928_v27  ;;  %v2147_v40 = vadd.f32 %v4524_v20, %v1930_v28  ;;  %1995 = vst [vmem:[#allocation2 + $0x20] sm:$0xff] %v1931_v31  ;;  %1997 = vst [vmem:[#allocation2 + $0x30] sm:$0xff] %v1933_v32  ;;  %v2148_v42 = vadd.f32 %v4518_v13, %v1931_v31  ;;  %v2208_v51 = vmax.f32 %v2144_v35, 0.0  ;;  %v469_v28 = vld [vmem:[#allocation2 + $0x90] sm:$0xff] }
 0x215   : > { %v2150_v43 = vadd.f32 %v4520_v14, %v1933_v32  ;;  %1996 = vst [vmem:[#allocation2 + $0x28] sm:$0xff] %v1932_v37  ;;  %1998 = vst [vmem:[#allocation2 + $0x38] sm:$0xff] %v1934_v38  ;;  %v2149_v47 = vadd.f32 %v4522_v19, %v1932_v37  ;;  %v2151_v48 = vadd.f32 %v4524_v20, %v1934_v38  ;;  %v2210_v53 = vmax.f32 %v2146_v36, 0.0 }
 0x216   : > { %v2212_v52 = vmax.f32 %v2148_v42, 0.0  ;;  %v2209_v57 = vmax.f32 %v2145_v39, 0.0  ;;  %v2211_v59 = vmax.f32 %v2147_v40, 0.0 }
 0x217   : > { %v2214_v54 = vmax.f32 %v2150_v43, 0.0  ;;  %v1632_v55 = vpop.f32.mrb[4].mxu0  ;;  %v1858_v56 = vpop.f32.mrb[4].mxu1  ;;  %v2213_v58 = vmax.f32 %v2149_v47, 0.0  ;;  %v2215_v60 = vmax.f32 %v2151_v48, 0.0 }
 0x218   : > { %v1935_v61 = vadd.f32 %v1632_v55, %v459_v41  ;;  %v1937_v62 = vadd.f32 %v1858_v56, %v461_v44  ;;  %v1634_v63 = vpop.f32.mrb[5].mxu0  ;;  %v1860_v0 = vpop.f32.mrb[5].mxu1  ;;  %v2288_v3 = vpack.c.bf16 %v2212_v52, %v2208_v51 }
 0x219   : > { %v2290_v4 = vpack.c.bf16 %v2214_v54, %v2210_v53  ;;  %v1936_v5 = vadd.f32 %v1634_v63, %v460_v45  ;;  %v1938_v6 = vadd.f32 %v1860_v0, %v462_v46  ;;  %v1636_v7 = vpop.f32.mrb[6].mxu0  ;;  %v1862_v8 = vpop.f32.mrb[6].mxu1  ;;  %v2289_v9 = vpack.c.bf16 %v2213_v58, %v2209_v57 }
 0x21a   : > { %v2291_v10 = vpack.c.bf16 %v2215_v60, %v2211_v59  ;;  %1999 = vst [vmem:[#allocation2 + $0x40] sm:$0xff] %v1935_v61  ;;  %2001 = vst [vmem:[#allocation2 + $0x50] sm:$0xff] %v1937_v62  ;;  %v1939_v11 = vadd.f32 %v1636_v7, %v463_v49  ;;  %v1941_v12 = vadd.f32 %v1862_v8, %v465_v50  ;;  %v1638_v15 = vpop.f32.mrb[7].mxu0  ;;  %v1864_v16 = vpop.f32.mrb[7].mxu1  ;;  %v472_v49 = vld [vmem:[#allocation2 + $0xa8] sm:$0xff]  ;;  %v474_v50 = vld [vmem:[#allocation2 + $0xb8] sm:$0xff] }
 0x21b   : > { %v2152_v17 = vadd.f32 %v4518_v13, %v1935_v61  ;;  %v2154_v18 = vadd.f32 %v4520_v14, %v1937_v62  ;;  %2000 = vst [vmem:[#allocation2 + $0x48] sm:$0xff] %v1936_v5  ;;  %2002 = vst [vmem:[#allocation2 + $0x58] sm:$0xff] %v1938_v6  ;;  %v1940_v21 = vadd.f32 %v1638_v15, %v464_v1  ;;  %2608 = vmatprep.mubr.bf16.mxu0 %v2289_v9  ;;  %v477_v8 = vld [vmem:[#allocation2 + $0xd0] sm:$0xff]  ;;  %v476_v9 = vld [vmem:[#allocation2 + $0xc8] sm:$0xff] }
 0x21c   : > { %v1942_v22 = vadd.f32 %v1864_v16, %v466_v2  ;;  %2705 = vmatprep.mubr.bf16.mxu1 %v2291_v10  ;;  %v2153_v23 = vadd.f32 %v4522_v19, %v1936_v5  ;;  %2003 = vst [vmem:[#allocation2 + $0x60] sm:$0xff] %v1939_v11  ;;  %2005 = vst [vmem:[#allocation2 + $0x70] sm:$0xff] %v1941_v12  ;;  %2609 = vmatmul.mubr.bf16.vlgmr.msra.gmra.mrb[32].mxu0 %v2288_v3  ;;  %v478_v10 = vld [vmem:[#allocation2 + $0xd8] sm:$0xff]  ;;  %v479_v15 = vld [vmem:[#allocation2 + $0xe0] sm:$0xff] }
 0x21d   : > { %2706 = vmatmul.mubr.bf16.vlgmr.msra.gmra.mrb[32].mxu1 %v2290_v4  ;;  %v2155_v25 = vadd.f32 %v4524_v20, %v1938_v6  ;;  %v2156_v26 = vadd.f32 %v4518_v13, %v1939_v11  ;;  %v2158_v27 = vadd.f32 %v4520_v14, %v1941_v12  ;;  %2004 = vst [vmem:[#allocation2 + $0x68] sm:$0xff] %v1940_v21  ;;  %v2216_v35 = vmax.f32 %v2152_v17, 0.0  ;;  %v475_v4 = vld [vmem:[#allocation2 + $0xc0] sm:$0xff]  ;;  %v481_v16 = vld [vmem:[#allocation2 + $0xf0] sm:$0xff] }
 0x21e   : > { %2006 = vst [vmem:[#allocation2 + $0x78] sm:$0xff] %v1942_v22  ;;  %v2157_v31 = vadd.f32 %v4522_v19, %v1940_v21  ;;  %v2159_v32 = vadd.f32 %v4524_v20, %v1942_v22  ;;  %v2218_v37 = vmax.f32 %v2154_v18, 0.0  ;;  %v2217_v41 = vmax.f32 %v2153_v23, 0.0 }
 0x21f   : > { %v2220_v36 = vmax.f32 %v2156_v26, 0.0  ;;  %v2222_v38 = vmax.f32 %v2158_v27, 0.0  ;;  %v1642_v39 = vpop.f32.mrb[8].mxu0  ;;  %v1868_v40 = vpop.f32.mrb[8].mxu1  ;;  %v2219_v43 = vmax.f32 %v2155_v25, 0.0 }
 0x220   : > { %v2221_v42 = vmax.f32 %v2157_v31, 0.0  ;;  %v2223_v44 = vmax.f32 %v2159_v32, 0.0  ;;  %v1943_v45 = vadd.f32 %v1642_v39, %v467_v24  ;;  %v1945_v46 = vadd.f32 %v1868_v40, %v469_v28  ;;  %v1644_v47 = vpop.f32.mrb[9].mxu0  ;;  %v1870_v48 = vpop.f32.mrb[9].mxu1 }
 0x221   : > { %v2292_v51 = vpack.c.bf16 %v2220_v36, %v2216_v35  ;;  %v2294_v52 = vpack.c.bf16 %v2222_v38, %v2218_v37  ;;  %v1944_v53 = vadd.f32 %v1644_v47, %v468_v29  ;;  %v1946_v54 = vadd.f32 %v1870_v48, %v470_v30  ;;  %v1646_v55 = vpop.f32.mrb[10].mxu0  ;;  %v1872_v56 = vpop.f32.mrb[10].mxu1 }
 0x222   : > { %v2293_v57 = vpack.c.bf16 %v2221_v42, %v2217_v41  ;;  %v2295_v58 = vpack.c.bf16 %v2223_v44, %v2219_v43  ;;  %2007 = vst [vmem:[#allocation2 + $0x80] sm:$0xff] %v1943_v45  ;;  %2009 = vst [vmem:[#allocation2 + $0x90] sm:$0xff] %v1945_v46  ;;  %v1947_v59 = vadd.f32 %v1646_v55, %v471_v33  ;;  %v1648_v61 = vpop.f32.mrb[11].mxu0  ;;  %v1874_v62 = vpop.f32.mrb[11].mxu1  ;;  %v480_v33 = vld [vmem:[#allocation2 + $0xe8] sm:$0xff] }
 0x223   : > { %v1949_v60 = vadd.f32 %v1872_v56, %v473_v34  ;;  %v2160_v63 = vadd.f32 %v4518_v13, %v1943_v45  ;;  %v2162_v0 = vadd.f32 %v4520_v14, %v1945_v46  ;;  %2008 = vst [vmem:[#allocation2 + $0x88] sm:$0xff] %v1944_v53  ;;  %2010 = vst [vmem:[#allocation2 + $0x98] sm:$0xff] %v1946_v54  ;;  %v482_v34 = vld [vmem:[#allocation2 + $0xf8] sm:$0xff]  ;;  %v485_v56 = vld [vmem:[#allocation2 + $0x110] sm:$0xff] }
 0x224   : > { %v1948_v1 = vadd.f32 %v1648_v61, %v472_v49  ;;  %v1950_v2 = vadd.f32 %v1874_v62, %v474_v50  ;;  %2616 = vmatprep.mubr.bf16.mxu0 %v2293_v57  ;;  %2713 = vmatprep.mubr.bf16.mxu1 %v2295_v58  ;;  %v2161_v3 = vadd.f32 %v4522_v19, %v1944_v53  ;;  %v484_v57 = vld [vmem:[#allocation2 + $0x108] sm:$0xff]  ;;  %v486_v58 = vld [vmem:[#allocation2 + $0x118] sm:$0xff]  ;;  %v487_v61 = vld [vmem:[#allocation2 + $0x120] sm:$0xff] }
 0x225   : > { %2011 = vst [vmem:[#allocation2 + $0xa0] sm:$0xff] %v1947_v59  ;;  %2013 = vst [vmem:[#allocation2 + $0xb0] sm:$0xff] %v1949_v60  ;;  %2617 = vmatmul.mubr.bf16.gmra.mrb[36].mxu0 %v2292_v51  ;;  %2714 = vmatmul.mubr.bf16.gmra.mrb[36].mxu1 %v2294_v52  ;;  %v2163_v5 = vadd.f32 %v4524_v20, %v1946_v54  ;;  %v2164_v6 = vadd.f32 %v4518_v13, %v1947_v59  ;;  %v2224_v17 = vmax.f32 %v2160_v63, 0.0  ;;  %v483_v52 = vld [vmem:[#allocation2 + $0x100] sm:$0xff]  ;;  %v489_v62 = vld [vmem:[#allocation2 + $0x130] sm:$0xff] }
 0x226   : > { %v2166_v7 = vadd.f32 %v4520_v14, %v1949_v60  ;;  %2012 = vst [vmem:[#allocation2 + $0xa8] sm:$0xff] %v1948_v1  ;;  %2014 = vst [vmem:[#allocation2 + $0xb8] sm:$0xff] %v1950_v2  ;;  %v2165_v11 = vadd.f32 %v4522_v19, %v1948_v1  ;;  %v2167_v12 = vadd.f32 %v4524_v20, %v1950_v2  ;;  %v2226_v21 = vmax.f32 %v2162_v0, 0.0 }
 0x227   : > { %v2228_v18 = vmax.f32 %v2164_v6, 0.0  ;;  %v1652_v23 = vpop.f32.mrb[12].mxu0  ;;  %v1878_v24 = vpop.f32.mrb[12].mxu1  ;;  %v2225_v25 = vmax.f32 %v2161_v3, 0.0  ;;  %v2227_v27 = vmax.f32 %v2163_v5, 0.0 }
 0x228   : > { %v2230_v22 = vmax.f32 %v2166_v7, 0.0  ;;  %v2229_v26 = vmax.f32 %v2165_v11, 0.0  ;;  %v2231_v28 = vmax.f32 %v2167_v12, 0.0  ;;  %v1951_v29 = vadd.f32 %v1652_v23, %v475_v4  ;;  %v1654_v31 = vpop.f32.mrb[13].mxu0  ;;  %v1880_v32 = vpop.f32.mrb[13].mxu1 }
 0x229   : > { %v1953_v30 = vadd.f32 %v1878_v24, %v477_v8  ;;  %v2296_v35 = vpack.c.bf16 %v2228_v18, %v2224_v17  ;;  %v1952_v37 = vadd.f32 %v1654_v31, %v476_v9  ;;  %v1954_v38 = vadd.f32 %v1880_v32, %v478_v10  ;;  %v1656_v39 = vpop.f32.mrb[14].mxu0  ;;  %v1882_v40 = vpop.f32.mrb[14].mxu1 }
 0x22a   : > { %v2298_v36 = vpack.c.bf16 %v2230_v22, %v2226_v21  ;;  %v2297_v41 = vpack.c.bf16 %v2229_v26, %v2225_v25  ;;  %v2299_v42 = vpack.c.bf16 %v2231_v28, %v2227_v27  ;;  %2015 = vst [vmem:[#allocation2 + $0xc0] sm:$0xff] %v1951_v29  ;;  %v1955_v43 = vadd.f32 %v1656_v39, %v479_v15  ;;  %v1658_v45 = vpop.f32.mrb[15].mxu0  ;;  %v1884_v46 = vpop.f32.mrb[15].mxu1  ;;  %v488_v15 = vld [vmem:[#allocation2 + $0x128] sm:$0xff] }
 0x22b   : > { %2017 = vst [vmem:[#allocation2 + $0xd0] sm:$0xff] %v1953_v30  ;;  %v1957_v44 = vadd.f32 %v1882_v40, %v481_v16  ;;  %v2168_v47 = vadd.f32 %v4518_v13, %v1951_v29  ;;  %v2170_v48 = vadd.f32 %v4520_v14, %v1953_v30  ;;  %2016 = vst [vmem:[#allocation2 + $0xc8] sm:$0xff] %v1952_v37  ;;  %v490_v16 = vld [vmem:[#allocation2 + $0x138] sm:$0xff]  ;;  %v493_v40 = vld [vmem:[#allocation2 + $0x150] sm:$0xff] }
 0x22c   : > { %2018 = vst [vmem:[#allocation2 + $0xd8] sm:$0xff] %v1954_v38  ;;  %v1956_v49 = vadd.f32 %v1658_v45, %v480_v33  ;;  %v1958_v50 = vadd.f32 %v1884_v46, %v482_v34  ;;  %2624 = vmatprep.mubr.bf16.mxu0 %v2297_v41  ;;  %2721 = vmatprep.mubr.bf16.mxu1 %v2299_v42  ;;  %2019 = vst [vmem:[#allocation2 + $0xe0] sm:$0xff] %v1955_v43  ;;  %v492_v41 = vld [vmem:[#allocation2 + $0x148] sm:$0xff]  ;;  %v494_v42 = vld [vmem:[#allocation2 + $0x158] sm:$0xff] }
 0x22d   : > { %v2169_v51 = vadd.f32 %v4522_v19, %v1952_v37  ;;  %2021 = vst [vmem:[#allocation2 + $0xf0] sm:$0xff] %v1957_v44  ;;  %2625 = vmatmul.mubr.bf16.gmra.mrb[40].mxu0 %v2296_v35  ;;  %2722 = vmatmul.mubr.bf16.gmra.mrb[40].mxu1 %v2298_v36  ;;  %v2171_v53 = vadd.f32 %v4524_v20, %v1954_v38  ;;  %v2232_v63 = vmax.f32 %v2168_v47, 0.0  ;;  %v2234_v1 = vmax.f32 %v2170_v48, 0.0  ;;  %v491_v36 = vld [vmem:[#allocation2 + $0x140] sm:$0xff]  ;;  %v497_v46 = vld [vmem:[#allocation2 + $0x170] sm:$0xff] }
 0x22e   : > { %v2172_v54 = vadd.f32 %v4518_v13, %v1955_v43  ;;  %v2174_v55 = vadd.f32 %v4520_v14, %v1957_v44  ;;  %2020 = vst [vmem:[#allocation2 + $0xe8] sm:$0xff] %v1956_v49  ;;  %2022 = vst [vmem:[#allocation2 + $0xf8] sm:$0xff] %v1958_v50  ;;  %v2173_v59 = vadd.f32 %v4522_v19, %v1956_v49  ;;  %v495_v45 = vld [vmem:[#allocation2 + $0x160] sm:$0xff] }
 0x22f   : > { %v2175_v60 = vadd.f32 %v4524_v20, %v1958_v50  ;;  %v1662_v3 = vpop.f32.mrb[16].mxu0  ;;  %v1888_v4 = vpop.f32.mrb[16].mxu1  ;;  %v2233_v5 = vmax.f32 %v2169_v51, 0.0  ;;  %v2235_v7 = vmax.f32 %v2171_v53, 0.0 }
 0x230   : > { %v2236_v0 = vmax.f32 %v2172_v54, 0.0  ;;  %v2238_v2 = vmax.f32 %v2174_v55, 0.0  ;;  %v2237_v6 = vmax.f32 %v2173_v59, 0.0  ;;  %v1959_v9 = vadd.f32 %v1662_v3, %v483_v52  ;;  %v1664_v11 = vpop.f32.mrb[17].mxu0  ;;  %v1890_v12 = vpop.f32.mrb[17].mxu1 }
 0x231   : > { %v2239_v8 = vmax.f32 %v2175_v60, 0.0  ;;  %v1961_v10 = vadd.f32 %v1888_v4, %v485_v56  ;;  %v1960_v21 = vadd.f32 %v1664_v11, %v484_v57  ;;  %v1962_v22 = vadd.f32 %v1890_v12, %v486_v58  ;;  %v1666_v23 = vpop.f32.mrb[18].mxu0  ;;  %v1892_v24 = vpop.f32.mrb[18].mxu1 }
 0x232   : > { %v2300_v17 = vpack.c.bf16 %v2236_v0, %v2232_v63  ;;  %v2302_v18 = vpack.c.bf16 %v2238_v2, %v2234_v1  ;;  %v2301_v25 = vpack.c.bf16 %v2237_v6, %v2233_v5  ;;  %2023 = vst [vmem:[#allocation2 + $0x100] sm:$0xff] %v1959_v9  ;;  %v1963_v27 = vadd.f32 %v1666_v23, %v487_v61  ;;  %v1668_v29 = vpop.f32.mrb[19].mxu0  ;;  %v1894_v30 = vpop.f32.mrb[19].mxu1  ;;  %v496_v61 = vld [vmem:[#allocation2 + $0x168] sm:$0xff] }
 0x233   : > { %v2303_v26 = vpack.c.bf16 %v2239_v8, %v2235_v7  ;;  %2025 = vst [vmem:[#allocation2 + $0x110] sm:$0xff] %v1961_v10  ;;  %v1965_v28 = vadd.f32 %v1892_v24, %v489_v62  ;;  %v2176_v31 = vadd.f32 %v4518_v13, %v1959_v9  ;;  %v2178_v32 = vadd.f32 %v4520_v14, %v1961_v10  ;;  %v498_v62 = vld [vmem:[#allocation2 + $0x178] sm:$0xff]  ;;  %v501_v24 = vld [vmem:[#allocation2 + $0x190] sm:$0xff] }
 0x234   : > { %2024 = vst [vmem:[#allocation2 + $0x108] sm:$0xff] %v1960_v21  ;;  %2026 = vst [vmem:[#allocation2 + $0x118] sm:$0xff] %v1962_v22  ;;  %v1964_v33 = vadd.f32 %v1668_v29, %v488_v15  ;;  %v1966_v34 = vadd.f32 %v1894_v30, %v490_v16  ;;  %2632 = vmatprep.mubr.bf16.mxu0 %v2301_v25  ;;  %v2177_v35 = vadd.f32 %v4522_v19, %v1960_v21  ;;  %v500_v25 = vld [vmem:[#allocation2 + $0x188] sm:$0xff]  ;;  %v503_v29 = vld [vmem:[#allocation2 + $0x1a0] sm:$0xff] }
 0x235   : > { %2729 = vmatprep.mubr.bf16.mxu1 %v2303_v26  ;;  %2027 = vst [vmem:[#allocation2 + $0x120] sm:$0xff] %v1963_v27  ;;  %2029 = vst [vmem:[#allocation2 + $0x130] sm:$0xff] %v1965_v28  ;;  %2633 = vmatmul.mubr.bf16.gmra.mrb[44].mxu0 %v2300_v17  ;;  %v2179_v37 = vadd.f32 %v4524_v20, %v1962_v22  ;;  %v2180_v38 = vadd.f32 %v4518_v13, %v1963_v27  ;;  %v2240_v47 = vmax.f32 %v2176_v31, 0.0  ;;  %v502_v26 = vld [vmem:[#allocation2 + $0x198] sm:$0xff]  ;;  %v505_v30 = vld [vmem:[#allocation2 + $0x1b0] sm:$0xff] }
 0x236   : > { %2730 = vmatmul.mubr.bf16.gmra.mrb[44].mxu1 %v2302_v18  ;;  %v2182_v39 = vadd.f32 %v4520_v14, %v1965_v28  ;;  %2028 = vst [vmem:[#allocation2 + $0x128] sm:$0xff] %v1964_v33  ;;  %2030 = vst [vmem:[#allocation2 + $0x138] sm:$0xff] %v1966_v34  ;;  %v2181_v43 = vadd.f32 %v4522_v19, %v1964_v33  ;;  %v2183_v44 = vadd.f32 %v4524_v20, %v1966_v34  ;;  %v499_v18 = vld [vmem:[#allocation2 + $0x180] sm:$0xff] }
 0x237   : > { %v2244_v48 = vmax.f32 %v2180_v38, 0.0  ;;  %v2242_v49 = vmax.f32 %v2178_v32, 0.0  ;;  %v1672_v51 = vpop.f32.mrb[20].mxu0  ;;  %v1898_v52 = vpop.f32.mrb[20].mxu1  ;;  %v2241_v53 = vmax.f32 %v2177_v35, 0.0  ;;  %v2243_v55 = vmax.f32 %v2179_v37, 0.0 }
 0x238   : > { %v2246_v50 = vmax.f32 %v2182_v39, 0.0  ;;  %v2245_v54 = vmax.f32 %v2181_v43, 0.0  ;;  %v2247_v56 = vmax.f32 %v2183_v44, 0.0  ;;  %v1967_v57 = vadd.f32 %v1672_v51, %v491_v36  ;;  %v1674_v59 = vpop.f32.mrb[21].mxu0  ;;  %v1900_v60 = vpop.f32.mrb[21].mxu1 }
 0x239   : > { %v1969_v58 = vadd.f32 %v1898_v52, %v493_v40  ;;  %v2304_v63 = vpack.c.bf16 %v2244_v48, %v2240_v47  ;;  %v1968_v1 = vadd.f32 %v1674_v59, %v492_v41  ;;  %v1970_v2 = vadd.f32 %v1900_v60, %v494_v42  ;;  %v1676_v3 = vpop.f32.mrb[22].mxu0  ;;  %v1902_v4 = vpop.f32.mrb[22].mxu1 }
 0x23a   : > { %v2306_v0 = vpack.c.bf16 %v2246_v50, %v2242_v49  ;;  %v2305_v5 = vpack.c.bf16 %v2245_v54, %v2241_v53  ;;  %v2307_v6 = vpack.c.bf16 %v2247_v56, %v2243_v55  ;;  %2031 = vst [vmem:[#allocation2 + $0x140] sm:$0xff] %v1967_v57  ;;  %v1971_v7 = vadd.f32 %v1676_v3, %v495_v45  ;;  %v1678_v9 = vpop.f32.mrb[23].mxu0  ;;  %v1904_v10 = vpop.f32.mrb[23].mxu1  ;;  %v504_v45 = vld [vmem:[#allocation2 + $0x1a8] sm:$0xff] }
 0x23b   : > { %2033 = vst [vmem:[#allocation2 + $0x150] sm:$0xff] %v1969_v58  ;;  %v1973_v8 = vadd.f32 %v1902_v4, %v497_v46  ;;  %v2184_v11 = vadd.f32 %v4518_v13, %v1967_v57  ;;  %v2186_v12 = vadd.f32 %v4520_v14, %v1969_v58  ;;  %2032 = vst [vmem:[#allocation2 + $0x148] sm:$0xff] %v1968_v1  ;;  %v506_v46 = vld [vmem:[#allocation2 + $0x1b8] sm:$0xff]  ;;  %v509_v4 = vld [vmem:[#allocation2 + $0x1d0] sm:$0xff] }
 0x23c   : > { %2034 = vst [vmem:[#allocation2 + $0x158] sm:$0xff] %v1970_v2  ;;  %v1972_v15 = vadd.f32 %v1678_v9, %v496_v61  ;;  %v1974_v16 = vadd.f32 %v1904_v10, %v498_v62  ;;  %2640 = vmatprep.mubr.bf16.mxu0 %v2305_v5  ;;  %2737 = vmatprep.mubr.bf16.mxu1 %v2307_v6  ;;  %2035 = vst [vmem:[#allocation2 + $0x160] sm:$0xff] %v1971_v7  ;;  %v508_v5 = vld [vmem:[#allocation2 + $0x1c8] sm:$0xff]  ;;  %v510_v6 = vld [vmem:[#allocation2 + $0x1d8] sm:$0xff] }
 0x23d   : > { %v2185_v17 = vadd.f32 %v4522_v19, %v1968_v1  ;;  %2037 = vst [vmem:[#allocation2 + $0x170] sm:$0xff] %v1973_v8  ;;  %2641 = vmatmul.mubr.bf16.gmra.mrb[48].mxu0 %v2304_v63  ;;  %v2187_v21 = vadd.f32 %v4524_v20, %v1970_v2  ;;  %v2188_v22 = vadd.f32 %v4518_v13, %v1971_v7  ;;  %v2248_v31 = vmax.f32 %v2184_v11, 0.0  ;;  %v511_v9 = vld [vmem:[#allocation2 + $0x1e0] sm:$0xff]  ;;  %v513_v10 = vld [vmem:[#allocation2 + $0x1f0] sm:$0xff] }
 0x23e   : > { %2738 = vmatmul.mubr.bf16.gmra.mrb[48].mxu1 %v2306_v0  ;;  %v2190_v23 = vadd.f32 %v4520_v14, %v1973_v8  ;;  %2036 = vst [vmem:[#allocation2 + $0x168] sm:$0xff] %v1972_v15  ;;  %2038 = vst [vmem:[#allocation2 + $0x178] sm:$0xff] %v1974_v16  ;;  %v2189_v27 = vadd.f32 %v4522_v19, %v1972_v15  ;;  %v2191_v28 = vadd.f32 %v4524_v20, %v1974_v16  ;;  %v507_v0 = vld [vmem:[#allocation2 + $0x1c0] sm:$0xff] }
 0x23f   : > { %v2252_v32 = vmax.f32 %v2188_v22, 0.0  ;;  %v2250_v33 = vmax.f32 %v2186_v12, 0.0  ;;  %v1682_v35 = vpop.f32.mrb[24].mxu0  ;;  %v1908_v36 = vpop.f32.mrb[24].mxu1  ;;  %v2249_v37 = vmax.f32 %v2185_v17, 0.0  ;;  %v2251_v39 = vmax.f32 %v2187_v21, 0.0 }
 0x240   : > { %v2254_v34 = vmax.f32 %v2190_v23, 0.0  ;;  %v2253_v38 = vmax.f32 %v2189_v27, 0.0  ;;  %v2255_v40 = vmax.f32 %v2191_v28, 0.0  ;;  %v1975_v41 = vadd.f32 %v1682_v35, %v499_v18  ;;  %v1684_v43 = vpop.f32.mrb[25].mxu0  ;;  %v1910_v44 = vpop.f32.mrb[25].mxu1 }
 0x241   : > { %v1977_v42 = vadd.f32 %v1908_v36, %v501_v24  ;;  %v2308_v47 = vpack.c.bf16 %v2252_v32, %v2248_v31  ;;  %v1976_v49 = vadd.f32 %v1684_v43, %v500_v25  ;;  %v1978_v50 = vadd.f32 %v1910_v44, %v502_v26  ;;  %v1686_v51 = vpop.f32.mrb[26].mxu0  ;;  %v1912_v52 = vpop.f32.mrb[26].mxu1 }
 0x242   : > { %v2310_v48 = vpack.c.bf16 %v2254_v34, %v2250_v33  ;;  %v2309_v53 = vpack.c.bf16 %v2253_v38, %v2249_v37  ;;  %v2311_v54 = vpack.c.bf16 %v2255_v40, %v2251_v39  ;;  %2039 = vst [vmem:[#allocation2 + $0x180] sm:$0xff] %v1975_v41  ;;  %v1979_v55 = vadd.f32 %v1686_v51, %v503_v29  ;;  %v1688_v57 = vpop.f32.mrb[27].mxu0  ;;  %v1914_v58 = vpop.f32.mrb[27].mxu1  ;;  %v512_v29 = vld [vmem:[#allocation2 + $0x1e8] sm:$0xff] }
 0x243   : > { %2041 = vst [vmem:[#allocation2 + $0x190] sm:$0xff] %v1977_v42  ;;  %v1981_v56 = vadd.f32 %v1912_v52, %v505_v30  ;;  %v2192_v59 = vadd.f32 %v4518_v13, %v1975_v41  ;;  %v2194_v60 = vadd.f32 %v4520_v14, %v1977_v42  ;;  %2040 = vst [vmem:[#allocation2 + $0x188] sm:$0xff] %v1976_v49  ;;  %v514_v30 = vld [vmem:[#allocation2 + $0x1f8] sm:$0xff] }
 0x244   : > { %2042 = vst [vmem:[#allocation2 + $0x198] sm:$0xff] %v1978_v50  ;;  %v1980_v61 = vadd.f32 %v1688_v57, %v504_v45  ;;  %v1982_v62 = vadd.f32 %v1914_v58, %v506_v46  ;;  %2648 = vmatprep.mubr.bf16.mxu0 %v2309_v53  ;;  %2745 = vmatprep.mubr.bf16.mxu1 %v2311_v54  ;;  %2043 = vst [vmem:[#allocation2 + $0x1a0] sm:$0xff] %v1979_v55 }
 0x245   : > { %v2193_v63 = vadd.f32 %v4522_v19, %v1976_v49  ;;  %2045 = vst [vmem:[#allocation2 + $0x1b0] sm:$0xff] %v1981_v56  ;;  %2649 = vmatmul.mubr.bf16.gmra.mrb[52].mxu0 %v2308_v47  ;;  %v2195_v1 = vadd.f32 %v4524_v20, %v1978_v50  ;;  %v2196_v2 = vadd.f32 %v4518_v13, %v1979_v55  ;;  %v2256_v11 = vmax.f32 %v2192_v59, 0.0 }
 0x246   : > { %2746 = vmatmul.mubr.bf16.gmra.mrb[52].mxu1 %v2310_v48  ;;  %v2198_v3 = vadd.f32 %v4520_v14, %v1981_v56  ;;  %2044 = vst [vmem:[#allocation2 + $0x1a8] sm:$0xff] %v1980_v61  ;;  %2046 = vst [vmem:[#allocation2 + $0x1b8] sm:$0xff] %v1982_v62  ;;  %v2197_v7 = vadd.f32 %v4522_v19, %v1980_v61  ;;  %v2199_v8 = vadd.f32 %v4524_v20, %v1982_v62 }
 0x247   : > { %v2260_v12 = vmax.f32 %v2196_v2, 0.0  ;;  %v2258_v15 = vmax.f32 %v2194_v60, 0.0  ;;  %v1692_v17 = vpop.f32.mrb[28].mxu0  ;;  %v1918_v18 = vpop.f32.mrb[28].mxu1  ;;  %v2257_v21 = vmax.f32 %v2193_v63, 0.0  ;;  %v2259_v23 = vmax.f32 %v2195_v1, 0.0 }
 0x248   : > { %v2262_v16 = vmax.f32 %v2198_v3, 0.0  ;;  %v2261_v22 = vmax.f32 %v2197_v7, 0.0  ;;  %v2263_v24 = vmax.f32 %v2199_v8, 0.0  ;;  %v1983_v25 = vadd.f32 %v1692_v17, %v507_v0  ;;  %v1694_v27 = vpop.f32.mrb[29].mxu0  ;;  %v1920_v28 = vpop.f32.mrb[29].mxu1 }
 0x249   : > { %v1985_v26 = vadd.f32 %v1918_v18, %v509_v4  ;;  %v2312_v31 = vpack.c.bf16 %v2260_v12, %v2256_v11  ;;  %v1984_v33 = vadd.f32 %v1694_v27, %v508_v5  ;;  %v1986_v34 = vadd.f32 %v1920_v28, %v510_v6  ;;  %v1696_v35 = vpop.f32.mrb[30].mxu0  ;;  %v1922_v36 = vpop.f32.mrb[30].mxu1  ;;  %v2272_v5 = vld [vmem:[#allocation3] sm:$0xff]  ;;  %v2273_v11 = vld [vmem:[#allocation3 + $0x8] sm:$0xff]  ;;  %v2274_v27 = vld [vmem:[#allocation3 + $0x10] sm:$0xff] }
 0x24a   : > { %v2314_v32 = vpack.c.bf16 %v2262_v16, %v2258_v15  ;;  %v2313_v37 = vpack.c.bf16 %v2261_v22, %v2257_v21  ;;  %v2315_v38 = vpack.c.bf16 %v2263_v24, %v2259_v23  ;;  %2047 = vst [vmem:[#allocation2 + $0x1c0] sm:$0xff] %v1983_v25  ;;  %v1987_v39 = vadd.f32 %v1696_v35, %v511_v9  ;;  %v1698_v41 = vpop.f32.mrb[31].mxu0  ;;  %v1924_v42 = vpop.f32.mrb[31].mxu1 }
 0x24b   : > { %2049 = vst [vmem:[#allocation2 + $0x1d0] sm:$0xff] %v1985_v26  ;;  %v1989_v40 = vadd.f32 %v1922_v36, %v513_v10  ;;  %v2200_v43 = vadd.f32 %v4518_v13, %v1983_v25  ;;  %v2202_v44 = vadd.f32 %v4520_v14, %v1985_v26  ;;  %2048 = vst [vmem:[#allocation2 + $0x1c8] sm:$0xff] %v1984_v33 }
 0x24c   : > { %2050 = vst [vmem:[#allocation2 + $0x1d8] sm:$0xff] %v1986_v34  ;;  %v1988_v45 = vadd.f32 %v1698_v41, %v512_v29  ;;  %v1990_v46 = vadd.f32 %v1924_v42, %v514_v30  ;;  %2656 = vmatprep.mubr.bf16.mxu0 %v2313_v37  ;;  %2753 = vmatprep.mubr.bf16.mxu1 %v2315_v38  ;;  %2051 = vst [vmem:[#allocation2 + $0x1e0] sm:$0xff] %v1987_v39 }
 0x24d   : > { %v2201_v47 = vadd.f32 %v4522_v19, %v1984_v33  ;;  %2053 = vst [vmem:[#allocation2 + $0x1f0] sm:$0xff] %v1989_v40  ;;  %2657 = vmatmul.mubr.bf16.gmra.mrb[56].mxu0 %v2312_v31  ;;  %v2203_v48 = vadd.f32 %v4524_v20, %v1986_v34  ;;  %v2204_v49 = vadd.f32 %v4518_v13, %v1987_v39  ;;  %v2264_v53 = vmax.f32 %v2200_v43, 0.0  ;;  %v2275_v33 = vld [vmem:[#allocation3 + $0x18] sm:$0xff] }
 0x24e   : > { %2754 = vmatmul.mubr.bf16.gmra.mrb[56].mxu1 %v2314_v32  ;;  %v2206_v50 = vadd.f32 %v4520_v14, %v1989_v40  ;;  %2052 = vst [vmem:[#allocation2 + $0x1e8] sm:$0xff] %v1988_v45  ;;  %2054 = vst [vmem:[#allocation2 + $0x1f8] sm:$0xff] %v1990_v46  ;;  %v2205_v51 = vadd.f32 %v4522_v19, %v1988_v45  ;;  %v2207_v52 = vadd.f32 %v4524_v20, %v1990_v46  ;;  %v2276_v45 = vld [vmem:[#allocation3 + $0x20] sm:$0xff] }
 0x24f   : > { %v2268_v54 = vmax.f32 %v2204_v49, 0.0  ;;  %v2266_v55 = vmax.f32 %v2202_v44, 0.0  ;;  %v2265_v57 = vmax.f32 %v2201_v47, 0.0  ;;  %v2267_v59 = vmax.f32 %v2203_v48, 0.0 }
 0x250   : > { %v2270_v56 = vmax.f32 %v2206_v50, 0.0  ;;  %v2269_v58 = vmax.f32 %v2205_v51, 0.0  ;;  %v2271_v60 = vmax.f32 %v2207_v52, 0.0  ;;  %v2277_v51 = vld [vmem:[#allocation3 + $0x28] sm:$0xff] }
 0x251   : > { %v2316_v61 = vpack.c.bf16 %v2268_v54, %v2264_v53 }
 0x252   : > { %v2318_v62 = vpack.c.bf16 %v2270_v56, %v2266_v55  ;;  %v2317_v13 = vpack.c.bf16 %v2269_v58, %v2265_v57  ;;  %v2319_v63 = vpack.c.bf16 %v2271_v60, %v2267_v59 }
 0x254   : > { %2664 = vmatprep.mubr.bf16.mxu0 %v2317_v13  ;;  %2761 = vmatprep.mubr.bf16.mxu1 %v2319_v63  ;;  %v2278_v13 = vld [vmem:[#allocation3 + $0x30] sm:$0xff] }
 0x255   : > { %2665 = vmatmul.mubr.bf16.gmra.mrb[60].mxu0 %v2316_v61 }
 0x256   : > { %2762 = vmatmul.mubr.bf16.gmra.mrb[60].mxu1 %v2318_v62 }
 0x2ef   : > { %v3218_v14 = vpop.f32.mrb[32].mxu0 }
 0x2f0   : > { %v3282_v19 = vpop.f32.mrb[32].mxu1  ;;  %v3219_v20 = vpop.f32.mrb[33].mxu0 }
 0x2f1   : > { %v3283_v0 = vpop.f32.mrb[33].mxu1  ;;  %v3220_v1 = vadd.f32 %v3219_v20, %v3218_v14  ;;  %v3221_v3 = vpop.f32.mrb[34].mxu0 }
 0x2f2   : > { %v3284_v2 = vadd.f32 %v3283_v0, %v3282_v19  ;;  %v3285_v4 = vpop.f32.mrb[34].mxu1  ;;  %v3222_v6 = vpop.f32.mrb[35].mxu0 }
 0x2f3   : > { %v3286_v7 = vpop.f32.mrb[35].mxu1  ;;  %v3223_v9 = vadd.f32 %v3222_v6, %v3221_v3 }
 0x2f4   : > { %v2708_v8 = vadd.f32 %v3284_v2, %v3220_v1  ;;  %v3287_v10 = vadd.f32 %v3286_v7, %v3285_v4  ;;  %v2279_v1 = vld [vmem:[#allocation3 + $0x38] sm:$0xff] }
 0x2f6   : > { %v2770_v12 = vadd.f32 %v2708_v8, %v2272_v5  ;;  %v2711_v15 = vadd.f32 %v3287_v10, %v3223_v9 }
 0x2f8   : > { %2786 = vst [vmem:[#allocation3] sm:$0xff] %v2770_v12  ;;  %v2771_v16 = vadd.f32 %v2711_v15, %v2273_v11  ;;  %v3224_v17 = vpop.f32.mrb[36].mxu0  ;;  %v3288_v18 = vpop.f32.mrb[36].mxu1  ;;  %v2280_v15 = vld [vmem:[#allocation3 + $0x40] sm:$0xff] }
 0x2f9   : > { %v3225_v21 = vpop.f32.mrb[37].mxu0  ;;  %v3289_v22 = vpop.f32.mrb[37].mxu1 }
 0x2fa   : > { %2787 = vst [vmem:[#allocation3 + $0x8] sm:$0xff] %v2771_v16  ;;  %v3226_v23 = vadd.f32 %v3225_v21, %v3224_v17  ;;  %v3290_v24 = vadd.f32 %v3289_v22, %v3288_v18  ;;  %v3227_v25 = vpop.f32.mrb[38].mxu0  ;;  %v3291_v26 = vpop.f32.mrb[38].mxu1 }
 0x2fb   : > { %v3228_v28 = vpop.f32.mrb[39].mxu0  ;;  %v3292_v29 = vpop.f32.mrb[39].mxu1 }
 0x2fc   : > { %v2716_v30 = vadd.f32 %v3290_v24, %v3226_v23  ;;  %v3229_v31 = vadd.f32 %v3228_v28, %v3227_v25  ;;  %v3293_v32 = vadd.f32 %v3292_v29, %v3291_v26  ;;  %v2281_v23 = vld [vmem:[#allocation3 + $0x48] sm:$0xff] }
 0x2fe   : > { %v2772_v34 = vadd.f32 %v2716_v30, %v2274_v27  ;;  %v2719_v35 = vadd.f32 %v3293_v32, %v3229_v31 }
 0x300   : > { %2788 = vst [vmem:[#allocation3 + $0x10] sm:$0xff] %v2772_v34  ;;  %v2773_v36 = vadd.f32 %v2719_v35, %v2275_v33  ;;  %v3230_v37 = vpop.f32.mrb[40].mxu0  ;;  %v3294_v38 = vpop.f32.mrb[40].mxu1  ;;  %v2282_v35 = vld [vmem:[#allocation3 + $0x50] sm:$0xff] }
 0x301   : > { %v3231_v39 = vpop.f32.mrb[41].mxu0  ;;  %v3295_v40 = vpop.f32.mrb[41].mxu1 }
 0x302   : > { %2789 = vst [vmem:[#allocation3 + $0x18] sm:$0xff] %v2773_v36  ;;  %v3232_v41 = vadd.f32 %v3231_v39, %v3230_v37  ;;  %v3296_v42 = vadd.f32 %v3295_v40, %v3294_v38  ;;  %v3233_v43 = vpop.f32.mrb[42].mxu0  ;;  %v3297_v44 = vpop.f32.mrb[42].mxu1 }
 0x303   : > { %v3234_v46 = vpop.f32.mrb[43].mxu0  ;;  %v3298_v47 = vpop.f32.mrb[43].mxu1 }
 0x304   : > { %v2724_v48 = vadd.f32 %v3296_v42, %v3232_v41  ;;  %v3235_v49 = vadd.f32 %v3234_v46, %v3233_v43  ;;  %v3299_v50 = vadd.f32 %v3298_v47, %v3297_v44  ;;  %v2283_v41 = vld [vmem:[#allocation3 + $0x58] sm:$0xff] }
 0x306   : > { %v2774_v52 = vadd.f32 %v2724_v48, %v2276_v45  ;;  %v2727_v53 = vadd.f32 %v3299_v50, %v3235_v49 }
 0x308   : > { %2790 = vst [vmem:[#allocation3 + $0x20] sm:$0xff] %v2774_v52  ;;  %v2775_v54 = vadd.f32 %v2727_v53, %v2277_v51  ;;  %v3236_v55 = vpop.f32.mrb[44].mxu0  ;;  %v2284_v53 = vld [vmem:[#allocation3 + $0x60] sm:$0xff] }
 0x309   : > { %v3300_v56 = vpop.f32.mrb[44].mxu1  ;;  %v3237_v57 = vpop.f32.mrb[45].mxu0 }
 0x30a   : > { %v3301_v58 = vpop.f32.mrb[45].mxu1  ;;  %2791 = vst [vmem:[#allocation3 + $0x28] sm:$0xff] %v2775_v54  ;;  %v3238_v59 = vadd.f32 %v3237_v57, %v3236_v55  ;;  %v3239_v61 = vpop.f32.mrb[46].mxu0 }
 0x30b   : > { %v3302_v60 = vadd.f32 %v3301_v58, %v3300_v56  ;;  %v3303_v62 = vpop.f32.mrb[46].mxu1  ;;  %v3240_v63 = vpop.f32.mrb[47].mxu0 }
 0x30c   : > { %v3304_v14 = vpop.f32.mrb[47].mxu1  ;;  %v3241_v20 = vadd.f32 %v3240_v63, %v3239_v61 }
 0x30d   : > { %v2732_v19 = vadd.f32 %v3302_v60, %v3238_v59  ;;  %v3305_v0 = vadd.f32 %v3304_v14, %v3303_v62  ;;  %v2285_v59 = vld [vmem:[#allocation3 + $0x68] sm:$0xff] }
 0x30f   : > { %v2776_v2 = vadd.f32 %v2732_v19, %v2278_v13  ;;  %v2735_v3 = vadd.f32 %v3305_v0, %v3241_v20 }
 0x310   : > { %v3242_v5 = vpop.f32.mrb[48].mxu0 }
 0x311   : > { %2792 = vst [vmem:[#allocation3 + $0x30] sm:$0xff] %v2776_v2  ;;  %v2777_v4 = vadd.f32 %v2735_v3, %v2279_v1  ;;  %v3306_v6 = vpop.f32.mrb[48].mxu1  ;;  %v3243_v7 = vpop.f32.mrb[49].mxu0  ;;  %v2286_v3 = vld [vmem:[#allocation3 + $0x70] sm:$0xff] }
 0x312   : > { %v3307_v8 = vpop.f32.mrb[49].mxu1  ;;  %v3244_v9 = vadd.f32 %v3243_v7, %v3242_v5  ;;  %v3245_v11 = vpop.f32.mrb[50].mxu0 }
 0x313   : > { %2793 = vst [vmem:[#allocation3 + $0x38] sm:$0xff] %v2777_v4  ;;  %v3308_v10 = vadd.f32 %v3307_v8, %v3306_v6  ;;  %v3309_v12 = vpop.f32.mrb[50].mxu1  ;;  %v3246_v16 = vpop.f32.mrb[51].mxu0 }
 0x314   : > { %v3310_v17 = vpop.f32.mrb[51].mxu1  ;;  %v3247_v21 = vadd.f32 %v3246_v16, %v3245_v11  ;;  %v3194_v16 = vld [vmem:[#allocation9] ss:$0 sm:$0xff] (%p2802_p0) }
 0x315   : > { %v2740_v18 = vadd.f32 %v3308_v10, %v3244_v9  ;;  %v3311_v22 = vadd.f32 %v3310_v17, %v3309_v12  ;;  %v2287_v9 = vld [vmem:[#allocation3 + $0x78] sm:$0xff]  ;;  %v2808_v17 = vld [vmem:[#allocation3 + $0x8] sm:$0xff] (%p2802_p0) }
 0x317   : > { %v2778_v24 = vadd.f32 %v2740_v18, %v2280_v15  ;;  %v2743_v25 = vadd.f32 %v3311_v22, %v3247_v21  ;;  %v2807_v15 = vld [vmem:[#allocation3] sm:$0xff] (%p2802_p0)  ;;  %v2831_v21 = vadd.f32 (%p2802_p0), %v3194_v16, %v2808_v17  ;;  %v2809_v22 = vld [vmem:[#allocation3 + $0x10] sm:$0xff] (%p2802_p0) }
 0x318   : > { %v3248_v27 = vpop.f32.mrb[52].mxu0  ;;  %v2830_v18 = vadd.f32 (%p2802_p0), %v3194_v16, %v2807_v15 }
 0x319   : > { %2794 = vst [vmem:[#allocation3 + $0x40] sm:$0xff] %v2778_v24  ;;  %v2779_v26 = vadd.f32 %v2743_v25, %v2281_v23  ;;  %v3312_v28 = vpop.f32.mrb[52].mxu1  ;;  %v3249_v29 = vpop.f32.mrb[53].mxu0  ;;  %v2810_v23 = vld [vmem:[#allocation3 + $0x18] sm:$0xff] (%p2802_p0)  ;;  %v2811_v24 = vld [vmem:[#allocation3 + $0x20] sm:$0xff] (%p2802_p0)  ;;  %v2832_v25 = vadd.f32 (%p2802_p0), %v3194_v16, %v2809_v22  ;;  %2847 = vst [vmem:[%s4664_s5 + $0x8] sm:$0xff] (%p2802_p0), %v2831_v21 }
 0x31a   : > { %v3313_v30 = vpop.f32.mrb[53].mxu1  ;;  %v3250_v31 = vadd.f32 %v3249_v29, %v3248_v27  ;;  %v3251_v33 = vpop.f32.mrb[54].mxu0  ;;  %v2834_v27 = vadd.f32 (%p2802_p0), %v3194_v16, %v2811_v24  ;;  %v2813_v29 = vld [vmem:[#allocation3 + $0x30] sm:$0xff] (%p2802_p0)  ;;  %2846 = vst [vmem:[%s4664_s5] sm:$0xff] (%p2802_p0), %v2830_v18 }
 0x31b   : > { %2795 = vst [vmem:[#allocation3 + $0x48] sm:$0xff] %v2779_v26  ;;  %v3314_v32 = vadd.f32 %v3313_v30, %v3312_v28  ;;  %v3315_v34 = vpop.f32.mrb[54].mxu1  ;;  %v3252_v36 = vpop.f32.mrb[55].mxu0  ;;  %v2833_v26 = vadd.f32 (%p2802_p0), %v3194_v16, %v2810_v23  ;;  %v2812_v28 = vld [vmem:[#allocation3 + $0x28] sm:$0xff] (%p2802_p0)  ;;  %v2814_v30 = vld [vmem:[#allocation3 + $0x38] sm:$0xff] (%p2802_p0)  ;;  %2848 = vst [vmem:[%s4664_s5 + $0x10] sm:$0xff] (%p2802_p0), %v2832_v25 }
 0x31c   : > { %v3316_v37 = vpop.f32.mrb[55].mxu1  ;;  %v3253_v39 = vadd.f32 %v3252_v36, %v3251_v33  ;;  %v2837_v33 = vadd.f32 (%p2802_p0), %v3194_v16, %v2814_v30  ;;  %2850 = vst [vmem:[%s4664_s5 + $0x20] sm:$0xff] (%p2802_p0), %v2834_v27 }
 0x31d   : > { %v2748_v38 = vadd.f32 %v3314_v32, %v3250_v31  ;;  %v3317_v40 = vadd.f32 %v3316_v37, %v3315_v34  ;;  %v2835_v31 = vadd.f32 (%p2802_p0), %v3194_v16, %v2812_v28  ;;  %v2836_v32 = vadd.f32 (%p2802_p0), %v3194_v16, %v2813_v29  ;;  %2849 = vst [vmem:[%s4664_s5 + $0x18] sm:$0xff] (%p2802_p0), %v2833_v26 }
 0x31e   : > { %2853 = vst [vmem:[%s4664_s5 + $0x38] sm:$0xff] (%p2802_p0), %v2837_v33 }
 0x31f   : > { %v2780_v42 = vadd.f32 %v2748_v38, %v2282_v35  ;;  %v2751_v43 = vadd.f32 %v3317_v40, %v3253_v39  ;;  %2851 = vst [vmem:[%s4664_s5 + $0x28] sm:$0xff] (%p2802_p0), %v2835_v31  ;;  %2852 = vst [vmem:[%s4664_s5 + $0x30] sm:$0xff] (%p2802_p0), %v2836_v32 }
 0x320   : > { %v3254_v45 = vpop.f32.mrb[56].mxu0  ;;  %v2815_v34 = vld [vmem:[#allocation3 + $0x40] sm:$0xff] (%p2802_p0) }
 0x321   : > { %2796 = vst [vmem:[#allocation3 + $0x50] sm:$0xff] %v2780_v42  ;;  %v2781_v44 = vadd.f32 %v2751_v43, %v2283_v41  ;;  %v3318_v46 = vpop.f32.mrb[56].mxu1  ;;  %v3255_v47 = vpop.f32.mrb[57].mxu0  ;;  %v2838_v37 = vadd.f32 (%p2802_p0), %v3194_v16, %v2815_v34 }
 0x322   : > { %v3319_v48 = vpop.f32.mrb[57].mxu1  ;;  %v3256_v49 = vadd.f32 %v3255_v47, %v3254_v45  ;;  %v3257_v51 = vpop.f32.mrb[58].mxu0  ;;  %v2816_v35 = vld [vmem:[#allocation3 + $0x48] sm:$0xff] (%p2802_p0) }
 0x323   : > { %2797 = vst [vmem:[#allocation3 + $0x58] sm:$0xff] %v2781_v44  ;;  %v3320_v50 = vadd.f32 %v3319_v48, %v3318_v46  ;;  %v3321_v52 = vpop.f32.mrb[58].mxu1  ;;  %v3258_v54 = vpop.f32.mrb[59].mxu0  ;;  %v2839_v38 = vadd.f32 (%p2802_p0), %v3194_v16, %v2816_v35  ;;  %2854 = vst [vmem:[%s4664_s5 + $0x40] sm:$0xff] (%p2802_p0), %v2838_v37 }
 0x324   : > { %v3322_v55 = vpop.f32.mrb[59].mxu1  ;;  %v3259_v57 = vadd.f32 %v3258_v54, %v3257_v51 }
 0x325   : > { %v2756_v56 = vadd.f32 %v3320_v50, %v3256_v49  ;;  %v3323_v58 = vadd.f32 %v3322_v55, %v3321_v52  ;;  %2855 = vst [vmem:[%s4664_s5 + $0x48] sm:$0xff] (%p2802_p0), %v2839_v38 }
 0x327   : > { %v2782_v60 = vadd.f32 %v2756_v56, %v2284_v53  ;;  %v2759_v61 = vadd.f32 %v3323_v58, %v3259_v57 }
 0x328   : > { %v3260_v13 = vpop.f32.mrb[60].mxu0  ;;  %v2817_v36 = vld [vmem:[#allocation3 + $0x50] sm:$0xff] (%p2802_p0) }
 0x329   : > { %2798 = vst [vmem:[#allocation3 + $0x60] sm:$0xff] %v2782_v60  ;;  %v2783_v62 = vadd.f32 %v2759_v61, %v2285_v59  ;;  %v3324_v63 = vpop.f32.mrb[60].mxu1  ;;  %v3261_v14 = vpop.f32.mrb[61].mxu0  ;;  %v2840_v39 = vadd.f32 (%p2802_p0), %v3194_v16, %v2817_v36 }
 0x32a   : > { %v3325_v19 = vpop.f32.mrb[61].mxu1  ;;  %v3262_v20 = vadd.f32 %v3261_v14, %v3260_v13  ;;  %v3263_v1 = vpop.f32.mrb[62].mxu0  ;;  %v2818_v40 = vld [vmem:[#allocation3 + $0x58] sm:$0xff] (%p2802_p0) }
 0x32b   : > { %2799 = vst [vmem:[#allocation3 + $0x68] sm:$0xff] %v2783_v62  ;;  %v3326_v0 = vadd.f32 %v3325_v19, %v3324_v63  ;;  %v3327_v2 = vpop.f32.mrb[62].mxu1  ;;  %v3264_v4 = vpop.f32.mrb[63].mxu0  ;;  %v2841_v43 = vadd.f32 (%p2802_p0), %v3194_v16, %v2818_v40  ;;  %2856 = vst [vmem:[%s4664_s5 + $0x50] sm:$0xff] (%p2802_p0), %v2840_v39 }
 0x32c   : > { %v3328_v5 = vpop.f32.mrb[63].mxu1  ;;  %v3265_v7 = vadd.f32 %v3264_v4, %v3263_v1 }
 0x32d   : > { %v2764_v6 = vadd.f32 %v3326_v0, %v3262_v20  ;;  %v3329_v8 = vadd.f32 %v3328_v5, %v3327_v2  ;;  %2806 = sbr.rel (!%p2802_p0) target bundleno = 830 (0x33e), region = 72  ;;  %2857 = vst [vmem:[%s4664_s5 + $0x58] sm:$0xff] (%p2802_p0), %v2841_v43 }
 0x32f   : > { %v2784_v10 = vadd.f32 %v2764_v6, %v2286_v3  ;;  %v2767_v11 = vadd.f32 %v3329_v8, %v3265_v7 }
 0x330   : > { %v2819_v41 = vld [vmem:[#allocation3 + $0x60] sm:$0xff] (%p2802_p0) }
 0x331   : > { %2800 = vst [vmem:[#allocation3 + $0x70] sm:$0xff] %v2784_v10  ;;  %v2785_v12 = vadd.f32 %v2767_v11, %v2287_v9  ;;  %v2842_v44 = vadd.f32 (%p2802_p0), %v3194_v16, %v2819_v41 }
 0x332   : > { %v2820_v42 = vld [vmem:[#allocation3 + $0x68] sm:$0xff] (%p2802_p0) }
 0x333   : > { %2801 = vst [vmem:[#allocation3 + $0x78] sm:$0xff] %v2785_v12  ;;  %v2843_v45 = vadd.f32 (%p2802_p0), %v3194_v16, %v2820_v42  ;;  %2858 = vst [vmem:[%s4664_s5 + $0x60] sm:$0xff] (%p2802_p0), %v2842_v44 }
 0x335   : > { %2859 = vst [vmem:[%s4664_s5 + $0x68] sm:$0xff] %v2843_v45 }
 0x338   : > { %v2821_v46 = vld [vmem:[#allocation3 + $0x70] sm:$0xff] }
 0x339   : > { %v2844_v48 = vadd.f32 %v3194_v16, %v2821_v46 }
 0x33a   : > { %v2822_v47 = vld [vmem:[#allocation3 + $0x78] sm:$0xff] }
 0x33b   : > { %v2845_v49 = vadd.f32 %v3194_v16, %v2822_v47  ;;  %2860 = vst [vmem:[%s4664_s5 + $0x70] sm:$0xff] %v2844_v48 }
 0x33d   : > { %2861 = vst [vmem:[%s4664_s5 + $0x78] sm:$0xff] %v2845_v49 }
 0x33e PF: > { %s22_s23 = sadd.s32 1, %s3925_s23   ;;  %s4692_s15 = sld [smem:[#allocation15_spill]] }
 0x33f   : > { %p19_p1 = scmp.ge.s32.totalorder %s22_s23, 10   ;;  %s4693_s13 = sld [smem:[#allocation14_spill]] }
 0x340   : > { %s4694_s18 = smov %s3909_s19  ;;  %s4695_s19 = smov %s3913_s20 }
 0x341   : > { %s4697_s21 = smov %s3921_s22  ;;  %21 = sbr.rel (!%p19_p1) target bundleno = 9 (0x9), region = 123 }
 0x344   : > { %s4696_s20 = smov %s4692_s15 }
 0x345   : > { %s4698_s22 = smov %s4693_s13 }
 0x348   :  { %2873 = vsyncpa [#allocation5], 1 }
 0x349   :  { %2875 = vsyncpa [#allocation5 + $0x1], 1 }
 0x34a   :  { %2876 = vsyncpa [#allocation7], 1 }
 0x34b   :  { %2878 = vsyncpa [#allocation7 + $0x1], 1 }
 0x34c   :  { %2879 = vsyncpa [#allocation10], 1 }

</bundles_post_ra>
